<compile_context>
chip_gen: v5e
topology: v5e:2x2
jax: 0.10.0
libtpu: 0.0.40
codegen_flags: <defaults>
</compile_context>

<pallas_src>
import functools

import jax
import jax.numpy as jnp
from jax import lax
from jax.experimental import pallas as pl
from jax.experimental.pallas import tpu as pltpu

SOS = 0                          # start-of-sentence token id (module references a global SOS)
COMPUTE_DTYPE = jnp.bfloat16     # MXU operand dtype; accumulation stays f32


def _round_up(x, m):
    return -(-x // m) * m


def _gru_decoder_kernel(h0_ref,
                        w_ie_ref, w_hh_ref, b_hh_ref,
                        w_out_ref, b_out_ref,
                        logits_ref, h_out_ref):
    BB, Hp = h0_ref.shape
    Vp = w_out_ref.shape[1]
    T = logits_ref.shape[1]
    cdt = w_ie_ref.dtype            # bf16 compute dtype for MXU operands

    iota_v = lax.broadcasted_iota(jnp.int32, (BB, Vp), 1)

    h = h0_ref[...]                               # (BB, Hp) f32 recurrent state
    onehot = (iota_v == SOS).astype(cdt)          # (BB, Vp) one-hot SOS feedback token
    # TODO(synk): nn.Dropout is identity at inference; no RNG dropout applied.

    dotf = functools.partial(jnp.dot, preferred_element_type=jnp.float32)

    # Static unroll of the short fixed time loop (T is a compile-time constant):
    # gives the scheduler cross-step visibility.  Weight tables are deliberately
    # read at the dot sites (not hoisted) so nothing big stays vreg-live across
    # the unroll — the MXU reads its operands from VMEM anyway.
    for i in range(T):
        # Input gates: embedding lookup fused into the input-gate table
        # (W_ie = embed @ W_ih^T + b_ih).  Single (BB,Vp)x(Vp,3Hp) matmul; the
        # per-gate slices below land exactly on 128-lane tile boundaries.
        gi = dotf(onehot, w_ie_ref[...])                                   # (BB, 3Hp) f32

        # Hidden gates: single (BB,Hp)x(Hp,3Hp) matmul.
        gh = dotf(h.astype(cdt), w_hh_ref[...]) + b_hh_ref[...]           # (BB, 3Hp) f32

        # PyTorch GRU cell (gate order r, z, n); elementwise math in f32.
        r = jax.nn.sigmoid(gi[:, :Hp] + gh[:, :Hp])
        z = jax.nn.sigmoid(gi[:, Hp:2 * Hp] + gh[:, Hp:2 * Hp])
        n = jnp.tanh(gi[:, 2 * Hp:] + r * gh[:, 2 * Hp:])
        h = (1.0 - z) * n + z * h

        # Output projection; lane-dense (Vp % 128 == 0) store straight into the
        # final (B, T, Vp) layout.  Padded vocab lanes carry a -1e30 bias.
        logits = dotf(h.astype(cdt), w_out_ref[...]) + b_out_ref[...]     # (BB, Vp) f32
        logits_ref[:, i, :] = logits

        # Greedy argmax (first-occurrence tie-break, like torch.topk(1)).
        m = jnp.max(logits, axis=-1, keepdims=True)
        idx = jnp.min(jnp.where(logits == m, iota_v, Vp), axis=-1, keepdims=True)
        onehot = (iota_v == idx).astype(cdt)

    h_out_ref[...] = h


def prepare_decoder_params(params, compute_dtype=COMPUTE_DTYPE):
    """One-time parameter preparation (hoisted out of the forward pass):
    transposes, embedding->input-gate fusion, 128-lane padding of V and H,
    per-gate-aligned concatenation, bf16 casts."""
    V, H = params["embed"].shape
    Hp = _round_up(H, 128)
    Vp = _round_up(V, 128)

    embed = params["embed"].astype(jnp.float32)                        # (V, H)
    w_ih_t = params["w_ih"].T.astype(jnp.float32)                      # (H, 3H)
    b_ih = params["b_ih"].astype(jnp.float32)                          # (3H,)
    w_ie = embed @ w_ih_t + b_ih[None, :]                              # (V, 3H) fused table
    w_hh_t = params["w_hh"].T.astype(jnp.float32)                      # (H, 3H)
    b_hh = params["b_hh"].astype(jnp.float32)                          # (3H,)

    def pad_gates(w, rows, rows_p):
        # w: (rows, 3H) with gates [r|z|n].  Pad each gate block to (rows_p, Hp)
        # and re-concatenate so per-gate slices fall on 128-lane boundaries.
        gates = [w[:, g * H:(g + 1) * H] for g in range(3)]
        gates = [jnp.pad(g, ((0, rows_p - rows), (0, Hp - H))) for g in gates]
        return jnp.concatenate(gates, axis=1)                          # (rows_p, 3*Hp)

    b_hh_p = jnp.concatenate(
        [jnp.pad(b_hh[g * H:(g + 1) * H], (0, Hp - H)) for g in range(3)])[None, :]

    w_out_p = jnp.pad(params["w_out"].T.astype(jnp.float32),
                      ((0, Hp - H), (0, Vp - V)))                      # (Hp, Vp)
    # Padded vocab lanes get a huge negative bias so greedy argmax never selects
    # them; those lanes are sliced away in the wrapper.
    b_out_p = jnp.full((1, Vp), -1e30, jnp.float32)
    b_out_p = b_out_p.at[0, :V].set(params["b_out"].astype(jnp.float32))

    # NOTE: bf16 weights change numerics vs PyTorch f32; greedy argmax can flip on
    # near-ties.  Keep w_out (and everything) in f32 if bit-faithful tokens matter.
    return {
        "w_ie": pad_gates(w_ie, V, Vp).astype(compute_dtype),          # (Vp, 3Hp)
        "w_hh": pad_gates(w_hh_t, H, Hp).astype(compute_dtype),        # (Hp, 3Hp)
        "b_hh": b_hh_p,                                                # (1, 3Hp) f32
        "w_out": w_out_p.astype(compute_dtype),                        # (Hp, Vp)
        "b_out": b_out_p,                                              # (1, Vp) f32
        "H": H, "V": V, "Hp": Hp, "Vp": Vp,
    }


def decoder_rnn_forward(encoder_outputs, encoder_hidden, prepped,
                        max_sentence_length=12, block_b=None):
    """Pallas implementation of DecoderRNN.forward (greedy decoding path)."""
    B = encoder_outputs.shape[0]
    H, V, Hp, Vp = prepped["H"], prepped["V"], prepped["Hp"], prepped["Vp"]
    T = max_sentence_length

    # bf16 sublane packing is (16, 128): pad the batch to a multiple of 16.  Once
    # both halves carry real rows, split the batch over >=2 "parallel" grid blocks
    # so both TensorCores on v7x get independent decode streams; blocks grow up to
    # 256 rows to fill the MXU M dimension for large batches.
    B16 = _round_up(B, 16)
    if block_b is None:
        bb = min(256, _round_up(pl.cdiv(B16, 2), 16)) if B16 >= 32 else B16
    else:
        bb = min(_round_up(block_b, 16), B16)
    B_pad = _round_up(B16, bb)
    nb = B_pad // bb

    h0 = encoder_hidden[0].astype(jnp.float32)                 # (B, H)
    h0 = jnp.pad(h0, ((0, B_pad - B), (0, Hp - H)))            # zero-pad batch + hidden lanes

    # Grid-invariant weights/biases: whole-array VMEM residents (NOT pipelined) ->
    # a single VMEM copy each instead of the default double-buffered pair.
    vmem_resident = pl.BlockSpec(memory_space=pltpu.MemorySpace.VMEM)

    # Explicit VMEM budget (review: re-derive for v7x's 64 MiB).  Weights are
    # single-buffered; only the h0 / logits / h_out blocks are double-buffered.
    weight_bytes = ((prepped["w_ie"].size + prepped["w_hh"].size + prepped["w_out"].size) * 2
                    + (prepped["b_hh"].size + prepped["b_out"].size) * 4)
    block_bytes = 2 * (bb * Hp * 4) * 2 + 2 * (bb * T * Vp * 4)
    vmem_limit = int(min(max(2 * (weight_bytes + block_bytes), 8 << 20), 64 << 20))

    logits, h_final = pl.pallas_call(
        _gru_decoder_kernel,
        out_shape=(jax.ShapeDtypeStruct((B_pad, T, Vp), jnp.float32),
                   jax.ShapeDtypeStruct((B_pad, Hp), jnp.float32)),
        grid_spec=pltpu.PrefetchScalarGridSpec(
            num_scalar_prefetch=0,
            grid=(nb,),
            in_specs=[
                pl.BlockSpec((bb, Hp), lambda b: (b, 0)),   # h0 (batch-blocked, pipelined)
                vmem_resident,                              # W_ie  (Vp, 3Hp)
                vmem_resident,                              # W_hh  (Hp, 3Hp)
                vmem_resident,                              # b_hh  (1, 3Hp)
                vmem_resident,                              # W_out (Hp, Vp)
                vmem_resident,                              # b_out (1, Vp)
            ],
            out_specs=(pl.BlockSpec((bb, T, Vp), lambda b: (b, 0, 0)),
                       pl.BlockSpec((bb, Hp), lambda b: (b, 0))),
        ),
        compiler_params=pltpu.CompilerParams(
            dimension_semantics=("parallel",),
            vmem_limit_bytes=vmem_limit),
    )(h0, prepped["w_ie"], prepped["w_hh"], prepped["b_hh"],
      prepped["w_out"], prepped["b_out"])

    decoder_outputs = logits[:B, :, :V]        # strip batch + vocab-lane padding
    decoder_hidden = h_final[:B, :H][None]     # (1, B, H)
    return decoder_outputs, decoder_hidden, None


def init_params(key, output_size, hidden_size):
    """Deterministic parameter init mirroring the module's __init__ shapes."""
    ks = jax.random.split(key, 7)
    bound = 1.0 / jnp.sqrt(hidden_size)
    u = lambda k, shape: jax.random.uniform(k, shape, jnp.float32, -bound, bound)
    return {
        "embed": jax.random.normal(ks[0], (output_size, hidden_size), jnp.float32),
        "w_ih": u(ks[1], (3 * hidden_size, hidden_size)),
        "w_hh": u(ks[2], (3 * hidden_size, hidden_size)),
        "b_ih": u(ks[3], (3 * hidden_size,)),
        "b_hh": u(ks[4], (3 * hidden_size,)),
        "w_out": u(ks[5], (output_size, hidden_size)),
        "b_out": u(ks[6], (output_size,)),
    }


if __name__ == "__main__":
    B, S, H, V, T = 2, 8, 32, 16, 12   # batch, enc seq, hidden, vocab, max_sentence_length

    key = jax.random.PRNGKey(0)
    k_enc, k_hid, k_par = jax.random.split(key, 3)

    encoder_outputs = jax.random.normal(k_enc, (B, S, H), jnp.float32)   # only batch size used
    encoder_hidden = jax.random.normal(k_hid, (1, B, H), jnp.float32)    # (n_layers=1, B, H)
    params = init_params(k_par, V, H)

    # One-time parameter prep (transposes, embedding fusion, lane padding, bf16) — hoisted.
    prepped = prepare_decoder_params(params)

    dec_out, dec_hidden, attn = decoder_rnn_forward(
        encoder_outputs, encoder_hidden, prepped, max_sentence_length=T)

    dec_out = jax.block_until_ready(dec_out)
    dec_hidden = jax.block_until_ready(dec_hidden)

    assert dec_out.shape == (B, T, V)
    assert dec_hidden.shape == (1, B, H)
    assert attn is None
    assert bool(jnp.all(jnp.isfinite(dec_out)))
    assert bool(jnp.all(jnp.isfinite(dec_hidden)))

    print("KERNEL_OK")
</pallas_src>

<mosaic_0001>
module attributes {stable_mosaic.version = 11 : i64} {
  func.func @_gru_decoder_kernel(%arg0: i32, %arg1: memref<16x128xf32, #tpu.memory_space<vmem>>, %arg2: memref<128x384xbf16, #tpu.memory_space<vmem>>, %arg3: memref<128x384xbf16, #tpu.memory_space<vmem>>, %arg4: memref<1x384xf32, #tpu.memory_space<vmem>>, %arg5: memref<128x128xbf16, #tpu.memory_space<vmem>>, %arg6: memref<1x128xf32, #tpu.memory_space<vmem>>, %arg7: memref<16x12x128xf32, #tpu.memory_space<vmem>>, %arg8: memref<16x128xf32, #tpu.memory_space<vmem>>) attributes {dimension_semantics = [#tpu.dimension_semantics<parallel>], iteration_bounds = array<i64: 1>, scalar_prefetch = 0 : i64, scratch_operands = 0 : i64, tpu.core_type = #tpu.core_type<tc>, window_params = [{transform_indices = @transform_0, window_bounds = array<i64: 16, 128>}, {pipeline_mode = #tpu.pipeline_mode<synchronous>, transform_indices = @transform_1, window_bounds = array<i64: 128, 384>}, {pipeline_mode = #tpu.pipeline_mode<synchronous>, transform_indices = @transform_2, window_bounds = array<i64: 128, 384>}, {pipeline_mode = #tpu.pipeline_mode<synchronous>, transform_indices = @transform_3, window_bounds = array<i64: 1, 384>}, {pipeline_mode = #tpu.pipeline_mode<synchronous>, transform_indices = @transform_4, window_bounds = array<i64: 128, 128>}, {pipeline_mode = #tpu.pipeline_mode<synchronous>, transform_indices = @transform_5, window_bounds = array<i64: 1, 128>}, {transform_indices = @transform_6, window_bounds = array<i64: 16, 12, 128>}, {transform_indices = @transform_7, window_bounds = array<i64: 16, 128>}]} {
    %0 = tpu.iota {dimensions = array<i32: 1>} : vector<16x128xi32>
    %c0 = arith.constant 0 : index
    %c0_0 = arith.constant 0 : index
    %1 = vector.load %arg1[%c0, %c0_0] : memref<16x128xf32, #tpu.memory_space<vmem>>, vector<16x128xf32>
    %c0_i32 = arith.constant 0 : i32
    %2 = vector.broadcast %c0_i32 : i32 to vector<16x128xi32>
    %3 = arith.cmpi eq, %0, %2 : vector<16x128xi32>
    %4 = arith.extui %3 : vector<16x128xi1> to vector<16x128xi32>
    %5 = arith.sitofp %4 : vector<16x128xi32> to vector<16x128xf32>
    %6 = arith.truncf %5 : vector<16x128xf32> to vector<16x128xbf16>
    %c0_1 = arith.constant 0 : index
    %c0_2 = arith.constant 0 : index
    %7 = vector.load %arg2[%c0_1, %c0_2] : memref<128x384xbf16, #tpu.memory_space<vmem>>, vector<128x384xbf16>
    %cst = arith.constant dense<0.000000e+00> : vector<16x384xf32>
    %8 = tpu.matmul %6, %7, %cst {dimension_numbers = #tpu.dot_dimension_numbers<[1], [0], [0], [1], [0, 0, 1, 1], [], []>} : vector<16x128xbf16>, vector<128x384xbf16>, vector<16x384xf32> -> vector<16x384xf32>
    %9 = arith.truncf %1 : vector<16x128xf32> to vector<16x128xbf16>
    %c0_3 = arith.constant 0 : index
    %c0_4 = arith.constant 0 : index
    %10 = vector.load %arg3[%c0_3, %c0_4] : memref<128x384xbf16, #tpu.memory_space<vmem>>, vector<128x384xbf16>
    %cst_5 = arith.constant dense<0.000000e+00> : vector<16x384xf32>
    %11 = tpu.matmul %9, %10, %cst_5 {dimension_numbers = #tpu.dot_dimension_numbers<[1], [0], [0], [1], [0, 0, 1, 1], [], []>} : vector<16x128xbf16>, vector<128x384xbf16>, vector<16x384xf32> -> vector<16x384xf32>
    %c0_6 = arith.constant 0 : index
    %c0_7 = arith.constant 0 : index
    %12 = vector.load %arg4[%c0_6, %c0_7] : memref<1x384xf32, #tpu.memory_space<vmem>>, vector<1x384xf32>
    %13 = vector.broadcast %12 : vector<1x384xf32> to vector<16x384xf32>
    %14 = arith.addf %11, %13 : vector<16x384xf32>
    %15 = vector.extract_strided_slice %8 {offsets = [0, 0], sizes = [16, 128], strides = [1, 1]} : vector<16x384xf32> to vector<16x128xf32>
    %16 = vector.extract_strided_slice %14 {offsets = [0, 0], sizes = [16, 128], strides = [1, 1]} : vector<16x384xf32> to vector<16x128xf32>
    %17 = arith.addf %15, %16 : vector<16x128xf32>
    %18 = arith.negf %17 : vector<16x128xf32>
    %19 = math.exp %18 : vector<16x128xf32>
    %cst_8 = arith.constant 1.000000e+00 : f32
    %20 = vector.broadcast %cst_8 : f32 to vector<16x128xf32>
    %21 = arith.addf %20, %19 : vector<16x128xf32>
    %22 = arith.divf %20, %21 : vector<16x128xf32>
    %23 = vector.extract_strided_slice %8 {offsets = [0, 128], sizes = [16, 128], strides = [1, 1]} : vector<16x384xf32> to vector<16x128xf32>
    %24 = vector.extract_strided_slice %14 {offsets = [0, 128], sizes = [16, 128], strides = [1, 1]} : vector<16x384xf32> to vector<16x128xf32>
    %25 = arith.addf %23, %24 : vector<16x128xf32>
    %26 = arith.negf %25 : vector<16x128xf32>
    %27 = math.exp %26 : vector<16x128xf32>
    %cst_9 = arith.constant 1.000000e+00 : f32
    %28 = vector.broadcast %cst_9 : f32 to vector<16x128xf32>
    %29 = arith.addf %28, %27 : vector<16x128xf32>
    %30 = arith.divf %28, %29 : vector<16x128xf32>
    %31 = vector.extract_strided_slice %8 {offsets = [0, 256], sizes = [16, 128], strides = [1, 1]} : vector<16x384xf32> to vector<16x128xf32>
    %32 = vector.extract_strided_slice %14 {offsets = [0, 256], sizes = [16, 128], strides = [1, 1]} : vector<16x384xf32> to vector<16x128xf32>
    %33 = arith.mulf %22, %32 : vector<16x128xf32>
    %34 = arith.addf %31, %33 : vector<16x128xf32>
    %35 = math.tanh %34 : vector<16x128xf32>
    %cst_10 = arith.constant 1.000000e+00 : f32
    %36 = vector.broadcast %cst_10 : f32 to vector<16x128xf32>
    %37 = arith.subf %36, %30 : vector<16x128xf32>
    %38 = arith.mulf %37, %35 : vector<16x128xf32>
    %39 = arith.mulf %30, %1 : vector<16x128xf32>
    %40 = arith.addf %38, %39 : vector<16x128xf32>
    %41 = arith.truncf %40 : vector<16x128xf32> to vector<16x128xbf16>
    %c0_11 = arith.constant 0 : index
    %c0_12 = arith.constant 0 : index
    %42 = vector.load %arg5[%c0_11, %c0_12] : memref<128x128xbf16, #tpu.memory_space<vmem>>, vector<128x128xbf16>
    %cst_13 = arith.constant dense<0.000000e+00> : vector<16x128xf32>
    %43 = tpu.matmul %41, %42, %cst_13 {dimension_numbers = #tpu.dot_dimension_numbers<[1], [0], [0], [1], [0, 0, 1, 1], [], []>} : vector<16x128xbf16>, vector<128x128xbf16>, vector<16x128xf32> -> vector<16x128xf32>
    %c0_14 = arith.constant 0 : index
    %c0_15 = arith.constant 0 : index
    %44 = vector.load %arg6[%c0_14, %c0_15] : memref<1x128xf32, #tpu.memory_space<vmem>>, vector<1x128xf32>
    %45 = vector.broadcast %44 : vector<1x128xf32> to vector<16x128xf32>
    %46 = arith.addf %43, %45 : vector<16x128xf32>
    %c0_16 = arith.constant 0 : index
    %c0_17 = arith.constant 0 : index
    %c0_18 = arith.constant 0 : index
    %47 = vector.load %arg7[%c0_16, %c0_17, %c0_18] : memref<16x12x128xf32, #tpu.memory_space<vmem>>, vector<16x1x128xf32>
    %48 = vector.shape_cast %47 : vector<16x1x128xf32> to vector<16x128xf32>
    %49 = vector.shape_cast %46 : vector<16x128xf32> to vector<16x1x128xf32>
    tpu.vector_store %arg7[%c0_16, %c0_17, %c0_18], %49 {strides = array<i32>} : memref<16x12x128xf32, #tpu.memory_space<vmem>>, vector<16x1x128xf32>,
    %cst_19 = arith.constant dense<0xFF800000> : vector<16xf32>
    %50 = vector.multi_reduction <maximumf>, %46, %cst_19 [1] : vector<16x128xf32> to vector<16xf32>
    %51 = vector.shape_cast %50 : vector<16xf32> to vector<16x1xf32>
    %52 = vector.broadcast %51 : vector<16x1xf32> to vector<16x128xf32>
    %53 = arith.cmpf oeq, %46, %52 : vector<16x128xf32>
    %c128_i32 = arith.constant 128 : i32
    %54 = vector.broadcast %c128_i32 : i32 to vector<16x128xi32>
    %55 = arith.select %53, %0, %54 : vector<16x128xi1>, vector<16x128xi32>
    %cst_20 = arith.constant dense<2147483647> : vector<16xi32>
    %56 = vector.multi_reduction <minsi>, %55, %cst_20 [1] : vector<16x128xi32> to vector<16xi32>
    %57 = vector.shape_cast %56 : vector<16xi32> to vector<16x1xi32>
    %58 = vector.broadcast %57 : vector<16x1xi32> to vector<16x128xi32>
    %59 = arith.cmpi eq, %0, %58 : vector<16x128xi32>
    %60 = arith.extui %59 : vector<16x128xi1> to vector<16x128xi32>
    %61 = arith.sitofp %60 : vector<16x128xi32> to vector<16x128xf32>
    %62 = arith.truncf %61 : vector<16x128xf32> to vector<16x128xbf16>
    %c0_21 = arith.constant 0 : index
    %c0_22 = arith.constant 0 : index
    %63 = vector.load %arg2[%c0_21, %c0_22] : memref<128x384xbf16, #tpu.memory_space<vmem>>, vector<128x384xbf16>
    %cst_23 = arith.constant dense<0.000000e+00> : vector<16x384xf32>
    %64 = tpu.matmul %62, %63, %cst_23 {dimension_numbers = #tpu.dot_dimension_numbers<[1], [0], [0], [1], [0, 0, 1, 1], [], []>} : vector<16x128xbf16>, vector<128x384xbf16>, vector<16x384xf32> -> vector<16x384xf32>
    %65 = arith.truncf %40 : vector<16x128xf32> to vector<16x128xbf16>
    %c0_24 = arith.constant 0 : index
    %c0_25 = arith.constant 0 : index
    %66 = vector.load %arg3[%c0_24, %c0_25] : memref<128x384xbf16, #tpu.memory_space<vmem>>, vector<128x384xbf16>
    %cst_26 = arith.constant dense<0.000000e+00> : vector<16x384xf32>
    %67 = tpu.matmul %65, %66, %cst_26 {dimension_numbers = #tpu.dot_dimension_numbers<[1], [0], [0], [1], [0, 0, 1, 1], [], []>} : vector<16x128xbf16>, vector<128x384xbf16>, vector<16x384xf32> -> vector<16x384xf32>
    %c0_27 = arith.constant 0 : index
    %c0_28 = arith.constant 0 : index
    %68 = vector.load %arg4[%c0_27, %c0_28] : memref<1x384xf32, #tpu.memory_space<vmem>>, vector<1x384xf32>
    %69 = vector.broadcast %68 : vector<1x384xf32> to vector<16x384xf32>
    %70 = arith.addf %67, %69 : vector<16x384xf32>
    %71 = vector.extract_strided_slice %64 {offsets = [0, 0], sizes = [16, 128], strides = [1, 1]} : vector<16x384xf32> to vector<16x128xf32>
    %72 = vector.extract_strided_slice %70 {offsets = [0, 0], sizes = [16, 128], strides = [1, 1]} : vector<16x384xf32> to vector<16x128xf32>
    %73 = arith.addf %71, %72 : vector<16x128xf32>
    %74 = arith.negf %73 : vector<16x128xf32>
    %75 = math.exp %74 : vector<16x128xf32>
    %cst_29 = arith.constant 1.000000e+00 : f32
    %76 = vector.broadcast %cst_29 : f32 to vector<16x128xf32>
    %77 = arith.addf %76, %75 : vector<16x128xf32>
    %78 = arith.divf %76, %77 : vector<16x128xf32>
    %79 = vector.extract_strided_slice %64 {offsets = [0, 128], sizes = [16, 128], strides = [1, 1]} : vector<16x384xf32> to vector<16x128xf32>
    %80 = vector.extract_strided_slice %70 {offsets = [0, 128], sizes = [16, 128], strides = [1, 1]} : vector<16x384xf32> to vector<16x128xf32>
    %81 = arith.addf %79, %80 : vector<16x128xf32>
    %82 = arith.negf %81 : vector<16x128xf32>
    %83 = math.exp %82 : vector<16x128xf32>
    %cst_30 = arith.constant 1.000000e+00 : f32
    %84 = vector.broadcast %cst_30 : f32 to vector<16x128xf32>
    %85 = arith.addf %84, %83 : vector<16x128xf32>
    %86 = arith.divf %84, %85 : vector<16x128xf32>
    %87 = vector.extract_strided_slice %64 {offsets = [0, 256], sizes = [16, 128], strides = [1, 1]} : vector<16x384xf32> to vector<16x128xf32>
    %88 = vector.extract_strided_slice %70 {offsets = [0, 256], sizes = [16, 128], strides = [1, 1]} : vector<16x384xf32> to vector<16x128xf32>
    %89 = arith.mulf %78, %88 : vector<16x128xf32>
    %90 = arith.addf %87, %89 : vector<16x128xf32>
    %91 = math.tanh %90 : vector<16x128xf32>
    %cst_31 = arith.constant 1.000000e+00 : f32
    %92 = vector.broadcast %cst_31 : f32 to vector<16x128xf32>
    %93 = arith.subf %92, %86 : vector<16x128xf32>
    %94 = arith.mulf %93, %91 : vector<16x128xf32>
    %95 = arith.mulf %86, %40 : vector<16x128xf32>
    %96 = arith.addf %94, %95 : vector<16x128xf32>
    %97 = arith.truncf %96 : vector<16x128xf32> to vector<16x128xbf16>
    %c0_32 = arith.constant 0 : index
    %c0_33 = arith.constant 0 : index
    %98 = vector.load %arg5[%c0_32, %c0_33] : memref<128x128xbf16, #tpu.memory_space<vmem>>, vector<128x128xbf16>
    %cst_34 = arith.constant dense<0.000000e+00> : vector<16x128xf32>
    %99 = tpu.matmul %97, %98, %cst_34 {dimension_numbers = #tpu.dot_dimension_numbers<[1], [0], [0], [1], [0, 0, 1, 1], [], []>} : vector<16x128xbf16>, vector<128x128xbf16>, vector<16x128xf32> -> vector<16x128xf32>
    %c0_35 = arith.constant 0 : index
    %c0_36 = arith.constant 0 : index
    %100 = vector.load %arg6[%c0_35, %c0_36] : memref<1x128xf32, #tpu.memory_space<vmem>>, vector<1x128xf32>
    %101 = vector.broadcast %100 : vector<1x128xf32> to vector<16x128xf32>
    %102 = arith.addf %99, %101 : vector<16x128xf32>
    %c0_37 = arith.constant 0 : index
    %c1 = arith.constant 1 : index
    %c0_38 = arith.constant 0 : index
    %103 = vector.load %arg7[%c0_37, %c1, %c0_38] : memref<16x12x128xf32, #tpu.memory_space<vmem>>, vector<16x1x128xf32>
    %104 = vector.shape_cast %103 : vector<16x1x128xf32> to vector<16x128xf32>
    %105 = vector.shape_cast %102 : vector<16x128xf32> to vector<16x1x128xf32>
    tpu.vector_store %arg7[%c0_37, %c1, %c0_38], %105 {strides = array<i32>} : memref<16x12x128xf32, #tpu.memory_space<vmem>>, vector<16x1x128xf32>,
    %cst_39 = arith.constant dense<0xFF800000> : vector<16xf32>
    %106 = vector.multi_reduction <maximumf>, %102, %cst_39 [1] : vector<16x128xf32> to vector<16xf32>
    %107 = vector.shape_cast %106 : vector<16xf32> to vector<16x1xf32>
    %108 = vector.broadcast %107 : vector<16x1xf32> to vector<16x128xf32>
    %109 = arith.cmpf oeq, %102, %108 : vector<16x128xf32>
    %c128_i32_40 = arith.constant 128 : i32
    %110 = vector.broadcast %c128_i32_40 : i32 to vector<16x128xi32>
    %111 = arith.select %109, %0, %110 : vector<16x128xi1>, vector<16x128xi32>
    %cst_41 = arith.constant dense<2147483647> : vector<16xi32>
    %112 = vector.multi_reduction <minsi>, %111, %cst_41 [1] : vector<16x128xi32> to vector<16xi32>
    %113 = vector.shape_cast %112 : vector<16xi32> to vector<16x1xi32>
    %114 = vector.broadcast %113 : vector<16x1xi32> to vector<16x128xi32>
    %115 = arith.cmpi eq, %0, %114 : vector<16x128xi32>
    %116 = arith.extui %115 : vector<16x128xi1> to vector<16x128xi32>
    %117 = arith.sitofp %116 : vector<16x128xi32> to vector<16x128xf32>
    %118 = arith.truncf %117 : vector<16x128xf32> to vector<16x128xbf16>
    %c0_42 = arith.constant 0 : index
    %c0_43 = arith.constant 0 : index
    %119 = vector.load %arg2[%c0_42, %c0_43] : memref<128x384xbf16, #tpu.memory_space<vmem>>, vector<128x384xbf16>
    %cst_44 = arith.constant dense<0.000000e+00> : vector<16x384xf32>
    %120 = tpu.matmul %118, %119, %cst_44 {dimension_numbers = #tpu.dot_dimension_numbers<[1], [0], [0], [1], [0, 0, 1, 1], [], []>} : vector<16x128xbf16>, vector<128x384xbf16>, vector<16x384xf32> -> vector<16x384xf32>
    %121 = arith.truncf %96 : vector<16x128xf32> to vector<16x128xbf16>
    %c0_45 = arith.constant 0 : index
    %c0_46 = arith.constant 0 : index
    %122 = vector.load %arg3[%c0_45, %c0_46] : memref<128x384xbf16, #tpu.memory_space<vmem>>, vector<128x384xbf16>
    %cst_47 = arith.constant dense<0.000000e+00> : vector<16x384xf32>
    %123 = tpu.matmul %121, %122, %cst_47 {dimension_numbers = #tpu.dot_dimension_numbers<[1], [0], [0], [1], [0, 0, 1, 1], [], []>} : vector<16x128xbf16>, vector<128x384xbf16>, vector<16x384xf32> -> vector<16x384xf32>
    %c0_48 = arith.constant 0 : index
    %c0_49 = arith.constant 0 : index
    %124 = vector.load %arg4[%c0_48, %c0_49] : memref<1x384xf32, #tpu.memory_space<vmem>>, vector<1x384xf32>
    %125 = vector.broadcast %124 : vector<1x384xf32> to vector<16x384xf32>
    %126 = arith.addf %123, %125 : vector<16x384xf32>
    %127 = vector.extract_strided_slice %120 {offsets = [0, 0], sizes = [16, 128], strides = [1, 1]} : vector<16x384xf32> to vector<16x128xf32>
    %128 = vector.extract_strided_slice %126 {offsets = [0, 0], sizes = [16, 128], strides = [1, 1]} : vector<16x384xf32> to vector<16x128xf32>
    %129 = arith.addf %127, %128 : vector<16x128xf32>
    %130 = arith.negf %129 : vector<16x128xf32>
    %131 = math.exp %130 : vector<16x128xf32>
    %cst_50 = arith.constant 1.000000e+00 : f32
    %132 = vector.broadcast %cst_50 : f32 to vector<16x128xf32>
    %133 = arith.addf %132, %131 : vector<16x128xf32>
    %134 = arith.divf %132, %133 : vector<16x128xf32>
    %135 = vector.extract_strided_slice %120 {offsets = [0, 128], sizes = [16, 128], strides = [1, 1]} : vector<16x384xf32> to vector<16x128xf32>
    %136 = vector.extract_strided_slice %126 {offsets = [0, 128], sizes = [16, 128], strides = [1, 1]} : vector<16x384xf32> to vector<16x128xf32>
    %137 = arith.addf %135, %136 : vector<16x128xf32>
    %138 = arith.negf %137 : vector<16x128xf32>
    %139 = math.exp %138 : vector<16x128xf32>
    %cst_51 = arith.constant 1.000000e+00 : f32
    %140 = vector.broadcast %cst_51 : f32 to vector<16x128xf32>
    %141 = arith.addf %140, %139 : vector<16x128xf32>
    %142 = arith.divf %140, %141 : vector<16x128xf32>
    %143 = vector.extract_strided_slice %120 {offsets = [0, 256], sizes = [16, 128], strides = [1, 1]} : vector<16x384xf32> to vector<16x128xf32>
    %144 = vector.extract_strided_slice %126 {offsets = [0, 256], sizes = [16, 128], strides = [1, 1]} : vector<16x384xf32> to vector<16x128xf32>
    %145 = arith.mulf %134, %144 : vector<16x128xf32>
    %146 = arith.addf %143, %145 : vector<16x128xf32>
    %147 = math.tanh %146 : vector<16x128xf32>
    %cst_52 = arith.constant 1.000000e+00 : f32
    %148 = vector.broadcast %cst_52 : f32 to vector<16x128xf32>
    %149 = arith.subf %148, %142 : vector<16x128xf32>
    %150 = arith.mulf %149, %147 : vector<16x128xf32>
    %151 = arith.mulf %142, %96 : vector<16x128xf32>
    %152 = arith.addf %150, %151 : vector<16x128xf32>
    %153 = arith.truncf %152 : vector<16x128xf32> to vector<16x128xbf16>
    %c0_53 = arith.constant 0 : index
    %c0_54 = arith.constant 0 : index
    %154 = vector.load %arg5[%c0_53, %c0_54] : memref<128x128xbf16, #tpu.memory_space<vmem>>, vector<128x128xbf16>
    %cst_55 = arith.constant dense<0.000000e+00> : vector<16x128xf32>
    %155 = tpu.matmul %153, %154, %cst_55 {dimension_numbers = #tpu.dot_dimension_numbers<[1], [0], [0], [1], [0, 0, 1, 1], [], []>} : vector<16x128xbf16>, vector<128x128xbf16>, vector<16x128xf32> -> vector<16x128xf32>
    %c0_56 = arith.constant 0 : index
    %c0_57 = arith.constant 0 : index
    %156 = vector.load %arg6[%c0_56, %c0_57] : memref<1x128xf32, #tpu.memory_space<vmem>>, vector<1x128xf32>
    %157 = vector.broadcast %156 : vector<1x128xf32> to vector<16x128xf32>
    %158 = arith.addf %155, %157 : vector<16x128xf32>
    %c0_58 = arith.constant 0 : index
    %c2 = arith.constant 2 : index
    %c0_59 = arith.constant 0 : index
    %159 = vector.load %arg7[%c0_58, %c2, %c0_59] : memref<16x12x128xf32, #tpu.memory_space<vmem>>, vector<16x1x128xf32>
    %160 = vector.shape_cast %159 : vector<16x1x128xf32> to vector<16x128xf32>
    %161 = vector.shape_cast %158 : vector<16x128xf32> to vector<16x1x128xf32>
    tpu.vector_store %arg7[%c0_58, %c2, %c0_59], %161 {strides = array<i32>} : memref<16x12x128xf32, #tpu.memory_space<vmem>>, vector<16x1x128xf32>,
    %cst_60 = arith.constant dense<0xFF800000> : vector<16xf32>
    %162 = vector.multi_reduction <maximumf>, %158, %cst_60 [1] : vector<16x128xf32> to vector<16xf32>
    %163 = vector.shape_cast %162 : vector<16xf32> to vector<16x1xf32>
    %164 = vector.broadcast %163 : vector<16x1xf32> to vector<16x128xf32>
    %165 = arith.cmpf oeq, %158, %164 : vector<16x128xf32>
    %c128_i32_61 = arith.constant 128 : i32
    %166 = vector.broadcast %c128_i32_61 : i32 to vector<16x128xi32>
    %167 = arith.select %165, %0, %166 : vector<16x128xi1>, vector<16x128xi32>
    %cst_62 = arith.constant dense<2147483647> : vector<16xi32>
    %168 = vector.multi_reduction <minsi>, %167, %cst_62 [1] : vector<16x128xi32> to vector<16xi32>
    %169 = vector.shape_cast %168 : vector<16xi32> to vector<16x1xi32>
    %170 = vector.broadcast %169 : vector<16x1xi32> to vector<16x128xi32>
    %171 = arith.cmpi eq, %0, %170 : vector<16x128xi32>
    %172 = arith.extui %171 : vector<16x128xi1> to vector<16x128xi32>
    %173 = arith.sitofp %172 : vector<16x128xi32> to vector<16x128xf32>
    %174 = arith.truncf %173 : vector<16x128xf32> to vector<16x128xbf16>
    %c0_63 = arith.constant 0 : index
    %c0_64 = arith.constant 0 : index
    %175 = vector.load %arg2[%c0_63, %c0_64] : memref<128x384xbf16, #tpu.memory_space<vmem>>, vector<128x384xbf16>
    %cst_65 = arith.constant dense<0.000000e+00> : vector<16x384xf32>
    %176 = tpu.matmul %174, %175, %cst_65 {dimension_numbers = #tpu.dot_dimension_numbers<[1], [0], [0], [1], [0, 0, 1, 1], [], []>} : vector<16x128xbf16>, vector<128x384xbf16>, vector<16x384xf32> -> vector<16x384xf32>
    %177 = arith.truncf %152 : vector<16x128xf32> to vector<16x128xbf16>
    %c0_66 = arith.constant 0 : index
    %c0_67 = arith.constant 0 : index
    %178 = vector.load %arg3[%c0_66, %c0_67] : memref<128x384xbf16, #tpu.memory_space<vmem>>, vector<128x384xbf16>
    %cst_68 = arith.constant dense<0.000000e+00> : vector<16x384xf32>
    %179 = tpu.matmul %177, %178, %cst_68 {dimension_numbers = #tpu.dot_dimension_numbers<[1], [0], [0], [1], [0, 0, 1, 1], [], []>} : vector<16x128xbf16>, vector<128x384xbf16>, vector<16x384xf32> -> vector<16x384xf32>
    %c0_69 = arith.constant 0 : index
    %c0_70 = arith.constant 0 : index
    %180 = vector.load %arg4[%c0_69, %c0_70] : memref<1x384xf32, #tpu.memory_space<vmem>>, vector<1x384xf32>
    %181 = vector.broadcast %180 : vector<1x384xf32> to vector<16x384xf32>
    %182 = arith.addf %179, %181 : vector<16x384xf32>
    %183 = vector.extract_strided_slice %176 {offsets = [0, 0], sizes = [16, 128], strides = [1, 1]} : vector<16x384xf32> to vector<16x128xf32>
    %184 = vector.extract_strided_slice %182 {offsets = [0, 0], sizes = [16, 128], strides = [1, 1]} : vector<16x384xf32> to vector<16x128xf32>
    %185 = arith.addf %183, %184 : vector<16x128xf32>
    %186 = arith.negf %185 : vector<16x128xf32>
    %187 = math.exp %186 : vector<16x128xf32>
    %cst_71 = arith.constant 1.000000e+00 : f32
    %188 = vector.broadcast %cst_71 : f32 to vector<16x128xf32>
    %189 = arith.addf %188, %187 : vector<16x128xf32>
    %190 = arith.divf %188, %189 : vector<16x128xf32>
    %191 = vector.extract_strided_slice %176 {offsets = [0, 128], sizes = [16, 128], strides = [1, 1]} : vector<16x384xf32> to vector<16x128xf32>
    %192 = vector.extract_strided_slice %182 {offsets = [0, 128], sizes = [16, 128], strides = [1, 1]} : vector<16x384xf32> to vector<16x128xf32>
    %193 = arith.addf %191, %192 : vector<16x128xf32>
    %194 = arith.negf %193 : vector<16x128xf32>
    %195 = math.exp %194 : vector<16x128xf32>
    %cst_72 = arith.constant 1.000000e+00 : f32
    %196 = vector.broadcast %cst_72 : f32 to vector<16x128xf32>
    %197 = arith.addf %196, %195 : vector<16x128xf32>
    %198 = arith.divf %196, %197 : vector<16x128xf32>
    %199 = vector.extract_strided_slice %176 {offsets = [0, 256], sizes = [16, 128], strides = [1, 1]} : vector<16x384xf32> to vector<16x128xf32>
    %200 = vector.extract_strided_slice %182 {offsets = [0, 256], sizes = [16, 128], strides = [1, 1]} : vector<16x384xf32> to vector<16x128xf32>
    %201 = arith.mulf %190, %200 : vector<16x128xf32>
    %202 = arith.addf %199, %201 : vector<16x128xf32>
    %203 = math.tanh %202 : vector<16x128xf32>
    %cst_73 = arith.constant 1.000000e+00 : f32
    %204 = vector.broadcast %cst_73 : f32 to vector<16x128xf32>
    %205 = arith.subf %204, %198 : vector<16x128xf32>
    %206 = arith.mulf %205, %203 : vector<16x128xf32>
    %207 = arith.mulf %198, %152 : vector<16x128xf32>
    %208 = arith.addf %206, %207 : vector<16x128xf32>
    %209 = arith.truncf %208 : vector<16x128xf32> to vector<16x128xbf16>
    %c0_74 = arith.constant 0 : index
    %c0_75 = arith.constant 0 : index
    %210 = vector.load %arg5[%c0_74, %c0_75] : memref<128x128xbf16, #tpu.memory_space<vmem>>, vector<128x128xbf16>
    %cst_76 = arith.constant dense<0.000000e+00> : vector<16x128xf32>
    %211 = tpu.matmul %209, %210, %cst_76 {dimension_numbers = #tpu.dot_dimension_numbers<[1], [0], [0], [1], [0, 0, 1, 1], [], []>} : vector<16x128xbf16>, vector<128x128xbf16>, vector<16x128xf32> -> vector<16x128xf32>
    %c0_77 = arith.constant 0 : index
    %c0_78 = arith.constant 0 : index
    %212 = vector.load %arg6[%c0_77, %c0_78] : memref<1x128xf32, #tpu.memory_space<vmem>>, vector<1x128xf32>
    %213 = vector.broadcast %212 : vector<1x128xf32> to vector<16x128xf32>
    %214 = arith.addf %211, %213 : vector<16x128xf32>
    %c0_79 = arith.constant 0 : index
    %c3 = arith.constant 3 : index
    %c0_80 = arith.constant 0 : index
    %215 = vector.load %arg7[%c0_79, %c3, %c0_80] : memref<16x12x128xf32, #tpu.memory_space<vmem>>, vector<16x1x128xf32>
    %216 = vector.shape_cast %215 : vector<16x1x128xf32> to vector<16x128xf32>
    %217 = vector.shape_cast %214 : vector<16x128xf32> to vector<16x1x128xf32>
    tpu.vector_store %arg7[%c0_79, %c3, %c0_80], %217 {strides = array<i32>} : memref<16x12x128xf32, #tpu.memory_space<vmem>>, vector<16x1x128xf32>,
    %cst_81 = arith.constant dense<0xFF800000> : vector<16xf32>
    %218 = vector.multi_reduction <maximumf>, %214, %cst_81 [1] : vector<16x128xf32> to vector<16xf32>
    %219 = vector.shape_cast %218 : vector<16xf32> to vector<16x1xf32>
    %220 = vector.broadcast %219 : vector<16x1xf32> to vector<16x128xf32>
    %221 = arith.cmpf oeq, %214, %220 : vector<16x128xf32>
    %c128_i32_82 = arith.constant 128 : i32
    %222 = vector.broadcast %c128_i32_82 : i32 to vector<16x128xi32>
    %223 = arith.select %221, %0, %222 : vector<16x128xi1>, vector<16x128xi32>
    %cst_83 = arith.constant dense<2147483647> : vector<16xi32>
    %224 = vector.multi_reduction <minsi>, %223, %cst_83 [1] : vector<16x128xi32> to vector<16xi32>
    %225 = vector.shape_cast %224 : vector<16xi32> to vector<16x1xi32>
    %226 = vector.broadcast %225 : vector<16x1xi32> to vector<16x128xi32>
    %227 = arith.cmpi eq, %0, %226 : vector<16x128xi32>
    %228 = arith.extui %227 : vector<16x128xi1> to vector<16x128xi32>
    %229 = arith.sitofp %228 : vector<16x128xi32> to vector<16x128xf32>
    %230 = arith.truncf %229 : vector<16x128xf32> to vector<16x128xbf16>
    %c0_84 = arith.constant 0 : index
    %c0_85 = arith.constant 0 : index
    %231 = vector.load %arg2[%c0_84, %c0_85] : memref<128x384xbf16, #tpu.memory_space<vmem>>, vector<128x384xbf16>
    %cst_86 = arith.constant dense<0.000000e+00> : vector<16x384xf32>
    %232 = tpu.matmul %230, %231, %cst_86 {dimension_numbers = #tpu.dot_dimension_numbers<[1], [0], [0], [1], [0, 0, 1, 1], [], []>} : vector<16x128xbf16>, vector<128x384xbf16>, vector<16x384xf32> -> vector<16x384xf32>
    %233 = arith.truncf %208 : vector<16x128xf32> to vector<16x128xbf16>
    %c0_87 = arith.constant 0 : index
    %c0_88 = arith.constant 0 : index
    %234 = vector.load %arg3[%c0_87, %c0_88] : memref<128x384xbf16, #tpu.memory_space<vmem>>, vector<128x384xbf16>
    %cst_89 = arith.constant dense<0.000000e+00> : vector<16x384xf32>
    %235 = tpu.matmul %233, %234, %cst_89 {dimension_numbers = #tpu.dot_dimension_numbers<[1], [0], [0], [1], [0, 0, 1, 1], [], []>} : vector<16x128xbf16>, vector<128x384xbf16>, vector<16x384xf32> -> vector<16x384xf32>
    %c0_90 = arith.constant 0 : index
    %c0_91 = arith.constant 0 : index
    %236 = vector.load %arg4[%c0_90, %c0_91] : memref<1x384xf32, #tpu.memory_space<vmem>>, vector<1x384xf32>
    %237 = vector.broadcast %236 : vector<1x384xf32> to vector<16x384xf32>
    %238 = arith.addf %235, %237 : vector<16x384xf32>
    %239 = vector.extract_strided_slice %232 {offsets = [0, 0], sizes = [16, 128], strides = [1, 1]} : vector<16x384xf32> to vector<16x128xf32>
    %240 = vector.extract_strided_slice %238 {offsets = [0, 0], sizes = [16, 128], strides = [1, 1]} : vector<16x384xf32> to vector<16x128xf32>
    %241 = arith.addf %239, %240 : vector<16x128xf32>
    %242 = arith.negf %241 : vector<16x128xf32>
    %243 = math.exp %242 : vector<16x128xf32>
    %cst_92 = arith.constant 1.000000e+00 : f32
    %244 = vector.broadcast %cst_92 : f32 to vector<16x128xf32>
    %245 = arith.addf %244, %243 : vector<16x128xf32>
    %246 = arith.divf %244, %245 : vector<16x128xf32>
    %247 = vector.extract_strided_slice %232 {offsets = [0, 128], sizes = [16, 128], strides = [1, 1]} : vector<16x384xf32> to vector<16x128xf32>
    %248 = vector.extract_strided_slice %238 {offsets = [0, 128], sizes = [16, 128], strides = [1, 1]} : vector<16x384xf32> to vector<16x128xf32>
    %249 = arith.addf %247, %248 : vector<16x128xf32>
    %250 = arith.negf %249 : vector<16x128xf32>
    %251 = math.exp %250 : vector<16x128xf32>
    %cst_93 = arith.constant 1.000000e+00 : f32
    %252 = vector.broadcast %cst_93 : f32 to vector<16x128xf32>
    %253 = arith.addf %252, %251 : vector<16x128xf32>
    %254 = arith.divf %252, %253 : vector<16x128xf32>
    %255 = vector.extract_strided_slice %232 {offsets = [0, 256], sizes = [16, 128], strides = [1, 1]} : vector<16x384xf32> to vector<16x128xf32>
    %256 = vector.extract_strided_slice %238 {offsets = [0, 256], sizes = [16, 128], strides = [1, 1]} : vector<16x384xf32> to vector<16x128xf32>
    %257 = arith.mulf %246, %256 : vector<16x128xf32>
    %258 = arith.addf %255, %257 : vector<16x128xf32>
    %259 = math.tanh %258 : vector<16x128xf32>
    %cst_94 = arith.constant 1.000000e+00 : f32
    %260 = vector.broadcast %cst_94 : f32 to vector<16x128xf32>
    %261 = arith.subf %260, %254 : vector<16x128xf32>
    %262 = arith.mulf %261, %259 : vector<16x128xf32>
    %263 = arith.mulf %254, %208 : vector<16x128xf32>
    %264 = arith.addf %262, %263 : vector<16x128xf32>
    %265 = arith.truncf %264 : vector<16x128xf32> to vector<16x128xbf16>
    %c0_95 = arith.constant 0 : index
    %c0_96 = arith.constant 0 : index
    %266 = vector.load %arg5[%c0_95, %c0_96] : memref<128x128xbf16, #tpu.memory_space<vmem>>, vector<128x128xbf16>
    %cst_97 = arith.constant dense<0.000000e+00> : vector<16x128xf32>
    %267 = tpu.matmul %265, %266, %cst_97 {dimension_numbers = #tpu.dot_dimension_numbers<[1], [0], [0], [1], [0, 0, 1, 1], [], []>} : vector<16x128xbf16>, vector<128x128xbf16>, vector<16x128xf32> -> vector<16x128xf32>
    %c0_98 = arith.constant 0 : index
    %c0_99 = arith.constant 0 : index
    %268 = vector.load %arg6[%c0_98, %c0_99] : memref<1x128xf32, #tpu.memory_space<vmem>>, vector<1x128xf32>
    %269 = vector.broadcast %268 : vector<1x128xf32> to vector<16x128xf32>
    %270 = arith.addf %267, %269 : vector<16x128xf32>
    %c0_100 = arith.constant 0 : index
    %c4 = arith.constant 4 : index
    %c0_101 = arith.constant 0 : index
    %271 = vector.load %arg7[%c0_100, %c4, %c0_101] : memref<16x12x128xf32, #tpu.memory_space<vmem>>, vector<16x1x128xf32>
    %272 = vector.shape_cast %271 : vector<16x1x128xf32> to vector<16x128xf32>
    %273 = vector.shape_cast %270 : vector<16x128xf32> to vector<16x1x128xf32>
    tpu.vector_store %arg7[%c0_100, %c4, %c0_101], %273 {strides = array<i32>} : memref<16x12x128xf32, #tpu.memory_space<vmem>>, vector<16x1x128xf32>,
    %cst_102 = arith.constant dense<0xFF800000> : vector<16xf32>
    %274 = vector.multi_reduction <maximumf>, %270, %cst_102 [1] : vector<16x128xf32> to vector<16xf32>
    %275 = vector.shape_cast %274 : vector<16xf32> to vector<16x1xf32>
    %276 = vector.broadcast %275 : vector<16x1xf32> to vector<16x128xf32>
    %277 = arith.cmpf oeq, %270, %276 : vector<16x128xf32>
    %c128_i32_103 = arith.constant 128 : i32
    %278 = vector.broadcast %c128_i32_103 : i32 to vector<16x128xi32>
    %279 = arith.select %277, %0, %278 : vector<16x128xi1>, vector<16x128xi32>
    %cst_104 = arith.constant dense<2147483647> : vector<16xi32>
    %280 = vector.multi_reduction <minsi>, %279, %cst_104 [1] : vector<16x128xi32> to vector<16xi32>
    %281 = vector.shape_cast %280 : vector<16xi32> to vector<16x1xi32>
    %282 = vector.broadcast %281 : vector<16x1xi32> to vector<16x128xi32>
    %283 = arith.cmpi eq, %0, %282 : vector<16x128xi32>
    %284 = arith.extui %283 : vector<16x128xi1> to vector<16x128xi32>
    %285 = arith.sitofp %284 : vector<16x128xi32> to vector<16x128xf32>
    %286 = arith.truncf %285 : vector<16x128xf32> to vector<16x128xbf16>
    %c0_105 = arith.constant 0 : index
    %c0_106 = arith.constant 0 : index
    %287 = vector.load %arg2[%c0_105, %c0_106] : memref<128x384xbf16, #tpu.memory_space<vmem>>, vector<128x384xbf16>
    %cst_107 = arith.constant dense<0.000000e+00> : vector<16x384xf32>
    %288 = tpu.matmul %286, %287, %cst_107 {dimension_numbers = #tpu.dot_dimension_numbers<[1], [0], [0], [1], [0, 0, 1, 1], [], []>} : vector<16x128xbf16>, vector<128x384xbf16>, vector<16x384xf32> -> vector<16x384xf32>
    %289 = arith.truncf %264 : vector<16x128xf32> to vector<16x128xbf16>
    %c0_108 = arith.constant 0 : index
    %c0_109 = arith.constant 0 : index
    %290 = vector.load %arg3[%c0_108, %c0_109] : memref<128x384xbf16, #tpu.memory_space<vmem>>, vector<128x384xbf16>
    %cst_110 = arith.constant dense<0.000000e+00> : vector<16x384xf32>
    %291 = tpu.matmul %289, %290, %cst_110 {dimension_numbers = #tpu.dot_dimension_numbers<[1], [0], [0], [1], [0, 0, 1, 1], [], []>} : vector<16x128xbf16>, vector<128x384xbf16>, vector<16x384xf32> -> vector<16x384xf32>
    %c0_111 = arith.constant 0 : index
    %c0_112 = arith.constant 0 : index
    %292 = vector.load %arg4[%c0_111, %c0_112] : memref<1x384xf32, #tpu.memory_space<vmem>>, vector<1x384xf32>
    %293 = vector.broadcast %292 : vector<1x384xf32> to vector<16x384xf32>
    %294 = arith.addf %291, %293 : vector<16x384xf32>
    %295 = vector.extract_strided_slice %288 {offsets = [0, 0], sizes = [16, 128], strides = [1, 1]} : vector<16x384xf32> to vector<16x128xf32>
    %296 = vector.extract_strided_slice %294 {offsets = [0, 0], sizes = [16, 128], strides = [1, 1]} : vector<16x384xf32> to vector<16x128xf32>
    %297 = arith.addf %295, %296 : vector<16x128xf32>
    %298 = arith.negf %297 : vector<16x128xf32>
    %299 = math.exp %298 : vector<16x128xf32>
    %cst_113 = arith.constant 1.000000e+00 : f32
    %300 = vector.broadcast %cst_113 : f32 to vector<16x128xf32>
    %301 = arith.addf %300, %299 : vector<16x128xf32>
    %302 = arith.divf %300, %301 : vector<16x128xf32>
    %303 = vector.extract_strided_slice %288 {offsets = [0, 128], sizes = [16, 128], strides = [1, 1]} : vector<16x384xf32> to vector<16x128xf32>
    %304 = vector.extract_strided_slice %294 {offsets = [0, 128], sizes = [16, 128], strides = [1, 1]} : vector<16x384xf32> to vector<16x128xf32>
    %305 = arith.addf %303, %304 : vector<16x128xf32>
    %306 = arith.negf %305 : vector<16x128xf32>
    %307 = math.exp %306 : vector<16x128xf32>
    %cst_114 = arith.constant 1.000000e+00 : f32
    %308 = vector.broadcast %cst_114 : f32 to vector<16x128xf32>
    %309 = arith.addf %308, %307 : vector<16x128xf32>
    %310 = arith.divf %308, %309 : vector<16x128xf32>
    %311 = vector.extract_strided_slice %288 {offsets = [0, 256], sizes = [16, 128], strides = [1, 1]} : vector<16x384xf32> to vector<16x128xf32>
    %312 = vector.extract_strided_slice %294 {offsets = [0, 256], sizes = [16, 128], strides = [1, 1]} : vector<16x384xf32> to vector<16x128xf32>
    %313 = arith.mulf %302, %312 : vector<16x128xf32>
    %314 = arith.addf %311, %313 : vector<16x128xf32>
    %315 = math.tanh %314 : vector<16x128xf32>
    %cst_115 = arith.constant 1.000000e+00 : f32
    %316 = vector.broadcast %cst_115 : f32 to vector<16x128xf32>
    %317 = arith.subf %316, %310 : vector<16x128xf32>
    %318 = arith.mulf %317, %315 : vector<16x128xf32>
    %319 = arith.mulf %310, %264 : vector<16x128xf32>
    %320 = arith.addf %318, %319 : vector<16x128xf32>
    %321 = arith.truncf %320 : vector<16x128xf32> to vector<16x128xbf16>
    %c0_116 = arith.constant 0 : index
    %c0_117 = arith.constant 0 : index
    %322 = vector.load %arg5[%c0_116, %c0_117] : memref<128x128xbf16, #tpu.memory_space<vmem>>, vector<128x128xbf16>
    %cst_118 = arith.constant dense<0.000000e+00> : vector<16x128xf32>
    %323 = tpu.matmul %321, %322, %cst_118 {dimension_numbers = #tpu.dot_dimension_numbers<[1], [0], [0], [1], [0, 0, 1, 1], [], []>} : vector<16x128xbf16>, vector<128x128xbf16>, vector<16x128xf32> -> vector<16x128xf32>
    %c0_119 = arith.constant 0 : index
    %c0_120 = arith.constant 0 : index
    %324 = vector.load %arg6[%c0_119, %c0_120] : memref<1x128xf32, #tpu.memory_space<vmem>>, vector<1x128xf32>
    %325 = vector.broadcast %324 : vector<1x128xf32> to vector<16x128xf32>
    %326 = arith.addf %323, %325 : vector<16x128xf32>
    %c0_121 = arith.constant 0 : index
    %c5 = arith.constant 5 : index
    %c0_122 = arith.constant 0 : index
    %327 = vector.load %arg7[%c0_121, %c5, %c0_122] : memref<16x12x128xf32, #tpu.memory_space<vmem>>, vector<16x1x128xf32>
    %328 = vector.shape_cast %327 : vector<16x1x128xf32> to vector<16x128xf32>
    %329 = vector.shape_cast %326 : vector<16x128xf32> to vector<16x1x128xf32>
    tpu.vector_store %arg7[%c0_121, %c5, %c0_122], %329 {strides = array<i32>} : memref<16x12x128xf32, #tpu.memory_space<vmem>>, vector<16x1x128xf32>,
    %cst_123 = arith.constant dense<0xFF800000> : vector<16xf32>
    %330 = vector.multi_reduction <maximumf>, %326, %cst_123 [1] : vector<16x128xf32> to vector<16xf32>
    %331 = vector.shape_cast %330 : vector<16xf32> to vector<16x1xf32>
    %332 = vector.broadcast %331 : vector<16x1xf32> to vector<16x128xf32>
    %333 = arith.cmpf oeq, %326, %332 : vector<16x128xf32>
    %c128_i32_124 = arith.constant 128 : i32
    %334 = vector.broadcast %c128_i32_124 : i32 to vector<16x128xi32>
    %335 = arith.select %333, %0, %334 : vector<16x128xi1>, vector<16x128xi32>
    %cst_125 = arith.constant dense<2147483647> : vector<16xi32>
    %336 = vector.multi_reduction <minsi>, %335, %cst_125 [1] : vector<16x128xi32> to vector<16xi32>
    %337 = vector.shape_cast %336 : vector<16xi32> to vector<16x1xi32>
    %338 = vector.broadcast %337 : vector<16x1xi32> to vector<16x128xi32>
    %339 = arith.cmpi eq, %0, %338 : vector<16x128xi32>
    %340 = arith.extui %339 : vector<16x128xi1> to vector<16x128xi32>
    %341 = arith.sitofp %340 : vector<16x128xi32> to vector<16x128xf32>
    %342 = arith.truncf %341 : vector<16x128xf32> to vector<16x128xbf16>
    %c0_126 = arith.constant 0 : index
    %c0_127 = arith.constant 0 : index
    %343 = vector.load %arg2[%c0_126, %c0_127] : memref<128x384xbf16, #tpu.memory_space<vmem>>, vector<128x384xbf16>
    %cst_128 = arith.constant dense<0.000000e+00> : vector<16x384xf32>
    %344 = tpu.matmul %342, %343, %cst_128 {dimension_numbers = #tpu.dot_dimension_numbers<[1], [0], [0], [1], [0, 0, 1, 1], [], []>} : vector<16x128xbf16>, vector<128x384xbf16>, vector<16x384xf32> -> vector<16x384xf32>
    %345 = arith.truncf %320 : vector<16x128xf32> to vector<16x128xbf16>
    %c0_129 = arith.constant 0 : index
    %c0_130 = arith.constant 0 : index
    %346 = vector.load %arg3[%c0_129, %c0_130] : memref<128x384xbf16, #tpu.memory_space<vmem>>, vector<128x384xbf16>
    %cst_131 = arith.constant dense<0.000000e+00> : vector<16x384xf32>
    %347 = tpu.matmul %345, %346, %cst_131 {dimension_numbers = #tpu.dot_dimension_numbers<[1], [0], [0], [1], [0, 0, 1, 1], [], []>} : vector<16x128xbf16>, vector<128x384xbf16>, vector<16x384xf32> -> vector<16x384xf32>
    %c0_132 = arith.constant 0 : index
    %c0_133 = arith.constant 0 : index
    %348 = vector.load %arg4[%c0_132, %c0_133] : memref<1x384xf32, #tpu.memory_space<vmem>>, vector<1x384xf32>
    %349 = vector.broadcast %348 : vector<1x384xf32> to vector<16x384xf32>
    %350 = arith.addf %347, %349 : vector<16x384xf32>
    %351 = vector.extract_strided_slice %344 {offsets = [0, 0], sizes = [16, 128], strides = [1, 1]} : vector<16x384xf32> to vector<16x128xf32>
    %352 = vector.extract_strided_slice %350 {offsets = [0, 0], sizes = [16, 128], strides = [1, 1]} : vector<16x384xf32> to vector<16x128xf32>
    %353 = arith.addf %351, %352 : vector<16x128xf32>
    %354 = arith.negf %353 : vector<16x128xf32>
    %355 = math.exp %354 : vector<16x128xf32>
    %cst_134 = arith.constant 1.000000e+00 : f32
    %356 = vector.broadcast %cst_134 : f32 to vector<16x128xf32>
    %357 = arith.addf %356, %355 : vector<16x128xf32>
    %358 = arith.divf %356, %357 : vector<16x128xf32>
    %359 = vector.extract_strided_slice %344 {offsets = [0, 128], sizes = [16, 128], strides = [1, 1]} : vector<16x384xf32> to vector<16x128xf32>
    %360 = vector.extract_strided_slice %350 {offsets = [0, 128], sizes = [16, 128], strides = [1, 1]} : vector<16x384xf32> to vector<16x128xf32>
    %361 = arith.addf %359, %360 : vector<16x128xf32>
    %362 = arith.negf %361 : vector<16x128xf32>
    %363 = math.exp %362 : vector<16x128xf32>
    %cst_135 = arith.constant 1.000000e+00 : f32
    %364 = vector.broadcast %cst_135 : f32 to vector<16x128xf32>
    %365 = arith.addf %364, %363 : vector<16x128xf32>
    %366 = arith.divf %364, %365 : vector<16x128xf32>
    %367 = vector.extract_strided_slice %344 {offsets = [0, 256], sizes = [16, 128], strides = [1, 1]} : vector<16x384xf32> to vector<16x128xf32>
    %368 = vector.extract_strided_slice %350 {offsets = [0, 256], sizes = [16, 128], strides = [1, 1]} : vector<16x384xf32> to vector<16x128xf32>
    %369 = arith.mulf %358, %368 : vector<16x128xf32>
    %370 = arith.addf %367, %369 : vector<16x128xf32>
    %371 = math.tanh %370 : vector<16x128xf32>
    %cst_136 = arith.constant 1.000000e+00 : f32
    %372 = vector.broadcast %cst_136 : f32 to vector<16x128xf32>
    %373 = arith.subf %372, %366 : vector<16x128xf32>
    %374 = arith.mulf %373, %371 : vector<16x128xf32>
    %375 = arith.mulf %366, %320 : vector<16x128xf32>
    %376 = arith.addf %374, %375 : vector<16x128xf32>
    %377 = arith.truncf %376 : vector<16x128xf32> to vector<16x128xbf16>
    %c0_137 = arith.constant 0 : index
    %c0_138 = arith.constant 0 : index
    %378 = vector.load %arg5[%c0_137, %c0_138] : memref<128x128xbf16, #tpu.memory_space<vmem>>, vector<128x128xbf16>
    %cst_139 = arith.constant dense<0.000000e+00> : vector<16x128xf32>
    %379 = tpu.matmul %377, %378, %cst_139 {dimension_numbers = #tpu.dot_dimension_numbers<[1], [0], [0], [1], [0, 0, 1, 1], [], []>} : vector<16x128xbf16>, vector<128x128xbf16>, vector<16x128xf32> -> vector<16x128xf32>
    %c0_140 = arith.constant 0 : index
    %c0_141 = arith.constant 0 : index
    %380 = vector.load %arg6[%c0_140, %c0_141] : memref<1x128xf32, #tpu.memory_space<vmem>>, vector<1x128xf32>
    %381 = vector.broadcast %380 : vector<1x128xf32> to vector<16x128xf32>
    %382 = arith.addf %379, %381 : vector<16x128xf32>
    %c0_142 = arith.constant 0 : index
    %c6 = arith.constant 6 : index
    %c0_143 = arith.constant 0 : index
    %383 = vector.load %arg7[%c0_142, %c6, %c0_143] : memref<16x12x128xf32, #tpu.memory_space<vmem>>, vector<16x1x128xf32>
    %384 = vector.shape_cast %383 : vector<16x1x128xf32> to vector<16x128xf32>
    %385 = vector.shape_cast %382 : vector<16x128xf32> to vector<16x1x128xf32>
    tpu.vector_store %arg7[%c0_142, %c6, %c0_143], %385 {strides = array<i32>} : memref<16x12x128xf32, #tpu.memory_space<vmem>>, vector<16x1x128xf32>,
    %cst_144 = arith.constant dense<0xFF800000> : vector<16xf32>
    %386 = vector.multi_reduction <maximumf>, %382, %cst_144 [1] : vector<16x128xf32> to vector<16xf32>
    %387 = vector.shape_cast %386 : vector<16xf32> to vector<16x1xf32>
    %388 = vector.broadcast %387 : vector<16x1xf32> to vector<16x128xf32>
    %389 = arith.cmpf oeq, %382, %388 : vector<16x128xf32>
    %c128_i32_145 = arith.constant 128 : i32
    %390 = vector.broadcast %c128_i32_145 : i32 to vector<16x128xi32>
    %391 = arith.select %389, %0, %390 : vector<16x128xi1>, vector<16x128xi32>
    %cst_146 = arith.constant dense<2147483647> : vector<16xi32>
    %392 = vector.multi_reduction <minsi>, %391, %cst_146 [1] : vector<16x128xi32> to vector<16xi32>
    %393 = vector.shape_cast %392 : vector<16xi32> to vector<16x1xi32>
    %394 = vector.broadcast %393 : vector<16x1xi32> to vector<16x128xi32>
    %395 = arith.cmpi eq, %0, %394 : vector<16x128xi32>
    %396 = arith.extui %395 : vector<16x128xi1> to vector<16x128xi32>
    %397 = arith.sitofp %396 : vector<16x128xi32> to vector<16x128xf32>
    %398 = arith.truncf %397 : vector<16x128xf32> to vector<16x128xbf16>
    %c0_147 = arith.constant 0 : index
    %c0_148 = arith.constant 0 : index
    %399 = vector.load %arg2[%c0_147, %c0_148] : memref<128x384xbf16, #tpu.memory_space<vmem>>, vector<128x384xbf16>
    %cst_149 = arith.constant dense<0.000000e+00> : vector<16x384xf32>
    %400 = tpu.matmul %398, %399, %cst_149 {dimension_numbers = #tpu.dot_dimension_numbers<[1], [0], [0], [1], [0, 0, 1, 1], [], []>} : vector<16x128xbf16>, vector<128x384xbf16>, vector<16x384xf32> -> vector<16x384xf32>
    %401 = arith.truncf %376 : vector<16x128xf32> to vector<16x128xbf16>
    %c0_150 = arith.constant 0 : index
    %c0_151 = arith.constant 0 : index
    %402 = vector.load %arg3[%c0_150, %c0_151] : memref<128x384xbf16, #tpu.memory_space<vmem>>, vector<128x384xbf16>
    %cst_152 = arith.constant dense<0.000000e+00> : vector<16x384xf32>
    %403 = tpu.matmul %401, %402, %cst_152 {dimension_numbers = #tpu.dot_dimension_numbers<[1], [0], [0], [1], [0, 0, 1, 1], [], []>} : vector<16x128xbf16>, vector<128x384xbf16>, vector<16x384xf32> -> vector<16x384xf32>
    %c0_153 = arith.constant 0 : index
    %c0_154 = arith.constant 0 : index
    %404 = vector.load %arg4[%c0_153, %c0_154] : memref<1x384xf32, #tpu.memory_space<vmem>>, vector<1x384xf32>
    %405 = vector.broadcast %404 : vector<1x384xf32> to vector<16x384xf32>
    %406 = arith.addf %403, %405 : vector<16x384xf32>
    %407 = vector.extract_strided_slice %400 {offsets = [0, 0], sizes = [16, 128], strides = [1, 1]} : vector<16x384xf32> to vector<16x128xf32>
    %408 = vector.extract_strided_slice %406 {offsets = [0, 0], sizes = [16, 128], strides = [1, 1]} : vector<16x384xf32> to vector<16x128xf32>
    %409 = arith.addf %407, %408 : vector<16x128xf32>
    %410 = arith.negf %409 : vector<16x128xf32>
    %411 = math.exp %410 : vector<16x128xf32>
    %cst_155 = arith.constant 1.000000e+00 : f32
    %412 = vector.broadcast %cst_155 : f32 to vector<16x128xf32>
    %413 = arith.addf %412, %411 : vector<16x128xf32>
    %414 = arith.divf %412, %413 : vector<16x128xf32>
    %415 = vector.extract_strided_slice %400 {offsets = [0, 128], sizes = [16, 128], strides = [1, 1]} : vector<16x384xf32> to vector<16x128xf32>
    %416 = vector.extract_strided_slice %406 {offsets = [0, 128], sizes = [16, 128], strides = [1, 1]} : vector<16x384xf32> to vector<16x128xf32>
    %417 = arith.addf %415, %416 : vector<16x128xf32>
    %418 = arith.negf %417 : vector<16x128xf32>
    %419 = math.exp %418 : vector<16x128xf32>
    %cst_156 = arith.constant 1.000000e+00 : f32
    %420 = vector.broadcast %cst_156 : f32 to vector<16x128xf32>
    %421 = arith.addf %420, %419 : vector<16x128xf32>
    %422 = arith.divf %420, %421 : vector<16x128xf32>
    %423 = vector.extract_strided_slice %400 {offsets = [0, 256], sizes = [16, 128], strides = [1, 1]} : vector<16x384xf32> to vector<16x128xf32>
    %424 = vector.extract_strided_slice %406 {offsets = [0, 256], sizes = [16, 128], strides = [1, 1]} : vector<16x384xf32> to vector<16x128xf32>
    %425 = arith.mulf %414, %424 : vector<16x128xf32>
    %426 = arith.addf %423, %425 : vector<16x128xf32>
    %427 = math.tanh %426 : vector<16x128xf32>
    %cst_157 = arith.constant 1.000000e+00 : f32
    %428 = vector.broadcast %cst_157 : f32 to vector<16x128xf32>
    %429 = arith.subf %428, %422 : vector<16x128xf32>
    %430 = arith.mulf %429, %427 : vector<16x128xf32>
    %431 = arith.mulf %422, %376 : vector<16x128xf32>
    %432 = arith.addf %430, %431 : vector<16x128xf32>
    %433 = arith.truncf %432 : vector<16x128xf32> to vector<16x128xbf16>
    %c0_158 = arith.constant 0 : index
    %c0_159 = arith.constant 0 : index
    %434 = vector.load %arg5[%c0_158, %c0_159] : memref<128x128xbf16, #tpu.memory_space<vmem>>, vector<128x128xbf16>
    %cst_160 = arith.constant dense<0.000000e+00> : vector<16x128xf32>
    %435 = tpu.matmul %433, %434, %cst_160 {dimension_numbers = #tpu.dot_dimension_numbers<[1], [0], [0], [1], [0, 0, 1, 1], [], []>} : vector<16x128xbf16>, vector<128x128xbf16>, vector<16x128xf32> -> vector<16x128xf32>
    %c0_161 = arith.constant 0 : index
    %c0_162 = arith.constant 0 : index
    %436 = vector.load %arg6[%c0_161, %c0_162] : memref<1x128xf32, #tpu.memory_space<vmem>>, vector<1x128xf32>
    %437 = vector.broadcast %436 : vector<1x128xf32> to vector<16x128xf32>
    %438 = arith.addf %435, %437 : vector<16x128xf32>
    %c0_163 = arith.constant 0 : index
    %c7 = arith.constant 7 : index
    %c0_164 = arith.constant 0 : index
    %439 = vector.load %arg7[%c0_163, %c7, %c0_164] : memref<16x12x128xf32, #tpu.memory_space<vmem>>, vector<16x1x128xf32>
    %440 = vector.shape_cast %439 : vector<16x1x128xf32> to vector<16x128xf32>
    %441 = vector.shape_cast %438 : vector<16x128xf32> to vector<16x1x128xf32>
    tpu.vector_store %arg7[%c0_163, %c7, %c0_164], %441 {strides = array<i32>} : memref<16x12x128xf32, #tpu.memory_space<vmem>>, vector<16x1x128xf32>,
    %cst_165 = arith.constant dense<0xFF800000> : vector<16xf32>
    %442 = vector.multi_reduction <maximumf>, %438, %cst_165 [1] : vector<16x128xf32> to vector<16xf32>
    %443 = vector.shape_cast %442 : vector<16xf32> to vector<16x1xf32>
    %444 = vector.broadcast %443 : vector<16x1xf32> to vector<16x128xf32>
    %445 = arith.cmpf oeq, %438, %444 : vector<16x128xf32>
    %c128_i32_166 = arith.constant 128 : i32
    %446 = vector.broadcast %c128_i32_166 : i32 to vector<16x128xi32>
    %447 = arith.select %445, %0, %446 : vector<16x128xi1>, vector<16x128xi32>
    %cst_167 = arith.constant dense<2147483647> : vector<16xi32>
    %448 = vector.multi_reduction <minsi>, %447, %cst_167 [1] : vector<16x128xi32> to vector<16xi32>
    %449 = vector.shape_cast %448 : vector<16xi32> to vector<16x1xi32>
    %450 = vector.broadcast %449 : vector<16x1xi32> to vector<16x128xi32>
    %451 = arith.cmpi eq, %0, %450 : vector<16x128xi32>
    %452 = arith.extui %451 : vector<16x128xi1> to vector<16x128xi32>
    %453 = arith.sitofp %452 : vector<16x128xi32> to vector<16x128xf32>
    %454 = arith.truncf %453 : vector<16x128xf32> to vector<16x128xbf16>
    %c0_168 = arith.constant 0 : index
    %c0_169 = arith.constant 0 : index
    %455 = vector.load %arg2[%c0_168, %c0_169] : memref<128x384xbf16, #tpu.memory_space<vmem>>, vector<128x384xbf16>
    %cst_170 = arith.constant dense<0.000000e+00> : vector<16x384xf32>
    %456 = tpu.matmul %454, %455, %cst_170 {dimension_numbers = #tpu.dot_dimension_numbers<[1], [0], [0], [1], [0, 0, 1, 1], [], []>} : vector<16x128xbf16>, vector<128x384xbf16>, vector<16x384xf32> -> vector<16x384xf32>
    %457 = arith.truncf %432 : vector<16x128xf32> to vector<16x128xbf16>
    %c0_171 = arith.constant 0 : index
    %c0_172 = arith.constant 0 : index
    %458 = vector.load %arg3[%c0_171, %c0_172] : memref<128x384xbf16, #tpu.memory_space<vmem>>, vector<128x384xbf16>
    %cst_173 = arith.constant dense<0.000000e+00> : vector<16x384xf32>
    %459 = tpu.matmul %457, %458, %cst_173 {dimension_numbers = #tpu.dot_dimension_numbers<[1], [0], [0], [1], [0, 0, 1, 1], [], []>} : vector<16x128xbf16>, vector<128x384xbf16>, vector<16x384xf32> -> vector<16x384xf32>
    %c0_174 = arith.constant 0 : index
    %c0_175 = arith.constant 0 : index
    %460 = vector.load %arg4[%c0_174, %c0_175] : memref<1x384xf32, #tpu.memory_space<vmem>>, vector<1x384xf32>
    %461 = vector.broadcast %460 : vector<1x384xf32> to vector<16x384xf32>
    %462 = arith.addf %459, %461 : vector<16x384xf32>
    %463 = vector.extract_strided_slice %456 {offsets = [0, 0], sizes = [16, 128], strides = [1, 1]} : vector<16x384xf32> to vector<16x128xf32>
    %464 = vector.extract_strided_slice %462 {offsets = [0, 0], sizes = [16, 128], strides = [1, 1]} : vector<16x384xf32> to vector<16x128xf32>
    %465 = arith.addf %463, %464 : vector<16x128xf32>
    %466 = arith.negf %465 : vector<16x128xf32>
    %467 = math.exp %466 : vector<16x128xf32>
    %cst_176 = arith.constant 1.000000e+00 : f32
    %468 = vector.broadcast %cst_176 : f32 to vector<16x128xf32>
    %469 = arith.addf %468, %467 : vector<16x128xf32>
    %470 = arith.divf %468, %469 : vector<16x128xf32>
    %471 = vector.extract_strided_slice %456 {offsets = [0, 128], sizes = [16, 128], strides = [1, 1]} : vector<16x384xf32> to vector<16x128xf32>
    %472 = vector.extract_strided_slice %462 {offsets = [0, 128], sizes = [16, 128], strides = [1, 1]} : vector<16x384xf32> to vector<16x128xf32>
    %473 = arith.addf %471, %472 : vector<16x128xf32>
    %474 = arith.negf %473 : vector<16x128xf32>
    %475 = math.exp %474 : vector<16x128xf32>
    %cst_177 = arith.constant 1.000000e+00 : f32
    %476 = vector.broadcast %cst_177 : f32 to vector<16x128xf32>
    %477 = arith.addf %476, %475 : vector<16x128xf32>
    %478 = arith.divf %476, %477 : vector<16x128xf32>
    %479 = vector.extract_strided_slice %456 {offsets = [0, 256], sizes = [16, 128], strides = [1, 1]} : vector<16x384xf32> to vector<16x128xf32>
    %480 = vector.extract_strided_slice %462 {offsets = [0, 256], sizes = [16, 128], strides = [1, 1]} : vector<16x384xf32> to vector<16x128xf32>
    %481 = arith.mulf %470, %480 : vector<16x128xf32>
    %482 = arith.addf %479, %481 : vector<16x128xf32>
    %483 = math.tanh %482 : vector<16x128xf32>
    %cst_178 = arith.constant 1.000000e+00 : f32
    %484 = vector.broadcast %cst_178 : f32 to vector<16x128xf32>
    %485 = arith.subf %484, %478 : vector<16x128xf32>
    %486 = arith.mulf %485, %483 : vector<16x128xf32>
    %487 = arith.mulf %478, %432 : vector<16x128xf32>
    %488 = arith.addf %486, %487 : vector<16x128xf32>
    %489 = arith.truncf %488 : vector<16x128xf32> to vector<16x128xbf16>
    %c0_179 = arith.constant 0 : index
    %c0_180 = arith.constant 0 : index
    %490 = vector.load %arg5[%c0_179, %c0_180] : memref<128x128xbf16, #tpu.memory_space<vmem>>, vector<128x128xbf16>
    %cst_181 = arith.constant dense<0.000000e+00> : vector<16x128xf32>
    %491 = tpu.matmul %489, %490, %cst_181 {dimension_numbers = #tpu.dot_dimension_numbers<[1], [0], [0], [1], [0, 0, 1, 1], [], []>} : vector<16x128xbf16>, vector<128x128xbf16>, vector<16x128xf32> -> vector<16x128xf32>
    %c0_182 = arith.constant 0 : index
    %c0_183 = arith.constant 0 : index
    %492 = vector.load %arg6[%c0_182, %c0_183] : memref<1x128xf32, #tpu.memory_space<vmem>>, vector<1x128xf32>
    %493 = vector.broadcast %492 : vector<1x128xf32> to vector<16x128xf32>
    %494 = arith.addf %491, %493 : vector<16x128xf32>
    %c0_184 = arith.constant 0 : index
    %c8 = arith.constant 8 : index
    %c0_185 = arith.constant 0 : index
    %495 = vector.load %arg7[%c0_184, %c8, %c0_185] : memref<16x12x128xf32, #tpu.memory_space<vmem>>, vector<16x1x128xf32>
    %496 = vector.shape_cast %495 : vector<16x1x128xf32> to vector<16x128xf32>
    %497 = vector.shape_cast %494 : vector<16x128xf32> to vector<16x1x128xf32>
    tpu.vector_store %arg7[%c0_184, %c8, %c0_185], %497 {strides = array<i32>} : memref<16x12x128xf32, #tpu.memory_space<vmem>>, vector<16x1x128xf32>,
    %cst_186 = arith.constant dense<0xFF800000> : vector<16xf32>
    %498 = vector.multi_reduction <maximumf>, %494, %cst_186 [1] : vector<16x128xf32> to vector<16xf32>
    %499 = vector.shape_cast %498 : vector<16xf32> to vector<16x1xf32>
    %500 = vector.broadcast %499 : vector<16x1xf32> to vector<16x128xf32>
    %501 = arith.cmpf oeq, %494, %500 : vector<16x128xf32>
    %c128_i32_187 = arith.constant 128 : i32
    %502 = vector.broadcast %c128_i32_187 : i32 to vector<16x128xi32>
    %503 = arith.select %501, %0, %502 : vector<16x128xi1>, vector<16x128xi32>
    %cst_188 = arith.constant dense<2147483647> : vector<16xi32>
    %504 = vector.multi_reduction <minsi>, %503, %cst_188 [1] : vector<16x128xi32> to vector<16xi32>
    %505 = vector.shape_cast %504 : vector<16xi32> to vector<16x1xi32>
    %506 = vector.broadcast %505 : vector<16x1xi32> to vector<16x128xi32>
    %507 = arith.cmpi eq, %0, %506 : vector<16x128xi32>
    %508 = arith.extui %507 : vector<16x128xi1> to vector<16x128xi32>
    %509 = arith.sitofp %508 : vector<16x128xi32> to vector<16x128xf32>
    %510 = arith.truncf %509 : vector<16x128xf32> to vector<16x128xbf16>
    %c0_189 = arith.constant 0 : index
    %c0_190 = arith.constant 0 : index
    %511 = vector.load %arg2[%c0_189, %c0_190] : memref<128x384xbf16, #tpu.memory_space<vmem>>, vector<128x384xbf16>
    %cst_191 = arith.constant dense<0.000000e+00> : vector<16x384xf32>
    %512 = tpu.matmul %510, %511, %cst_191 {dimension_numbers = #tpu.dot_dimension_numbers<[1], [0], [0], [1], [0, 0, 1, 1], [], []>} : vector<16x128xbf16>, vector<128x384xbf16>, vector<16x384xf32> -> vector<16x384xf32>
    %513 = arith.truncf %488 : vector<16x128xf32> to vector<16x128xbf16>
    %c0_192 = arith.constant 0 : index
    %c0_193 = arith.constant 0 : index
    %514 = vector.load %arg3[%c0_192, %c0_193] : memref<128x384xbf16, #tpu.memory_space<vmem>>, vector<128x384xbf16>
    %cst_194 = arith.constant dense<0.000000e+00> : vector<16x384xf32>
    %515 = tpu.matmul %513, %514, %cst_194 {dimension_numbers = #tpu.dot_dimension_numbers<[1], [0], [0], [1], [0, 0, 1, 1], [], []>} : vector<16x128xbf16>, vector<128x384xbf16>, vector<16x384xf32> -> vector<16x384xf32>
    %c0_195 = arith.constant 0 : index
    %c0_196 = arith.constant 0 : index
    %516 = vector.load %arg4[%c0_195, %c0_196] : memref<1x384xf32, #tpu.memory_space<vmem>>, vector<1x384xf32>
    %517 = vector.broadcast %516 : vector<1x384xf32> to vector<16x384xf32>
    %518 = arith.addf %515, %517 : vector<16x384xf32>
    %519 = vector.extract_strided_slice %512 {offsets = [0, 0], sizes = [16, 128], strides = [1, 1]} : vector<16x384xf32> to vector<16x128xf32>
    %520 = vector.extract_strided_slice %518 {offsets = [0, 0], sizes = [16, 128], strides = [1, 1]} : vector<16x384xf32> to vector<16x128xf32>
    %521 = arith.addf %519, %520 : vector<16x128xf32>
    %522 = arith.negf %521 : vector<16x128xf32>
    %523 = math.exp %522 : vector<16x128xf32>
    %cst_197 = arith.constant 1.000000e+00 : f32
    %524 = vector.broadcast %cst_197 : f32 to vector<16x128xf32>
    %525 = arith.addf %524, %523 : vector<16x128xf32>
    %526 = arith.divf %524, %525 : vector<16x128xf32>
    %527 = vector.extract_strided_slice %512 {offsets = [0, 128], sizes = [16, 128], strides = [1, 1]} : vector<16x384xf32> to vector<16x128xf32>
    %528 = vector.extract_strided_slice %518 {offsets = [0, 128], sizes = [16, 128], strides = [1, 1]} : vector<16x384xf32> to vector<16x128xf32>
    %529 = arith.addf %527, %528 : vector<16x128xf32>
    %530 = arith.negf %529 : vector<16x128xf32>
    %531 = math.exp %530 : vector<16x128xf32>
    %cst_198 = arith.constant 1.000000e+00 : f32
    %532 = vector.broadcast %cst_198 : f32 to vector<16x128xf32>
    %533 = arith.addf %532, %531 : vector<16x128xf32>
    %534 = arith.divf %532, %533 : vector<16x128xf32>
    %535 = vector.extract_strided_slice %512 {offsets = [0, 256], sizes = [16, 128], strides = [1, 1]} : vector<16x384xf32> to vector<16x128xf32>
    %536 = vector.extract_strided_slice %518 {offsets = [0, 256], sizes = [16, 128], strides = [1, 1]} : vector<16x384xf32> to vector<16x128xf32>
    %537 = arith.mulf %526, %536 : vector<16x128xf32>
    %538 = arith.addf %535, %537 : vector<16x128xf32>
    %539 = math.tanh %538 : vector<16x128xf32>
    %cst_199 = arith.constant 1.000000e+00 : f32
    %540 = vector.broadcast %cst_199 : f32 to vector<16x128xf32>
    %541 = arith.subf %540, %534 : vector<16x128xf32>
    %542 = arith.mulf %541, %539 : vector<16x128xf32>
    %543 = arith.mulf %534, %488 : vector<16x128xf32>
    %544 = arith.addf %542, %543 : vector<16x128xf32>
    %545 = arith.truncf %544 : vector<16x128xf32> to vector<16x128xbf16>
    %c0_200 = arith.constant 0 : index
    %c0_201 = arith.constant 0 : index
    %546 = vector.load %arg5[%c0_200, %c0_201] : memref<128x128xbf16, #tpu.memory_space<vmem>>, vector<128x128xbf16>
    %cst_202 = arith.constant dense<0.000000e+00> : vector<16x128xf32>
    %547 = tpu.matmul %545, %546, %cst_202 {dimension_numbers = #tpu.dot_dimension_numbers<[1], [0], [0], [1], [0, 0, 1, 1], [], []>} : vector<16x128xbf16>, vector<128x128xbf16>, vector<16x128xf32> -> vector<16x128xf32>
    %c0_203 = arith.constant 0 : index
    %c0_204 = arith.constant 0 : index
    %548 = vector.load %arg6[%c0_203, %c0_204] : memref<1x128xf32, #tpu.memory_space<vmem>>, vector<1x128xf32>
    %549 = vector.broadcast %548 : vector<1x128xf32> to vector<16x128xf32>
    %550 = arith.addf %547, %549 : vector<16x128xf32>
    %c0_205 = arith.constant 0 : index
    %c9 = arith.constant 9 : index
    %c0_206 = arith.constant 0 : index
    %551 = vector.load %arg7[%c0_205, %c9, %c0_206] : memref<16x12x128xf32, #tpu.memory_space<vmem>>, vector<16x1x128xf32>
    %552 = vector.shape_cast %551 : vector<16x1x128xf32> to vector<16x128xf32>
    %553 = vector.shape_cast %550 : vector<16x128xf32> to vector<16x1x128xf32>
    tpu.vector_store %arg7[%c0_205, %c9, %c0_206], %553 {strides = array<i32>} : memref<16x12x128xf32, #tpu.memory_space<vmem>>, vector<16x1x128xf32>,
    %cst_207 = arith.constant dense<0xFF800000> : vector<16xf32>
    %554 = vector.multi_reduction <maximumf>, %550, %cst_207 [1] : vector<16x128xf32> to vector<16xf32>
    %555 = vector.shape_cast %554 : vector<16xf32> to vector<16x1xf32>
    %556 = vector.broadcast %555 : vector<16x1xf32> to vector<16x128xf32>
    %557 = arith.cmpf oeq, %550, %556 : vector<16x128xf32>
    %c128_i32_208 = arith.constant 128 : i32
    %558 = vector.broadcast %c128_i32_208 : i32 to vector<16x128xi32>
    %559 = arith.select %557, %0, %558 : vector<16x128xi1>, vector<16x128xi32>
    %cst_209 = arith.constant dense<2147483647> : vector<16xi32>
    %560 = vector.multi_reduction <minsi>, %559, %cst_209 [1] : vector<16x128xi32> to vector<16xi32>
    %561 = vector.shape_cast %560 : vector<16xi32> to vector<16x1xi32>
    %562 = vector.broadcast %561 : vector<16x1xi32> to vector<16x128xi32>
    %563 = arith.cmpi eq, %0, %562 : vector<16x128xi32>
    %564 = arith.extui %563 : vector<16x128xi1> to vector<16x128xi32>
    %565 = arith.sitofp %564 : vector<16x128xi32> to vector<16x128xf32>
    %566 = arith.truncf %565 : vector<16x128xf32> to vector<16x128xbf16>
    %c0_210 = arith.constant 0 : index
    %c0_211 = arith.constant 0 : index
    %567 = vector.load %arg2[%c0_210, %c0_211] : memref<128x384xbf16, #tpu.memory_space<vmem>>, vector<128x384xbf16>
    %cst_212 = arith.constant dense<0.000000e+00> : vector<16x384xf32>
    %568 = tpu.matmul %566, %567, %cst_212 {dimension_numbers = #tpu.dot_dimension_numbers<[1], [0], [0], [1], [0, 0, 1, 1], [], []>} : vector<16x128xbf16>, vector<128x384xbf16>, vector<16x384xf32> -> vector<16x384xf32>
    %569 = arith.truncf %544 : vector<16x128xf32> to vector<16x128xbf16>
    %c0_213 = arith.constant 0 : index
    %c0_214 = arith.constant 0 : index
    %570 = vector.load %arg3[%c0_213, %c0_214] : memref<128x384xbf16, #tpu.memory_space<vmem>>, vector<128x384xbf16>
    %cst_215 = arith.constant dense<0.000000e+00> : vector<16x384xf32>
    %571 = tpu.matmul %569, %570, %cst_215 {dimension_numbers = #tpu.dot_dimension_numbers<[1], [0], [0], [1], [0, 0, 1, 1], [], []>} : vector<16x128xbf16>, vector<128x384xbf16>, vector<16x384xf32> -> vector<16x384xf32>
    %c0_216 = arith.constant 0 : index
    %c0_217 = arith.constant 0 : index
    %572 = vector.load %arg4[%c0_216, %c0_217] : memref<1x384xf32, #tpu.memory_space<vmem>>, vector<1x384xf32>
    %573 = vector.broadcast %572 : vector<1x384xf32> to vector<16x384xf32>
    %574 = arith.addf %571, %573 : vector<16x384xf32>
    %575 = vector.extract_strided_slice %568 {offsets = [0, 0], sizes = [16, 128], strides = [1, 1]} : vector<16x384xf32> to vector<16x128xf32>
    %576 = vector.extract_strided_slice %574 {offsets = [0, 0], sizes = [16, 128], strides = [1, 1]} : vector<16x384xf32> to vector<16x128xf32>
    %577 = arith.addf %575, %576 : vector<16x128xf32>
    %578 = arith.negf %577 : vector<16x128xf32>
    %579 = math.exp %578 : vector<16x128xf32>
    %cst_218 = arith.constant 1.000000e+00 : f32
    %580 = vector.broadcast %cst_218 : f32 to vector<16x128xf32>
    %581 = arith.addf %580, %579 : vector<16x128xf32>
    %582 = arith.divf %580, %581 : vector<16x128xf32>
    %583 = vector.extract_strided_slice %568 {offsets = [0, 128], sizes = [16, 128], strides = [1, 1]} : vector<16x384xf32> to vector<16x128xf32>
    %584 = vector.extract_strided_slice %574 {offsets = [0, 128], sizes = [16, 128], strides = [1, 1]} : vector<16x384xf32> to vector<16x128xf32>
    %585 = arith.addf %583, %584 : vector<16x128xf32>
    %586 = arith.negf %585 : vector<16x128xf32>
    %587 = math.exp %586 : vector<16x128xf32>
    %cst_219 = arith.constant 1.000000e+00 : f32
    %588 = vector.broadcast %cst_219 : f32 to vector<16x128xf32>
    %589 = arith.addf %588, %587 : vector<16x128xf32>
    %590 = arith.divf %588, %589 : vector<16x128xf32>
    %591 = vector.extract_strided_slice %568 {offsets = [0, 256], sizes = [16, 128], strides = [1, 1]} : vector<16x384xf32> to vector<16x128xf32>
    %592 = vector.extract_strided_slice %574 {offsets = [0, 256], sizes = [16, 128], strides = [1, 1]} : vector<16x384xf32> to vector<16x128xf32>
    %593 = arith.mulf %582, %592 : vector<16x128xf32>
    %594 = arith.addf %591, %593 : vector<16x128xf32>
    %595 = math.tanh %594 : vector<16x128xf32>
    %cst_220 = arith.constant 1.000000e+00 : f32
    %596 = vector.broadcast %cst_220 : f32 to vector<16x128xf32>
    %597 = arith.subf %596, %590 : vector<16x128xf32>
    %598 = arith.mulf %597, %595 : vector<16x128xf32>
    %599 = arith.mulf %590, %544 : vector<16x128xf32>
    %600 = arith.addf %598, %599 : vector<16x128xf32>
    %601 = arith.truncf %600 : vector<16x128xf32> to vector<16x128xbf16>
    %c0_221 = arith.constant 0 : index
    %c0_222 = arith.constant 0 : index
    %602 = vector.load %arg5[%c0_221, %c0_222] : memref<128x128xbf16, #tpu.memory_space<vmem>>, vector<128x128xbf16>
    %cst_223 = arith.constant dense<0.000000e+00> : vector<16x128xf32>
    %603 = tpu.matmul %601, %602, %cst_223 {dimension_numbers = #tpu.dot_dimension_numbers<[1], [0], [0], [1], [0, 0, 1, 1], [], []>} : vector<16x128xbf16>, vector<128x128xbf16>, vector<16x128xf32> -> vector<16x128xf32>
    %c0_224 = arith.constant 0 : index
    %c0_225 = arith.constant 0 : index
    %604 = vector.load %arg6[%c0_224, %c0_225] : memref<1x128xf32, #tpu.memory_space<vmem>>, vector<1x128xf32>
    %605 = vector.broadcast %604 : vector<1x128xf32> to vector<16x128xf32>
    %606 = arith.addf %603, %605 : vector<16x128xf32>
    %c0_226 = arith.constant 0 : index
    %c10 = arith.constant 10 : index
    %c0_227 = arith.constant 0 : index
    %607 = vector.load %arg7[%c0_226, %c10, %c0_227] : memref<16x12x128xf32, #tpu.memory_space<vmem>>, vector<16x1x128xf32>
    %608 = vector.shape_cast %607 : vector<16x1x128xf32> to vector<16x128xf32>
    %609 = vector.shape_cast %606 : vector<16x128xf32> to vector<16x1x128xf32>
    tpu.vector_store %arg7[%c0_226, %c10, %c0_227], %609 {strides = array<i32>} : memref<16x12x128xf32, #tpu.memory_space<vmem>>, vector<16x1x128xf32>,
    %cst_228 = arith.constant dense<0xFF800000> : vector<16xf32>
    %610 = vector.multi_reduction <maximumf>, %606, %cst_228 [1] : vector<16x128xf32> to vector<16xf32>
    %611 = vector.shape_cast %610 : vector<16xf32> to vector<16x1xf32>
    %612 = vector.broadcast %611 : vector<16x1xf32> to vector<16x128xf32>
    %613 = arith.cmpf oeq, %606, %612 : vector<16x128xf32>
    %c128_i32_229 = arith.constant 128 : i32
    %614 = vector.broadcast %c128_i32_229 : i32 to vector<16x128xi32>
    %615 = arith.select %613, %0, %614 : vector<16x128xi1>, vector<16x128xi32>
    %cst_230 = arith.constant dense<2147483647> : vector<16xi32>
    %616 = vector.multi_reduction <minsi>, %615, %cst_230 [1] : vector<16x128xi32> to vector<16xi32>
    %617 = vector.shape_cast %616 : vector<16xi32> to vector<16x1xi32>
    %618 = vector.broadcast %617 : vector<16x1xi32> to vector<16x128xi32>
    %619 = arith.cmpi eq, %0, %618 : vector<16x128xi32>
    %620 = arith.extui %619 : vector<16x128xi1> to vector<16x128xi32>
    %621 = arith.sitofp %620 : vector<16x128xi32> to vector<16x128xf32>
    %622 = arith.truncf %621 : vector<16x128xf32> to vector<16x128xbf16>
    %c0_231 = arith.constant 0 : index
    %c0_232 = arith.constant 0 : index
    %623 = vector.load %arg2[%c0_231, %c0_232] : memref<128x384xbf16, #tpu.memory_space<vmem>>, vector<128x384xbf16>
    %cst_233 = arith.constant dense<0.000000e+00> : vector<16x384xf32>
    %624 = tpu.matmul %622, %623, %cst_233 {dimension_numbers = #tpu.dot_dimension_numbers<[1], [0], [0], [1], [0, 0, 1, 1], [], []>} : vector<16x128xbf16>, vector<128x384xbf16>, vector<16x384xf32> -> vector<16x384xf32>
    %625 = arith.truncf %600 : vector<16x128xf32> to vector<16x128xbf16>
    %c0_234 = arith.constant 0 : index
    %c0_235 = arith.constant 0 : index
    %626 = vector.load %arg3[%c0_234, %c0_235] : memref<128x384xbf16, #tpu.memory_space<vmem>>, vector<128x384xbf16>
    %cst_236 = arith.constant dense<0.000000e+00> : vector<16x384xf32>
    %627 = tpu.matmul %625, %626, %cst_236 {dimension_numbers = #tpu.dot_dimension_numbers<[1], [0], [0], [1], [0, 0, 1, 1], [], []>} : vector<16x128xbf16>, vector<128x384xbf16>, vector<16x384xf32> -> vector<16x384xf32>
    %c0_237 = arith.constant 0 : index
    %c0_238 = arith.constant 0 : index
    %628 = vector.load %arg4[%c0_237, %c0_238] : memref<1x384xf32, #tpu.memory_space<vmem>>, vector<1x384xf32>
    %629 = vector.broadcast %628 : vector<1x384xf32> to vector<16x384xf32>
    %630 = arith.addf %627, %629 : vector<16x384xf32>
    %631 = vector.extract_strided_slice %624 {offsets = [0, 0], sizes = [16, 128], strides = [1, 1]} : vector<16x384xf32> to vector<16x128xf32>
    %632 = vector.extract_strided_slice %630 {offsets = [0, 0], sizes = [16, 128], strides = [1, 1]} : vector<16x384xf32> to vector<16x128xf32>
    %633 = arith.addf %631, %632 : vector<16x128xf32>
    %634 = arith.negf %633 : vector<16x128xf32>
    %635 = math.exp %634 : vector<16x128xf32>
    %cst_239 = arith.constant 1.000000e+00 : f32
    %636 = vector.broadcast %cst_239 : f32 to vector<16x128xf32>
    %637 = arith.addf %636, %635 : vector<16x128xf32>
    %638 = arith.divf %636, %637 : vector<16x128xf32>
    %639 = vector.extract_strided_slice %624 {offsets = [0, 128], sizes = [16, 128], strides = [1, 1]} : vector<16x384xf32> to vector<16x128xf32>
    %640 = vector.extract_strided_slice %630 {offsets = [0, 128], sizes = [16, 128], strides = [1, 1]} : vector<16x384xf32> to vector<16x128xf32>
    %641 = arith.addf %639, %640 : vector<16x128xf32>
    %642 = arith.negf %641 : vector<16x128xf32>
    %643 = math.exp %642 : vector<16x128xf32>
    %cst_240 = arith.constant 1.000000e+00 : f32
    %644 = vector.broadcast %cst_240 : f32 to vector<16x128xf32>
    %645 = arith.addf %644, %643 : vector<16x128xf32>
    %646 = arith.divf %644, %645 : vector<16x128xf32>
    %647 = vector.extract_strided_slice %624 {offsets = [0, 256], sizes = [16, 128], strides = [1, 1]} : vector<16x384xf32> to vector<16x128xf32>
    %648 = vector.extract_strided_slice %630 {offsets = [0, 256], sizes = [16, 128], strides = [1, 1]} : vector<16x384xf32> to vector<16x128xf32>
    %649 = arith.mulf %638, %648 : vector<16x128xf32>
    %650 = arith.addf %647, %649 : vector<16x128xf32>
    %651 = math.tanh %650 : vector<16x128xf32>
    %cst_241 = arith.constant 1.000000e+00 : f32
    %652 = vector.broadcast %cst_241 : f32 to vector<16x128xf32>
    %653 = arith.subf %652, %646 : vector<16x128xf32>
    %654 = arith.mulf %653, %651 : vector<16x128xf32>
    %655 = arith.mulf %646, %600 : vector<16x128xf32>
    %656 = arith.addf %654, %655 : vector<16x128xf32>
    %657 = arith.truncf %656 : vector<16x128xf32> to vector<16x128xbf16>
    %c0_242 = arith.constant 0 : index
    %c0_243 = arith.constant 0 : index
    %658 = vector.load %arg5[%c0_242, %c0_243] : memref<128x128xbf16, #tpu.memory_space<vmem>>, vector<128x128xbf16>
    %cst_244 = arith.constant dense<0.000000e+00> : vector<16x128xf32>
    %659 = tpu.matmul %657, %658, %cst_244 {dimension_numbers = #tpu.dot_dimension_numbers<[1], [0], [0], [1], [0, 0, 1, 1], [], []>} : vector<16x128xbf16>, vector<128x128xbf16>, vector<16x128xf32> -> vector<16x128xf32>
    %c0_245 = arith.constant 0 : index
    %c0_246 = arith.constant 0 : index
    %660 = vector.load %arg6[%c0_245, %c0_246] : memref<1x128xf32, #tpu.memory_space<vmem>>, vector<1x128xf32>
    %661 = vector.broadcast %660 : vector<1x128xf32> to vector<16x128xf32>
    %662 = arith.addf %659, %661 : vector<16x128xf32>
    %c0_247 = arith.constant 0 : index
    %c11 = arith.constant 11 : index
    %c0_248 = arith.constant 0 : index
    %663 = vector.load %arg7[%c0_247, %c11, %c0_248] : memref<16x12x128xf32, #tpu.memory_space<vmem>>, vector<16x1x128xf32>
    %664 = vector.shape_cast %663 : vector<16x1x128xf32> to vector<16x128xf32>
    %665 = vector.shape_cast %662 : vector<16x128xf32> to vector<16x1x128xf32>
    tpu.vector_store %arg7[%c0_247, %c11, %c0_248], %665 {strides = array<i32>} : memref<16x12x128xf32, #tpu.memory_space<vmem>>, vector<16x1x128xf32>,
    %c0_249 = arith.constant 0 : index
    %c0_250 = arith.constant 0 : index
    %666 = vector.load %arg8[%c0_249, %c0_250] : memref<16x128xf32, #tpu.memory_space<vmem>>, vector<16x128xf32>
    tpu.vector_store %arg8[%c0_249, %c0_250], %656 {strides = array<i32>} : memref<16x128xf32, #tpu.memory_space<vmem>>, vector<16x128xf32>,
    return
  }
  func.func @transform_0(%arg0: i32) -> (i32, i32) {
    %c0_i32 = arith.constant 0 : i32
    %c0_i32_0 = arith.constant 0 : i32
    return %arg0, %c0_i32 : i32, i32
  }
  func.func @transform_1(%arg0: i32) -> (i32, i32) {
    %c0_i32 = arith.constant 0 : i32
    %c0_i32_0 = arith.constant 0 : i32
    %c0_i32_1 = arith.constant 0 : i32
    return %c0_i32, %c0_i32_0 : i32, i32
  }
  func.func @transform_2(%arg0: i32) -> (i32, i32) {
    %c0_i32 = arith.constant 0 : i32
    %c0_i32_0 = arith.constant 0 : i32
    %c0_i32_1 = arith.constant 0 : i32
    return %c0_i32, %c0_i32_0 : i32, i32
  }
  func.func @transform_3(%arg0: i32) -> (i32, i32) {
    %c0_i32 = arith.constant 0 : i32
    %c0_i32_0 = arith.constant 0 : i32
    %c0_i32_1 = arith.constant 0 : i32
    return %c0_i32, %c0_i32_0 : i32, i32
  }
  func.func @transform_4(%arg0: i32) -> (i32, i32) {
    %c0_i32 = arith.constant 0 : i32
    %c0_i32_0 = arith.constant 0 : i32
    %c0_i32_1 = arith.constant 0 : i32
    return %c0_i32, %c0_i32_0 : i32, i32
  }
  func.func @transform_5(%arg0: i32) -> (i32, i32) {
    %c0_i32 = arith.constant 0 : i32
    %c0_i32_0 = arith.constant 0 : i32
    %c0_i32_1 = arith.constant 0 : i32
    return %c0_i32, %c0_i32_0 : i32, i32
  }
  func.func @transform_6(%arg0: i32) -> (i32, i32, i32) {
    %c0_i32 = arith.constant 0 : i32
    %c0_i32_0 = arith.constant 0 : i32
    %c0_i32_1 = arith.constant 0 : i32
    return %arg0, %c0_i32, %c0_i32_0 : i32, i32, i32
  }
  func.func @transform_7(%arg0: i32) -> (i32, i32) {
    %c0_i32 = arith.constant 0 : i32
    %c0_i32_0 = arith.constant 0 : i32
    return %arg0, %c0_i32 : i32, i32
  }
}

</mosaic_0001>

<bundles_post_ra>
// kernel: tpu_custom_call.1
= control target key start
LH: loop header
LB: loop body
LE: loop exit
PB: predicated region body
PF: predicated region fallthrough
CT: control target
= control target key end

     0   :  { %13 = vsyncpa [#allocation3], 0  ;;  %s13873_s0 = inlined_call_operand.hbm [shape: f32[16,128], index: 0, kind: input, shape index: {}]   ;;  %s13874_s1 = inlined_call_operand.hbm [shape: bf16[128,384], index: 1, kind: input, shape index: {}]   ;;  %s13875_s2 = inlined_call_operand.hbm [shape: bf16[128,384], index: 2, kind: input, shape index: {}]   ;;  %s13876_s3 = inlined_call_operand.hbm [shape: f32[1,384], index: 3, kind: input, shape index: {}]   ;;  %s13877_s4 = inlined_call_operand.hbm [shape: bf16[128,128], index: 4, kind: input, shape index: {}]   ;;  %s13878_s5 = inlined_call_operand.vmem [shape: f32[1,128], index: 5, kind: input, shape index: {}]   ;;  %s13879_s6 = inlined_call_operand.vmem [shape: f32[16,12,128], index: 6, kind: output, shape index: {0}]   ;;  %s13880_s7 = inlined_call_operand.hbm [shape: f32[16,128], index: 7, kind: output, shape index: {1}]  }
   0x1   :  { %14 = vsyncpa [#allocation6], 0 }
   0x2   :  { %15 = vsyncpa [#allocation9], 0  ;;  %s34_s26 = sshll.u32 %s13874_s1, 4  ;;  %s35_s26 = int_to_ptr.hbm [resolvable:$true] %s34_s26 }
   0x3   :  { %16 = vsyncpa [#allocation4], 0  ;;  %s12151_s27 = smov [#allocation5]   ;;  %s61_s8 = sshll.u32 %s13876_s3, 4  ;;  %s62_s8 = int_to_ptr.hbm [resolvable:$true] %s61_s8 }
   0x4   :  { %s36_s28 = sshll.u32 %s12151_s27, 4  ;;  %s12152_s9 = smov 192   ;;  %s37_s28 = int_to_ptr.vmem [resolvable:$true] %s36_s28 }
   0x5   :  { %s12153_s10 = smov 12   ;;  %s12154_s11 = smov [#allocation8]  }
   0x6   :  { %42 = dma.hbm_to_vmem [thread:$0]  %s35_s26, 3072, %s37_s28, [#allocation6], %s12152_s9, %s12152_s9, %s12153_s10  }
   0x7   :  { %s63_s12 = sshll.u32 %s12154_s11, 4  ;;  %s21_s15 = sshll.u32 %s13873_s0, 4  ;;  %s64_s12 = int_to_ptr.vmem [resolvable:$true] %s63_s12  ;;  %s22_s15 = int_to_ptr.hbm [resolvable:$true] %s21_s15 }
   0x8   :  { %66 = dma.hbm_to_vmem [thread:$0]  %s62_s8, 48, %s64_s12, [#allocation9]  }
   0x9   :  { %s12155_s1 = smov [#allocation2]   ;;  %s47_s3 = sshll.u32 %s13875_s2, 4  ;;  %s48_s3 = int_to_ptr.hbm [resolvable:$true] %s47_s3 }
   0xa   :  { %s23_s16 = sshll.u32 %s12155_s1, 4  ;;  %s12156_s19 = smov 128   ;;  %s24_s16 = int_to_ptr.vmem [resolvable:$true] %s23_s16 }
   0xb   :  { %s12157_s20 = smov 8   ;;  %s12158_s21 = smov [#allocation7]  }
   0xc   :  { %29 = dma.hbm_to_vmem [thread:$0]  %s22_s15, 256, %s24_s16, [#allocation3], %s12156_s19, %s12156_s19, %s12157_s20  }
   0xd   :  { %s49_s22 = sshll.u32 %s12158_s21, 4  ;;  %s71_s24 = sshll.u32 %s13877_s4, 4  ;;  %s50_s22 = int_to_ptr.vmem [resolvable:$true] %s49_s22  ;;  %s72_s24 = int_to_ptr.hbm [resolvable:$true] %s71_s24 }
   0xe   :  { %55 = dma.hbm_to_vmem [thread:$0]  %s48_s3, 3072, %s50_s22, [#allocation6], %s12152_s9, %s12152_s9, %s12153_s10  }
   0xf   :  { %s12159_s25 = smov [#allocation10]   ;;  %s12160_s2 = smov 64  }
  0x10   :  { %s73_s26 = sshll.u32 %s12159_s25, 4  ;;  %s12161_s27 = smov 4   ;;  %s74_s26 = int_to_ptr.vmem [resolvable:$true] %s73_s26 }
  0x11   :  { %79 = dma.hbm_to_vmem [thread:$0]  %s72_s24, 1024, %s74_s26, [#allocation9], %s12160_s2, %s12160_s2, %s12161_s27  }
  0x12   :  { %12143 = dma.done.wait [#allocation3], 256  }
  0x13   :  { %12144 = vsyncadd [#allocation3], 4294967040 }
  0x14   :  { %12145 = dma.done.wait [#allocation6], 6144  }
  0x15   :  { %12146 = vsyncadd [#allocation6], 4294961152 }
  0x16   :  { %12147 = dma.done.wait [#allocation9], 1072  }
  0x17   :  { %12148 = vsyncadd [#allocation9], 4294966224  ;;  %v8318_v0 = vld [vmem:[#allocation5 + $0xa8] sm:$0xf]  ;;  %v11084_v1 = vld [vmem:[#allocation5 + $0xb0] sm:$0xf0]  ;;  %v102_v58 = vlaneseq }
  0x18   :  { %v8420_v2 = vld [vmem:[#allocation7 + $0xa8] sm:$0xf]  ;;  %v8319_v3 = vor.u32 %v11084_v1, %v8318_v0  ;;  %v11108_v4 = vld [vmem:[#allocation7 + $0xb0] sm:$0xf0]  ;;  %v8306_v5 = vld [vmem:[#allocation5 + $0x90] sm:$0xf] }
  0x19   :  { %v11081_v6 = vld [vmem:[#allocation5 + $0x98] sm:$0xf0]  ;;  %v8421_v7 = vor.u32 %v11108_v4, %v8420_v2  ;;  %v8408_v8 = vld [vmem:[#allocation7 + $0x90] sm:$0xf]  ;;  %v11083_v10 = vld [vmem:[#allocation5 + $0xac] sm:$0xf] }
  0x1a   :  { %v11105_v9 = vld [vmem:[#allocation7 + $0x98] sm:$0xf0]  ;;  %270 = vmatpush.bf16.msra.mxu0 %v8319_v3  ;;  %v8307_v11 = vor.u32 %v11081_v6, %v8306_v5  ;;  %v8320_v12 = vld [vmem:[#allocation5 + $0xb4] sm:$0xf0]  ;;  %v11078_v16 = vld [vmem:[#allocation5 + $0x80] sm:$0xf0] }
  0x1b   :  { %481 = vmatpush.bf16.msra.mxu3 %v8421_v7  ;;  %v8409_v13 = vor.u32 %v11105_v9, %v8408_v8  ;;  %v8323_v14 = vor.u32 %v11083_v10, %v8320_v12  ;;  %v8294_v15 = vld [vmem:[#allocation5 + $0x78] sm:$0xf]  ;;  %v11080_v17 = vld [vmem:[#allocation5 + $0x94] sm:$0xf]  ;;  %v11102_v19 = vld [vmem:[#allocation7 + $0x80] sm:$0xf0] }
  0x1c   :  { %v8396_v18 = vld [vmem:[#allocation7 + $0x78] sm:$0xf]  ;;  %v8308_v20 = vld [vmem:[#allocation5 + $0x9c] sm:$0xf0]  ;;  %v8295_v22 = vor.u32 %v11078_v16, %v8294_v15  ;;  %v11077_v23 = vld [vmem:[#allocation5 + $0x7c] sm:$0xf] }
  0x1d   :  { %284 = vmatpush.bf16.msra.mxu1 %v8323_v14  ;;  %v8311_v21 = vor.u32 %v11080_v17, %v8308_v20  ;;  %v8296_v24 = vld [vmem:[#allocation5 + $0x84] sm:$0xf0]  ;;  %v8397_v25 = vor.u32 %v11102_v19, %v8396_v18  ;;  %v8282_v26 = vld [vmem:[#allocation5 + $0x60] sm:$0xf]  ;;  %v11075_v27 = vld [vmem:[#allocation5 + $0x68] sm:$0xf0] }
  0x1e   :  { %271 = vmatpush.bf16.msra.mxu0 %v8307_v11  ;;  %v8384_v28 = vld [vmem:[#allocation7 + $0x60] sm:$0xf]  ;;  %v11099_v29 = vld [vmem:[#allocation7 + $0x68] sm:$0xf0]  ;;  %v8299_v30 = vor.u32 %v11077_v23, %v8296_v24  ;;  %v8283_v31 = vor.u32 %v11075_v27, %v8282_v26  ;;  %v11074_v32 = vld [vmem:[#allocation5 + $0x64] sm:$0xf] }
  0x1f   :  { %482 = vmatpush.bf16.msra.mxu3 %v8409_v13  ;;  %v8284_v33 = vld [vmem:[#allocation5 + $0x6c] sm:$0xf0]  ;;  %v8385_v34 = vor.u32 %v11099_v29, %v8384_v28  ;;  %v8270_v35 = vld [vmem:[#allocation5 + $0x48] sm:$0xf]  ;;  %v11072_v36 = vld [vmem:[#allocation5 + $0x50] sm:$0xf0] }
  0x20   :  { %v8372_v37 = vld [vmem:[#allocation7 + $0x48] sm:$0xf]  ;;  %v11096_v38 = vld [vmem:[#allocation7 + $0x50] sm:$0xf0]  ;;  %v8287_v39 = vor.u32 %v11074_v32, %v8284_v33  ;;  %v8271_v40 = vor.u32 %v11072_v36, %v8270_v35  ;;  %v11071_v41 = vld [vmem:[#allocation5 + $0x4c] sm:$0xf] }
  0x21   :  { %285 = vmatpush.bf16.msra.mxu1 %v8311_v21  ;;  %v8272_v42 = vld [vmem:[#allocation5 + $0x54] sm:$0xf0]  ;;  %v8373_v43 = vor.u32 %v11096_v38, %v8372_v37  ;;  %v8258_v44 = vld [vmem:[#allocation5 + $0x30] sm:$0xf]  ;;  %v11069_v45 = vld [vmem:[#allocation5 + $0x38] sm:$0xf0] }
  0x22   :  { %272 = vmatpush.bf16.msra.mxu0 %v8295_v22  ;;  %v8360_v46 = vld [vmem:[#allocation7 + $0x30] sm:$0xf]  ;;  %v11093_v47 = vld [vmem:[#allocation7 + $0x38] sm:$0xf0]  ;;  %v8275_v50 = vor.u32 %v11071_v41, %v8272_v42  ;;  %v8259_v52 = vor.u32 %v11069_v45, %v8258_v44  ;;  %v11068_v53 = vld [vmem:[#allocation5 + $0x34] sm:$0xf] }
  0x23   :  { %483 = vmatpush.bf16.msra.mxu3 %v8397_v25  ;;  %v8326_v48 = vld [vmem:[#allocation5 + $0xb0] sm:$0xf]  ;;  %v11085_v49 = vld [vmem:[#allocation5 + $0xb8] sm:$0xf0]  ;;  %v8260_v54 = vld [vmem:[#allocation5 + $0x3c] sm:$0xf0]  ;;  %v8361_v55 = vor.u32 %v11093_v47, %v8360_v46 }
  0x24   :  { %v8327_v51 = vor.u32 %v11085_v49, %v8326_v48  ;;  %v8246_v56 = vld [vmem:[#allocation5 + $0x18] sm:$0xf]  ;;  %v11066_v57 = vld [vmem:[#allocation5 + $0x20] sm:$0xf0]  ;;  %v8263_v63 = vor.u32 %v11068_v53, %v8260_v54  ;;  %v8234_v0 = vld [vmem:[#allocation5] sm:$0xf] }
  0x25   :  { %286 = vmatpush.bf16.msra.mxu1 %v8299_v30  ;;  %v8314_v59 = vld [vmem:[#allocation5 + $0x98] sm:$0xf]  ;;  %v11090_v61 = vld [vmem:[#allocation7 + $0x20] sm:$0xf0]  ;;  %v8302_v2 = vld [vmem:[#allocation5 + $0x80] sm:$0xf]  ;;  %v8247_v3 = vor.u32 %v11066_v57, %v8246_v56 }
  0x26   :  { %273 = vmatpush.bf16.msra.mxu0 %v8283_v31  ;;  %298 = vmatpush.bf16.msra.mxu2 %v8327_v51  ;;  %v8348_v60 = vld [vmem:[#allocation7 + $0x18] sm:$0xf]  ;;  %v11082_v62 = vld [vmem:[#allocation5 + $0xa0] sm:$0xf0]  ;;  %v11065_v4 = vld [vmem:[#allocation5 + $0x1c] sm:$0xf] }
  0x27   :  { %484 = vmatpush.bf16.msra.mxu3 %v8385_v34  ;;  %v8315_v1 = vor.u32 %v11082_v62, %v8314_v59  ;;  %v8248_v5 = vld [vmem:[#allocation5 + $0x24] sm:$0xf0]  ;;  %v11079_v6 = vld [vmem:[#allocation5 + $0x88] sm:$0xf0]  ;;  %v8349_v7 = vor.u32 %v11090_v61, %v8348_v60  ;;  %v8336_v9 = vld [vmem:[#allocation7] sm:$0xf] }
  0x28   :  { %v11063_v8 = vld [vmem:[#allocation5 + $0x8] sm:$0xf0]  ;;  %v12222_v10 = vand.u32 127, %v102_v58  ;;  %v8303_v11 = vor.u32 %v11079_v6, %v8302_v2  ;;  %v8422_v14 = vld [vmem:[#allocation7 + $0xb4] sm:$0xf0]  ;;  %v8251_v15 = vor.u32 %v11065_v4, %v8248_v5  ;;  %v12224_v19 = vld [vmem:[#allocation2] sm:$0xff] }
  0x29   :  { %287 = vmatpush.bf16.msra.mxu1 %v8287_v39  ;;  %v11087_v12 = vld [vmem:[#allocation7 + $0x8] sm:$0xf0]  ;;  %v8290_v16 = vld [vmem:[#allocation5 + $0x68] sm:$0xf]  ;;  %v11076_v17 = vld [vmem:[#allocation5 + $0x70] sm:$0xf0]  ;;  %v8235_v18 = vor.u32 %v11063_v8, %v8234_v0 }
  0x2a   :  { %274 = vmatpush.bf16.msra.mxu0 %v8271_v40  ;;  %299 = vmatpush.bf16.msra.mxu2 %v8315_v1  ;;  %v11107_v13 = vld [vmem:[#allocation7 + $0xac] sm:$0xf]  ;;  %v11062_v20 = vld [vmem:[#allocation5 + $0x4] sm:$0xf]  ;;  %v8236_v21 = vld [vmem:[#allocation5 + $0xc] sm:$0xf0]  ;;  %v8337_v22 = vor.u32 %v11087_v12, %v8336_v9  ;;  %v8291_v29 = vor.u32 %v11076_v17, %v8290_v16 }
  0x2b   :  { %485 = vmatpush.bf16.msra.mxu3 %v8373_v43  ;;  %v8425_v23 = vor.u32 %v11107_v13, %v8422_v14  ;;  %v12226_v24 = vld [vmem:[#allocation2 + $0x8] sm:$0xff]  ;;  %vm106_vm0 = vcmp.eq.s32.totalorder %v12222_v10, 0  ;;  %v8428_v25 = vld [vmem:[#allocation7 + $0xb0] sm:$0xf]  ;;  %v11104_v27 = vld [vmem:[#allocation7 + $0x94] sm:$0xf]  ;;  %v8239_v30 = vor.u32 %v11062_v20, %v8236_v21 }
  0x2c   :  { %v11109_v26 = vld [vmem:[#allocation7 + $0xb8] sm:$0xf0]  ;;  %v8410_v28 = vld [vmem:[#allocation7 + $0x9c] sm:$0xf0]  ;;  %v8278_v31 = vld [vmem:[#allocation5 + $0x50] sm:$0xf]  ;;  %v12231_v33 = vpack.c.bf16 %v12226_v24, %v12224_v19 }
  0x2d   :  { %288 = vmatpush.bf16.msra.mxu1 %v8275_v50  ;;  %v11073_v32 = vld [vmem:[#allocation5 + $0x58] sm:$0xf0]  ;;  %vm12233_vm1 = vmpackc.low %vm106_vm0, %vm106_vm0  ;;  %v8429_v35 = vor.u32 %v11109_v26, %v8428_v25  ;;  %v8398_v37 = vld [vmem:[#allocation7 + $0x84] sm:$0xf0]  ;;  %v8413_v38 = vor.u32 %v11104_v27, %v8410_v28  ;;  %v12162_v44 = vmov 1.0|1.0  }
  0x2e   :  { %275 = vmatpush.bf16.msra.mxu0 %v8259_v52  ;;  %300 = vmatpush.bf16.msra.mxu2 %v8303_v11  ;;  %v11101_v36 = vld [vmem:[#allocation7 + $0x7c] sm:$0xf]  ;;  %v8416_v39 = vld [vmem:[#allocation7 + $0x98] sm:$0xf]  ;;  %v11106_v40 = vld [vmem:[#allocation7 + $0xa0] sm:$0xf0]  ;;  %v8279_v42 = vor.u32 %v11073_v32, %v8278_v31 }
  0x2f   :  { %486 = vmatpush.bf16.msra.mxu3 %v8361_v55  ;;  %v8266_v41 = vld [vmem:[#allocation5 + $0x38] sm:$0xf]  ;;  %v11070_v43 = vld [vmem:[#allocation5 + $0x40] sm:$0xf0]  ;;  %v8404_v45 = vld [vmem:[#allocation7 + $0x80] sm:$0xf]  ;;  %v8417_v47 = vor.u32 %v11106_v40, %v8416_v39  ;;  %v8401_v48 = vor.u32 %v11101_v36, %v8398_v37 }
  0x30   :  { %v11103_v46 = vld [vmem:[#allocation7 + $0x88] sm:$0xf0]  ;;  %v11098_v49 = vld [vmem:[#allocation7 + $0x64] sm:$0xf]  ;;  %v8386_v50 = vld [vmem:[#allocation7 + $0x6c] sm:$0xf0]  ;;  %v8267_v51 = vor.u32 %v11070_v43, %v8266_v41 }
  0x31   :  { %289 = vmatpush.bf16.msra.mxu1 %v8263_v63  ;;  %v8254_v52 = vld [vmem:[#allocation5 + $0x20] sm:$0xf]  ;;  %v11067_v53 = vld [vmem:[#allocation5 + $0x28] sm:$0xf0]  ;;  %v8405_v54 = vor.u32 %v11103_v46, %v8404_v45  ;;  %v8389_v55 = vor.u32 %v11098_v49, %v8386_v50  ;;  %v8392_v56 = vld [vmem:[#allocation7 + $0x68] sm:$0xf] }
  0x32   :  { %276 = vmatpush.bf16.msra.mxu0 %v8247_v3  ;;  %301 = vmatpush.bf16.msra.mxu2 %v8291_v29  ;;  %v11100_v57 = vld [vmem:[#allocation7 + $0x70] sm:$0xf0]  ;;  %v11095_v58 = vld [vmem:[#allocation7 + $0x4c] sm:$0xf]  ;;  %v8374_v59 = vld [vmem:[#allocation7 + $0x54] sm:$0xf0]  ;;  %v8255_v60 = vor.u32 %v11067_v53, %v8254_v52 }
  0x33   :  { %487 = vmatpush.bf16.msra.mxu3 %v8349_v7  ;;  %v8242_v61 = vld [vmem:[#allocation5 + $0x8] sm:$0xf]  ;;  %v11064_v62 = vld [vmem:[#allocation5 + $0x10] sm:$0xf0]  ;;  %v8393_v63 = vor.u32 %v11100_v57, %v8392_v56  ;;  %v8377_v0 = vor.u32 %v11095_v58, %v8374_v59  ;;  %v8380_v1 = vld [vmem:[#allocation7 + $0x50] sm:$0xf] }
  0x34   :  { %v11097_v2 = vld [vmem:[#allocation7 + $0x58] sm:$0xf0]  ;;  %v11092_v3 = vld [vmem:[#allocation7 + $0x34] sm:$0xf]  ;;  %v8362_v4 = vld [vmem:[#allocation7 + $0x3c] sm:$0xf0]  ;;  %v8243_v5 = vor.u32 %v11064_v62, %v8242_v61 }
  0x35   :  { %290 = vmatpush.bf16.msra.mxu1 %v8251_v15  ;;  %v8381_v6 = vor.u32 %v11097_v2, %v8380_v1  ;;  %v8365_v7 = vor.u32 %v11092_v3, %v8362_v4  ;;  %v8368_v8 = vld [vmem:[#allocation7 + $0x38] sm:$0xf]  ;;  %v11094_v9 = vld [vmem:[#allocation7 + $0x40] sm:$0xf0]  ;;  %v11089_v11 = vld [vmem:[#allocation7 + $0x1c] sm:$0xf] }
  0x36   :  { %277 = vmatpush.bf16.msra.mxu0 %v8235_v18  ;;  %302 = vmatpush.bf16.msra.mxu2 %v8279_v42  ;;  %v8350_v12 = vld [vmem:[#allocation7 + $0x24] sm:$0xf0]  ;;  %v8369_v13 = vor.u32 %v11094_v9, %v8368_v8  ;;  %v8356_v15 = vld [vmem:[#allocation7 + $0x20] sm:$0xf]  ;;  %v11091_v16 = vld [vmem:[#allocation7 + $0x28] sm:$0xf0] }
  0x37   :  { %488 = vmatpush.bf16.msra.mxu3 %v8337_v22  ;;  %v8353_v14 = vor.u32 %v11089_v11, %v8350_v12  ;;  %v11086_v17 = vld [vmem:[#allocation7 + $0x4] sm:$0xf]  ;;  %v8338_v18 = vld [vmem:[#allocation7 + $0xc] sm:$0xf0]  ;;  %v8357_v20 = vor.u32 %v11091_v16, %v8356_v15  ;;  %v8344_v22 = vld [vmem:[#allocation7 + $0x8] sm:$0xf] }
  0x38   :  { %v8341_v21 = vor.u32 %v11086_v17, %v8338_v18  ;;  %v12249_v26 = vld [vmem:[#allocation8] sm:$0x7]  ;;  %v11116_v29 = vld [vmem:[#allocation10 + $0x30] sm:$0xff]  ;;  %v11111_v49 = vld [vmem:[#allocation10 + $0x8] sm:$0xff]  ;;  %s12163_s14 = smov [#allocation11]   ;;  %s8214_s17 = sshll.u32 %s13880_s7, 4  ;;  %s8215_s17 = int_to_ptr.hbm [resolvable:$true] %s8214_s17 }
  0x39   :  { %291 = vmatpush.bf16.msra.mxu1 %v8239_v30  ;;  %8329 = vmatmul.msk.bf16.vlgmr.msra.gmra.mxu0 %vm12233_vm1, %v12162_v44  ;;  %v11117_v27 = vld [vmem:[#allocation10 + $0x38] sm:$0xff]  ;;  %v347_v28 = vperm.slane %v12249_v26, 0  ;;  %v11110_v56 = vld [vmem:[#allocation10] sm:$0xff]  ;;  %v11164_v59 = vld [vmem:[#allocation7 + $0xb0] sm:$0xf0]  ;;  %s8212_s15 = sshll.u32 %s12163_s14, 4  ;;  %s8213_s15 = int_to_ptr.vmem [resolvable:$true] %s8212_s15 }
  0x3a   :  { %495 = vmatpush.bf16.msrb.mxu0 %v8425_v23  ;;  %489 = vmatmul.bf16.vlgmr.msra.gmra.mxu3 %v12231_v33  ;;  %v11088_v23 = vld [vmem:[#allocation7 + $0x10] sm:$0xf0]  ;;  %v11113_v41 = vld [vmem:[#allocation10 + $0x18] sm:$0xff]  ;;  %v8656_v57 = vld [vmem:[#allocation7 + $0xa8] sm:$0xf] }
  0x3b   :  { %303 = vmatpush.bf16.msra.mxu2 %v8267_v51  ;;  %v8345_v25 = vor.u32 %v11088_v23, %v8344_v22  ;;  %v8657_v61 = vor.u32 %v11164_v59, %v8656_v57  ;;  %v11158_v8 = vld [vmem:[#allocation7 + $0x80] sm:$0xf0]  ;;  %v11155_v15 = vld [vmem:[#allocation7 + $0x68] sm:$0xf0] }
  0x3c   :  { %8331 = vmatmul.msk.bf16.vlgmr.msra.gmra.mxu1 %vm12233_vm1, %v12162_v44 }
  0x3d   :  { %509 = vmatpush.bf16.msrb.mxu1 %v8429_v35  ;;  %v11115_v35 = vld [vmem:[#allocation10 + $0x28] sm:$0xff] }
  0x3e   :  { %496 = vmatpush.bf16.msrb.mxu0 %v8413_v38  ;;  %v11114_v38 = vld [vmem:[#allocation10 + $0x20] sm:$0xff] }
  0x3f   :  { %304 = vmatpush.bf16.msra.mxu2 %v8255_v60 }
  0x41   :  { %510 = vmatpush.bf16.msrb.mxu1 %v8417_v47  ;;  %v11112_v47 = vld [vmem:[#allocation10 + $0x10] sm:$0xff] }
  0x42   :  { %497 = vmatpush.bf16.msrb.mxu0 %v8401_v48  ;;  %v348_v48 = vperm.slane %v12249_v26, 1 }
  0x43   :  { %305 = vmatpush.bf16.msra.mxu2 %v8243_v5 }
  0x45   :  { %511 = vmatpush.bf16.msrb.mxu1 %v8405_v54 }
  0x46   :  { %498 = vmatpush.bf16.msrb.mxu0 %v8389_v55  ;;  %8333 = vmatmul.msk.bf16.vlgmr.msra.gmra.mxu2 %vm12233_vm1, %v12162_v44 }
  0x47   :  { %686 = vmatpush.bf16.msrb.mxu2 %v11117_v27  ;;  %v349_v27 = vperm.slane %v12249_v26, 2  ;;  %v8596_v26 = vld [vmem:[#allocation7 + $0x30] sm:$0xf] }
  0x49   :  { %512 = vmatpush.bf16.msrb.mxu1 %v8393_v63  ;;  %v8644_v63 = vld [vmem:[#allocation7 + $0x90] sm:$0xf] }
  0x4a   :  { %499 = vmatpush.bf16.msrb.mxu0 %v8377_v0  ;;  %v11161_v0 = vld [vmem:[#allocation7 + $0x98] sm:$0xf0] }
  0x4b   :  { %687 = vmatpush.bf16.msrb.mxu2 %v11116_v29  ;;  %v8645_v1 = vor.u32 %v11161_v0, %v8644_v63  ;;  %v8608_v29 = vld [vmem:[#allocation7 + $0x48] sm:$0xf] }
  0x4d   :  { %513 = vmatpush.bf16.msrb.mxu1 %v8381_v6 }
  0x4e   :  { %500 = vmatpush.bf16.msrb.mxu0 %v8365_v7  ;;  %v8632_v7 = vld [vmem:[#allocation7 + $0x78] sm:$0xf] }
  0x4f   :  { %688 = vmatpush.bf16.msrb.mxu2 %v11115_v35  ;;  %v11747_v35 = vld [vmem:[%s13878_s5] ss:$0 sm:$0xff] }
  0x51   :  { %514 = vmatpush.bf16.msrb.mxu1 %v8369_v13  ;;  %v8633_v13 = vor.u32 %v11158_v8, %v8632_v7 }
  0x52   :  { %501 = vmatpush.bf16.msrb.mxu0 %v8353_v14  ;;  %v8620_v14 = vld [vmem:[#allocation7 + $0x60] sm:$0xf] }
  0x53   :  { %689 = vmatpush.bf16.msrb.mxu2 %v11114_v38  ;;  %v8621_v22 = vor.u32 %v11155_v15, %v8620_v14 }
  0x55   :  { %515 = vmatpush.bf16.msrb.mxu1 %v8357_v20 }
  0x56   :  { %502 = vmatpush.bf16.msrb.mxu0 %v8341_v21 }
  0x57   :  { %690 = vmatpush.bf16.msrb.mxu2 %v11113_v41 }
  0x59   :  { %503 = vmatmul.bf16.vlgmr.msrb.gmra.mxu0 %v12231_v33  ;;  %516 = vmatpush.bf16.msrb.mxu1 %v8345_v25 }
  0x5b   :  { %691 = vmatpush.bf16.msrb.mxu2 %v11112_v47 }
  0x5c   :  { %517 = vmatmul.bf16.vlgmr.msrb.gmra.mxu1 %v12231_v33 }
  0x5f   :  { %692 = vmatpush.bf16.msrb.mxu2 %v11111_v49 }
  0x63   :  { %693 = vmatpush.bf16.msrb.mxu2 %v11110_v56 }
  0x67   :  { %1159 = vmatpush.bf16.msra.mxu2 %v8657_v61  ;;  %v11143_v61 = vld [vmem:[#allocation7 + $0x8] sm:$0xf0] }
  0x6b   :  { %1160 = vmatpush.bf16.msra.mxu2 %v8645_v1 }
  0x6f   :  { %1161 = vmatpush.bf16.msra.mxu2 %v8633_v13 }
  0x73   :  { %1162 = vmatpush.bf16.msra.mxu2 %v8621_v22 }
  0xb6   :  { %v279_v30 = vpop.f32.mrf.mxu0 }
  0xb9   :  { %v293_v45 = vpop.f32.mrf.mxu1 }
  0xbd   :  { %v490_v31 = vpop.f32.mrf.mxu3 }
  0xbe   :  { %v491_v32 = vadd.f32 %v490_v31, %v347_v28  ;;  %v281_v33 = vpop.f32.mrf.mxu0 }
  0xc0   :  { %v523_v34 = vadd.f32 %v491_v32, %v279_v30  ;;  %v11152_v30 = vld [vmem:[#allocation7 + $0x50] sm:$0xf0] }
  0xc1   :  { %v295_v54 = vpop.f32.mrf.mxu1  ;;  %v8609_v32 = vor.u32 %v11152_v30, %v8608_v29 }
  0xc2   :  { %v8430_v36 = vmul.f32 -1.442695, %v523_v34 }
  0xc3   :  { %1163 = vmatpush.bf16.msra.mxu2 %v8609_v32 }
  0xc4   :  { %11759 = vpow2.f32 %v8430_v36 }
  0xc5   :  { %v492_v37 = vpop.f32.mrf.mxu3 }
  0xc6   :  { %v493_v39 = vadd.f32 %v492_v37, %v347_v28  ;;  %v11149_v37 = vld [vmem:[#allocation7 + $0x38] sm:$0xf0] }
  0xc8   :  { %v524_v40 = vadd.f32 %v493_v39, %v281_v33 }
  0xc9   :  { %v307_v34 = vpop.f32.mrf.mxu2 }
  0xca   :  { %v11760_v42 = vpop.eup %11759  ;;  %v8431_v43 = vmul.f32 -1.442695, %v524_v40 }
  0xcb   :  { %v12252_v46 = vadd.f32 1.0, %v11760_v42 }
  0xcc   :  { %11761 = vpow2.f32 %v8431_v43 }
  0xcd   :  { %11763 = vrcp.f32 %v12252_v46  ;;  %v542_v25 = vand.u32 2147483647, %v12252_v46  ;;  %v544_v28 = vand.u32 2147483648, %v12252_v46  ;;  %vm538_vm3 = vweird.f32 %v12252_v46 }
  0xcf   :  { %vm543_vm7 = vcmp.eq.f32.partialorder %v542_v25, 8.507059e+37  ;;  %v545_v40 = vor.u32 1.1754944e-38, %v544_v28 }
  0xd2   :  { %v11762_v50 = vpop.eup %11761 }
  0xd3   :  { %v12256_v51 = vadd.f32 1.0, %v11762_v50  ;;  %v12258_v53 = vpop.eup %11763 }
  0xd4   :  { %v534_v60 = vmul.f32 %v12258_v53, %v12252_v46  ;;  %vm539_vm2 = vweird.f32 %v12258_v53 }
  0xd5   :  { %11765 = vrcp.f32 %v12256_v51  ;;  %vm12280_vm5 = vmor %vm538_vm3, %vm539_vm2  ;;  %v559_v36 = vand.u32 2147483648, %v12256_v51  ;;  %vm553_vm6 = vweird.f32 %v12256_v51  ;;  %v557_v39 = vand.u32 2147483647, %v12256_v51 }
  0xd6   :  { %v504_v52 = vpop.f32.mrf.mxu0  ;;  %v535_v4 = vsub.f32 1.0, %v534_v60  ;;  %v8572_v60 = vld [vmem:[#allocation7] sm:$0xf] }
  0xd7   :  { %v505_v55 = vadd.f32 %v504_v52, %v348_v48  ;;  %v8584_v52 = vld [vmem:[#allocation7 + $0x18] sm:$0xf]  ;;  %vm558_vm9 = vcmp.eq.f32.partialorder %v557_v39, 8.507059e+37 }
  0xd8   :  { %v536_v16 = vmul.f32 %v12258_v53, %v535_v4 }
  0xd9   :  { %v563_v58 = vadd.f32 %v505_v55, %v293_v45  ;;  %v518_v9 = vpop.f32.mrf.mxu1 }
  0xda   :  { %v537_v23 = vadd.f32 %v12258_v53, %v536_v16  ;;  %v519_v45 = vadd.f32 %v518_v9, %v349_v27 }
  0xdb   :  { %v8432_v62 = vmul.f32 -1.442695, %v563_v58  ;;  %v12263_v2 = vpop.eup %11765 }
  0xdc   :  { %v549_v6 = vmul.f32 %v12263_v2, %v12256_v51  ;;  %vm554_vm4 = vweird.f32 %v12263_v2  ;;  %v541_v38 = vsel %vm12280_vm5, %v12258_v53, %v537_v23  ;;  %v560_v51 = vor.u32 1.1754944e-38, %v559_v36  ;;  %v11146_v53 = vld [vmem:[#allocation7 + $0x20] sm:$0xf0] }
  0xdd   :  { %11767 = vpow2.f32 %v8432_v62  ;;  %vm12292_vm8 = vmor %vm553_vm6, %vm554_vm4  ;;  %v546_v50 = vsel %vm543_vm7, %v545_v40, %v541_v38  ;;  %v8585_v58 = vor.u32 %v11146_v53, %v8584_v52 }
  0xde   :  { %v506_v3 = vpop.f32.mrf.mxu0  ;;  %v550_v12 = vsub.f32 1.0, %v549_v6  ;;  %v603_v57 = vmul.f32 %v546_v50, %v519_v45 }
  0xdf   :  { %v507_v5 = vadd.f32 %v506_v3, %v348_v48  ;;  %v8597_v48 = vor.u32 %v11149_v37, %v8596_v26 }
  0xe0   :  { %v551_v21 = vmul.f32 %v12263_v2, %v550_v12  ;;  %v605_v4 = vadd.f32 %v603_v57, %v307_v34 }
  0xe1   :  { %v564_v11 = vadd.f32 %v507_v5, %v295_v54  ;;  %v520_v41 = vpop.f32.mrf.mxu1  ;;  %1164 = vmatpush.bf16.msra.mxu2 %v8597_v48  ;;  %v8573_v5 = vor.u32 %v11143_v61, %v8572_v60  ;;  %v11140_v60 = vld [vmem:[#allocation5 + $0xb0] sm:$0xf0]  ;;  %v11139_v61 = vld [vmem:[#allocation5 + $0xac] sm:$0xf] }
  0xe2   :  { %v552_v31 = vadd.f32 %v12263_v2, %v551_v21  ;;  %v521_v54 = vadd.f32 %v520_v41, %v349_v27 }
  0xe3   :  { %v11768_v17 = vpop.eup %11767  ;;  %v8433_v18 = vmul.f32 -1.442695, %v564_v11 }
  0xe4   :  { %v12268_v20 = vadd.f32 1.0, %v11768_v17  ;;  %v556_v47 = vsel %vm12292_vm8, %v12263_v2, %v552_v31  ;;  %v309_v2 = vpop.f32.mrf.mxu2 }
  0xe5   :  { %11769 = vpow2.f32 %v8433_v18  ;;  %v561_v56 = vsel %vm558_vm9, %v560_v51, %v556_v47  ;;  %1165 = vmatpush.bf16.msra.mxu2 %v8585_v58 }
  0xe6   :  { %11771 = vrcp.f32 %v12268_v20  ;;  %v584_v62 = vand.u32 2147483648, %v12268_v20  ;;  %v604_v63 = vmul.f32 %v561_v56, %v521_v54  ;;  %vm578_vm11 = vweird.f32 %v12268_v20 }
  0xe7   :  { %v582_v1 = vand.u32 2147483647, %v12268_v20 }
  0xe8   :  { %v585_v8 = vor.u32 1.1754944e-38, %v584_v62  ;;  %v606_v9 = vadd.f32 %v604_v63, %v309_v2  ;;  %v8556_v63 = vld [vmem:[#allocation5 + $0xb4] sm:$0xf0] }
  0xe9   :  { %vm583_vm13 = vcmp.eq.f32.partialorder %v582_v1, 8.507059e+37  ;;  %1166 = vmatpush.bf16.msra.mxu2 %v8573_v5  ;;  %v11137_v1 = vld [vmem:[#allocation5 + $0x98] sm:$0xf0]  ;;  %v8559_v2 = vor.u32 %v11139_v61, %v8556_v63 }
  0xeb   :  { %v11770_v33 = vpop.eup %11769  ;;  %963 = vmatpush.bf16.msra.mxu0 %v8559_v2  ;;  %v11119_v2 = vld [vmem:[#allocation5 + $0x8] sm:$0xf0] }
  0xec   :  { %v11772_v43 = vpop.eup %11771  ;;  %v572_v46 = vadd.f32 1.0, %v11770_v33 }
  0xed   :  { %v574_v49 = vmul.f32 %v11772_v43, %v12268_v20  ;;  %vm579_vm10 = vweird.f32 %v11772_v43 }
  0xee   :  { %11773 = vrcp.f32 %v572_v46  ;;  %vm580_vm12 = vmor %vm578_vm11, %vm579_vm10  ;;  %v599_v13 = vand.u32 2147483648, %v572_v46  ;;  %v597_v15 = vand.u32 2147483647, %v572_v46  ;;  %vm593_vm15 = vweird.f32 %v572_v46 }
  0xef   :  { %v575_v55 = vsub.f32 1.0, %v574_v49  ;;  %11775 = vtanh.f32 %v605_v4  ;;  %v8544_v4 = vld [vmem:[#allocation5 + $0x9c] sm:$0xf0] }
  0xf0   :  { %11777 = vtanh.f32 %v606_v9  ;;  %v600_v18 = vor.u32 1.1754944e-38, %v599_v13  ;;  %vm598_vm1 = vcmp.eq.f32.partialorder %v597_v15, 8.507059e+37  ;;  %v11133_v9 = vld [vmem:[#allocation5 + $0x7c] sm:$0xf] }
  0xf1   :  { %v576_v59 = vmul.f32 %v11772_v43, %v575_v55  ;;  %v11141_v13 = vld [vmem:[#allocation5 + $0xb8] sm:$0xf0] }
  0xf3   :  { %v577_v0 = vadd.f32 %v11772_v43, %v576_v59  ;;  %v8554_v59 = vld [vmem:[#allocation5 + $0xa8] sm:$0xf] }
  0xf4   :  { %v11774_v3 = vpop.eup %11773  ;;  %v8555_v62 = vor.u32 %v11140_v60, %v8554_v59  ;;  %v11121_v59 = vld [vmem:[#allocation5 + $0x1c] sm:$0xf]  ;;  %v8484_v60 = vld [vmem:[#allocation5 + $0x24] sm:$0xf0] }
  0xf5   :  { %v589_v6 = vmul.f32 %v11774_v3, %v572_v46  ;;  %v581_v7 = vsel %vm580_vm12, %v11772_v43, %v577_v0  ;;  %vm594_vm14 = vweird.f32 %v11774_v3  ;;  %v11776_v21 = vpop.eup %11775  ;;  %v8542_v0 = vld [vmem:[#allocation5 + $0x90] sm:$0xf] }
  0xf6   :  { %v586_v12 = vsel %vm583_vm13, %v585_v8, %v581_v7  ;;  %vm595_vm0 = vmor %vm593_vm15, %vm594_vm14  ;;  %v11778_v27 = vpop.eup %11777  ;;  %949 = vmatpush.bf16.msrb.mxu3 %v8555_v62  ;;  %v8543_v5 = vor.u32 %v11137_v1, %v8542_v0  ;;  %v8530_v7 = vld [vmem:[#allocation5 + $0x78] sm:$0xf]  ;;  %v11134_v8 = vld [vmem:[#allocation5 + $0x80] sm:$0xf0]  ;;  %v8487_v0 = vor.u32 %v11121_v59, %v8484_v60 }
  0xf7   :  { %v590_v11 = vsub.f32 1.0, %v589_v6  ;;  %v609_v16 = vsub.f32 1.0, %v586_v12  ;;  %v613_v29 = vmul.f32 %v586_v12, %v12224_v19  ;;  %v8562_v12 = vld [vmem:[#allocation5 + $0xb0] sm:$0xf]  ;;  %v8531_v15 = vor.u32 %v11134_v8, %v8530_v7  ;;  %v8470_v1 = vld [vmem:[#allocation5] sm:$0xf] }
  0xf8   :  { %v8664_v7 = vld [vmem:[#allocation7 + $0xb0] sm:$0xf]  ;;  %v11165_v8 = vld [vmem:[#allocation7 + $0xb8] sm:$0xf0]  ;;  %v11150_v59 = vld [vmem:[#allocation7 + $0x40] sm:$0xf0] }
  0xf9   :  { %v591_v14 = vmul.f32 %v11774_v3, %v590_v11  ;;  %v611_v23 = vmul.f32 %v11776_v21, %v609_v16  ;;  %v8532_v11 = vld [vmem:[#allocation5 + $0x84] sm:$0xf0]  ;;  %v8550_v16 = vld [vmem:[#allocation5 + $0x98] sm:$0xf]  ;;  %v11131_v21 = vld [vmem:[#allocation5 + $0x68] sm:$0xf0] }
  0xfa   :  { %950 = vmatpush.bf16.msrb.mxu3 %v8543_v5  ;;  %v11163_v5 = vld [vmem:[#allocation7 + $0xac] sm:$0xf] }
  0xfb   :  { %v592_v17 = vadd.f32 %v11774_v3, %v591_v14  ;;  %v12305_v31 = vadd.f32 %v613_v29, %v611_v23  ;;  %v8563_v14 = vor.u32 %v11141_v13, %v8562_v12  ;;  %v8665_v13 = vor.u32 %v11165_v8, %v8664_v7 }
  0xfd   :  { %v596_v20 = vsel %vm595_vm0, %v11774_v3, %v592_v17  ;;  %v11136_v3 = vld [vmem:[#allocation5 + $0x94] sm:$0xf]  ;;  %v11138_v17 = vld [vmem:[#allocation5 + $0xa0] sm:$0xf0]  ;;  %977 = vmatpush.bf16.msra.mxu1 %v8563_v14 }
  0xfe   :  { %v601_v22 = vsel %vm598_vm1, %v600_v18, %v596_v20  ;;  %v8547_v6 = vor.u32 %v11136_v3, %v8544_v4  ;;  %v8535_v18 = vor.u32 %v11133_v9, %v8532_v11  ;;  %v8518_v20 = vld [vmem:[#allocation5 + $0x60] sm:$0xf]  ;;  %v8551_v23 = vor.u32 %v11138_v17, %v8550_v16  ;;  %951 = vmatpush.bf16.msrb.mxu3 %v8531_v15  ;;  %v11118_v3 = vld [vmem:[#allocation5 + $0x4] sm:$0xf]  ;;  %v8472_v4 = vld [vmem:[#allocation5 + $0xc] sm:$0xf0] }
  0xff   :  { %v610_v25 = vsub.f32 1.0, %v601_v22  ;;  %v614_v30 = vmul.f32 %v601_v22, %v12226_v24  ;;  %v11130_v22 = vld [vmem:[#allocation5 + $0x64] sm:$0xf]  ;;  %v8519_v29 = vor.u32 %v11131_v21, %v8518_v20  ;;  %v8471_v9 = vor.u32 %v11119_v2, %v8470_v1  ;;  %v8502_v15 = vld [vmem:[#allocation5 + $0x38] sm:$0xf] }
 0x100   :  { %964 = vmatpush.bf16.msra.mxu0 %v8547_v6  ;;  %v8658_v6 = vld [vmem:[#allocation7 + $0xb4] sm:$0xf0]  ;;  %v11126_v16 = vld [vmem:[#allocation5 + $0x40] sm:$0xf0]  ;;  %v11160_v17 = vld [vmem:[#allocation7 + $0x94] sm:$0xf] }
 0x101   :  { %v612_v28 = vmul.f32 %v11778_v27, %v610_v25  ;;  %v8520_v25 = vld [vmem:[#allocation5 + $0x6c] sm:$0xf0]  ;;  %v8538_v27 = vld [vmem:[#allocation5 + $0x80] sm:$0xf]  ;;  %978 = vmatpush.bf16.msra.mxu1 %v8551_v23  ;;  %v8652_v21 = vld [vmem:[#allocation7 + $0x98] sm:$0xf] }
 0x102   :  { %952 = vmatpush.bf16.msrb.mxu3 %v8519_v29  ;;  %v8646_v20 = vld [vmem:[#allocation7 + $0x9c] sm:$0xf0]  ;;  %v11157_v29 = vld [vmem:[#allocation7 + $0x7c] sm:$0xf] }
 0x103   :  { %v12307_v32 = vadd.f32 %v614_v30, %v612_v28  ;;  %v11135_v28 = vld [vmem:[#allocation5 + $0x88] sm:$0xf0]  ;;  %v8523_v30 = vor.u32 %v11130_v22, %v8520_v25  ;;  %v11162_v22 = vld [vmem:[#allocation7 + $0xa0] sm:$0xf0]  ;;  %v8649_v23 = vor.u32 %v11160_v17, %v8646_v20 }
 0x104   :  { %965 = vmatpush.bf16.msra.mxu0 %v8535_v18  ;;  %v8503_v18 = vor.u32 %v11126_v16, %v8502_v15  ;;  %v8653_v25 = vor.u32 %v11162_v22, %v8652_v21  ;;  %v11172_v22 = vld [vmem:[#allocation10 + $0x30] sm:$0xff] }
 0x105   :  { %v12311_v34 = vpack.c.bf16 %v12307_v32, %v12305_v31 }
 0x107   :  { %694 = vmatmul.bf16.vlgmr.msrb.gmra.mxu2 %v12311_v34 }
 0x108   :  { %966 = vmatpush.bf16.msra.mxu0 %v8523_v30  ;;  %v8634_v30 = vld [vmem:[#allocation7 + $0x84] sm:$0xf0] }
 0x117   :  { %1167 = vmatmul.bf16.vlgmr.msra.gmra.mxu2 %v12311_v34 }
 0x18a   :  { %v695_v36 = vpop.f32.mrf.mxu2 }
 0x18b   :  { %v696_v19 = vadd.f32 %v11747_v35, %v695_v36  ;;  %v11128_v36 = vld [vmem:[#allocation5 + $0x50] sm:$0xf0] }
 0x18d   :  { %v702_v26 = vrot.slane %v696_v19, 1  ;;  %v703_v24 = vrot.slane %v696_v19, 2  ;;  %v704_v37 = vrot.slane %v696_v19, 3  ;;  %730 = vst [vmem:[%s13879_s6] sm:$0x1] %v696_v19  ;;  %746 = vmax.xlane.f32.xlu0 %v696_v19  ;;  %v705_v38 = vrot.slane %v696_v19, 4 }
 0x18e   :  { %v706_v39 = vrot.slane %v696_v19, 5  ;;  %v707_v33 = vrot.slane %v696_v19, 6  ;;  %v708_v40 = vrot.slane %v696_v19, 7 }
 0x18f   :  { %731 = vst [vmem:[%s13879_s6 + $0x10] sm:$0x1] %v702_v26  ;;  %v8539_v26 = vor.u32 %v11135_v28, %v8538_v27  ;;  %v8490_v27 = vld [vmem:[#allocation5 + $0x20] sm:$0xf]  ;;  %v11123_v28 = vld [vmem:[#allocation5 + $0x28] sm:$0xf0] }
 0x190   :  { %732 = vst [vmem:[%s13879_s6 + $0x20] sm:$0x1] %v703_v24  ;;  %v8508_v24 = vld [vmem:[#allocation5 + $0x54] sm:$0xf0] }
 0x191   :  { %733 = vst [vmem:[%s13879_s6 + $0x30] sm:$0x1] %v704_v37  ;;  %v8526_v37 = vld [vmem:[#allocation5 + $0x68] sm:$0xf]  ;;  %979 = vmatpush.bf16.msra.mxu1 %v8539_v26 }
 0x192   :  { %734 = vst [vmem:[%s13879_s6 + $0x40] sm:$0x1] %v705_v38  ;;  %v697_v41 = vpop.f32.mrf.mxu2  ;;  %v11132_v38 = vld [vmem:[#allocation5 + $0x70] sm:$0xf0] }
 0x193   :  { %735 = vst [vmem:[%s13879_s6 + $0x50] sm:$0x1] %v706_v39  ;;  %v698_v42 = vadd.f32 %v11747_v35, %v697_v41  ;;  %v8506_v35 = vld [vmem:[#allocation5 + $0x48] sm:$0xf]  ;;  %v11125_v41 = vld [vmem:[#allocation5 + $0x38] sm:$0xf0] }
 0x194   :  { %736 = vst [vmem:[%s13879_s6 + $0x60] sm:$0x1] %v707_v33  ;;  %v8507_v39 = vor.u32 %v11128_v36, %v8506_v35  ;;  %v8640_v35 = vld [vmem:[#allocation7 + $0x80] sm:$0xf]  ;;  %v11159_v36 = vld [vmem:[#allocation7 + $0x88] sm:$0xf0] }
 0x195   :  { %737 = vst [vmem:[%s13879_s6 + $0x70] sm:$0x1] %v708_v40  ;;  %v709_v43 = vrot.slane %v698_v42, 1  ;;  %v710_v45 = vrot.slane %v698_v42, 2  ;;  %v711_v46 = vrot.slane %v698_v42, 3  ;;  %748 = vmax.xlane.f32.xlu0 %v698_v42  ;;  %v712_v47 = vrot.slane %v698_v42, 4 }
 0x196   :  { %738 = vst [vmem:[%s13879_s6 + $0x80] sm:$0x1] %v698_v42  ;;  %v713_v48 = vrot.slane %v698_v42, 5  ;;  %v714_v49 = vrot.slane %v698_v42, 6  ;;  %v715_v50 = vrot.slane %v698_v42, 7  ;;  %953 = vmatpush.bf16.msrb.mxu3 %v8507_v39  ;;  %v8641_v26 = vor.u32 %v11159_v36, %v8640_v35 }
 0x197   :  { %739 = vst [vmem:[%s13879_s6 + $0x90] sm:$0x1] %v709_v43  ;;  %v8494_v40 = vld [vmem:[#allocation5 + $0x30] sm:$0xf] }
 0x198   :  { %740 = vst [vmem:[%s13879_s6 + $0xa0] sm:$0x1] %v710_v45  ;;  %v11124_v45 = vld [vmem:[#allocation5 + $0x34] sm:$0xf] }
 0x199   :  { %741 = vst [vmem:[%s13879_s6 + $0xb0] sm:$0x1] %v711_v46  ;;  %v8496_v46 = vld [vmem:[#allocation5 + $0x3c] sm:$0xf0] }
 0x19a   :  { %742 = vst [vmem:[%s13879_s6 + $0xc0] sm:$0x1] %v712_v47  ;;  %v8514_v47 = vld [vmem:[#allocation5 + $0x50] sm:$0xf]  ;;  %v1168_v20 = vpop.f32.mrf.mxu2 }
 0x19b   :  { %743 = vst [vmem:[%s13879_s6 + $0xd0] sm:$0x1] %v713_v48  ;;  %v11129_v48 = vld [vmem:[#allocation5 + $0x58] sm:$0xf0] }
 0x19c   :  { %744 = vst [vmem:[%s13879_s6 + $0xe0] sm:$0x1] %v714_v49  ;;  %v8495_v49 = vor.u32 %v11125_v41, %v8494_v40  ;;  %v8515_v61 = vor.u32 %v11129_v48, %v8514_v47  ;;  %v8628_v40 = vld [vmem:[#allocation7 + $0x68] sm:$0xf]  ;;  %v11156_v41 = vld [vmem:[#allocation7 + $0x70] sm:$0xf0] }
 0x19d   :  { %745 = vst [vmem:[%s13879_s6 + $0xf0] sm:$0x1] %v715_v50  ;;  %v8499_v50 = vor.u32 %v11124_v45, %v8496_v46  ;;  %v11151_v45 = vld [vmem:[#allocation7 + $0x4c] sm:$0xf]  ;;  %v8610_v46 = vld [vmem:[#allocation7 + $0x54] sm:$0xf0] }
 0x19e   :  { %954 = vmatpush.bf16.msrb.mxu3 %v8495_v49  ;;  %v8616_v47 = vld [vmem:[#allocation7 + $0x50] sm:$0xf]  ;;  %v8613_v48 = vor.u32 %v11151_v45, %v8610_v46  ;;  %v11153_v49 = vld [vmem:[#allocation7 + $0x58] sm:$0xf0]  ;;  %v11220_v45 = vld [vmem:[#allocation7 + $0xb0] sm:$0xf0] }
 0x200   :  { %v747_v51 = vpop.xlane.xlu0 %746 }
 0x201   :  { %vm750_vm2 = vcmp.eq.f32.partialorder %v696_v19, %v747_v51  ;;  %v11127_v19 = vld [vmem:[#allocation5 + $0x4c] sm:$0xf]  ;;  %v8482_v51 = vld [vmem:[#allocation5 + $0x18] sm:$0xf] }
 0x202   :  { %v12367_v52 = vsel %vm750_vm2, %v12222_v10, 128  ;;  %v8511_v33 = vor.u32 %v11127_v19, %v8508_v24  ;;  %v8637_v19 = vor.u32 %v11157_v29, %v8634_v30  ;;  %v8478_v24 = vld [vmem:[#allocation5 + $0x8] sm:$0xf] }
 0x203   :  { %v755_v53 = vshra.s32 %v12367_v52, 16  ;;  %v754_v43 = vand.u32 65535, %v12367_v52  ;;  %v11170_v30 = vld [vmem:[#allocation10 + $0x20] sm:$0xff] }
 0x204   :  { %967 = vmatpush.bf16.msra.mxu0 %v8511_v33  ;;  %v8622_v33 = vld [vmem:[#allocation7 + $0x6c] sm:$0xf0] }
 0x205   :  { %v12370_v54 = vcvt.s32.f32 %v755_v53  ;;  %v11122_v53 = vld [vmem:[#allocation5 + $0x20] sm:$0xf0] }
 0x206   :  { %v8483_v62 = vor.u32 %v11122_v53, %v8482_v51  ;;  %v8598_v51 = vld [vmem:[#allocation7 + $0x3c] sm:$0xf0]  ;;  %v8617_v53 = vor.u32 %v11153_v49, %v8616_v47  ;;  %v11166_v49 = vld [vmem:[#allocation10] sm:$0xff] }
 0x207   :  { %758 = vmin.xlane.f32.xlu1 %v12370_v54 }
 0x208   :  { %v749_v55 = vpop.xlane.xlu0 %748  ;;  %968 = vmatpush.bf16.msra.mxu0 %v8499_v50  ;;  %955 = vmatpush.bf16.msrb.mxu3 %v8483_v62  ;;  %v11148_v50 = vld [vmem:[#allocation7 + $0x34] sm:$0xf]  ;;  %v8586_v62 = vld [vmem:[#allocation7 + $0x24] sm:$0xf0] }
 0x209   :  { %vm751_vm3 = vcmp.eq.f32.partialorder %v698_v42, %v749_v55  ;;  %v8527_v42 = vor.u32 %v11132_v38, %v8526_v37  ;;  %v11120_v37 = vld [vmem:[#allocation5 + $0x10] sm:$0xf0]  ;;  %v11154_v38 = vld [vmem:[#allocation7 + $0x64] sm:$0xf]  ;;  %v8601_v60 = vor.u32 %v11148_v50, %v8598_v51 }
 0x20a   :  { %v12374_v56 = vsel %vm751_vm3, %v12222_v10, 128  ;;  %v8479_v39 = vor.u32 %v11120_v37, %v8478_v24 }
 0x20b   :  { %v769_v57 = vshra.s32 %v12374_v56, 16  ;;  %980 = vmatpush.bf16.msra.mxu1 %v8527_v42  ;;  %v768_v63 = vand.u32 65535, %v12374_v56  ;;  %v8661_v56 = vor.u32 %v11163_v5, %v8658_v6  ;;  %v8625_v42 = vor.u32 %v11154_v38, %v8622_v33  ;;  %v8580_v5 = vld [vmem:[#allocation7 + $0x8] sm:$0xf]  ;;  %v11144_v6 = vld [vmem:[#allocation7 + $0x10] sm:$0xf0] }
 0x20c   :  { %969 = vmatpush.bf16.msra.mxu0 %v8487_v0  ;;  %956 = vmatpush.bf16.msrb.mxu3 %v8471_v9  ;;  %v11147_v0 = vld [vmem:[#allocation7 + $0x28] sm:$0xf0]  ;;  %v8581_v8 = vor.u32 %v11144_v6, %v8580_v5  ;;  %v11168_v33 = vld [vmem:[#allocation10 + $0x10] sm:$0xff] }
 0x20d   :  { %v12377_v58 = vcvt.s32.f32 %v769_v57  ;;  %v756_v57 = vcvt.s32.f32 %v754_v43  ;;  %v770_v12 = vcvt.s32.f32 %v768_v63  ;;  %v8629_v43 = vor.u32 %v11156_v41, %v8628_v40  ;;  %v8592_v63 = vld [vmem:[#allocation7 + $0x20] sm:$0xf] }
 0x20e   :  { %v8593_v2 = vor.u32 %v11147_v0, %v8592_v63 }
 0x20f   :  { %772 = vmin.xlane.f32.xlu1 %v12377_v58  ;;  %981 = vmatpush.bf16.msra.mxu1 %v8515_v61 }
 0x210   :  { %1173 = vmatpush.bf16.msra.mxu3 %v8661_v56 }
 0x213   :  { %982 = vmatpush.bf16.msra.mxu1 %v8503_v18 }
 0x214   :  { %1174 = vmatpush.bf16.msra.mxu3 %v8649_v23 }
 0x218   :  { %1175 = vmatpush.bf16.msra.mxu3 %v8637_v19 }
 0x21c   :  { %1176 = vmatpush.bf16.msra.mxu3 %v8625_v42  ;;  %v11167_v42 = vld [vmem:[#allocation10 + $0x8] sm:$0xff] }
 0x220   :  { %1177 = vmatpush.bf16.msra.mxu3 %v8613_v48 }
 0x224   :  { %1178 = vmatpush.bf16.msra.mxu3 %v8601_v60  ;;  %v8880_v60 = vld [vmem:[#allocation7 + $0x90] sm:$0xf] }
 0x27a   :  { %v12381_v55 = vpop.xlane.xlu1 %758 }
 0x27b   :  { %vm760_vm4 = vcmp.eq.f32.partialorder %v12370_v54, %v12381_v55  ;;  %v8475_v54 = vor.u32 %v11118_v3, %v8472_v4  ;;  %v11142_v3 = vld [vmem:[#allocation7 + $0x4] sm:$0xf]  ;;  %v8574_v4 = vld [vmem:[#allocation7 + $0xc] sm:$0xf0] }
 0x27c   :  { %v761_v52 = vsel %vm760_vm4, %v756_v57, inf  ;;  %v8604_v57 = vld [vmem:[#allocation7 + $0x38] sm:$0xf]  ;;  %v8577_v7 = vor.u32 %v11142_v3, %v8574_v4 }
 0x27d   :  { %762 = vmin.xlane.f32.xlu2 %v761_v52  ;;  %970 = vmatpush.bf16.msra.mxu0 %v8475_v54  ;;  %v8605_v61 = vor.u32 %v11150_v59, %v8604_v57  ;;  %v11145_v52 = vld [vmem:[#allocation7 + $0x1c] sm:$0xf]  ;;  %v765_v54 = vcvt.f32.s32 %v12381_v55  ;;  %v12399_v55 = vld [vmem:[#allocation8] sm:$0x7] }
 0x27e   :  { %v8589_v1 = vor.u32 %v11145_v52, %v8586_v62  ;;  %v1025_v21 = vperm.slane %v12399_v55, 0 }
 0x280   :  { %1179 = vmatpush.bf16.msra.mxu3 %v8589_v1  ;;  %v1169_v23 = vadd.f32 %v1168_v20, %v1025_v21  ;;  %v8868_v1 = vld [vmem:[#allocation7 + $0x78] sm:$0xf]  ;;  %v11208_v20 = vld [vmem:[#allocation7 + $0x50] sm:$0xf0] }
 0x281   :  { %1187 = vmatpush.bf16.msrb.mxu0 %v8665_v13  ;;  %v766_v13 = vshll.u32 %v765_v54, 16 }
 0x282   :  { %v12386_v11 = vpop.xlane.xlu1 %772 }
 0x283   :  { %vm774_vm5 = vcmp.eq.f32.partialorder %v12377_v58, %v12386_v11  ;;  %v8491_v58 = vor.u32 %v11123_v28, %v8490_v27  ;;  %v11171_v28 = vld [vmem:[#allocation10 + $0x28] sm:$0xff] }
 0x284   :  { %v775_v14 = vsel %vm774_vm5, %v770_v12, inf  ;;  %1180 = vmatpush.bf16.msra.mxu3 %v8577_v7  ;;  %v779_v12 = vcvt.f32.s32 %v12386_v11  ;;  %v11173_v11 = vld [vmem:[#allocation10 + $0x38] sm:$0xff] }
 0x285   :  { %776 = vmin.xlane.f32.xlu2 %v775_v14  ;;  %1188 = vmatpush.bf16.msrb.mxu0 %v8653_v25 }
 0x286   :  { %983 = vmatpush.bf16.msra.mxu1 %v8491_v58  ;;  %v780_v15 = vshll.u32 %v779_v12, 16  ;;  %v1170_v58 = vpop.f32.mrf.mxu2  ;;  %v8856_v12 = vld [vmem:[#allocation7 + $0x60] sm:$0xf] }
 0x287   :  { %v1171_v35 = vadd.f32 %v1170_v58, %v1025_v21 }
 0x289   :  { %1189 = vmatpush.bf16.msrb.mxu0 %v8641_v26  ;;  %v11169_v26 = vld [vmem:[#allocation10 + $0x18] sm:$0xff] }
 0x28a   :  { %984 = vmatpush.bf16.msra.mxu1 %v8479_v39  ;;  %v1026_v39 = vperm.slane %v12399_v55, 1 }
 0x28d   :  { %1190 = vmatpush.bf16.msrb.mxu0 %v8629_v43  ;;  %v8892_v43 = vld [vmem:[#allocation7 + $0xa8] sm:$0xf] }
 0x28e   :  { %1364 = vmatpush.bf16.msrb.mxu1 %v11173_v11  ;;  %v8844_v11 = vld [vmem:[#allocation7 + $0x48] sm:$0xf] }
 0x28f   :  { %v8845_v58 = vor.u32 %v11208_v20, %v8844_v11 }
 0x291   :  { %1191 = vmatpush.bf16.msrb.mxu0 %v8617_v53  ;;  %v8893_v53 = vor.u32 %v11220_v45, %v8892_v43 }
 0x292   :  { %1365 = vmatpush.bf16.msrb.mxu1 %v11172_v22  ;;  %v1027_v22 = vperm.slane %v12399_v55, 2 }
 0x295   :  { %1192 = vmatpush.bf16.msrb.mxu0 %v8605_v61  ;;  %v11217_v61 = vld [vmem:[#allocation7 + $0x98] sm:$0xf0] }
 0x296   :  { %1366 = vmatpush.bf16.msrb.mxu1 %v11171_v28  ;;  %v8881_v63 = vor.u32 %v11217_v61, %v8880_v60  ;;  %v8808_v61 = vld [vmem:[#allocation7] sm:$0xf] }
 0x299   :  { %1193 = vmatpush.bf16.msrb.mxu0 %v8593_v2  ;;  %v11214_v2 = vld [vmem:[#allocation7 + $0x80] sm:$0xf0] }
 0x29a   :  { %1367 = vmatpush.bf16.msrb.mxu1 %v11170_v30  ;;  %v8869_v6 = vor.u32 %v11214_v2, %v8868_v1 }
 0x29d   :  { %1194 = vmatpush.bf16.msrb.mxu0 %v8581_v8 }
 0x29e   :  { %1368 = vmatpush.bf16.msrb.mxu1 %v11169_v26 }
 0x2a2   :  { %1369 = vmatpush.bf16.msrb.mxu1 %v11168_v33 }
 0x2a6   :  { %1370 = vmatpush.bf16.msrb.mxu1 %v11167_v42 }
 0x2aa   :  { %1371 = vmatpush.bf16.msrb.mxu1 %v11166_v49 }
 0x2f0   :  { %v763_v9 = vpop.xlane.xlu2 %762 }
 0x2f1   :  { %v764_v56 = vcvt.f32.s32 %v763_v9 }
 0x2f3   :  { %v767_v16 = vadd.s32 %v766_v13, %v764_v56  ;;  %v11211_v56 = vld [vmem:[#allocation7 + $0x68] sm:$0xf0] }
 0x2f5   :  { %vm782_vm6 = vcmp.eq.s32.totalorder %v12222_v10, %v767_v16  ;;  %v8857_v16 = vor.u32 %v11211_v56, %v8856_v12 }
 0x2f8   :  { %v777_v14 = vpop.xlane.xlu2 %776 }
 0x2f9   :  { %v778_v17 = vcvt.f32.s32 %v777_v14 }
 0x2fb   :  { %v781_v18 = vadd.s32 %v780_v15, %v778_v17 }
 0x2fd   :  { %vm783_vm7 = vcmp.eq.s32.totalorder %v12222_v10, %v781_v18 }
 0x2fe   :  { %vm8564_vm8 = vmpackc.low %vm783_vm7, %vm782_vm6 }
 0x2ff   :  { %8565 = vmatmul.msk.bf16.vlgmr.msrb.gmra.mxu3 %vm8564_vm8, %v12162_v44  ;;  %8567 = vmatmul.msk.bf16.vlgmr.msra.gmra.mxu0 %vm8564_vm8, %v12162_v44 }
 0x300   :  { %8569 = vmatmul.msk.bf16.vlgmr.msra.gmra.mxu1 %vm8564_vm8, %v12162_v44 }
 0x301   :  { %1837 = vmatpush.bf16.msra.mxu1 %v8893_v53 }
 0x305   :  { %1838 = vmatpush.bf16.msra.mxu1 %v8881_v63 }
 0x309   :  { %1839 = vmatpush.bf16.msra.mxu1 %v8869_v6 }
 0x30d   :  { %1840 = vmatpush.bf16.msra.mxu1 %v8857_v16 }
 0x30f   :  { %1181 = vmatmul.bf16.vlgmr.msra.gmra.mxu3 %v12311_v34  ;;  %1195 = vmatmul.bf16.vlgmr.msrb.gmra.mxu0 %v12311_v34 }
 0x311   :  { %1841 = vmatpush.bf16.msra.mxu1 %v8845_v58 }
 0x37c   :  { %v972_v36 = vpop.f32.mrf.mxu0 }
 0x382   :  { %v958_v25 = vpop.f32.mrf.mxu3 }
 0x383   :  { %v1201_v27 = vadd.f32 %v1169_v23, %v958_v25 }
 0x384   :  { %v974_v47 = vpop.f32.mrf.mxu0 }
 0x385   :  { %v8666_v29 = vmul.f32 -1.442695, %v1201_v27 }
 0x387   :  { %11779 = vpow2.f32 %v8666_v29 }
 0x38a   :  { %v960_v34 = vpop.f32.mrf.mxu3 }
 0x38b   :  { %v1202_v19 = vadd.f32 %v1171_v35, %v960_v34  ;;  %v986_v35 = vpop.f32.mrf.mxu1 }
 0x38c   :  { %v1196_v8 = vpop.f32.mrf.mxu0 }
 0x38d   :  { %v11780_v24 = vpop.eup %11779  ;;  %v8667_v37 = vmul.f32 -1.442695, %v1202_v19  ;;  %v11205_v19 = vld [vmem:[#allocation7 + $0x38] sm:$0xf0] }
 0x38e   :  { %v12402_v38 = vadd.f32 1.0, %v11780_v24 }
 0x38f   :  { %11781 = vpow2.f32 %v8667_v37 }
 0x390   :  { %11783 = vrcp.f32 %v12402_v38  ;;  %v1222_v17 = vand.u32 2147483648, %v12402_v38  ;;  %vm1216_vm10 = vweird.f32 %v12402_v38  ;;  %v1220_v21 = vand.u32 2147483647, %v12402_v38 }
 0x392   :  { %v1182_v40 = vpop.f32.mrf.mxu3  ;;  %v1223_v55 = vor.u32 1.1754944e-38, %v1222_v17  ;;  %vm1221_vm15 = vcmp.eq.f32.partialorder %v1220_v21, 8.507059e+37 }
 0x393   :  { %v1183_v41 = vadd.f32 %v1182_v40, %v1026_v39 }
 0x394   :  { %v1198_v33 = vpop.f32.mrf.mxu0 }
 0x395   :  { %v11782_v46 = vpop.eup %11781  ;;  %v1241_v48 = vadd.f32 %v1183_v41, %v972_v36  ;;  %v8832_v36 = vld [vmem:[#allocation7 + $0x30] sm:$0xf]  ;;  %v1197_v41 = vadd.f32 %v1196_v8, %v1027_v22  ;;  %v1199_v49 = vadd.f32 %v1198_v33, %v1027_v22 }
 0x396   :  { %v12406_v50 = vpop.eup %11783  ;;  %v12408_v51 = vadd.f32 1.0, %v11782_v46  ;;  %v8833_v42 = vor.u32 %v11205_v19, %v8832_v36  ;;  %v8820_v46 = vld [vmem:[#allocation7 + $0x18] sm:$0xf] }
 0x397   :  { %v1212_v57 = vmul.f32 %v12406_v50, %v12402_v38  ;;  %v8668_v59 = vmul.f32 -1.442695, %v1241_v48  ;;  %vm1217_vm9 = vweird.f32 %v12406_v50 }
 0x398   :  { %11785 = vrcp.f32 %v12408_v51  ;;  %vm12424_vm12 = vmor %vm1216_vm10, %vm1217_vm9  ;;  %v1237_v27 = vand.u32 2147483648, %v12408_v51  ;;  %vm1231_vm13 = vweird.f32 %v12408_v51  ;;  %v1235_v29 = vand.u32 2147483647, %v12408_v51  ;;  %1842 = vmatpush.bf16.msra.mxu1 %v8833_v42 }
 0x399   :  { %11787 = vpow2.f32 %v8668_v59  ;;  %v1213_v52 = vsub.f32 1.0, %v1212_v57 }
 0x39a   :  { %v1184_v62 = vpop.f32.mrf.mxu3  ;;  %v1238_v40 = vor.u32 1.1754944e-38, %v1237_v27  ;;  %vm1236_vm0 = vcmp.eq.f32.partialorder %v1235_v29, 8.507059e+37 }
 0x39b   :  { %v1185_v0 = vadd.f32 %v1184_v62, %v1026_v39  ;;  %v1214_v5 = vmul.f32 %v12406_v50, %v1213_v52  ;;  %v11199_v52 = vld [vmem:[#allocation7 + $0x8] sm:$0xf0] }
 0x39d   :  { %v1242_v3 = vadd.f32 %v1185_v0, %v974_v47  ;;  %v1215_v15 = vadd.f32 %v12406_v50, %v1214_v5  ;;  %v11202_v47 = vld [vmem:[#allocation7 + $0x20] sm:$0xf0]  ;;  %v988_v0 = vpop.f32.mrf.mxu1  ;;  %v8809_v5 = vor.u32 %v11199_v52, %v8808_v61  ;;  %v8778_v61 = vld [vmem:[#allocation5 + $0x90] sm:$0xf]  ;;  %v11193_v52 = vld [vmem:[#allocation5 + $0x98] sm:$0xf0] }
 0x39e   :  { %v11786_v4 = vpop.eup %11785  ;;  %v8821_v57 = vor.u32 %v11202_v47, %v8820_v46 }
 0x39f   :  { %v11788_v7 = vpop.eup %11787  ;;  %v1227_v9 = vmul.f32 %v11786_v4, %v12408_v51  ;;  %v8669_v54 = vmul.f32 -1.442695, %v1242_v3  ;;  %vm1232_vm11 = vweird.f32 %v11786_v4  ;;  %v1219_v28 = vsel %vm12424_vm12, %v12406_v50, %v1215_v15 }
 0x3a0   :  { %v12415_v13 = vadd.f32 1.0, %v11788_v7  ;;  %vm12434_vm14 = vmor %vm1231_vm13, %vm1232_vm11  ;;  %v1224_v38 = vsel %vm1221_vm15, %v1223_v55, %v1219_v28  ;;  %1843 = vmatpush.bf16.msra.mxu1 %v8821_v57  ;;  %v11748_v28 = vld [vmem:[%s13878_s5] ss:$0 sm:$0xff]  ;;  %v11195_v57 = vld [vmem:[#allocation5 + $0xac] sm:$0xf] }
 0x3a1   :  { %v1228_v14 = vsub.f32 1.0, %v1227_v9  ;;  %11789 = vpow2.f32 %v8669_v54  ;;  %v1281_v48 = vmul.f32 %v1224_v38, %v1197_v41 }
 0x3a2   :  { %11791 = vrcp.f32 %v12415_v13  ;;  %v1262_v53 = vand.u32 2147483648, %v12415_v13  ;;  %vm1256_vm2 = vweird.f32 %v12415_v13  ;;  %v1260_v60 = vand.u32 2147483647, %v12415_v13 }
 0x3a3   :  { %v1229_v18 = vmul.f32 %v11786_v4, %v1228_v14  ;;  %v1283_v63 = vadd.f32 %v1281_v48, %v986_v35 }
 0x3a4   :  { %vm1261_vm4 = vcmp.eq.f32.partialorder %v1260_v60, 8.507059e+37  ;;  %1844 = vmatpush.bf16.msra.mxu1 %v8809_v5  ;;  %v8792_v60 = vld [vmem:[#allocation5 + $0xb4] sm:$0xf0]  ;;  %v11189_v5 = vld [vmem:[#allocation5 + $0x7c] sm:$0xf] }
 0x3a5   :  { %v1230_v25 = vadd.f32 %v11786_v4, %v1229_v18 }
 0x3a7   :  { %v11790_v30 = vpop.eup %11789  ;;  %v1234_v24 = vsel %vm12434_vm14, %v11786_v4, %v1230_v25  ;;  %v1263_v4 = vor.u32 1.1754944e-38, %v1262_v53  ;;  %v11196_v53 = vld [vmem:[#allocation5 + $0xb0] sm:$0xf0] }
 0x3a8   :  { %v11792_v26 = vpop.eup %11791  ;;  %v1250_v37 = vadd.f32 1.0, %v11790_v30  ;;  %v1239_v45 = vsel %vm1236_vm0, %v1238_v40, %v1234_v24 }
 0x3a9   :  { %v1252_v39 = vmul.f32 %v11792_v26, %v12415_v13  ;;  %vm1257_vm1 = vweird.f32 %v11792_v26  ;;  %v1282_v51 = vmul.f32 %v1239_v45, %v1199_v49 }
 0x3aa   :  { %11793 = vrcp.f32 %v1250_v37  ;;  %vm1258_vm3 = vmor %vm1256_vm2, %vm1257_vm1  ;;  %v1277_v8 = vand.u32 2147483648, %v1250_v37  ;;  %v1275_v54 = vand.u32 2147483647, %v1250_v37  ;;  %vm1271_vm6 = vweird.f32 %v1250_v37 }
 0x3ab   :  { %v1253_v43 = vsub.f32 1.0, %v1252_v39  ;;  %v1284_v3 = vadd.f32 %v1282_v51, %v988_v0  ;;  %11795 = vtanh.f32 %v1283_v63  ;;  %v8790_v51 = vld [vmem:[#allocation5 + $0xa8] sm:$0xf]  ;;  %v11192_v63 = vld [vmem:[#allocation5 + $0x94] sm:$0xf] }
 0x3ac   :  { %v1278_v13 = vor.u32 1.1754944e-38, %v1277_v8  ;;  %vm1276_vm8 = vcmp.eq.f32.partialorder %v1275_v54, 8.507059e+37  ;;  %v8780_v0 = vld [vmem:[#allocation5 + $0x9c] sm:$0xf0]  ;;  %v11197_v8 = vld [vmem:[#allocation5 + $0xb8] sm:$0xf0] }
 0x3ad   :  { %v1254_v50 = vmul.f32 %v11792_v26, %v1253_v43  ;;  %11797 = vtanh.f32 %v1284_v3  ;;  %v8766_v3 = vld [vmem:[#allocation5 + $0x78] sm:$0xf] }
 0x3af   :  { %v1255_v59 = vadd.f32 %v11792_v26, %v1254_v50 }
 0x3b0   :  { %v11794_v62 = vpop.eup %11793 }
 0x3b1   :  { %v1267_v1 = vmul.f32 %v11794_v62, %v1250_v37  ;;  %v1259_v2 = vsel %vm1258_vm3, %v11792_v26, %v1255_v59  ;;  %vm1272_vm5 = vweird.f32 %v11794_v62  ;;  %v11796_v15 = vpop.eup %11795  ;;  %v8791_v59 = vor.u32 %v11196_v53, %v8790_v51  ;;  %v11177_v51 = vld [vmem:[#allocation5 + $0x1c] sm:$0xf]  ;;  %v8720_v53 = vld [vmem:[#allocation5 + $0x24] sm:$0xf0] }
 0x3b2   :  { %v1264_v7 = vsel %vm1261_vm4, %v1263_v4, %v1259_v2  ;;  %vm1273_vm7 = vmor %vm1271_vm6, %vm1272_vm5  ;;  %v8783_v2 = vor.u32 %v11192_v63, %v8780_v0  ;;  %v11190_v4 = vld [vmem:[#allocation5 + $0x80] sm:$0xf0]  ;;  %v8708_v0 = vld [vmem:[#allocation5 + $0xc] sm:$0xf0] }
 0x3b3   :  { %v1268_v6 = vsub.f32 1.0, %v1267_v1  ;;  %v1287_v56 = vsub.f32 1.0, %v1264_v7  ;;  %v11798_v11 = vpop.eup %11797  ;;  %v1291_v21 = vmul.f32 %v1264_v7, %v12305_v31  ;;  %1627 = vmatpush.bf16.msrb.mxu2 %v8791_v59  ;;  %v8779_v1 = vor.u32 %v11193_v52, %v8778_v61  ;;  %v8798_v7 = vld [vmem:[#allocation5 + $0xb0] sm:$0xf]  ;;  %v8706_v52 = vld [vmem:[#allocation5] sm:$0xf] }
 0x3b4   :  { %v8767_v54 = vor.u32 %v11190_v4, %v8766_v3  ;;  %v8723_v61 = vor.u32 %v11177_v51, %v8720_v53  ;;  %v11174_v63 = vld [vmem:[#allocation5 + $0x4] sm:$0xf]  ;;  %v8900_v3 = vld [vmem:[#allocation7 + $0xb0] sm:$0xf]  ;;  %v11221_v4 = vld [vmem:[#allocation7 + $0xb8] sm:$0xf0] }
 0x3b5   :  { %v1269_v9 = vmul.f32 %v11794_v62, %v1268_v6  ;;  %v1289_v18 = vmul.f32 %v11796_v15, %v1287_v56  ;;  %v8768_v6 = vld [vmem:[#allocation5 + $0x84] sm:$0xf0]  ;;  %v11194_v56 = vld [vmem:[#allocation5 + $0xa0] sm:$0xf0]  ;;  %v11187_v15 = vld [vmem:[#allocation5 + $0x68] sm:$0xf0] }
 0x3b6   :  { %v11206_v51 = vld [vmem:[#allocation7 + $0x40] sm:$0xf0] }
 0x3b7   :  { %v1270_v12 = vadd.f32 %v11794_v62, %v1269_v9  ;;  %v12446_v23 = vadd.f32 %v1291_v21, %v1289_v18  ;;  %v8799_v9 = vor.u32 %v11197_v8, %v8798_v7  ;;  %1628 = vmatpush.bf16.msrb.mxu2 %v8779_v1  ;;  %v8756_v18 = vld [vmem:[#allocation5 + $0x6c] sm:$0xf0]  ;;  %v11219_v1 = vld [vmem:[#allocation7 + $0xac] sm:$0xf]  ;;  %v8901_v8 = vor.u32 %v11221_v4, %v8900_v3 }
 0x3b9   :  { %v1274_v14 = vsel %vm1273_vm7, %v11794_v62, %v1270_v12  ;;  %v8795_v62 = vor.u32 %v11195_v57, %v8792_v60  ;;  %v8786_v12 = vld [vmem:[#allocation5 + $0x98] sm:$0xf]  ;;  %1655 = vmatpush.bf16.msra.mxu0 %v8799_v9 }
 0x3ba   :  { %v1279_v16 = vsel %vm1276_vm8, %v1278_v13, %v1274_v14  ;;  %v8771_v13 = vor.u32 %v11189_v5, %v8768_v6  ;;  %v8754_v14 = vld [vmem:[#allocation5 + $0x60] sm:$0xf] }
 0x3bb   :  { %v1288_v17 = vsub.f32 1.0, %v1279_v16  ;;  %v1292_v22 = vmul.f32 %v1279_v16, %v12307_v32  ;;  %1641 = vmatpush.bf16.msrb.mxu3 %v8795_v62  ;;  %v11186_v16 = vld [vmem:[#allocation5 + $0x64] sm:$0xf]  ;;  %1629 = vmatpush.bf16.msrb.mxu2 %v8767_v54  ;;  %v8755_v21 = vor.u32 %v11187_v15, %v8754_v14  ;;  %v11175_v62 = vld [vmem:[#allocation5 + $0x8] sm:$0xf0] }
 0x3bc   :  { %v8707_v5 = vor.u32 %v11175_v62, %v8706_v52  ;;  %v8738_v54 = vld [vmem:[#allocation5 + $0x38] sm:$0xf]  ;;  %v8882_v14 = vld [vmem:[#allocation7 + $0x9c] sm:$0xf0] }
 0x3bd   :  { %v1290_v20 = vmul.f32 %v11798_v11, %v1288_v17  ;;  %v8787_v17 = vor.u32 %v11194_v56, %v8786_v12  ;;  %v8774_v11 = vld [vmem:[#allocation5 + $0x80] sm:$0xf]  ;;  %v11182_v12 = vld [vmem:[#allocation5 + $0x40] sm:$0xf0]  ;;  %v11216_v56 = vld [vmem:[#allocation7 + $0x94] sm:$0xf] }
 0x3be   :  { %v8888_v15 = vld [vmem:[#allocation7 + $0x98] sm:$0xf] }
 0x3bf   :  { %v12448_v25 = vadd.f32 %v1292_v22, %v1290_v20  ;;  %1642 = vmatpush.bf16.msrb.mxu3 %v8783_v2  ;;  %v11191_v20 = vld [vmem:[#allocation5 + $0x88] sm:$0xf0]  ;;  %v8759_v22 = vor.u32 %v11186_v16, %v8756_v18  ;;  %1656 = vmatpush.bf16.msra.mxu0 %v8787_v17  ;;  %v8894_v2 = vld [vmem:[#allocation7 + $0xb4] sm:$0xf0]  ;;  %v11218_v16 = vld [vmem:[#allocation7 + $0xa0] sm:$0xf0]  ;;  %v8885_v17 = vor.u32 %v11216_v56, %v8882_v14 }
 0x3c0   :  { %1630 = vmatpush.bf16.msrb.mxu2 %v8755_v21  ;;  %v8889_v18 = vor.u32 %v11218_v16, %v8888_v15  ;;  %v11213_v21 = vld [vmem:[#allocation7 + $0x7c] sm:$0xf]  ;;  %v11228_v16 = vld [vmem:[#allocation10 + $0x30] sm:$0xff] }
 0x3c1   :  { %v12452_v27 = vpack.c.bf16 %v12448_v25, %v12446_v23 }
 0x3c3   :  { %1372 = vmatmul.bf16.vlgmr.msrb.gmra.mxu1 %v12452_v27  ;;  %1643 = vmatpush.bf16.msrb.mxu3 %v8771_v13  ;;  %v8739_v13 = vor.u32 %v11182_v12, %v8738_v54 }
 0x3c7   :  { %1644 = vmatpush.bf16.msrb.mxu3 %v8759_v22  ;;  %v8870_v22 = vld [vmem:[#allocation7 + $0x84] sm:$0xf0] }
 0x3d3   :  { %1845 = vmatmul.bf16.vlgmr.msra.gmra.mxu1 %v12452_v27 }
 0x440   :  { %v1373_v29 = vpop.f32.mrf.mxu1 }
 0x441   :  { %v1374_v31 = vadd.f32 %v11748_v28, %v1373_v29  ;;  %v11184_v29 = vld [vmem:[#allocation5 + $0x50] sm:$0xf0] }
 0x443   :  { %v1380_v58 = vrot.slane %v1374_v31, 1  ;;  %v1381_v32 = vrot.slane %v1374_v31, 2  ;;  %v1382_v30 = vrot.slane %v1374_v31, 3  ;;  %1408 = vst [vmem:[%s13879_s6 + $0x1] sm:$0x1] %v1374_v31  ;;  %1424 = vmax.xlane.f32.xlu0 %v1374_v31  ;;  %v1383_v35 = vrot.slane %v1374_v31, 4 }
 0x444   :  { %v1384_v55 = vrot.slane %v1374_v31, 5  ;;  %v1385_v34 = vrot.slane %v1374_v31, 6  ;;  %v1386_v36 = vrot.slane %v1374_v31, 7 }
 0x445   :  { %1409 = vst [vmem:[%s13879_s6 + $0x11] sm:$0x1] %v1380_v58  ;;  %v8775_v58 = vor.u32 %v11191_v20, %v8774_v11  ;;  %v8726_v11 = vld [vmem:[#allocation5 + $0x20] sm:$0xf]  ;;  %v11179_v20 = vld [vmem:[#allocation5 + $0x28] sm:$0xf0] }
 0x446   :  { %1410 = vst [vmem:[%s13879_s6 + $0x21] sm:$0x1] %v1381_v32  ;;  %v8744_v32 = vld [vmem:[#allocation5 + $0x54] sm:$0xf0] }
 0x447   :  { %1411 = vst [vmem:[%s13879_s6 + $0x31] sm:$0x1] %v1382_v30  ;;  %v8762_v30 = vld [vmem:[#allocation5 + $0x68] sm:$0xf]  ;;  %1657 = vmatpush.bf16.msra.mxu0 %v8775_v58 }
 0x448   :  { %1412 = vst [vmem:[%s13879_s6 + $0x41] sm:$0x1] %v1383_v35  ;;  %v1375_v19 = vpop.f32.mrf.mxu1  ;;  %v11188_v35 = vld [vmem:[#allocation5 + $0x70] sm:$0xf0] }
 0x449   :  { %1413 = vst [vmem:[%s13879_s6 + $0x51] sm:$0x1] %v1384_v55  ;;  %v1376_v26 = vadd.f32 %v11748_v28, %v1375_v19  ;;  %v8742_v28 = vld [vmem:[#allocation5 + $0x48] sm:$0xf]  ;;  %v11181_v19 = vld [vmem:[#allocation5 + $0x38] sm:$0xf0] }
 0x44a   :  { %1414 = vst [vmem:[%s13879_s6 + $0x61] sm:$0x1] %v1385_v34  ;;  %v8743_v55 = vor.u32 %v11184_v29, %v8742_v28  ;;  %v8876_v28 = vld [vmem:[#allocation7 + $0x80] sm:$0xf]  ;;  %v11215_v29 = vld [vmem:[#allocation7 + $0x88] sm:$0xf0] }
 0x44b   :  { %1415 = vst [vmem:[%s13879_s6 + $0x71] sm:$0x1] %v1386_v36  ;;  %v1387_v24 = vrot.slane %v1376_v26, 1  ;;  %v1388_v37 = vrot.slane %v1376_v26, 2  ;;  %v1389_v38 = vrot.slane %v1376_v26, 3  ;;  %1426 = vmax.xlane.f32.xlu1 %v1376_v26  ;;  %v1390_v39 = vrot.slane %v1376_v26, 4 }
 0x44c   :  { %1416 = vst [vmem:[%s13879_s6 + $0x81] sm:$0x1] %v1376_v26  ;;  %v1391_v33 = vrot.slane %v1376_v26, 5  ;;  %v1392_v40 = vrot.slane %v1376_v26, 6  ;;  %v1393_v41 = vrot.slane %v1376_v26, 7  ;;  %1631 = vmatpush.bf16.msrb.mxu2 %v8743_v55  ;;  %v8877_v58 = vor.u32 %v11215_v29, %v8876_v28 }
 0x44d   :  { %1417 = vst [vmem:[%s13879_s6 + $0x91] sm:$0x1] %v1387_v24  ;;  %v8730_v36 = vld [vmem:[#allocation5 + $0x30] sm:$0xf] }
 0x44e   :  { %1418 = vst [vmem:[%s13879_s6 + $0xa1] sm:$0x1] %v1388_v37  ;;  %v11180_v37 = vld [vmem:[#allocation5 + $0x34] sm:$0xf] }
 0x44f   :  { %1419 = vst [vmem:[%s13879_s6 + $0xb1] sm:$0x1] %v1389_v38  ;;  %v8732_v38 = vld [vmem:[#allocation5 + $0x3c] sm:$0xf0] }
 0x450   :  { %1420 = vst [vmem:[%s13879_s6 + $0xc1] sm:$0x1] %v1390_v39  ;;  %v8750_v39 = vld [vmem:[#allocation5 + $0x50] sm:$0xf]  ;;  %v1846_v14 = vpop.f32.mrf.mxu1 }
 0x451   :  { %1421 = vst [vmem:[%s13879_s6 + $0xd1] sm:$0x1] %v1391_v33  ;;  %v11185_v33 = vld [vmem:[#allocation5 + $0x58] sm:$0xf0] }
 0x452   :  { %1422 = vst [vmem:[%s13879_s6 + $0xe1] sm:$0x1] %v1392_v40  ;;  %v8731_v40 = vor.u32 %v11181_v19, %v8730_v36  ;;  %v8751_v57 = vor.u32 %v11185_v33, %v8750_v39  ;;  %v8864_v36 = vld [vmem:[#allocation7 + $0x68] sm:$0xf]  ;;  %v11212_v19 = vld [vmem:[#allocation7 + $0x70] sm:$0xf0] }
 0x453   :  { %1423 = vst [vmem:[%s13879_s6 + $0xf1] sm:$0x1] %v1393_v41  ;;  %v8735_v41 = vor.u32 %v11180_v37, %v8732_v38  ;;  %v11207_v37 = vld [vmem:[#allocation7 + $0x4c] sm:$0xf]  ;;  %v8846_v38 = vld [vmem:[#allocation7 + $0x54] sm:$0xf0] }
 0x454   :  { %1632 = vmatpush.bf16.msrb.mxu2 %v8731_v40  ;;  %v8852_v39 = vld [vmem:[#allocation7 + $0x50] sm:$0xf]  ;;  %v11209_v33 = vld [vmem:[#allocation7 + $0x58] sm:$0xf0]  ;;  %v8849_v40 = vor.u32 %v11207_v37, %v8846_v38  ;;  %v11276_v37 = vld [vmem:[#allocation7 + $0xb0] sm:$0xf0] }
 0x4b6   :  { %v1425_v42 = vpop.xlane.xlu0 %1424 }
 0x4b7   :  { %vm1428_vm9 = vcmp.eq.f32.partialorder %v1374_v31, %v1425_v42  ;;  %v11183_v31 = vld [vmem:[#allocation5 + $0x4c] sm:$0xf]  ;;  %v8718_v42 = vld [vmem:[#allocation5 + $0x18] sm:$0xf] }
 0x4b8   :  { %v12508_v43 = vsel %vm1428_vm9, %v12222_v10, 128  ;;  %v8747_v34 = vor.u32 %v11183_v31, %v8744_v32  ;;  %v8873_v31 = vor.u32 %v11213_v21, %v8870_v22  ;;  %v8714_v32 = vld [vmem:[#allocation5 + $0x8] sm:$0xf] }
 0x4b9   :  { %v1433_v45 = vshra.s32 %v12508_v43, 16  ;;  %v1432_v24 = vand.u32 65535, %v12508_v43  ;;  %v11226_v22 = vld [vmem:[#allocation10 + $0x20] sm:$0xff] }
 0x4ba   :  { %1645 = vmatpush.bf16.msrb.mxu3 %v8747_v34  ;;  %v8858_v34 = vld [vmem:[#allocation7 + $0x6c] sm:$0xf0] }
 0x4bb   :  { %v12511_v46 = vcvt.s32.f32 %v1433_v45  ;;  %v11178_v45 = vld [vmem:[#allocation5 + $0x20] sm:$0xf0] }
 0x4bc   :  { %v8719_v59 = vor.u32 %v11178_v45, %v8718_v42  ;;  %v11204_v42 = vld [vmem:[#allocation7 + $0x34] sm:$0xf]  ;;  %v8834_v45 = vld [vmem:[#allocation7 + $0x3c] sm:$0xf0] }
 0x4bd   :  { %1436 = vmin.xlane.f32.xlu2 %v12511_v46  ;;  %v8837_v53 = vor.u32 %v11204_v42, %v8834_v45 }
 0x4be   :  { %v1427_v47 = vpop.xlane.xlu1 %1426  ;;  %1646 = vmatpush.bf16.msrb.mxu3 %v8735_v41  ;;  %1633 = vmatpush.bf16.msrb.mxu2 %v8719_v59  ;;  %v8853_v41 = vor.u32 %v11209_v33, %v8852_v39  ;;  %v8822_v59 = vld [vmem:[#allocation7 + $0x24] sm:$0xf0] }
 0x4bf   :  { %vm1429_vm10 = vcmp.eq.f32.partialorder %v1376_v26, %v1427_v47  ;;  %v8763_v26 = vor.u32 %v11188_v35, %v8762_v30  ;;  %v11176_v30 = vld [vmem:[#allocation5 + $0x10] sm:$0xf0]  ;;  %v11210_v35 = vld [vmem:[#allocation7 + $0x64] sm:$0xf] }
 0x4c0   :  { %v12515_v48 = vsel %vm1429_vm10, %v12222_v10, 128  ;;  %v8715_v55 = vor.u32 %v11176_v30, %v8714_v32 }
 0x4c1   :  { %v1447_v49 = vshra.s32 %v12515_v48, 16  ;;  %1658 = vmatpush.bf16.msra.mxu0 %v8763_v26  ;;  %v1446_v60 = vand.u32 65535, %v12515_v48  ;;  %v8897_v48 = vor.u32 %v11219_v1, %v8894_v2  ;;  %v8861_v26 = vor.u32 %v11210_v35, %v8858_v34  ;;  %v8816_v1 = vld [vmem:[#allocation7 + $0x8] sm:$0xf]  ;;  %v11200_v2 = vld [vmem:[#allocation7 + $0x10] sm:$0xf0] }
 0x4c2   :  { %1647 = vmatpush.bf16.msrb.mxu3 %v8723_v61  ;;  %1634 = vmatpush.bf16.msrb.mxu2 %v8707_v5  ;;  %v11203_v61 = vld [vmem:[#allocation7 + $0x28] sm:$0xf0]  ;;  %v8817_v4 = vor.u32 %v11200_v2, %v8816_v1  ;;  %v11224_v34 = vld [vmem:[#allocation10 + $0x10] sm:$0xff] }
 0x4c3   :  { %v12518_v50 = vcvt.s32.f32 %v1447_v49  ;;  %v1434_v49 = vcvt.s32.f32 %v1432_v24  ;;  %v1448_v7 = vcvt.s32.f32 %v1446_v60  ;;  %v8865_v24 = vor.u32 %v11212_v19, %v8864_v36  ;;  %v8828_v60 = vld [vmem:[#allocation7 + $0x20] sm:$0xf] }
 0x4c4   :  { %v8829_v62 = vor.u32 %v11203_v61, %v8828_v60 }
 0x4c5   :  { %1450 = vmin.xlane.f32.xlu0 %v12518_v50  ;;  %1659 = vmatpush.bf16.msra.mxu0 %v8751_v57 }
 0x4c6   :  { %1851 = vmatpush.bf16.msra.mxu2 %v8897_v48 }
 0x4c9   :  { %1660 = vmatpush.bf16.msra.mxu0 %v8739_v13 }
 0x4ca   :  { %1852 = vmatpush.bf16.msra.mxu2 %v8885_v17 }
 0x4ce   :  { %1853 = vmatpush.bf16.msra.mxu2 %v8873_v31 }
 0x4d2   :  { %1854 = vmatpush.bf16.msra.mxu2 %v8861_v26  ;;  %v11223_v26 = vld [vmem:[#allocation10 + $0x8] sm:$0xff] }
 0x4d6   :  { %1855 = vmatpush.bf16.msra.mxu2 %v8849_v40  ;;  %v11222_v40 = vld [vmem:[#allocation10] sm:$0xff] }
 0x4da   :  { %1856 = vmatpush.bf16.msra.mxu2 %v8837_v53  ;;  %v9116_v53 = vld [vmem:[#allocation7 + $0x90] sm:$0xf] }
 0x530   :  { %v12522_v47 = vpop.xlane.xlu2 %1436 }
 0x531   :  { %vm1438_vm11 = vcmp.eq.f32.partialorder %v12511_v46, %v12522_v47  ;;  %v8711_v46 = vor.u32 %v11174_v63, %v8708_v0  ;;  %v11198_v63 = vld [vmem:[#allocation7 + $0x4] sm:$0xf]  ;;  %v8810_v0 = vld [vmem:[#allocation7 + $0xc] sm:$0xf0] }
 0x532   :  { %v1439_v43 = vsel %vm1438_vm11, %v1434_v49, inf  ;;  %v8840_v49 = vld [vmem:[#allocation7 + $0x38] sm:$0xf]  ;;  %v8813_v3 = vor.u32 %v11198_v63, %v8810_v0 }
 0x533   :  { %1440 = vmin.xlane.f32.xlu1 %v1439_v43  ;;  %1648 = vmatpush.bf16.msrb.mxu3 %v8711_v46  ;;  %v8841_v57 = vor.u32 %v11206_v51, %v8840_v49  ;;  %v11201_v43 = vld [vmem:[#allocation7 + $0x1c] sm:$0xf]  ;;  %v1443_v46 = vcvt.f32.s32 %v12522_v47  ;;  %v12540_v47 = vld [vmem:[#allocation8] sm:$0x7] }
 0x534   :  { %v8825_v52 = vor.u32 %v11201_v43, %v8822_v59  ;;  %v1703_v15 = vperm.slane %v12540_v47, 0 }
 0x536   :  { %1857 = vmatpush.bf16.msra.mxu2 %v8825_v52  ;;  %v1847_v17 = vadd.f32 %v1846_v14, %v1703_v15  ;;  %v9104_v52 = vld [vmem:[#allocation7 + $0x78] sm:$0xf]  ;;  %v11264_v14 = vld [vmem:[#allocation7 + $0x50] sm:$0xf0] }
 0x537   :  { %1865 = vmatpush.bf16.msra.mxu3 %v8901_v8  ;;  %v1444_v8 = vshll.u32 %v1443_v46, 16 }
 0x538   :  { %v12527_v6 = vpop.xlane.xlu0 %1450 }
 0x539   :  { %vm1452_vm12 = vcmp.eq.f32.partialorder %v12518_v50, %v12527_v6  ;;  %v8727_v50 = vor.u32 %v11179_v20, %v8726_v11  ;;  %v11227_v20 = vld [vmem:[#allocation10 + $0x28] sm:$0xff] }
 0x53a   :  { %v1453_v9 = vsel %vm1452_vm12, %v1448_v7, inf  ;;  %1858 = vmatpush.bf16.msra.mxu2 %v8813_v3  ;;  %v1457_v7 = vcvt.f32.s32 %v12527_v6  ;;  %v11229_v6 = vld [vmem:[#allocation10 + $0x38] sm:$0xff] }
 0x53b   :  { %1454 = vmin.xlane.f32.xlu2 %v1453_v9  ;;  %1866 = vmatpush.bf16.msra.mxu3 %v8889_v18 }
 0x53c   :  { %1661 = vmatpush.bf16.msra.mxu0 %v8727_v50  ;;  %v1458_v54 = vshll.u32 %v1457_v7, 16  ;;  %v1848_v50 = vpop.f32.mrf.mxu1  ;;  %v9092_v7 = vld [vmem:[#allocation7 + $0x60] sm:$0xf] }
 0x53d   :  { %v1849_v28 = vadd.f32 %v1848_v50, %v1703_v15 }
 0x53f   :  { %1867 = vmatpush.bf16.msra.mxu3 %v8877_v58  ;;  %v11225_v58 = vld [vmem:[#allocation10 + $0x18] sm:$0xff] }
 0x540   :  { %1662 = vmatpush.bf16.msra.mxu0 %v8715_v55  ;;  %v1704_v55 = vperm.slane %v12540_v47, 1 }
 0x543   :  { %1868 = vmatpush.bf16.msra.mxu3 %v8865_v24  ;;  %v9128_v24 = vld [vmem:[#allocation7 + $0xa8] sm:$0xf] }
 0x544   :  { %2042 = vmatpush.bf16.msrb.mxu0 %v11229_v6  ;;  %v9129_v45 = vor.u32 %v11276_v37, %v9128_v24  ;;  %v9080_v6 = vld [vmem:[#allocation7 + $0x48] sm:$0xf] }
 0x545   :  { %v9081_v50 = vor.u32 %v11264_v14, %v9080_v6 }
 0x547   :  { %1869 = vmatpush.bf16.msra.mxu3 %v8853_v41 }
 0x548   :  { %2043 = vmatpush.bf16.msrb.mxu0 %v11228_v16  ;;  %v1705_v16 = vperm.slane %v12540_v47, 2 }
 0x54b   :  { %1870 = vmatpush.bf16.msra.mxu3 %v8841_v57  ;;  %v11273_v57 = vld [vmem:[#allocation7 + $0x98] sm:$0xf0] }
 0x54c   :  { %2044 = vmatpush.bf16.msrb.mxu0 %v11227_v20  ;;  %v9117_v60 = vor.u32 %v11273_v57, %v9116_v53  ;;  %v9044_v57 = vld [vmem:[#allocation7] sm:$0xf] }
 0x54f   :  { %1871 = vmatpush.bf16.msra.mxu3 %v8829_v62  ;;  %v11270_v62 = vld [vmem:[#allocation7 + $0x80] sm:$0xf0] }
 0x550   :  { %2045 = vmatpush.bf16.msrb.mxu0 %v11226_v22  ;;  %v9105_v2 = vor.u32 %v11270_v62, %v9104_v52 }
 0x553   :  { %1872 = vmatpush.bf16.msra.mxu3 %v8817_v4 }
 0x554   :  { %2046 = vmatpush.bf16.msrb.mxu0 %v11225_v58 }
 0x558   :  { %2047 = vmatpush.bf16.msrb.mxu0 %v11224_v34 }
 0x55c   :  { %2048 = vmatpush.bf16.msrb.mxu0 %v11223_v26 }
 0x560   :  { %2049 = vmatpush.bf16.msrb.mxu0 %v11222_v40 }
 0x5a6   :  { %v1441_v5 = vpop.xlane.xlu1 %1440 }
 0x5a7   :  { %v1442_v48 = vcvt.f32.s32 %v1441_v5 }
 0x5a9   :  { %v1445_v12 = vadd.s32 %v1444_v8, %v1442_v48  ;;  %v11267_v48 = vld [vmem:[#allocation7 + $0x68] sm:$0xf0] }
 0x5ab   :  { %vm1460_vm13 = vcmp.eq.s32.totalorder %v12222_v10, %v1445_v12  ;;  %v9093_v12 = vor.u32 %v11267_v48, %v9092_v7 }
 0x5ae   :  { %v1455_v9 = vpop.xlane.xlu2 %1454 }
 0x5af   :  { %v1456_v56 = vcvt.f32.s32 %v1455_v9 }
 0x5b1   :  { %v1459_v13 = vadd.s32 %v1458_v54, %v1456_v56 }
 0x5b3   :  { %vm1461_vm14 = vcmp.eq.s32.totalorder %v12222_v10, %v1459_v13 }
 0x5b4   :  { %vm8800_vm15 = vmpackc.low %vm1461_vm14, %vm1460_vm13 }
 0x5b5   :  { %8801 = vmatmul.msk.bf16.vlgmr.msrb.gmra.mxu2 %vm8800_vm15, %v12162_v44  ;;  %8803 = vmatmul.msk.bf16.vlgmr.msrb.gmra.mxu3 %vm8800_vm15, %v12162_v44 }
 0x5b6   :  { %8805 = vmatmul.msk.bf16.vlgmr.msra.gmra.mxu0 %vm8800_vm15, %v12162_v44 }
 0x5b7   :  { %2515 = vmatpush.bf16.msra.mxu0 %v9129_v45 }
 0x5bb   :  { %2516 = vmatpush.bf16.msra.mxu0 %v9117_v60 }
 0x5bf   :  { %2517 = vmatpush.bf16.msra.mxu0 %v9105_v2 }
 0x5c3   :  { %2518 = vmatpush.bf16.msra.mxu0 %v9093_v12 }
 0x5c5   :  { %1859 = vmatmul.bf16.vlgmr.msra.gmra.mxu2 %v12452_v27  ;;  %1873 = vmatmul.bf16.vlgmr.msra.gmra.mxu3 %v12452_v27 }
 0x5c7   :  { %2519 = vmatpush.bf16.msra.mxu0 %v9081_v50 }
 0x638   :  { %v1636_v18 = vpop.f32.mrf.mxu2  ;;  %v1650_v29 = vpop.f32.mrf.mxu3 }
 0x639   :  { %v1879_v11 = vadd.f32 %v1847_v17, %v1636_v18 }
 0x63b   :  { %v8902_v21 = vmul.f32 -1.442695, %v1879_v11 }
 0x63d   :  { %11799 = vpow2.f32 %v8902_v21 }
 0x640   :  { %v1638_v27 = vpop.f32.mrf.mxu2  ;;  %v1652_v39 = vpop.f32.mrf.mxu3 }
 0x641   :  { %v1880_v31 = vadd.f32 %v1849_v28, %v1638_v27  ;;  %v1664_v28 = vpop.f32.mrf.mxu0 }
 0x643   :  { %v11800_v32 = vpop.eup %11799  ;;  %v8903_v30 = vmul.f32 -1.442695, %v1880_v31  ;;  %v11261_v31 = vld [vmem:[#allocation7 + $0x38] sm:$0xf0] }
 0x644   :  { %v12543_v35 = vadd.f32 1.0, %v11800_v32 }
 0x645   :  { %11801 = vpow2.f32 %v8903_v30 }
 0x646   :  { %11803 = vrcp.f32 %v12543_v35  ;;  %v1900_v56 = vand.u32 2147483648, %v12543_v35  ;;  %vm1894_vm1 = vweird.f32 %v12543_v35  ;;  %v1898_v15 = vand.u32 2147483647, %v12543_v35 }
 0x648   :  { %v1860_v36 = vpop.f32.mrf.mxu2  ;;  %v1874_v4 = vpop.f32.mrf.mxu3  ;;  %v1901_v47 = vor.u32 1.1754944e-38, %v1900_v56  ;;  %vm1899_vm6 = vcmp.eq.f32.partialorder %v1898_v15, 8.507059e+37 }
 0x649   :  { %v1861_v19 = vadd.f32 %v1860_v36, %v1704_v55 }
 0x64b   :  { %v11802_v38 = vpop.eup %11801  ;;  %v1919_v33 = vadd.f32 %v1861_v19, %v1650_v29  ;;  %v9068_v29 = vld [vmem:[#allocation7 + $0x30] sm:$0xf]  ;;  %v1875_v19 = vadd.f32 %v1874_v4, %v1705_v16 }
 0x64c   :  { %v12547_v41 = vpop.eup %11803  ;;  %v12549_v42 = vadd.f32 1.0, %v11802_v38  ;;  %v9069_v26 = vor.u32 %v11261_v31, %v9068_v29  ;;  %v9056_v38 = vld [vmem:[#allocation7 + $0x18] sm:$0xf] }
 0x64d   :  { %v8904_v49 = vmul.f32 -1.442695, %v1919_v33  ;;  %v1890_v51 = vmul.f32 %v12547_v41, %v12543_v35  ;;  %vm1895_vm0 = vweird.f32 %v12547_v41 }
 0x64e   :  { %11805 = vrcp.f32 %v12549_v42  ;;  %vm12565_vm3 = vmor %vm1894_vm1, %vm1895_vm0  ;;  %v1915_v11 = vand.u32 2147483648, %v12549_v42  ;;  %vm1909_vm4 = vweird.f32 %v12549_v42  ;;  %v1913_v21 = vand.u32 2147483647, %v12549_v42  ;;  %2520 = vmatpush.bf16.msra.mxu0 %v9069_v26 }
 0x64f   :  { %11807 = vpow2.f32 %v8904_v49  ;;  %v1891_v43 = vsub.f32 1.0, %v1890_v51 }
 0x650   :  { %v1862_v59 = vpop.f32.mrf.mxu2  ;;  %v1876_v34 = vpop.f32.mrf.mxu3  ;;  %v1916_v36 = vor.u32 1.1754944e-38, %v1915_v11  ;;  %vm1914_vm7 = vcmp.eq.f32.partialorder %v1913_v21, 8.507059e+37 }
 0x651   :  { %v1863_v61 = vadd.f32 %v1862_v59, %v1704_v55  ;;  %v1892_v1 = vmul.f32 %v12547_v41, %v1891_v43  ;;  %v1877_v40 = vadd.f32 %v1876_v34, %v1705_v16  ;;  %v11255_v43 = vld [vmem:[#allocation7 + $0x8] sm:$0xf0] }
 0x653   :  { %v1920_v63 = vadd.f32 %v1863_v61, %v1652_v39  ;;  %v1893_v54 = vadd.f32 %v12547_v41, %v1892_v1  ;;  %v11258_v39 = vld [vmem:[#allocation7 + $0x20] sm:$0xf0]  ;;  %v1666_v61 = vpop.f32.mrf.mxu0  ;;  %v9045_v1 = vor.u32 %v11255_v43, %v9044_v57  ;;  %v9014_v57 = vld [vmem:[#allocation5 + $0x90] sm:$0xf]  ;;  %v11249_v43 = vld [vmem:[#allocation5 + $0x98] sm:$0xf0] }
 0x654   :  { %v11806_v0 = vpop.eup %11805  ;;  %v9057_v49 = vor.u32 %v11258_v39, %v9056_v38 }
 0x655   :  { %v11808_v3 = vpop.eup %11807  ;;  %v8905_v5 = vmul.f32 -1.442695, %v1920_v63  ;;  %v1905_v46 = vmul.f32 %v11806_v0, %v12549_v42  ;;  %vm1910_vm2 = vweird.f32 %v11806_v0  ;;  %v1897_v20 = vsel %vm12565_vm3, %v12547_v41, %v1893_v54 }
 0x656   :  { %v12556_v8 = vadd.f32 1.0, %v11808_v3  ;;  %vm12575_vm5 = vmor %vm1909_vm4, %vm1910_vm2  ;;  %v1902_v55 = vsel %vm1899_vm6, %v1901_v47, %v1897_v20  ;;  %2521 = vmatpush.bf16.msra.mxu0 %v9057_v49  ;;  %v11749_v20 = vld [vmem:[%s13878_s5] ss:$0 sm:$0xff]  ;;  %v11251_v49 = vld [vmem:[#allocation5 + $0xac] sm:$0xf] }
 0x657   :  { %11809 = vpow2.f32 %v8905_v5  ;;  %v1906_v9 = vsub.f32 1.0, %v1905_v46  ;;  %v1959_v33 = vmul.f32 %v1902_v55, %v1875_v19 }
 0x658   :  { %11811 = vrcp.f32 %v12556_v8  ;;  %v1940_v45 = vand.u32 2147483648, %v12556_v8  ;;  %vm1934_vm9 = vweird.f32 %v12556_v8  ;;  %v1938_v53 = vand.u32 2147483647, %v12556_v8 }
 0x659   :  { %v1907_v13 = vmul.f32 %v11806_v0, %v1906_v9  ;;  %v1961_v60 = vadd.f32 %v1959_v33, %v1664_v28 }
 0x65a   :  { %vm1939_vm11 = vcmp.eq.f32.partialorder %v1938_v53, 8.507059e+37  ;;  %2522 = vmatpush.bf16.msra.mxu0 %v9045_v1  ;;  %v9028_v53 = vld [vmem:[#allocation5 + $0xb4] sm:$0xf0]  ;;  %v11245_v1 = vld [vmem:[#allocation5 + $0x7c] sm:$0xf] }
 0x65b   :  { %v1908_v18 = vadd.f32 %v11806_v0, %v1907_v13 }
 0x65d   :  { %v11810_v22 = vpop.eup %11809  ;;  %v1912_v30 = vsel %vm12575_vm5, %v11806_v0, %v1908_v18  ;;  %v1941_v0 = vor.u32 1.1754944e-38, %v1940_v45  ;;  %v11252_v45 = vld [vmem:[#allocation5 + $0xb0] sm:$0xf0] }
 0x65e   :  { %v11812_v58 = vpop.eup %11811  ;;  %v1928_v32 = vadd.f32 1.0, %v11810_v22  ;;  %v1917_v37 = vsel %vm1914_vm7, %v1916_v36, %v1912_v30 }
 0x65f   :  { %v1930_v35 = vmul.f32 %v11812_v58, %v12556_v8  ;;  %vm1935_vm8 = vweird.f32 %v11812_v58  ;;  %v1960_v42 = vmul.f32 %v1917_v37, %v1877_v40 }
 0x660   :  { %11813 = vrcp.f32 %v1928_v32  ;;  %vm1936_vm10 = vmor %vm1934_vm9, %vm1935_vm8  ;;  %v1955_v4 = vand.u32 2147483648, %v1928_v32  ;;  %v1953_v46 = vand.u32 2147483647, %v1928_v32  ;;  %vm1949_vm13 = vweird.f32 %v1928_v32 }
 0x661   :  { %v1931_v24 = vsub.f32 1.0, %v1930_v35  ;;  %v1962_v63 = vadd.f32 %v1960_v42, %v1666_v61  ;;  %11815 = vtanh.f32 %v1961_v60  ;;  %v9026_v42 = vld [vmem:[#allocation5 + $0xa8] sm:$0xf]  ;;  %v11248_v60 = vld [vmem:[#allocation5 + $0x94] sm:$0xf] }
 0x662   :  { %v1956_v8 = vor.u32 1.1754944e-38, %v1955_v4  ;;  %vm1954_vm15 = vcmp.eq.f32.partialorder %v1953_v46, 8.507059e+37  ;;  %v9016_v61 = vld [vmem:[#allocation5 + $0x9c] sm:$0xf0]  ;;  %v11253_v4 = vld [vmem:[#allocation5 + $0xb8] sm:$0xf0] }
 0x663   :  { %v1932_v41 = vmul.f32 %v11812_v58, %v1931_v24  ;;  %11817 = vtanh.f32 %v1962_v63  ;;  %v9002_v63 = vld [vmem:[#allocation5 + $0x78] sm:$0xf] }
 0x665   :  { %v1933_v51 = vadd.f32 %v11812_v58, %v1932_v41 }
 0x666   :  { %v11814_v59 = vpop.eup %11813 }
 0x667   :  { %v1945_v52 = vmul.f32 %v11814_v59, %v1928_v32  ;;  %v1937_v62 = vsel %vm1936_vm10, %v11812_v58, %v1933_v51  ;;  %vm1950_vm12 = vweird.f32 %v11814_v59  ;;  %v11816_v54 = vpop.eup %11815  ;;  %v9027_v51 = vor.u32 %v11252_v45, %v9026_v42  ;;  %v11233_v42 = vld [vmem:[#allocation5 + $0x1c] sm:$0xf]  ;;  %v8956_v45 = vld [vmem:[#allocation5 + $0x24] sm:$0xf0] }
 0x668   :  { %v1942_v3 = vsel %vm1939_vm11, %v1941_v0, %v1937_v62  ;;  %vm1951_vm14 = vmor %vm1949_vm13, %vm1950_vm12  ;;  %v9019_v62 = vor.u32 %v11248_v60, %v9016_v61  ;;  %v11246_v0 = vld [vmem:[#allocation5 + $0x80] sm:$0xf0]  ;;  %v8944_v61 = vld [vmem:[#allocation5 + $0xc] sm:$0xf0] }
 0x669   :  { %v1946_v2 = vsub.f32 1.0, %v1945_v52  ;;  %v1965_v48 = vsub.f32 1.0, %v1942_v3  ;;  %v11818_v6 = vpop.eup %11817  ;;  %v1969_v15 = vmul.f32 %v1942_v3, %v12446_v23  ;;  %2305 = vmatpush.bf16.msrb.mxu1 %v9027_v51  ;;  %v9015_v52 = vor.u32 %v11249_v43, %v9014_v57  ;;  %v9034_v3 = vld [vmem:[#allocation5 + $0xb0] sm:$0xf]  ;;  %v8942_v43 = vld [vmem:[#allocation5] sm:$0xf] }
 0x66a   :  { %v9003_v46 = vor.u32 %v11246_v0, %v9002_v63  ;;  %v8959_v57 = vor.u32 %v11233_v42, %v8956_v45  ;;  %v11230_v60 = vld [vmem:[#allocation5 + $0x4] sm:$0xf]  ;;  %v9136_v63 = vld [vmem:[#allocation7 + $0xb0] sm:$0xf]  ;;  %v11277_v0 = vld [vmem:[#allocation7 + $0xb8] sm:$0xf0] }
 0x66b   :  { %v1947_v5 = vmul.f32 %v11814_v59, %v1946_v2  ;;  %v1967_v13 = vmul.f32 %v11816_v54, %v1965_v48  ;;  %v9004_v2 = vld [vmem:[#allocation5 + $0x84] sm:$0xf0]  ;;  %v11250_v48 = vld [vmem:[#allocation5 + $0xa0] sm:$0xf0]  ;;  %v11243_v54 = vld [vmem:[#allocation5 + $0x68] sm:$0xf0] }
 0x66c   :  { %v11262_v42 = vld [vmem:[#allocation7 + $0x40] sm:$0xf0] }
 0x66d   :  { %v1948_v7 = vadd.f32 %v11814_v59, %v1947_v5  ;;  %v12587_v17 = vadd.f32 %v1969_v15, %v1967_v13  ;;  %v9035_v5 = vor.u32 %v11253_v4, %v9034_v3  ;;  %2306 = vmatpush.bf16.msrb.mxu1 %v9015_v52  ;;  %v8992_v13 = vld [vmem:[#allocation5 + $0x6c] sm:$0xf0]  ;;  %v11275_v52 = vld [vmem:[#allocation7 + $0xac] sm:$0xf]  ;;  %v9137_v4 = vor.u32 %v11277_v0, %v9136_v63 }
 0x66f   :  { %v1952_v9 = vsel %vm1951_vm14, %v11814_v59, %v1948_v7  ;;  %v9031_v59 = vor.u32 %v11251_v49, %v9028_v53  ;;  %v9022_v7 = vld [vmem:[#allocation5 + $0x98] sm:$0xf]  ;;  %2333 = vmatpush.bf16.msrb.mxu3 %v9035_v5 }
 0x670   :  { %v1957_v12 = vsel %vm1954_vm15, %v1956_v8, %v1952_v9  ;;  %v9007_v8 = vor.u32 %v11245_v1, %v9004_v2  ;;  %v8990_v9 = vld [vmem:[#allocation5 + $0x60] sm:$0xf] }
 0x671   :  { %v1966_v56 = vsub.f32 1.0, %v1957_v12  ;;  %v1970_v16 = vmul.f32 %v1957_v12, %v12448_v25  ;;  %2319 = vmatpush.bf16.msrb.mxu2 %v9031_v59  ;;  %v11242_v12 = vld [vmem:[#allocation5 + $0x64] sm:$0xf]  ;;  %2307 = vmatpush.bf16.msrb.mxu1 %v9003_v46  ;;  %v8991_v15 = vor.u32 %v11243_v54, %v8990_v9  ;;  %v11231_v59 = vld [vmem:[#allocation5 + $0x8] sm:$0xf0] }
 0x672   :  { %v8943_v1 = vor.u32 %v11231_v59, %v8942_v43  ;;  %v8974_v46 = vld [vmem:[#allocation5 + $0x38] sm:$0xf]  ;;  %v9118_v9 = vld [vmem:[#allocation7 + $0x9c] sm:$0xf0] }
 0x673   :  { %v1968_v14 = vmul.f32 %v11818_v6, %v1966_v56  ;;  %v9023_v56 = vor.u32 %v11250_v48, %v9022_v7  ;;  %v9010_v6 = vld [vmem:[#allocation5 + $0x80] sm:$0xf]  ;;  %v11238_v7 = vld [vmem:[#allocation5 + $0x40] sm:$0xf0]  ;;  %v11272_v48 = vld [vmem:[#allocation7 + $0x94] sm:$0xf] }
 0x674   :  { %v9124_v54 = vld [vmem:[#allocation7 + $0x98] sm:$0xf] }
 0x675   :  { %v12589_v18 = vadd.f32 %v1970_v16, %v1968_v14  ;;  %2320 = vmatpush.bf16.msrb.mxu2 %v9019_v62  ;;  %v11247_v14 = vld [vmem:[#allocation5 + $0x88] sm:$0xf0]  ;;  %v8995_v16 = vor.u32 %v11242_v12, %v8992_v13  ;;  %2334 = vmatpush.bf16.msrb.mxu3 %v9023_v56  ;;  %v9130_v62 = vld [vmem:[#allocation7 + $0xb4] sm:$0xf0]  ;;  %v11274_v12 = vld [vmem:[#allocation7 + $0xa0] sm:$0xf0]  ;;  %v9121_v56 = vor.u32 %v11272_v48, %v9118_v9 }
 0x676   :  { %2308 = vmatpush.bf16.msrb.mxu1 %v8991_v15  ;;  %v9125_v13 = vor.u32 %v11274_v12, %v9124_v54  ;;  %v11269_v15 = vld [vmem:[#allocation7 + $0x7c] sm:$0xf]  ;;  %v11284_v12 = vld [vmem:[#allocation10 + $0x30] sm:$0xff] }
 0x677   :  { %v12593_v11 = vpack.c.bf16 %v12589_v18, %v12587_v17 }
 0x679   :  { %2050 = vmatmul.bf16.vlgmr.msrb.gmra.mxu0 %v12593_v11  ;;  %2321 = vmatpush.bf16.msrb.mxu2 %v9007_v8  ;;  %v8975_v8 = vor.u32 %v11238_v7, %v8974_v46 }
 0x67d   :  { %2322 = vmatpush.bf16.msrb.mxu2 %v8995_v16  ;;  %v9106_v16 = vld [vmem:[#allocation7 + $0x84] sm:$0xf0] }
 0x689   :  { %2523 = vmatmul.bf16.vlgmr.msra.gmra.mxu0 %v12593_v11 }
 0x6f6   :  { %v2051_v21 = vpop.f32.mrf.mxu0 }
 0x6f7   :  { %v2052_v23 = vadd.f32 %v11749_v20, %v2051_v21  ;;  %v11240_v21 = vld [vmem:[#allocation5 + $0x50] sm:$0xf0] }
 0x6f9   :  { %v2058_v50 = vrot.slane %v2052_v23, 1  ;;  %v2059_v25 = vrot.slane %v2052_v23, 2  ;;  %v2060_v22 = vrot.slane %v2052_v23, 3  ;;  %2086 = vst [vmem:[%s13879_s6 + $0x2] sm:$0x1] %v2052_v23  ;;  %2102 = vmax.xlane.f32.xlu0 %v2052_v23  ;;  %v2061_v28 = vrot.slane %v2052_v23, 4 }
 0x6fa   :  { %v2062_v47 = vrot.slane %v2052_v23, 5  ;;  %v2063_v27 = vrot.slane %v2052_v23, 6  ;;  %v2064_v29 = vrot.slane %v2052_v23, 7 }
 0x6fb   :  { %2087 = vst [vmem:[%s13879_s6 + $0x12] sm:$0x1] %v2058_v50  ;;  %v9011_v50 = vor.u32 %v11247_v14, %v9010_v6  ;;  %v8962_v6 = vld [vmem:[#allocation5 + $0x20] sm:$0xf]  ;;  %v11235_v14 = vld [vmem:[#allocation5 + $0x28] sm:$0xf0] }
 0x6fc   :  { %2088 = vst [vmem:[%s13879_s6 + $0x22] sm:$0x1] %v2059_v25  ;;  %v8980_v25 = vld [vmem:[#allocation5 + $0x54] sm:$0xf0] }
 0x6fd   :  { %2089 = vst [vmem:[%s13879_s6 + $0x32] sm:$0x1] %v2060_v22  ;;  %v8998_v22 = vld [vmem:[#allocation5 + $0x68] sm:$0xf]  ;;  %2335 = vmatpush.bf16.msrb.mxu3 %v9011_v50 }
 0x6fe   :  { %2090 = vst [vmem:[%s13879_s6 + $0x42] sm:$0x1] %v2061_v28  ;;  %v2053_v31 = vpop.f32.mrf.mxu0  ;;  %v11244_v28 = vld [vmem:[#allocation5 + $0x70] sm:$0xf0] }
 0x6ff   :  { %2091 = vst [vmem:[%s13879_s6 + $0x52] sm:$0x1] %v2062_v47  ;;  %v2054_v58 = vadd.f32 %v11749_v20, %v2053_v31  ;;  %v8978_v20 = vld [vmem:[#allocation5 + $0x48] sm:$0xf]  ;;  %v11237_v31 = vld [vmem:[#allocation5 + $0x38] sm:$0xf0] }
 0x700   :  { %2092 = vst [vmem:[%s13879_s6 + $0x62] sm:$0x1] %v2063_v27  ;;  %v8979_v47 = vor.u32 %v11240_v21, %v8978_v20  ;;  %v9112_v20 = vld [vmem:[#allocation7 + $0x80] sm:$0xf]  ;;  %v11271_v21 = vld [vmem:[#allocation7 + $0x88] sm:$0xf0] }
 0x701   :  { %2093 = vst [vmem:[%s13879_s6 + $0x72] sm:$0x1] %v2064_v29  ;;  %v2065_v32 = vrot.slane %v2054_v58, 1  ;;  %v2066_v30 = vrot.slane %v2054_v58, 2  ;;  %v2067_v35 = vrot.slane %v2054_v58, 3  ;;  %2104 = vmax.xlane.f32.xlu1 %v2054_v58  ;;  %v2068_v55 = vrot.slane %v2054_v58, 4 }
 0x702   :  { %2094 = vst [vmem:[%s13879_s6 + $0x82] sm:$0x1] %v2054_v58  ;;  %v2069_v34 = vrot.slane %v2054_v58, 5  ;;  %v2070_v36 = vrot.slane %v2054_v58, 6  ;;  %v2071_v19 = vrot.slane %v2054_v58, 7  ;;  %2309 = vmatpush.bf16.msrb.mxu1 %v8979_v47  ;;  %v9113_v50 = vor.u32 %v11271_v21, %v9112_v20 }
 0x703   :  { %2095 = vst [vmem:[%s13879_s6 + $0x92] sm:$0x1] %v2065_v32  ;;  %v8966_v29 = vld [vmem:[#allocation5 + $0x30] sm:$0xf] }
 0x704   :  { %2096 = vst [vmem:[%s13879_s6 + $0xa2] sm:$0x1] %v2066_v30  ;;  %v11236_v30 = vld [vmem:[#allocation5 + $0x34] sm:$0xf] }
 0x705   :  { %2097 = vst [vmem:[%s13879_s6 + $0xb2] sm:$0x1] %v2067_v35  ;;  %v8968_v35 = vld [vmem:[#allocation5 + $0x3c] sm:$0xf0] }
 0x706   :  { %2098 = vst [vmem:[%s13879_s6 + $0xc2] sm:$0x1] %v2068_v55  ;;  %v8986_v55 = vld [vmem:[#allocation5 + $0x50] sm:$0xf]  ;;  %v2524_v9 = vpop.f32.mrf.mxu0 }
 0x707   :  { %2099 = vst [vmem:[%s13879_s6 + $0xd2] sm:$0x1] %v2069_v34  ;;  %v11241_v34 = vld [vmem:[#allocation5 + $0x58] sm:$0xf0] }
 0x708   :  { %2100 = vst [vmem:[%s13879_s6 + $0xe2] sm:$0x1] %v2070_v36  ;;  %v8967_v36 = vor.u32 %v11237_v31, %v8966_v29  ;;  %v8987_v49 = vor.u32 %v11241_v34, %v8986_v55  ;;  %v9100_v29 = vld [vmem:[#allocation7 + $0x68] sm:$0xf]  ;;  %v11268_v31 = vld [vmem:[#allocation7 + $0x70] sm:$0xf0] }
 0x709   :  { %2101 = vst [vmem:[%s13879_s6 + $0xf2] sm:$0x1] %v2071_v19  ;;  %v8971_v19 = vor.u32 %v11236_v30, %v8968_v35  ;;  %v11263_v30 = vld [vmem:[#allocation7 + $0x4c] sm:$0xf]  ;;  %v9082_v35 = vld [vmem:[#allocation7 + $0x54] sm:$0xf0] }
 0x70a   :  { %2310 = vmatpush.bf16.msrb.mxu1 %v8967_v36  ;;  %v9088_v55 = vld [vmem:[#allocation7 + $0x50] sm:$0xf]  ;;  %v11265_v34 = vld [vmem:[#allocation7 + $0x58] sm:$0xf0]  ;;  %v9085_v36 = vor.u32 %v11263_v30, %v9082_v35  ;;  %v11332_v30 = vld [vmem:[#allocation7 + $0xb0] sm:$0xf0] }
 0x76c   :  { %v2103_v26 = vpop.xlane.xlu0 %2102 }
 0x76d   :  { %vm2106_vm0 = vcmp.eq.f32.partialorder %v2052_v23, %v2103_v26  ;;  %v11239_v23 = vld [vmem:[#allocation5 + $0x4c] sm:$0xf]  ;;  %v8954_v26 = vld [vmem:[#allocation5 + $0x18] sm:$0xf] }
 0x76e   :  { %v12649_v24 = vsel %vm2106_vm0, %v12222_v10, 128  ;;  %v8983_v27 = vor.u32 %v11239_v23, %v8980_v25  ;;  %v9109_v23 = vor.u32 %v11269_v15, %v9106_v16  ;;  %v8950_v25 = vld [vmem:[#allocation5 + $0x8] sm:$0xf] }
 0x76f   :  { %v2111_v37 = vshra.s32 %v12649_v24, 16  ;;  %v2110_v32 = vand.u32 65535, %v12649_v24  ;;  %v11282_v16 = vld [vmem:[#allocation10 + $0x20] sm:$0xff] }
 0x770   :  { %2323 = vmatpush.bf16.msrb.mxu2 %v8983_v27  ;;  %v9094_v27 = vld [vmem:[#allocation7 + $0x6c] sm:$0xf0] }
 0x771   :  { %v12652_v38 = vcvt.s32.f32 %v2111_v37  ;;  %v11234_v37 = vld [vmem:[#allocation5 + $0x20] sm:$0xf0] }
 0x772   :  { %v8955_v51 = vor.u32 %v11234_v37, %v8954_v26  ;;  %v11260_v26 = vld [vmem:[#allocation7 + $0x34] sm:$0xf]  ;;  %v9070_v37 = vld [vmem:[#allocation7 + $0x3c] sm:$0xf0] }
 0x773   :  { %2114 = vmin.xlane.f32.xlu2 %v12652_v38  ;;  %v9073_v45 = vor.u32 %v11260_v26, %v9070_v37 }
 0x774   :  { %v2105_v39 = vpop.xlane.xlu1 %2104  ;;  %2324 = vmatpush.bf16.msrb.mxu2 %v8971_v19  ;;  %2311 = vmatpush.bf16.msrb.mxu1 %v8955_v51  ;;  %v9089_v19 = vor.u32 %v11265_v34, %v9088_v55  ;;  %v9058_v51 = vld [vmem:[#allocation7 + $0x24] sm:$0xf0] }
 0x775   :  { %vm2107_vm1 = vcmp.eq.f32.partialorder %v2054_v58, %v2105_v39  ;;  %v8999_v58 = vor.u32 %v11244_v28, %v8998_v22  ;;  %v11232_v22 = vld [vmem:[#allocation5 + $0x10] sm:$0xf0]  ;;  %v11266_v28 = vld [vmem:[#allocation7 + $0x64] sm:$0xf] }
 0x776   :  { %v12656_v33 = vsel %vm2107_vm1, %v12222_v10, 128  ;;  %v8951_v47 = vor.u32 %v11232_v22, %v8950_v25 }
 0x777   :  { %v2125_v40 = vshra.s32 %v12656_v33, 16  ;;  %2336 = vmatpush.bf16.msrb.mxu3 %v8999_v58  ;;  %v2124_v53 = vand.u32 65535, %v12656_v33  ;;  %v9133_v33 = vor.u32 %v11275_v52, %v9130_v62  ;;  %v9097_v58 = vor.u32 %v11266_v28, %v9094_v27  ;;  %v9052_v52 = vld [vmem:[#allocation7 + $0x8] sm:$0xf]  ;;  %v11256_v62 = vld [vmem:[#allocation7 + $0x10] sm:$0xf0] }
 0x778   :  { %2325 = vmatpush.bf16.msrb.mxu2 %v8959_v57  ;;  %2312 = vmatpush.bf16.msrb.mxu1 %v8943_v1  ;;  %v11259_v57 = vld [vmem:[#allocation7 + $0x28] sm:$0xf0]  ;;  %v9053_v0 = vor.u32 %v11256_v62, %v9052_v52  ;;  %v11280_v27 = vld [vmem:[#allocation10 + $0x10] sm:$0xff] }
 0x779   :  { %v12659_v41 = vcvt.s32.f32 %v2125_v40  ;;  %v2112_v40 = vcvt.s32.f32 %v2110_v32  ;;  %v2126_v3 = vcvt.s32.f32 %v2124_v53  ;;  %v9101_v32 = vor.u32 %v11268_v31, %v9100_v29  ;;  %v9064_v53 = vld [vmem:[#allocation7 + $0x20] sm:$0xf] }
 0x77a   :  { %v9065_v59 = vor.u32 %v11259_v57, %v9064_v53 }
 0x77b   :  { %2128 = vmin.xlane.f32.xlu0 %v12659_v41  ;;  %2337 = vmatpush.bf16.msrb.mxu3 %v8987_v49 }
 0x77c   :  { %2529 = vmatpush.bf16.msra.mxu1 %v9133_v33 }
 0x77f   :  { %2338 = vmatpush.bf16.msrb.mxu3 %v8975_v8 }
 0x780   :  { %2530 = vmatpush.bf16.msra.mxu1 %v9121_v56 }
 0x784   :  { %2531 = vmatpush.bf16.msra.mxu1 %v9109_v23 }
 0x788   :  { %2532 = vmatpush.bf16.msra.mxu1 %v9097_v58  ;;  %v11279_v58 = vld [vmem:[#allocation10 + $0x8] sm:$0xff] }
 0x78c   :  { %2533 = vmatpush.bf16.msra.mxu1 %v9085_v36  ;;  %v11278_v36 = vld [vmem:[#allocation10] sm:$0xff] }
 0x790   :  { %2534 = vmatpush.bf16.msra.mxu1 %v9073_v45  ;;  %v9352_v45 = vld [vmem:[#allocation7 + $0x90] sm:$0xf] }
 0x7e6   :  { %v12663_v39 = vpop.xlane.xlu2 %2114 }
 0x7e7   :  { %vm2116_vm2 = vcmp.eq.f32.partialorder %v12652_v38, %v12663_v39  ;;  %v8947_v38 = vor.u32 %v11230_v60, %v8944_v61  ;;  %v11254_v60 = vld [vmem:[#allocation7 + $0x4] sm:$0xf]  ;;  %v9046_v61 = vld [vmem:[#allocation7 + $0xc] sm:$0xf0] }
 0x7e8   :  { %v2117_v24 = vsel %vm2116_vm2, %v2112_v40, inf  ;;  %v9076_v40 = vld [vmem:[#allocation7 + $0x38] sm:$0xf]  ;;  %v9049_v63 = vor.u32 %v11254_v60, %v9046_v61 }
 0x7e9   :  { %2118 = vmin.xlane.f32.xlu1 %v2117_v24  ;;  %2326 = vmatpush.bf16.msrb.mxu2 %v8947_v38  ;;  %v9077_v49 = vor.u32 %v11262_v42, %v9076_v40  ;;  %v11257_v24 = vld [vmem:[#allocation7 + $0x1c] sm:$0xf]  ;;  %v2121_v38 = vcvt.f32.s32 %v12663_v39  ;;  %v12681_v39 = vld [vmem:[#allocation8] sm:$0x7] }
 0x7ea   :  { %v9061_v43 = vor.u32 %v11257_v24, %v9058_v51  ;;  %v2381_v54 = vperm.slane %v12681_v39, 0 }
 0x7ec   :  { %2535 = vmatpush.bf16.msra.mxu1 %v9061_v43  ;;  %v2525_v56 = vadd.f32 %v2524_v9, %v2381_v54  ;;  %v9340_v43 = vld [vmem:[#allocation7 + $0x78] sm:$0xf]  ;;  %v11320_v9 = vld [vmem:[#allocation7 + $0x50] sm:$0xf0] }
 0x7ed   :  { %2543 = vmatpush.bf16.msra.mxu2 %v9137_v4  ;;  %v2122_v4 = vshll.u32 %v2121_v38, 16 }
 0x7ee   :  { %v12668_v2 = vpop.xlane.xlu0 %2128 }
 0x7ef   :  { %vm2130_vm3 = vcmp.eq.f32.partialorder %v12659_v41, %v12668_v2  ;;  %v8963_v41 = vor.u32 %v11235_v14, %v8962_v6  ;;  %v11283_v14 = vld [vmem:[#allocation10 + $0x28] sm:$0xff] }
 0x7f0   :  { %v2131_v5 = vsel %vm2130_vm3, %v2126_v3, inf  ;;  %2536 = vmatpush.bf16.msra.mxu1 %v9049_v63  ;;  %v2135_v3 = vcvt.f32.s32 %v12668_v2  ;;  %v11285_v2 = vld [vmem:[#allocation10 + $0x38] sm:$0xff] }
 0x7f1   :  { %2132 = vmin.xlane.f32.xlu2 %v2131_v5  ;;  %2544 = vmatpush.bf16.msra.mxu2 %v9125_v13 }
 0x7f2   :  { %2339 = vmatpush.bf16.msrb.mxu3 %v8963_v41  ;;  %v2136_v46 = vshll.u32 %v2135_v3, 16  ;;  %v2526_v41 = vpop.f32.mrf.mxu0  ;;  %v9328_v3 = vld [vmem:[#allocation7 + $0x60] sm:$0xf] }
 0x7f3   :  { %v2527_v20 = vadd.f32 %v2526_v41, %v2381_v54 }
 0x7f5   :  { %2545 = vmatpush.bf16.msra.mxu2 %v9113_v50  ;;  %v11281_v50 = vld [vmem:[#allocation10 + $0x18] sm:$0xff] }
 0x7f6   :  { %2340 = vmatpush.bf16.msrb.mxu3 %v8951_v47  ;;  %v2382_v47 = vperm.slane %v12681_v39, 1 }
 0x7f9   :  { %2546 = vmatpush.bf16.msra.mxu2 %v9101_v32  ;;  %v9364_v32 = vld [vmem:[#allocation7 + $0xa8] sm:$0xf] }
 0x7fa   :  { %2720 = vmatpush.bf16.msra.mxu3 %v11285_v2  ;;  %v9365_v37 = vor.u32 %v11332_v30, %v9364_v32  ;;  %v9316_v2 = vld [vmem:[#allocation7 + $0x48] sm:$0xf] }
 0x7fb   :  { %v9317_v41 = vor.u32 %v11320_v9, %v9316_v2 }
 0x7fd   :  { %2547 = vmatpush.bf16.msra.mxu2 %v9089_v19 }
 0x7fe   :  { %2721 = vmatpush.bf16.msra.mxu3 %v11284_v12  ;;  %v2383_v12 = vperm.slane %v12681_v39, 2 }
 0x801   :  { %2548 = vmatpush.bf16.msra.mxu2 %v9077_v49  ;;  %v11329_v49 = vld [vmem:[#allocation7 + $0x98] sm:$0xf0] }
 0x802   :  { %2722 = vmatpush.bf16.msra.mxu3 %v11283_v14  ;;  %v9353_v53 = vor.u32 %v11329_v49, %v9352_v45  ;;  %v9280_v49 = vld [vmem:[#allocation7] sm:$0xf] }
 0x805   :  { %2549 = vmatpush.bf16.msra.mxu2 %v9065_v59  ;;  %v11326_v59 = vld [vmem:[#allocation7 + $0x80] sm:$0xf0] }
 0x806   :  { %2723 = vmatpush.bf16.msra.mxu3 %v11282_v16  ;;  %v9341_v62 = vor.u32 %v11326_v59, %v9340_v43 }
 0x809   :  { %2550 = vmatpush.bf16.msra.mxu2 %v9053_v0 }
 0x80a   :  { %2724 = vmatpush.bf16.msra.mxu3 %v11281_v50 }
 0x80e   :  { %2725 = vmatpush.bf16.msra.mxu3 %v11280_v27 }
 0x812   :  { %2726 = vmatpush.bf16.msra.mxu3 %v11279_v58 }
 0x816   :  { %2727 = vmatpush.bf16.msra.mxu3 %v11278_v36 }
 0x85c   :  { %v2119_v1 = vpop.xlane.xlu1 %2118 }
 0x85d   :  { %v2120_v33 = vcvt.f32.s32 %v2119_v1 }
 0x85f   :  { %v2123_v7 = vadd.s32 %v2122_v4, %v2120_v33  ;;  %v11323_v33 = vld [vmem:[#allocation7 + $0x68] sm:$0xf0] }
 0x861   :  { %vm2138_vm4 = vcmp.eq.s32.totalorder %v12222_v10, %v2123_v7  ;;  %v9329_v7 = vor.u32 %v11323_v33, %v9328_v3 }
 0x864   :  { %v2133_v5 = vpop.xlane.xlu2 %2132 }
 0x865   :  { %v2134_v48 = vcvt.f32.s32 %v2133_v5 }
 0x867   :  { %v2137_v8 = vadd.s32 %v2136_v46, %v2134_v48 }
 0x869   :  { %vm2139_vm5 = vcmp.eq.s32.totalorder %v12222_v10, %v2137_v8 }
 0x86a   :  { %vm9036_vm6 = vmpackc.low %vm2139_vm5, %vm2138_vm4 }
 0x86b   :  { %9037 = vmatmul.msk.bf16.vlgmr.msrb.gmra.mxu1 %vm9036_vm6, %v12162_v44  ;;  %9039 = vmatmul.msk.bf16.vlgmr.msrb.gmra.mxu2 %vm9036_vm6, %v12162_v44 }
 0x86c   :  { %9041 = vmatmul.msk.bf16.vlgmr.msrb.gmra.mxu3 %vm9036_vm6, %v12162_v44 }
 0x86d   :  { %3193 = vmatpush.bf16.msrb.mxu3 %v9365_v37 }
 0x871   :  { %3194 = vmatpush.bf16.msrb.mxu3 %v9353_v53 }
 0x875   :  { %3195 = vmatpush.bf16.msrb.mxu3 %v9341_v62 }
 0x879   :  { %3196 = vmatpush.bf16.msrb.mxu3 %v9329_v7 }
 0x87b   :  { %2537 = vmatmul.bf16.vlgmr.msra.gmra.mxu1 %v12593_v11  ;;  %2551 = vmatmul.bf16.vlgmr.msra.gmra.mxu2 %v12593_v11 }
 0x87d   :  { %3197 = vmatpush.bf16.msrb.mxu3 %v9317_v41 }
 0x8e8   :  { %v2314_v13 = vpop.f32.mrf.mxu1 }
 0x8e9   :  { %v2557_v6 = vadd.f32 %v2525_v56, %v2314_v13 }
 0x8eb   :  { %v9138_v15 = vmul.f32 -1.442695, %v2557_v6 }
 0x8ed   :  { %11819 = vpow2.f32 %v9138_v15 }
 0x8ee   :  { %v2328_v21 = vpop.f32.mrf.mxu2 }
 0x8f0   :  { %v2316_v11 = vpop.f32.mrf.mxu1 }
 0x8f1   :  { %v2558_v23 = vadd.f32 %v2527_v20, %v2316_v11  ;;  %v2342_v20 = vpop.f32.mrf.mxu3 }
 0x8f3   :  { %v11820_v25 = vpop.eup %11819  ;;  %v9139_v22 = vmul.f32 -1.442695, %v2558_v23  ;;  %v11317_v23 = vld [vmem:[#allocation7 + $0x38] sm:$0xf0] }
 0x8f4   :  { %v12684_v28 = vadd.f32 1.0, %v11820_v25 }
 0x8f5   :  { %11821 = vpow2.f32 %v9139_v22 }
 0x8f6   :  { %11823 = vrcp.f32 %v12684_v28  ;;  %v2330_v55 = vpop.f32.mrf.mxu2  ;;  %v2578_v48 = vand.u32 2147483648, %v12684_v28  ;;  %vm2572_vm8 = vweird.f32 %v12684_v28  ;;  %v2576_v54 = vand.u32 2147483647, %v12684_v28 }
 0x8f8   :  { %v2538_v29 = vpop.f32.mrf.mxu1  ;;  %v2579_v39 = vor.u32 1.1754944e-38, %v2578_v48  ;;  %vm2577_vm13 = vcmp.eq.f32.partialorder %v2576_v54, 8.507059e+37 }
 0x8f9   :  { %v2539_v31 = vadd.f32 %v2538_v29, %v2382_v47 }
 0x8fb   :  { %v11822_v35 = vpop.eup %11821  ;;  %v2597_v34 = vadd.f32 %v2539_v31, %v2328_v21  ;;  %v9304_v21 = vld [vmem:[#allocation7 + $0x30] sm:$0xf] }
 0x8fc   :  { %v12688_v19 = vpop.eup %11823  ;;  %v12690_v26 = vadd.f32 1.0, %v11822_v35  ;;  %v9305_v58 = vor.u32 %v11317_v23, %v9304_v21  ;;  %v9292_v35 = vld [vmem:[#allocation7 + $0x18] sm:$0xf] }
 0x8fd   :  { %v9140_v40 = vmul.f32 -1.442695, %v2597_v34  ;;  %v2568_v42 = vmul.f32 %v12688_v19, %v12684_v28  ;;  %vm2573_vm7 = vweird.f32 %v12688_v19 }
 0x8fe   :  { %11825 = vrcp.f32 %v12690_v26  ;;  %v2552_v0 = vpop.f32.mrf.mxu2  ;;  %vm12706_vm10 = vmor %vm2572_vm8, %vm2573_vm7  ;;  %v2593_v6 = vand.u32 2147483648, %v12690_v26  ;;  %vm2587_vm11 = vweird.f32 %v12690_v26  ;;  %v2591_v15 = vand.u32 2147483647, %v12690_v26  ;;  %3198 = vmatpush.bf16.msrb.mxu3 %v9305_v58 }
 0x8ff   :  { %11827 = vpow2.f32 %v9140_v40  ;;  %v2569_v24 = vsub.f32 1.0, %v2568_v42  ;;  %v2553_v31 = vadd.f32 %v2552_v0, %v2383_v12 }
 0x900   :  { %v2540_v51 = vpop.f32.mrf.mxu1  ;;  %v2594_v29 = vor.u32 1.1754944e-38, %v2593_v6  ;;  %vm2592_vm14 = vcmp.eq.f32.partialorder %v2591_v15, 8.507059e+37 }
 0x901   :  { %v2541_v57 = vadd.f32 %v2540_v51, %v2382_v47  ;;  %v2570_v52 = vmul.f32 %v12688_v19, %v2569_v24  ;;  %v11311_v24 = vld [vmem:[#allocation7 + $0x8] sm:$0xf0] }
 0x903   :  { %v2598_v60 = vadd.f32 %v2541_v57, %v2330_v55  ;;  %v2571_v46 = vadd.f32 %v12688_v19, %v2570_v52  ;;  %v11314_v55 = vld [vmem:[#allocation7 + $0x20] sm:$0xf0]  ;;  %v2344_v57 = vpop.f32.mrf.mxu3  ;;  %v9281_v52 = vor.u32 %v11311_v24, %v9280_v49  ;;  %v9250_v49 = vld [vmem:[#allocation5 + $0x90] sm:$0xf]  ;;  %v11305_v24 = vld [vmem:[#allocation5 + $0x98] sm:$0xf0] }
 0x904   :  { %v11826_v61 = vpop.eup %11825  ;;  %v9293_v40 = vor.u32 %v11314_v55, %v9292_v35 }
 0x905   :  { %v11828_v63 = vpop.eup %11827  ;;  %v9141_v1 = vmul.f32 -1.442695, %v2598_v60  ;;  %v2583_v38 = vmul.f32 %v11826_v61, %v12690_v26  ;;  %vm2588_vm9 = vweird.f32 %v11826_v61  ;;  %v2575_v14 = vsel %vm12706_vm10, %v12688_v19, %v2571_v46 }
 0x906   :  { %v12697_v4 = vadd.f32 1.0, %v11828_v63  ;;  %vm12716_vm12 = vmor %vm2587_vm11, %vm2588_vm9  ;;  %v2580_v47 = vsel %vm2577_vm13, %v2579_v39, %v2575_v14  ;;  %v2554_v27 = vpop.f32.mrf.mxu2  ;;  %3199 = vmatpush.bf16.msrb.mxu3 %v9293_v40  ;;  %v11750_v14 = vld [vmem:[%s13878_s5] ss:$0 sm:$0xff]  ;;  %v11307_v40 = vld [vmem:[#allocation5 + $0xac] sm:$0xf] }
 0x907   :  { %11829 = vpow2.f32 %v9141_v1  ;;  %v2584_v5 = vsub.f32 1.0, %v2583_v38  ;;  %v2637_v34 = vmul.f32 %v2580_v47, %v2553_v31  ;;  %v2555_v36 = vadd.f32 %v2554_v27, %v2383_v12 }
 0x908   :  { %11831 = vrcp.f32 %v12697_v4  ;;  %v2618_v37 = vand.u32 2147483648, %v12697_v4  ;;  %vm2612_vm0 = vweird.f32 %v12697_v4  ;;  %v2616_v45 = vand.u32 2147483647, %v12697_v4 }
 0x909   :  { %v2585_v8 = vmul.f32 %v11826_v61, %v2584_v5  ;;  %v2639_v53 = vadd.f32 %v2637_v34, %v2342_v20 }
 0x90a   :  { %vm2617_vm2 = vcmp.eq.f32.partialorder %v2616_v45, 8.507059e+37  ;;  %3200 = vmatpush.bf16.msrb.mxu3 %v9281_v52  ;;  %v9264_v45 = vld [vmem:[#allocation5 + $0xb4] sm:$0xf0]  ;;  %v11301_v52 = vld [vmem:[#allocation5 + $0x7c] sm:$0xf] }
 0x90b   :  { %v2586_v13 = vadd.f32 %v11826_v61, %v2585_v8 }
 0x90d   :  { %v11830_v16 = vpop.eup %11829  ;;  %v2590_v22 = vsel %vm12716_vm12, %v11826_v61, %v2586_v13  ;;  %v2619_v61 = vor.u32 1.1754944e-38, %v2618_v37  ;;  %v11308_v37 = vld [vmem:[#allocation5 + $0xb0] sm:$0xf0] }
 0x90e   :  { %v11832_v50 = vpop.eup %11831  ;;  %v2606_v25 = vadd.f32 1.0, %v11830_v16  ;;  %v2595_v30 = vsel %vm2592_vm14, %v2594_v29, %v2590_v22 }
 0x90f   :  { %v2608_v28 = vmul.f32 %v11832_v50, %v12697_v4  ;;  %vm2613_vm15 = vweird.f32 %v11832_v50  ;;  %v2638_v26 = vmul.f32 %v2595_v30, %v2555_v36 }
 0x910   :  { %11833 = vrcp.f32 %v2606_v25  ;;  %vm2614_vm1 = vmor %vm2612_vm0, %vm2613_vm15  ;;  %v2633_v0 = vand.u32 2147483648, %v2606_v25  ;;  %v2631_v38 = vand.u32 2147483647, %v2606_v25  ;;  %vm2627_vm4 = vweird.f32 %v2606_v25 }
 0x911   :  { %v2609_v32 = vsub.f32 1.0, %v2608_v28  ;;  %v2640_v60 = vadd.f32 %v2638_v26, %v2344_v57  ;;  %11835 = vtanh.f32 %v2639_v53  ;;  %v9262_v26 = vld [vmem:[#allocation5 + $0xa8] sm:$0xf]  ;;  %v11304_v53 = vld [vmem:[#allocation5 + $0x94] sm:$0xf] }
 0x912   :  { %v2634_v4 = vor.u32 1.1754944e-38, %v2633_v0  ;;  %vm2632_vm6 = vcmp.eq.f32.partialorder %v2631_v38, 8.507059e+37  ;;  %v9252_v57 = vld [vmem:[#allocation5 + $0x9c] sm:$0xf0]  ;;  %v11309_v0 = vld [vmem:[#allocation5 + $0xb8] sm:$0xf0] }
 0x913   :  { %v2610_v19 = vmul.f32 %v11832_v50, %v2609_v32  ;;  %11837 = vtanh.f32 %v2640_v60  ;;  %v9238_v60 = vld [vmem:[#allocation5 + $0x78] sm:$0xf] }
 0x915   :  { %v2611_v42 = vadd.f32 %v11832_v50, %v2610_v19 }
 0x916   :  { %v11834_v51 = vpop.eup %11833 }
 0x917   :  { %v2623_v43 = vmul.f32 %v11834_v51, %v2606_v25  ;;  %v2615_v59 = vsel %vm2614_vm1, %v11832_v50, %v2611_v42  ;;  %vm2628_vm3 = vweird.f32 %v11834_v51  ;;  %v11836_v46 = vpop.eup %11835  ;;  %v9263_v42 = vor.u32 %v11308_v37, %v9262_v26  ;;  %v11289_v26 = vld [vmem:[#allocation5 + $0x1c] sm:$0xf]  ;;  %v9192_v37 = vld [vmem:[#allocation5 + $0x24] sm:$0xf0] }
 0x918   :  { %v2620_v63 = vsel %vm2617_vm2, %v2619_v61, %v2615_v59  ;;  %vm2629_vm5 = vmor %vm2627_vm4, %vm2628_vm3  ;;  %v9255_v59 = vor.u32 %v11304_v53, %v9252_v57  ;;  %v11302_v61 = vld [vmem:[#allocation5 + $0x80] sm:$0xf0]  ;;  %v9180_v57 = vld [vmem:[#allocation5 + $0xc] sm:$0xf0] }
 0x919   :  { %v2624_v62 = vsub.f32 1.0, %v2623_v43  ;;  %v2643_v33 = vsub.f32 1.0, %v2620_v63  ;;  %v11838_v2 = vpop.eup %11837  ;;  %v2647_v54 = vmul.f32 %v2620_v63, %v12587_v17  ;;  %2983 = vmatpush.bf16.msrb.mxu0 %v9263_v42  ;;  %v9251_v43 = vor.u32 %v11305_v24, %v9250_v49  ;;  %v9270_v63 = vld [vmem:[#allocation5 + $0xb0] sm:$0xf]  ;;  %v9178_v24 = vld [vmem:[#allocation5] sm:$0xf] }
 0x91a   :  { %v9239_v38 = vor.u32 %v11302_v61, %v9238_v60  ;;  %v9195_v49 = vor.u32 %v11289_v26, %v9192_v37  ;;  %v11286_v53 = vld [vmem:[#allocation5 + $0x4] sm:$0xf]  ;;  %v9372_v60 = vld [vmem:[#allocation7 + $0xb0] sm:$0xf]  ;;  %v11333_v61 = vld [vmem:[#allocation7 + $0xb8] sm:$0xf0] }
 0x91b   :  { %v2625_v1 = vmul.f32 %v11834_v51, %v2624_v62  ;;  %v2645_v8 = vmul.f32 %v11836_v46, %v2643_v33  ;;  %v9240_v62 = vld [vmem:[#allocation5 + $0x84] sm:$0xf0]  ;;  %v11306_v33 = vld [vmem:[#allocation5 + $0xa0] sm:$0xf0]  ;;  %v11299_v46 = vld [vmem:[#allocation5 + $0x68] sm:$0xf0] }
 0x91c   :  { %v11318_v26 = vld [vmem:[#allocation7 + $0x40] sm:$0xf0] }
 0x91d   :  { %v2626_v3 = vadd.f32 %v11834_v51, %v2625_v1  ;;  %v12728_v56 = vadd.f32 %v2647_v54, %v2645_v8  ;;  %v9271_v1 = vor.u32 %v11309_v0, %v9270_v63  ;;  %2984 = vmatpush.bf16.msrb.mxu0 %v9251_v43  ;;  %v9228_v8 = vld [vmem:[#allocation5 + $0x6c] sm:$0xf0]  ;;  %v11331_v43 = vld [vmem:[#allocation7 + $0xac] sm:$0xf]  ;;  %v9373_v0 = vor.u32 %v11333_v61, %v9372_v60 }
 0x91f   :  { %v2630_v5 = vsel %vm2629_vm5, %v11834_v51, %v2626_v3  ;;  %v9267_v51 = vor.u32 %v11307_v40, %v9264_v45  ;;  %v9258_v3 = vld [vmem:[#allocation5 + $0x98] sm:$0xf]  ;;  %3011 = vmatpush.bf16.msrb.mxu2 %v9271_v1 }
 0x920   :  { %v2635_v7 = vsel %vm2632_vm6, %v2634_v4, %v2630_v5  ;;  %v9243_v4 = vor.u32 %v11301_v52, %v9240_v62  ;;  %v9226_v5 = vld [vmem:[#allocation5 + $0x60] sm:$0xf] }
 0x921   :  { %v2644_v48 = vsub.f32 1.0, %v2635_v7  ;;  %v2648_v12 = vmul.f32 %v2635_v7, %v12589_v18  ;;  %2997 = vmatpush.bf16.msrb.mxu1 %v9267_v51  ;;  %v11298_v7 = vld [vmem:[#allocation5 + $0x64] sm:$0xf]  ;;  %2985 = vmatpush.bf16.msrb.mxu0 %v9239_v38  ;;  %v9227_v54 = vor.u32 %v11299_v46, %v9226_v5  ;;  %v11287_v51 = vld [vmem:[#allocation5 + $0x8] sm:$0xf0] }
 0x922   :  { %v9179_v52 = vor.u32 %v11287_v51, %v9178_v24  ;;  %v9210_v38 = vld [vmem:[#allocation5 + $0x38] sm:$0xf]  ;;  %v9354_v5 = vld [vmem:[#allocation7 + $0x9c] sm:$0xf0] }
 0x923   :  { %v2646_v9 = vmul.f32 %v11838_v2, %v2644_v48  ;;  %v9259_v48 = vor.u32 %v11306_v33, %v9258_v3  ;;  %v9246_v2 = vld [vmem:[#allocation5 + $0x80] sm:$0xf]  ;;  %v11294_v3 = vld [vmem:[#allocation5 + $0x40] sm:$0xf0]  ;;  %v11328_v33 = vld [vmem:[#allocation7 + $0x94] sm:$0xf] }
 0x924   :  { %v9360_v46 = vld [vmem:[#allocation7 + $0x98] sm:$0xf] }
 0x925   :  { %v12730_v13 = vadd.f32 %v2648_v12, %v2646_v9  ;;  %2998 = vmatpush.bf16.msrb.mxu1 %v9255_v59  ;;  %v11303_v9 = vld [vmem:[#allocation5 + $0x88] sm:$0xf0]  ;;  %v9231_v12 = vor.u32 %v11298_v7, %v9228_v8  ;;  %3012 = vmatpush.bf16.msrb.mxu2 %v9259_v48  ;;  %v9366_v59 = vld [vmem:[#allocation7 + $0xb4] sm:$0xf0]  ;;  %v11330_v7 = vld [vmem:[#allocation7 + $0xa0] sm:$0xf0]  ;;  %v9357_v48 = vor.u32 %v11328_v33, %v9354_v5 }
 0x926   :  { %2986 = vmatpush.bf16.msrb.mxu0 %v9227_v54  ;;  %v9361_v8 = vor.u32 %v11330_v7, %v9360_v46  ;;  %v11325_v54 = vld [vmem:[#allocation7 + $0x7c] sm:$0xf]  ;;  %v11340_v7 = vld [vmem:[#allocation10 + $0x30] sm:$0xff] }
 0x927   :  { %v12734_v6 = vpack.c.bf16 %v12730_v13, %v12728_v56 }
 0x929   :  { %2728 = vmatmul.bf16.vlgmr.msra.gmra.mxu3 %v12734_v6  ;;  %2999 = vmatpush.bf16.msrb.mxu1 %v9243_v4  ;;  %v9211_v4 = vor.u32 %v11294_v3, %v9210_v38 }
 0x92d   :  { %3000 = vmatpush.bf16.msrb.mxu1 %v9231_v12  ;;  %v9342_v12 = vld [vmem:[#allocation7 + $0x84] sm:$0xf0] }
 0x939   :  { %3201 = vmatmul.bf16.vlgmr.msrb.gmra.mxu3 %v12734_v6 }
 0x9ac   :  { %v2729_v15 = vpop.f32.mrf.mxu3 }
 0x9ad   :  { %v2730_v17 = vadd.f32 %v11750_v14, %v2729_v15  ;;  %v11296_v15 = vld [vmem:[#allocation5 + $0x50] sm:$0xf0] }
 0x9af   :  { %v2736_v41 = vrot.slane %v2730_v17, 1  ;;  %v2737_v18 = vrot.slane %v2730_v17, 2  ;;  %v2738_v16 = vrot.slane %v2730_v17, 3  ;;  %2764 = vst [vmem:[%s13879_s6 + $0x3] sm:$0x1] %v2730_v17  ;;  %2780 = vmax.xlane.f32.xlu0 %v2730_v17  ;;  %v2739_v20 = vrot.slane %v2730_v17, 4 }
 0x9b0   :  { %v2740_v39 = vrot.slane %v2730_v17, 5  ;;  %v2741_v11 = vrot.slane %v2730_v17, 6  ;;  %v2742_v21 = vrot.slane %v2730_v17, 7 }
 0x9b1   :  { %2765 = vst [vmem:[%s13879_s6 + $0x13] sm:$0x1] %v2736_v41  ;;  %v9247_v41 = vor.u32 %v11303_v9, %v9246_v2  ;;  %v9198_v2 = vld [vmem:[#allocation5 + $0x20] sm:$0xf]  ;;  %v11291_v9 = vld [vmem:[#allocation5 + $0x28] sm:$0xf0] }
 0x9b2   :  { %2766 = vst [vmem:[%s13879_s6 + $0x23] sm:$0x1] %v2737_v18  ;;  %v9216_v18 = vld [vmem:[#allocation5 + $0x54] sm:$0xf0] }
 0x9b3   :  { %2767 = vst [vmem:[%s13879_s6 + $0x33] sm:$0x1] %v2738_v16  ;;  %v9234_v16 = vld [vmem:[#allocation5 + $0x68] sm:$0xf]  ;;  %3013 = vmatpush.bf16.msrb.mxu2 %v9247_v41 }
 0x9b4   :  { %2768 = vst [vmem:[%s13879_s6 + $0x43] sm:$0x1] %v2739_v20  ;;  %v2731_v23 = vpop.f32.mrf.mxu3  ;;  %v11300_v20 = vld [vmem:[#allocation5 + $0x70] sm:$0xf0] }
 0x9b5   :  { %2769 = vst [vmem:[%s13879_s6 + $0x53] sm:$0x1] %v2740_v39  ;;  %v2732_v50 = vadd.f32 %v11750_v14, %v2731_v23  ;;  %v9214_v14 = vld [vmem:[#allocation5 + $0x48] sm:$0xf]  ;;  %v11293_v23 = vld [vmem:[#allocation5 + $0x38] sm:$0xf0] }
 0x9b6   :  { %2770 = vst [vmem:[%s13879_s6 + $0x63] sm:$0x1] %v2741_v11  ;;  %v9215_v39 = vor.u32 %v11296_v15, %v9214_v14  ;;  %v9348_v14 = vld [vmem:[#allocation7 + $0x80] sm:$0xf]  ;;  %v11327_v15 = vld [vmem:[#allocation7 + $0x88] sm:$0xf0] }
 0x9b7   :  { %2771 = vst [vmem:[%s13879_s6 + $0x73] sm:$0x1] %v2742_v21  ;;  %v2743_v25 = vrot.slane %v2732_v50, 1  ;;  %v2744_v22 = vrot.slane %v2732_v50, 2  ;;  %v2745_v28 = vrot.slane %v2732_v50, 3  ;;  %2782 = vmax.xlane.f32.xlu1 %v2732_v50  ;;  %v2746_v47 = vrot.slane %v2732_v50, 4 }
 0x9b8   :  { %2772 = vst [vmem:[%s13879_s6 + $0x83] sm:$0x1] %v2732_v50  ;;  %v2747_v27 = vrot.slane %v2732_v50, 5  ;;  %v2748_v29 = vrot.slane %v2732_v50, 6  ;;  %v2749_v31 = vrot.slane %v2732_v50, 7  ;;  %2987 = vmatpush.bf16.msrb.mxu0 %v9215_v39  ;;  %v9349_v41 = vor.u32 %v11327_v15, %v9348_v14 }
 0x9b9   :  { %2773 = vst [vmem:[%s13879_s6 + $0x93] sm:$0x1] %v2743_v25  ;;  %v9202_v21 = vld [vmem:[#allocation5 + $0x30] sm:$0xf] }
 0x9ba   :  { %2774 = vst [vmem:[%s13879_s6 + $0xa3] sm:$0x1] %v2744_v22  ;;  %v11292_v22 = vld [vmem:[#allocation5 + $0x34] sm:$0xf] }
 0x9bb   :  { %2775 = vst [vmem:[%s13879_s6 + $0xb3] sm:$0x1] %v2745_v28  ;;  %v9204_v28 = vld [vmem:[#allocation5 + $0x3c] sm:$0xf0] }
 0x9bc   :  { %2776 = vst [vmem:[%s13879_s6 + $0xc3] sm:$0x1] %v2746_v47  ;;  %v9222_v47 = vld [vmem:[#allocation5 + $0x50] sm:$0xf]  ;;  %v3202_v5 = vpop.f32.mrf.mxu3 }
 0x9bd   :  { %2777 = vst [vmem:[%s13879_s6 + $0xd3] sm:$0x1] %v2747_v27  ;;  %v11297_v27 = vld [vmem:[#allocation5 + $0x58] sm:$0xf0] }
 0x9be   :  { %2778 = vst [vmem:[%s13879_s6 + $0xe3] sm:$0x1] %v2748_v29  ;;  %v9203_v29 = vor.u32 %v11293_v23, %v9202_v21  ;;  %v9223_v40 = vor.u32 %v11297_v27, %v9222_v47  ;;  %v9336_v21 = vld [vmem:[#allocation7 + $0x68] sm:$0xf]  ;;  %v11324_v23 = vld [vmem:[#allocation7 + $0x70] sm:$0xf0] }
 0x9bf   :  { %2779 = vst [vmem:[%s13879_s6 + $0xf3] sm:$0x1] %v2749_v31  ;;  %v9207_v31 = vor.u32 %v11292_v22, %v9204_v28  ;;  %v11319_v22 = vld [vmem:[#allocation7 + $0x4c] sm:$0xf]  ;;  %v9318_v28 = vld [vmem:[#allocation7 + $0x54] sm:$0xf0] }
 0x9c0   :  { %2988 = vmatpush.bf16.msrb.mxu0 %v9203_v29  ;;  %v9324_v47 = vld [vmem:[#allocation7 + $0x50] sm:$0xf]  ;;  %v11321_v27 = vld [vmem:[#allocation7 + $0x58] sm:$0xf0]  ;;  %v9321_v29 = vor.u32 %v11319_v22, %v9318_v28  ;;  %v11388_v22 = vld [vmem:[#allocation7 + $0xb0] sm:$0xf0] }
 0xa22   :  { %v2781_v58 = vpop.xlane.xlu0 %2780 }
 0xa23   :  { %vm2784_vm7 = vcmp.eq.f32.partialorder %v2730_v17, %v2781_v58  ;;  %v11295_v17 = vld [vmem:[#allocation5 + $0x4c] sm:$0xf]  ;;  %v9190_v58 = vld [vmem:[#allocation5 + $0x18] sm:$0xf] }
 0xa24   :  { %v12790_v32 = vsel %vm2784_vm7, %v12222_v10, 128  ;;  %v9219_v11 = vor.u32 %v11295_v17, %v9216_v18  ;;  %v9345_v17 = vor.u32 %v11325_v54, %v9342_v12  ;;  %v9186_v18 = vld [vmem:[#allocation5 + $0x8] sm:$0xf] }
 0xa25   :  { %v2789_v30 = vshra.s32 %v12790_v32, 16  ;;  %v2788_v25 = vand.u32 65535, %v12790_v32  ;;  %v11338_v12 = vld [vmem:[#allocation10 + $0x20] sm:$0xff] }
 0xa26   :  { %3001 = vmatpush.bf16.msrb.mxu1 %v9219_v11  ;;  %v9330_v11 = vld [vmem:[#allocation7 + $0x6c] sm:$0xf0] }
 0xa27   :  { %v12793_v35 = vcvt.s32.f32 %v2789_v30  ;;  %v11290_v30 = vld [vmem:[#allocation5 + $0x20] sm:$0xf0] }
 0xa28   :  { %v9191_v42 = vor.u32 %v11290_v30, %v9190_v58  ;;  %v11316_v58 = vld [vmem:[#allocation7 + $0x34] sm:$0xf]  ;;  %v9306_v30 = vld [vmem:[#allocation7 + $0x3c] sm:$0xf0] }
 0xa29   :  { %2792 = vmin.xlane.f32.xlu2 %v12793_v35  ;;  %v9309_v37 = vor.u32 %v11316_v58, %v9306_v30 }
 0xa2a   :  { %v2783_v55 = vpop.xlane.xlu1 %2782  ;;  %3002 = vmatpush.bf16.msrb.mxu1 %v9207_v31  ;;  %2989 = vmatpush.bf16.msrb.mxu0 %v9191_v42  ;;  %v9325_v31 = vor.u32 %v11321_v27, %v9324_v47  ;;  %v9294_v42 = vld [vmem:[#allocation7 + $0x24] sm:$0xf0] }
 0xa2b   :  { %vm2785_vm8 = vcmp.eq.f32.partialorder %v2732_v50, %v2783_v55  ;;  %v9235_v50 = vor.u32 %v11300_v20, %v9234_v16  ;;  %v11288_v16 = vld [vmem:[#allocation5 + $0x10] sm:$0xf0]  ;;  %v11322_v20 = vld [vmem:[#allocation7 + $0x64] sm:$0xf] }
 0xa2c   :  { %v12797_v34 = vsel %vm2785_vm8, %v12222_v10, 128  ;;  %v9187_v39 = vor.u32 %v11288_v16, %v9186_v18 }
 0xa2d   :  { %v2803_v36 = vshra.s32 %v12797_v34, 16  ;;  %3014 = vmatpush.bf16.msrb.mxu2 %v9235_v50  ;;  %v2802_v45 = vand.u32 65535, %v12797_v34  ;;  %v9369_v34 = vor.u32 %v11331_v43, %v9366_v59  ;;  %v9333_v50 = vor.u32 %v11322_v20, %v9330_v11  ;;  %v9288_v43 = vld [vmem:[#allocation7 + $0x8] sm:$0xf]  ;;  %v11312_v59 = vld [vmem:[#allocation7 + $0x10] sm:$0xf0] }
 0xa2e   :  { %3003 = vmatpush.bf16.msrb.mxu1 %v9195_v49  ;;  %2990 = vmatpush.bf16.msrb.mxu0 %v9179_v52  ;;  %v11315_v49 = vld [vmem:[#allocation7 + $0x28] sm:$0xf0]  ;;  %v9289_v61 = vor.u32 %v11312_v59, %v9288_v43  ;;  %v11336_v11 = vld [vmem:[#allocation10 + $0x10] sm:$0xff] }
 0xa2f   :  { %v12800_v19 = vcvt.s32.f32 %v2803_v36  ;;  %v2790_v36 = vcvt.s32.f32 %v2788_v25  ;;  %v2804_v63 = vcvt.s32.f32 %v2802_v45  ;;  %v9337_v25 = vor.u32 %v11324_v23, %v9336_v21  ;;  %v9300_v45 = vld [vmem:[#allocation7 + $0x20] sm:$0xf] }
 0xa30   :  { %v9301_v51 = vor.u32 %v11315_v49, %v9300_v45 }
 0xa31   :  { %2806 = vmin.xlane.f32.xlu0 %v12800_v19  ;;  %3015 = vmatpush.bf16.msrb.mxu2 %v9223_v40 }
 0xa32   :  { %3207 = vmatpush.bf16.msra.mxu0 %v9369_v34 }
 0xa35   :  { %3016 = vmatpush.bf16.msrb.mxu2 %v9211_v4 }
 0xa36   :  { %3208 = vmatpush.bf16.msra.mxu0 %v9357_v48 }
 0xa3a   :  { %3209 = vmatpush.bf16.msra.mxu0 %v9345_v17 }
 0xa3e   :  { %3210 = vmatpush.bf16.msra.mxu0 %v9333_v50  ;;  %v11335_v50 = vld [vmem:[#allocation10 + $0x8] sm:$0xff] }
 0xa42   :  { %3211 = vmatpush.bf16.msra.mxu0 %v9321_v29  ;;  %v11334_v29 = vld [vmem:[#allocation10] sm:$0xff] }
 0xa46   :  { %3212 = vmatpush.bf16.msra.mxu0 %v9309_v37  ;;  %v9588_v37 = vld [vmem:[#allocation7 + $0x90] sm:$0xf] }
 0xa9c   :  { %v12804_v55 = vpop.xlane.xlu2 %2792 }
 0xa9d   :  { %vm2794_vm9 = vcmp.eq.f32.partialorder %v12793_v35, %v12804_v55  ;;  %v9183_v35 = vor.u32 %v11286_v53, %v9180_v57  ;;  %v11310_v53 = vld [vmem:[#allocation7 + $0x4] sm:$0xf]  ;;  %v9282_v57 = vld [vmem:[#allocation7 + $0xc] sm:$0xf0] }
 0xa9e   :  { %v2795_v32 = vsel %vm2794_vm9, %v2790_v36, inf  ;;  %v9312_v36 = vld [vmem:[#allocation7 + $0x38] sm:$0xf]  ;;  %v9285_v60 = vor.u32 %v11310_v53, %v9282_v57 }
 0xa9f   :  { %2796 = vmin.xlane.f32.xlu1 %v2795_v32  ;;  %3004 = vmatpush.bf16.msrb.mxu1 %v9183_v35  ;;  %v9313_v40 = vor.u32 %v11318_v26, %v9312_v36  ;;  %v11313_v32 = vld [vmem:[#allocation7 + $0x1c] sm:$0xf]  ;;  %v2799_v35 = vcvt.f32.s32 %v12804_v55  ;;  %v12822_v55 = vld [vmem:[#allocation8] sm:$0x7] }
 0xaa0   :  { %v9297_v24 = vor.u32 %v11313_v32, %v9294_v42  ;;  %v3059_v46 = vperm.slane %v12822_v55, 0 }
 0xaa2   :  { %3213 = vmatpush.bf16.msra.mxu0 %v9297_v24  ;;  %v3203_v48 = vadd.f32 %v3202_v5, %v3059_v46  ;;  %v9576_v24 = vld [vmem:[#allocation7 + $0x78] sm:$0xf]  ;;  %v11376_v5 = vld [vmem:[#allocation7 + $0x50] sm:$0xf0] }
 0xaa3   :  { %3221 = vmatpush.bf16.msra.mxu1 %v9373_v0  ;;  %v2800_v0 = vshll.u32 %v2799_v35, 16 }
 0xaa4   :  { %v12809_v62 = vpop.xlane.xlu0 %2806 }
 0xaa5   :  { %vm2808_vm10 = vcmp.eq.f32.partialorder %v12800_v19, %v12809_v62  ;;  %v9199_v19 = vor.u32 %v11291_v9, %v9198_v2  ;;  %v11339_v9 = vld [vmem:[#allocation10 + $0x28] sm:$0xff] }
 0xaa6   :  { %v2809_v1 = vsel %vm2808_vm10, %v2804_v63, inf  ;;  %3214 = vmatpush.bf16.msra.mxu0 %v9285_v60  ;;  %v2813_v63 = vcvt.f32.s32 %v12809_v62  ;;  %v11341_v62 = vld [vmem:[#allocation10 + $0x38] sm:$0xff] }
 0xaa7   :  { %2810 = vmin.xlane.f32.xlu2 %v2809_v1  ;;  %3222 = vmatpush.bf16.msra.mxu1 %v9361_v8 }
 0xaa8   :  { %3017 = vmatpush.bf16.msrb.mxu2 %v9199_v19  ;;  %v2814_v38 = vshll.u32 %v2813_v63, 16  ;;  %v3204_v19 = vpop.f32.mrf.mxu3  ;;  %v9564_v63 = vld [vmem:[#allocation7 + $0x60] sm:$0xf] }
 0xaa9   :  { %v3205_v14 = vadd.f32 %v3204_v19, %v3059_v46 }
 0xaab   :  { %3223 = vmatpush.bf16.msra.mxu1 %v9349_v41  ;;  %v11337_v41 = vld [vmem:[#allocation10 + $0x18] sm:$0xff] }
 0xaac   :  { %3018 = vmatpush.bf16.msrb.mxu2 %v9187_v39  ;;  %v3060_v39 = vperm.slane %v12822_v55, 1 }
 0xaaf   :  { %3224 = vmatpush.bf16.msra.mxu1 %v9337_v25  ;;  %v9600_v25 = vld [vmem:[#allocation7 + $0xa8] sm:$0xf] }
 0xab0   :  { %3398 = vmatpush.bf16.msra.mxu2 %v11341_v62  ;;  %v9601_v30 = vor.u32 %v11388_v22, %v9600_v25  ;;  %v9552_v62 = vld [vmem:[#allocation7 + $0x48] sm:$0xf] }
 0xab1   :  { %v9553_v19 = vor.u32 %v11376_v5, %v9552_v62 }
 0xab3   :  { %3225 = vmatpush.bf16.msra.mxu1 %v9325_v31 }
 0xab4   :  { %3399 = vmatpush.bf16.msra.mxu2 %v11340_v7  ;;  %v3061_v7 = vperm.slane %v12822_v55, 2 }
 0xab7   :  { %3226 = vmatpush.bf16.msra.mxu1 %v9313_v40  ;;  %v11385_v40 = vld [vmem:[#allocation7 + $0x98] sm:$0xf0] }
 0xab8   :  { %3400 = vmatpush.bf16.msra.mxu2 %v11339_v9  ;;  %v9589_v45 = vor.u32 %v11385_v40, %v9588_v37  ;;  %v9516_v40 = vld [vmem:[#allocation7] sm:$0xf] }
 0xabb   :  { %3227 = vmatpush.bf16.msra.mxu1 %v9301_v51  ;;  %v11382_v51 = vld [vmem:[#allocation7 + $0x80] sm:$0xf0] }
 0xabc   :  { %3401 = vmatpush.bf16.msra.mxu2 %v11338_v12  ;;  %v9577_v59 = vor.u32 %v11382_v51, %v9576_v24 }
 0xabf   :  { %3228 = vmatpush.bf16.msra.mxu1 %v9289_v61 }
 0xac0   :  { %3402 = vmatpush.bf16.msra.mxu2 %v11337_v41 }
 0xac4   :  { %3403 = vmatpush.bf16.msra.mxu2 %v11336_v11 }
 0xac8   :  { %3404 = vmatpush.bf16.msra.mxu2 %v11335_v50 }
 0xacc   :  { %3405 = vmatpush.bf16.msra.mxu2 %v11334_v29 }
 0xb12   :  { %v2797_v52 = vpop.xlane.xlu1 %2796 }
 0xb13   :  { %v2798_v34 = vcvt.f32.s32 %v2797_v52 }
 0xb15   :  { %v2801_v3 = vadd.s32 %v2800_v0, %v2798_v34  ;;  %v11379_v34 = vld [vmem:[#allocation7 + $0x68] sm:$0xf0] }
 0xb17   :  { %vm2816_vm11 = vcmp.eq.s32.totalorder %v12222_v10, %v2801_v3  ;;  %v9565_v3 = vor.u32 %v11379_v34, %v9564_v63 }
 0xb1a   :  { %v2811_v1 = vpop.xlane.xlu2 %2810 }
 0xb1b   :  { %v2812_v33 = vcvt.f32.s32 %v2811_v1 }
 0xb1d   :  { %v2815_v4 = vadd.s32 %v2814_v38, %v2812_v33 }
 0xb1f   :  { %vm2817_vm12 = vcmp.eq.s32.totalorder %v12222_v10, %v2815_v4 }
 0xb20   :  { %vm9272_vm13 = vmpackc.low %vm2817_vm12, %vm2816_vm11 }
 0xb21   :  { %9273 = vmatmul.msk.bf16.vlgmr.msrb.gmra.mxu0 %vm9272_vm13, %v12162_v44  ;;  %9275 = vmatmul.msk.bf16.vlgmr.msrb.gmra.mxu1 %vm9272_vm13, %v12162_v44 }
 0xb22   :  { %9277 = vmatmul.msk.bf16.vlgmr.msrb.gmra.mxu2 %vm9272_vm13, %v12162_v44 }
 0xb23   :  { %3871 = vmatpush.bf16.msrb.mxu2 %v9601_v30 }
 0xb27   :  { %3872 = vmatpush.bf16.msrb.mxu2 %v9589_v45 }
 0xb2b   :  { %3873 = vmatpush.bf16.msrb.mxu2 %v9577_v59 }
 0xb2f   :  { %3874 = vmatpush.bf16.msrb.mxu2 %v9565_v3 }
 0xb31   :  { %3215 = vmatmul.bf16.vlgmr.msra.gmra.mxu0 %v12734_v6  ;;  %3229 = vmatmul.bf16.vlgmr.msra.gmra.mxu1 %v12734_v6 }
 0xb33   :  { %3875 = vmatpush.bf16.msrb.mxu2 %v9553_v19 }
 0xb9e   :  { %v2992_v8 = vpop.f32.mrf.mxu0  ;;  %v3006_v15 = vpop.f32.mrf.mxu1 }
 0xb9f   :  { %v3235_v2 = vadd.f32 %v3203_v48, %v2992_v8 }
 0xba1   :  { %v9374_v54 = vmul.f32 -1.442695, %v3235_v2 }
 0xba3   :  { %11839 = vpow2.f32 %v9374_v54 }
 0xba6   :  { %v2994_v6 = vpop.f32.mrf.mxu0  ;;  %v3008_v47 = vpop.f32.mrf.mxu1 }
 0xba7   :  { %v3236_v17 = vadd.f32 %v3205_v14, %v2994_v6  ;;  %v3020_v14 = vpop.f32.mrf.mxu2 }
 0xba9   :  { %v11840_v18 = vpop.eup %11839  ;;  %v9375_v16 = vmul.f32 -1.442695, %v3236_v17  ;;  %v11373_v17 = vld [vmem:[#allocation7 + $0x38] sm:$0xf0] }
 0xbaa   :  { %v12825_v20 = vadd.f32 1.0, %v11840_v18 }
 0xbab   :  { %11841 = vpow2.f32 %v9375_v16 }
 0xbac   :  { %11843 = vrcp.f32 %v12825_v20  ;;  %v3256_v33 = vand.u32 2147483648, %v12825_v20  ;;  %vm3250_vm15 = vweird.f32 %v12825_v20  ;;  %v3254_v46 = vand.u32 2147483647, %v12825_v20 }
 0xbae   :  { %v3216_v21 = vpop.f32.mrf.mxu0  ;;  %v3230_v61 = vpop.f32.mrf.mxu1  ;;  %v3257_v55 = vor.u32 1.1754944e-38, %v3256_v33  ;;  %vm3255_vm4 = vcmp.eq.f32.partialorder %v3254_v46, 8.507059e+37 }
 0xbaf   :  { %v3217_v23 = vadd.f32 %v3216_v21, %v3060_v39 }
 0xbb1   :  { %v11842_v28 = vpop.eup %11841  ;;  %v3275_v27 = vadd.f32 %v3217_v23, %v3006_v15  ;;  %v9540_v15 = vld [vmem:[#allocation7 + $0x30] sm:$0xf]  ;;  %v3231_v23 = vadd.f32 %v3230_v61, %v3061_v7 }
 0xbb2   :  { %v12829_v31 = vpop.eup %11843  ;;  %v12831_v58 = vadd.f32 1.0, %v11842_v28  ;;  %v9541_v50 = vor.u32 %v11373_v17, %v9540_v15  ;;  %v9528_v28 = vld [vmem:[#allocation7 + $0x18] sm:$0xf] }
 0xbb3   :  { %v9376_v36 = vmul.f32 -1.442695, %v3275_v27  ;;  %v3246_v26 = vmul.f32 %v12829_v31, %v12825_v20  ;;  %vm3251_vm14 = vweird.f32 %v12829_v31 }
 0xbb4   :  { %11845 = vrcp.f32 %v12831_v58  ;;  %vm12847_vm1 = vmor %vm3250_vm15, %vm3251_vm14  ;;  %v3271_v2 = vand.u32 2147483648, %v12831_v58  ;;  %vm3265_vm2 = vweird.f32 %v12831_v58  ;;  %v3269_v54 = vand.u32 2147483647, %v12831_v58  ;;  %3876 = vmatpush.bf16.msrb.mxu2 %v9541_v50 }
 0xbb5   :  { %11847 = vpow2.f32 %v9376_v36  ;;  %v3247_v32 = vsub.f32 1.0, %v3246_v26 }
 0xbb6   :  { %v3218_v42 = vpop.f32.mrf.mxu0  ;;  %v3232_v11 = vpop.f32.mrf.mxu1  ;;  %v3272_v21 = vor.u32 1.1754944e-38, %v3271_v2  ;;  %vm3270_vm5 = vcmp.eq.f32.partialorder %v3269_v54, 8.507059e+37 }
 0xbb7   :  { %v3219_v49 = vadd.f32 %v3218_v42, %v3060_v39  ;;  %v3248_v43 = vmul.f32 %v12829_v31, %v3247_v32  ;;  %v3233_v29 = vadd.f32 %v3232_v11, %v3061_v7  ;;  %v11367_v32 = vld [vmem:[#allocation7 + $0x8] sm:$0xf0] }
 0xbb9   :  { %v3276_v53 = vadd.f32 %v3219_v49, %v3008_v47  ;;  %v3249_v38 = vadd.f32 %v12829_v31, %v3248_v43  ;;  %v11370_v47 = vld [vmem:[#allocation7 + $0x20] sm:$0xf0]  ;;  %v3022_v49 = vpop.f32.mrf.mxu2  ;;  %v9517_v43 = vor.u32 %v11367_v32, %v9516_v40  ;;  %v9486_v40 = vld [vmem:[#allocation5 + $0x90] sm:$0xf]  ;;  %v11361_v32 = vld [vmem:[#allocation5 + $0x98] sm:$0xf0] }
 0xbba   :  { %v11846_v57 = vpop.eup %11845  ;;  %v9529_v36 = vor.u32 %v11370_v47, %v9528_v28 }
 0xbbb   :  { %v11848_v60 = vpop.eup %11847  ;;  %v9377_v52 = vmul.f32 -1.442695, %v3276_v53  ;;  %v3261_v35 = vmul.f32 %v11846_v57, %v12831_v58  ;;  %vm3266_vm0 = vweird.f32 %v11846_v57  ;;  %v3253_v9 = vsel %vm12847_vm1, %v12829_v31, %v3249_v38 }
 0xbbc   :  { %v12838_v0 = vadd.f32 1.0, %v11848_v60  ;;  %vm12857_vm3 = vmor %vm3265_vm2, %vm3266_vm0  ;;  %v3258_v39 = vsel %vm3255_vm4, %v3257_v55, %v3253_v9  ;;  %3877 = vmatpush.bf16.msrb.mxu2 %v9529_v36  ;;  %v11751_v9 = vld [vmem:[%s13878_s5] ss:$0 sm:$0xff]  ;;  %v11363_v36 = vld [vmem:[#allocation5 + $0xac] sm:$0xf] }
 0xbbd   :  { %11849 = vpow2.f32 %v9377_v52  ;;  %v3262_v1 = vsub.f32 1.0, %v3261_v35  ;;  %v3315_v27 = vmul.f32 %v3258_v39, %v3231_v23 }
 0xbbe   :  { %11851 = vrcp.f32 %v12838_v0  ;;  %v3296_v30 = vand.u32 2147483648, %v12838_v0  ;;  %vm3290_vm7 = vweird.f32 %v12838_v0  ;;  %v3294_v37 = vand.u32 2147483647, %v12838_v0 }
 0xbbf   :  { %v3263_v4 = vmul.f32 %v11846_v57, %v3262_v1  ;;  %v3317_v45 = vadd.f32 %v3315_v27, %v3020_v14 }
 0xbc0   :  { %vm3295_vm9 = vcmp.eq.f32.partialorder %v3294_v37, 8.507059e+37  ;;  %3878 = vmatpush.bf16.msrb.mxu2 %v9517_v43  ;;  %v9500_v37 = vld [vmem:[#allocation5 + $0xb4] sm:$0xf0]  ;;  %v11357_v43 = vld [vmem:[#allocation5 + $0x7c] sm:$0xf] }
 0xbc1   :  { %v3264_v8 = vadd.f32 %v11846_v57, %v3263_v4 }
 0xbc3   :  { %v11850_v12 = vpop.eup %11849  ;;  %v3268_v16 = vsel %vm12857_vm3, %v11846_v57, %v3264_v8  ;;  %v3297_v57 = vor.u32 1.1754944e-38, %v3296_v30  ;;  %v11364_v30 = vld [vmem:[#allocation5 + $0xb0] sm:$0xf0] }
 0xbc4   :  { %v11852_v41 = vpop.eup %11851  ;;  %v3284_v18 = vadd.f32 1.0, %v11850_v12  ;;  %v3273_v22 = vsel %vm3270_vm5, %v3272_v21, %v3268_v16 }
 0xbc5   :  { %v3286_v20 = vmul.f32 %v11852_v41, %v12838_v0  ;;  %vm3291_vm6 = vweird.f32 %v11852_v41  ;;  %v3316_v58 = vmul.f32 %v3273_v22, %v3233_v29 }
 0xbc6   :  { %11853 = vrcp.f32 %v3284_v18  ;;  %vm3292_vm8 = vmor %vm3290_vm7, %vm3291_vm6  ;;  %v3311_v61 = vand.u32 2147483648, %v3284_v18  ;;  %v3309_v35 = vand.u32 2147483647, %v3284_v18  ;;  %vm3305_vm11 = vweird.f32 %v3284_v18 }
 0xbc7   :  { %v3287_v25 = vsub.f32 1.0, %v3286_v20  ;;  %v3318_v53 = vadd.f32 %v3316_v58, %v3022_v49  ;;  %11855 = vtanh.f32 %v3317_v45  ;;  %v9498_v58 = vld [vmem:[#allocation5 + $0xa8] sm:$0xf]  ;;  %v11360_v45 = vld [vmem:[#allocation5 + $0x94] sm:$0xf] }
 0xbc8   :  { %v3312_v0 = vor.u32 1.1754944e-38, %v3311_v61  ;;  %vm3310_vm13 = vcmp.eq.f32.partialorder %v3309_v35, 8.507059e+37  ;;  %v9488_v49 = vld [vmem:[#allocation5 + $0x9c] sm:$0xf0]  ;;  %v11365_v61 = vld [vmem:[#allocation5 + $0xb8] sm:$0xf0] }
 0xbc9   :  { %v3288_v31 = vmul.f32 %v11852_v41, %v3287_v25  ;;  %11857 = vtanh.f32 %v3318_v53  ;;  %v9474_v53 = vld [vmem:[#allocation5 + $0x78] sm:$0xf] }
 0xbcb   :  { %v3289_v26 = vadd.f32 %v11852_v41, %v3288_v31 }
 0xbcc   :  { %v11854_v42 = vpop.eup %11853 }
 0xbcd   :  { %v3301_v24 = vmul.f32 %v11854_v42, %v3284_v18  ;;  %v3293_v51 = vsel %vm3292_vm8, %v11852_v41, %v3289_v26  ;;  %vm3306_vm10 = vweird.f32 %v11854_v42  ;;  %v11856_v38 = vpop.eup %11855  ;;  %v9499_v26 = vor.u32 %v11364_v30, %v9498_v58  ;;  %v11345_v58 = vld [vmem:[#allocation5 + $0x1c] sm:$0xf]  ;;  %v9428_v30 = vld [vmem:[#allocation5 + $0x24] sm:$0xf0] }
 0xbce   :  { %v3298_v60 = vsel %vm3295_vm9, %v3297_v57, %v3293_v51  ;;  %vm3307_vm12 = vmor %vm3305_vm11, %vm3306_vm10  ;;  %v9491_v51 = vor.u32 %v11360_v45, %v9488_v49  ;;  %v11358_v57 = vld [vmem:[#allocation5 + $0x80] sm:$0xf0]  ;;  %v9416_v49 = vld [vmem:[#allocation5 + $0xc] sm:$0xf0] }
 0xbcf   :  { %v3302_v59 = vsub.f32 1.0, %v3301_v24  ;;  %v3321_v34 = vsub.f32 1.0, %v3298_v60  ;;  %v11858_v62 = vpop.eup %11857  ;;  %v3325_v46 = vmul.f32 %v3298_v60, %v12728_v56  ;;  %3661 = vmatpush.bf16.msra.mxu3 %v9499_v26  ;;  %v9487_v24 = vor.u32 %v11361_v32, %v9486_v40  ;;  %v9506_v60 = vld [vmem:[#allocation5 + $0xb0] sm:$0xf]  ;;  %v9414_v32 = vld [vmem:[#allocation5] sm:$0xf] }
 0xbd0   :  { %v9475_v35 = vor.u32 %v11358_v57, %v9474_v53  ;;  %v9431_v40 = vor.u32 %v11345_v58, %v9428_v30  ;;  %v11342_v45 = vld [vmem:[#allocation5 + $0x4] sm:$0xf]  ;;  %v9608_v53 = vld [vmem:[#allocation7 + $0xb0] sm:$0xf]  ;;  %v11389_v57 = vld [vmem:[#allocation7 + $0xb8] sm:$0xf0] }
 0xbd1   :  { %v3303_v52 = vmul.f32 %v11854_v42, %v3302_v59  ;;  %v3323_v4 = vmul.f32 %v11856_v38, %v3321_v34  ;;  %v9476_v59 = vld [vmem:[#allocation5 + $0x84] sm:$0xf0]  ;;  %v11362_v34 = vld [vmem:[#allocation5 + $0xa0] sm:$0xf0]  ;;  %v11355_v38 = vld [vmem:[#allocation5 + $0x68] sm:$0xf0] }
 0xbd2   :  { %v11374_v58 = vld [vmem:[#allocation7 + $0x40] sm:$0xf0] }
 0xbd3   :  { %v3304_v63 = vadd.f32 %v11854_v42, %v3303_v52  ;;  %v12869_v48 = vadd.f32 %v3325_v46, %v3323_v4  ;;  %v9507_v52 = vor.u32 %v11365_v61, %v9506_v60  ;;  %3662 = vmatpush.bf16.msra.mxu3 %v9487_v24  ;;  %v9464_v4 = vld [vmem:[#allocation5 + $0x6c] sm:$0xf0]  ;;  %v11387_v24 = vld [vmem:[#allocation7 + $0xac] sm:$0xf]  ;;  %v9609_v61 = vor.u32 %v11389_v57, %v9608_v53 }
 0xbd5   :  { %v3308_v1 = vsel %vm3307_vm12, %v11854_v42, %v3304_v63  ;;  %v9503_v42 = vor.u32 %v11363_v36, %v9500_v37  ;;  %v9494_v63 = vld [vmem:[#allocation5 + $0x98] sm:$0xf]  ;;  %3689 = vmatpush.bf16.msrb.mxu1 %v9507_v52 }
 0xbd6   :  { %v3313_v3 = vsel %vm3310_vm13, %v3312_v0, %v3308_v1  ;;  %v9479_v0 = vor.u32 %v11357_v43, %v9476_v59  ;;  %v9462_v1 = vld [vmem:[#allocation5 + $0x60] sm:$0xf] }
 0xbd7   :  { %v3322_v33 = vsub.f32 1.0, %v3313_v3  ;;  %v3326_v7 = vmul.f32 %v3313_v3, %v12730_v13  ;;  %3675 = vmatpush.bf16.msrb.mxu0 %v9503_v42  ;;  %v11354_v3 = vld [vmem:[#allocation5 + $0x64] sm:$0xf]  ;;  %3663 = vmatpush.bf16.msra.mxu3 %v9475_v35  ;;  %v9463_v46 = vor.u32 %v11355_v38, %v9462_v1  ;;  %v11343_v42 = vld [vmem:[#allocation5 + $0x8] sm:$0xf0] }
 0xbd8   :  { %v9415_v43 = vor.u32 %v11343_v42, %v9414_v32  ;;  %v9446_v35 = vld [vmem:[#allocation5 + $0x38] sm:$0xf]  ;;  %v9590_v1 = vld [vmem:[#allocation7 + $0x9c] sm:$0xf0] }
 0xbd9   :  { %v3324_v5 = vmul.f32 %v11858_v62, %v3322_v33  ;;  %v9495_v33 = vor.u32 %v11362_v34, %v9494_v63  ;;  %v9482_v62 = vld [vmem:[#allocation5 + $0x80] sm:$0xf]  ;;  %v11350_v63 = vld [vmem:[#allocation5 + $0x40] sm:$0xf0]  ;;  %v11384_v34 = vld [vmem:[#allocation7 + $0x94] sm:$0xf] }
 0xbda   :  { %v9596_v38 = vld [vmem:[#allocation7 + $0x98] sm:$0xf] }
 0xbdb   :  { %v12871_v8 = vadd.f32 %v3326_v7, %v3324_v5  ;;  %3676 = vmatpush.bf16.msrb.mxu0 %v9491_v51  ;;  %v11359_v5 = vld [vmem:[#allocation5 + $0x88] sm:$0xf0]  ;;  %v9467_v7 = vor.u32 %v11354_v3, %v9464_v4  ;;  %3690 = vmatpush.bf16.msrb.mxu1 %v9495_v33  ;;  %v9602_v51 = vld [vmem:[#allocation7 + $0xb4] sm:$0xf0]  ;;  %v11386_v3 = vld [vmem:[#allocation7 + $0xa0] sm:$0xf0]  ;;  %v9593_v33 = vor.u32 %v11384_v34, %v9590_v1 }
 0xbdc   :  { %3664 = vmatpush.bf16.msra.mxu3 %v9463_v46  ;;  %v9597_v4 = vor.u32 %v11386_v3, %v9596_v38  ;;  %v11381_v46 = vld [vmem:[#allocation7 + $0x7c] sm:$0xf]  ;;  %v11396_v3 = vld [vmem:[#allocation10 + $0x30] sm:$0xff] }
 0xbdd   :  { %v12875_v2 = vpack.c.bf16 %v12871_v8, %v12869_v48 }
 0xbdf   :  { %3406 = vmatmul.bf16.vlgmr.msra.gmra.mxu2 %v12875_v2  ;;  %3677 = vmatpush.bf16.msrb.mxu0 %v9479_v0  ;;  %v9447_v0 = vor.u32 %v11350_v63, %v9446_v35 }
 0xbe3   :  { %3678 = vmatpush.bf16.msrb.mxu0 %v9467_v7  ;;  %v9578_v7 = vld [vmem:[#allocation7 + $0x84] sm:$0xf0] }
 0xbef   :  { %3879 = vmatmul.bf16.vlgmr.msrb.gmra.mxu2 %v12875_v2 }
 0xc62   :  { %v3407_v54 = vpop.f32.mrf.mxu2 }
 0xc63   :  { %v3408_v56 = vadd.f32 %v11751_v9, %v3407_v54  ;;  %v11352_v54 = vld [vmem:[#allocation5 + $0x50] sm:$0xf0] }
 0xc65   :  { %v3414_v19 = vrot.slane %v3408_v56, 1  ;;  %v3415_v13 = vrot.slane %v3408_v56, 2  ;;  %v3416_v12 = vrot.slane %v3408_v56, 3  ;;  %3442 = vst [vmem:[%s13879_s6 + $0x4] sm:$0x1] %v3408_v56  ;;  %3458 = vmax.xlane.f32.xlu0 %v3408_v56  ;;  %v3417_v14 = vrot.slane %v3408_v56, 4 }
 0xc66   :  { %v3418_v55 = vrot.slane %v3408_v56, 5  ;;  %v3419_v6 = vrot.slane %v3408_v56, 6  ;;  %v3420_v15 = vrot.slane %v3408_v56, 7 }
 0xc67   :  { %3443 = vst [vmem:[%s13879_s6 + $0x14] sm:$0x1] %v3414_v19  ;;  %v9483_v19 = vor.u32 %v11359_v5, %v9482_v62  ;;  %v9434_v62 = vld [vmem:[#allocation5 + $0x20] sm:$0xf]  ;;  %v11347_v5 = vld [vmem:[#allocation5 + $0x28] sm:$0xf0] }
 0xc68   :  { %3444 = vst [vmem:[%s13879_s6 + $0x24] sm:$0x1] %v3415_v13  ;;  %v9452_v13 = vld [vmem:[#allocation5 + $0x54] sm:$0xf0] }
 0xc69   :  { %3445 = vst [vmem:[%s13879_s6 + $0x34] sm:$0x1] %v3416_v12  ;;  %v9470_v12 = vld [vmem:[#allocation5 + $0x68] sm:$0xf]  ;;  %3691 = vmatpush.bf16.msrb.mxu1 %v9483_v19 }
 0xc6a   :  { %3446 = vst [vmem:[%s13879_s6 + $0x44] sm:$0x1] %v3417_v14  ;;  %v3409_v17 = vpop.f32.mrf.mxu2  ;;  %v11356_v14 = vld [vmem:[#allocation5 + $0x70] sm:$0xf0] }
 0xc6b   :  { %3447 = vst [vmem:[%s13879_s6 + $0x54] sm:$0x1] %v3418_v55  ;;  %v3410_v41 = vadd.f32 %v11751_v9, %v3409_v17  ;;  %v9450_v9 = vld [vmem:[#allocation5 + $0x48] sm:$0xf]  ;;  %v11349_v17 = vld [vmem:[#allocation5 + $0x38] sm:$0xf0] }
 0xc6c   :  { %3448 = vst [vmem:[%s13879_s6 + $0x64] sm:$0x1] %v3419_v6  ;;  %v9451_v55 = vor.u32 %v11352_v54, %v9450_v9  ;;  %v9584_v9 = vld [vmem:[#allocation7 + $0x80] sm:$0xf]  ;;  %v11383_v54 = vld [vmem:[#allocation7 + $0x88] sm:$0xf0] }
 0xc6d   :  { %3449 = vst [vmem:[%s13879_s6 + $0x74] sm:$0x1] %v3420_v15  ;;  %v3421_v18 = vrot.slane %v3410_v41, 1  ;;  %v3422_v16 = vrot.slane %v3410_v41, 2  ;;  %v3423_v20 = vrot.slane %v3410_v41, 3  ;;  %3460 = vmax.xlane.f32.xlu1 %v3410_v41  ;;  %v3424_v39 = vrot.slane %v3410_v41, 4 }
 0xc6e   :  { %3450 = vst [vmem:[%s13879_s6 + $0x84] sm:$0x1] %v3410_v41  ;;  %v3425_v11 = vrot.slane %v3410_v41, 5  ;;  %v3426_v21 = vrot.slane %v3410_v41, 6  ;;  %v3427_v23 = vrot.slane %v3410_v41, 7  ;;  %3665 = vmatpush.bf16.msra.mxu3 %v9451_v55  ;;  %v9585_v19 = vor.u32 %v11383_v54, %v9584_v9 }
 0xc6f   :  { %3451 = vst [vmem:[%s13879_s6 + $0x94] sm:$0x1] %v3421_v18  ;;  %v9438_v15 = vld [vmem:[#allocation5 + $0x30] sm:$0xf] }
 0xc70   :  { %3452 = vst [vmem:[%s13879_s6 + $0xa4] sm:$0x1] %v3422_v16  ;;  %v11348_v16 = vld [vmem:[#allocation5 + $0x34] sm:$0xf] }
 0xc71   :  { %3453 = vst [vmem:[%s13879_s6 + $0xb4] sm:$0x1] %v3423_v20  ;;  %v9440_v20 = vld [vmem:[#allocation5 + $0x3c] sm:$0xf0] }
 0xc72   :  { %3454 = vst [vmem:[%s13879_s6 + $0xc4] sm:$0x1] %v3424_v39  ;;  %v9458_v39 = vld [vmem:[#allocation5 + $0x50] sm:$0xf]  ;;  %v3880_v1 = vpop.f32.mrf.mxu2 }
 0xc73   :  { %3455 = vst [vmem:[%s13879_s6 + $0xd4] sm:$0x1] %v3425_v11  ;;  %v11353_v11 = vld [vmem:[#allocation5 + $0x58] sm:$0xf0] }
 0xc74   :  { %3456 = vst [vmem:[%s13879_s6 + $0xe4] sm:$0x1] %v3426_v21  ;;  %v9439_v21 = vor.u32 %v11349_v17, %v9438_v15  ;;  %v9459_v36 = vor.u32 %v11353_v11, %v9458_v39  ;;  %v9572_v15 = vld [vmem:[#allocation7 + $0x68] sm:$0xf]  ;;  %v11380_v17 = vld [vmem:[#allocation7 + $0x70] sm:$0xf0] }
 0xc75   :  { %3457 = vst [vmem:[%s13879_s6 + $0xf4] sm:$0x1] %v3427_v23  ;;  %v9443_v23 = vor.u32 %v11348_v16, %v9440_v20  ;;  %v11375_v16 = vld [vmem:[#allocation7 + $0x4c] sm:$0xf]  ;;  %v9554_v20 = vld [vmem:[#allocation7 + $0x54] sm:$0xf0] }
 0xc76   :  { %3666 = vmatpush.bf16.msra.mxu3 %v9439_v21  ;;  %v9560_v39 = vld [vmem:[#allocation7 + $0x50] sm:$0xf]  ;;  %v11377_v11 = vld [vmem:[#allocation7 + $0x58] sm:$0xf0]  ;;  %v9557_v21 = vor.u32 %v11375_v16, %v9554_v20 }
 0xcd8   :  { %v3459_v50 = vpop.xlane.xlu0 %3458 }
 0xcd9   :  { %vm3462_vm14 = vcmp.eq.f32.partialorder %v3408_v56, %v3459_v50  ;;  %v11351_v56 = vld [vmem:[#allocation5 + $0x4c] sm:$0xf]  ;;  %v9426_v50 = vld [vmem:[#allocation5 + $0x18] sm:$0xf] }
 0xcda   :  { %v12931_v25 = vsel %vm3462_vm14, %v12222_v10, 128  ;;  %v9455_v6 = vor.u32 %v11351_v56, %v9452_v13  ;;  %v9581_v56 = vor.u32 %v11381_v46, %v9578_v7  ;;  %v9422_v13 = vld [vmem:[#allocation5 + $0x8] sm:$0xf] }
 0xcdb   :  { %v3467_v22 = vshra.s32 %v12931_v25, 16  ;;  %v3466_v18 = vand.u32 65535, %v12931_v25  ;;  %v11394_v7 = vld [vmem:[#allocation10 + $0x20] sm:$0xff] }
 0xcdc   :  { %3679 = vmatpush.bf16.msrb.mxu0 %v9455_v6  ;;  %v9566_v6 = vld [vmem:[#allocation7 + $0x6c] sm:$0xf0] }
 0xcdd   :  { %v12934_v28 = vcvt.s32.f32 %v3467_v22  ;;  %v11346_v22 = vld [vmem:[#allocation5 + $0x20] sm:$0xf0] }
 0xcde   :  { %v9427_v26 = vor.u32 %v11346_v22, %v9426_v50  ;;  %v11372_v50 = vld [vmem:[#allocation7 + $0x34] sm:$0xf]  ;;  %v9542_v22 = vld [vmem:[#allocation7 + $0x3c] sm:$0xf0] }
 0xcdf   :  { %3470 = vmin.xlane.f32.xlu2 %v12934_v28  ;;  %v9545_v30 = vor.u32 %v11372_v50, %v9542_v22 }
 0xce0   :  { %v3461_v47 = vpop.xlane.xlu1 %3460  ;;  %3680 = vmatpush.bf16.msrb.mxu0 %v9443_v23  ;;  %3667 = vmatpush.bf16.msra.mxu3 %v9427_v26  ;;  %v9561_v23 = vor.u32 %v11377_v11, %v9560_v39  ;;  %v9530_v26 = vld [vmem:[#allocation7 + $0x24] sm:$0xf0] }
 0xce1   :  { %vm3463_vm15 = vcmp.eq.f32.partialorder %v3410_v41, %v3461_v47  ;;  %v9471_v41 = vor.u32 %v11356_v14, %v9470_v12  ;;  %v11344_v12 = vld [vmem:[#allocation5 + $0x10] sm:$0xf0]  ;;  %v11378_v14 = vld [vmem:[#allocation7 + $0x64] sm:$0xf]  ;;  %v9836_v11 = vld [vmem:[#allocation7 + $0xa8] sm:$0xf] }
 0xce2   :  { %v12938_v27 = vsel %vm3463_vm15, %v12222_v10, 128  ;;  %v9423_v55 = vor.u32 %v11344_v12, %v9422_v13  ;;  %v11390_v39 = vld [vmem:[#allocation10] sm:$0xff] }
 0xce3   :  { %v3481_v29 = vshra.s32 %v12938_v27, 16  ;;  %3692 = vmatpush.bf16.msrb.mxu1 %v9471_v41  ;;  %v3480_v37 = vand.u32 65535, %v12938_v27  ;;  %v9605_v27 = vor.u32 %v11387_v24, %v9602_v51  ;;  %v9569_v41 = vor.u32 %v11378_v14, %v9566_v6  ;;  %v9524_v24 = vld [vmem:[#allocation7 + $0x8] sm:$0xf]  ;;  %v11368_v51 = vld [vmem:[#allocation7 + $0x10] sm:$0xf0] }
 0xce4   :  { %3681 = vmatpush.bf16.msrb.mxu0 %v9431_v40  ;;  %3668 = vmatpush.bf16.msra.mxu3 %v9415_v43  ;;  %v11371_v40 = vld [vmem:[#allocation7 + $0x28] sm:$0xf0]  ;;  %v9525_v57 = vor.u32 %v11368_v51, %v9524_v24  ;;  %v11392_v6 = vld [vmem:[#allocation10 + $0x10] sm:$0xff] }
 0xce5   :  { %v12941_v31 = vcvt.s32.f32 %v3481_v29  ;;  %v3468_v29 = vcvt.s32.f32 %v3466_v18  ;;  %v3482_v60 = vcvt.s32.f32 %v3480_v37  ;;  %v9573_v18 = vor.u32 %v11380_v17, %v9572_v15  ;;  %v9536_v37 = vld [vmem:[#allocation7 + $0x20] sm:$0xf] }
 0xce6   :  { %v9537_v42 = vor.u32 %v11371_v40, %v9536_v37 }
 0xce7   :  { %3484 = vmin.xlane.f32.xlu0 %v12941_v31  ;;  %3693 = vmatpush.bf16.msrb.mxu1 %v9459_v36 }
 0xce8   :  { %3885 = vmatpush.bf16.msrb.mxu3 %v9605_v27 }
 0xceb   :  { %3694 = vmatpush.bf16.msrb.mxu1 %v9447_v0 }
 0xcec   :  { %3886 = vmatpush.bf16.msrb.mxu3 %v9593_v33 }
 0xcf0   :  { %3887 = vmatpush.bf16.msrb.mxu3 %v9581_v56 }
 0xcf4   :  { %3888 = vmatpush.bf16.msrb.mxu3 %v9569_v41  ;;  %v11391_v41 = vld [vmem:[#allocation10 + $0x8] sm:$0xff] }
 0xcf8   :  { %3889 = vmatpush.bf16.msrb.mxu3 %v9557_v21  ;;  %v11444_v21 = vld [vmem:[#allocation7 + $0xb0] sm:$0xf0] }
 0xcf9   :  { %v9837_v22 = vor.u32 %v11444_v21, %v9836_v11 }
 0xcfc   :  { %3890 = vmatpush.bf16.msrb.mxu3 %v9545_v30  ;;  %v9824_v30 = vld [vmem:[#allocation7 + $0x90] sm:$0xf] }
 0xd52   :  { %v12945_v47 = vpop.xlane.xlu2 %3470 }
 0xd53   :  { %vm3472_vm0 = vcmp.eq.f32.partialorder %v12934_v28, %v12945_v47  ;;  %v9419_v28 = vor.u32 %v11342_v45, %v9416_v49  ;;  %v11366_v45 = vld [vmem:[#allocation7 + $0x4] sm:$0xf]  ;;  %v9518_v49 = vld [vmem:[#allocation7 + $0xc] sm:$0xf0] }
 0xd54   :  { %v3473_v25 = vsel %vm3472_vm0, %v3468_v29, inf  ;;  %v9548_v29 = vld [vmem:[#allocation7 + $0x38] sm:$0xf]  ;;  %v9521_v53 = vor.u32 %v11366_v45, %v9518_v49 }
 0xd55   :  { %3474 = vmin.xlane.f32.xlu1 %v3473_v25  ;;  %3682 = vmatpush.bf16.msrb.mxu0 %v9419_v28  ;;  %v9549_v36 = vor.u32 %v11374_v58, %v9548_v29  ;;  %v11369_v25 = vld [vmem:[#allocation7 + $0x1c] sm:$0xf]  ;;  %v3477_v28 = vcvt.f32.s32 %v12945_v47  ;;  %v12963_v47 = vld [vmem:[#allocation8] sm:$0x7] }
 0xd56   :  { %v9533_v32 = vor.u32 %v11369_v25, %v9530_v26  ;;  %v3737_v38 = vperm.slane %v12963_v47, 0 }
 0xd58   :  { %3891 = vmatpush.bf16.msrb.mxu3 %v9533_v32  ;;  %v3881_v33 = vadd.f32 %v3880_v1, %v3737_v38  ;;  %v9812_v32 = vld [vmem:[#allocation7 + $0x78] sm:$0xf]  ;;  %v11432_v1 = vld [vmem:[#allocation7 + $0x50] sm:$0xf0] }
 0xd59   :  { %3899 = vmatpush.bf16.msra.mxu0 %v9609_v61  ;;  %v3478_v61 = vshll.u32 %v3477_v28, 16 }
 0xd5a   :  { %v12950_v59 = vpop.xlane.xlu0 %3484 }
 0xd5b   :  { %vm3486_vm1 = vcmp.eq.f32.partialorder %v12941_v31, %v12950_v59  ;;  %v9435_v31 = vor.u32 %v11347_v5, %v9434_v62  ;;  %v11395_v5 = vld [vmem:[#allocation10 + $0x28] sm:$0xff] }
 0xd5c   :  { %v3487_v52 = vsel %vm3486_vm1, %v3482_v60, inf  ;;  %3892 = vmatpush.bf16.msrb.mxu3 %v9521_v53  ;;  %v3491_v60 = vcvt.f32.s32 %v12950_v59  ;;  %v11397_v59 = vld [vmem:[#allocation10 + $0x38] sm:$0xff] }
 0xd5d   :  { %3488 = vmin.xlane.f32.xlu2 %v3487_v52  ;;  %3900 = vmatpush.bf16.msra.mxu0 %v9597_v4 }
 0xd5e   :  { %3695 = vmatpush.bf16.msrb.mxu1 %v9435_v31  ;;  %v3492_v35 = vshll.u32 %v3491_v60, 16  ;;  %v3882_v31 = vpop.f32.mrf.mxu2  ;;  %v9800_v60 = vld [vmem:[#allocation7 + $0x60] sm:$0xf] }
 0xd5f   :  { %v3883_v9 = vadd.f32 %v3882_v31, %v3737_v38 }
 0xd61   :  { %3901 = vmatpush.bf16.msra.mxu0 %v9585_v19  ;;  %v11393_v19 = vld [vmem:[#allocation10 + $0x18] sm:$0xff] }
 0xd62   :  { %3696 = vmatpush.bf16.msrb.mxu1 %v9423_v55  ;;  %v3738_v55 = vperm.slane %v12963_v47, 1 }
 0xd65   :  { %3902 = vmatpush.bf16.msra.mxu0 %v9573_v18 }
 0xd66   :  { %4076 = vmatpush.bf16.msra.mxu1 %v11397_v59  ;;  %v9788_v59 = vld [vmem:[#allocation7 + $0x48] sm:$0xf] }
 0xd67   :  { %v9789_v31 = vor.u32 %v11432_v1, %v9788_v59 }
 0xd69   :  { %3903 = vmatpush.bf16.msra.mxu0 %v9561_v23 }
 0xd6a   :  { %4077 = vmatpush.bf16.msra.mxu1 %v11396_v3  ;;  %v3739_v3 = vperm.slane %v12963_v47, 2 }
 0xd6d   :  { %3904 = vmatpush.bf16.msra.mxu0 %v9549_v36  ;;  %v11441_v36 = vld [vmem:[#allocation7 + $0x98] sm:$0xf0] }
 0xd6e   :  { %4078 = vmatpush.bf16.msra.mxu1 %v11395_v5  ;;  %v9825_v37 = vor.u32 %v11441_v36, %v9824_v30  ;;  %v9752_v36 = vld [vmem:[#allocation7] sm:$0xf] }
 0xd71   :  { %3905 = vmatpush.bf16.msra.mxu0 %v9537_v42  ;;  %v11438_v42 = vld [vmem:[#allocation7 + $0x80] sm:$0xf0] }
 0xd72   :  { %4079 = vmatpush.bf16.msra.mxu1 %v11394_v7  ;;  %v9813_v51 = vor.u32 %v11438_v42, %v9812_v32 }
 0xd75   :  { %3906 = vmatpush.bf16.msra.mxu0 %v9525_v57 }
 0xd76   :  { %4080 = vmatpush.bf16.msra.mxu1 %v11393_v19 }
 0xd7a   :  { %4081 = vmatpush.bf16.msra.mxu1 %v11392_v6 }
 0xd7e   :  { %4082 = vmatpush.bf16.msra.mxu1 %v11391_v41 }
 0xd82   :  { %4083 = vmatpush.bf16.msra.mxu1 %v11390_v39  ;;  %v11426_v39 = vld [vmem:[#allocation7 + $0x20] sm:$0xf0] }
 0xdc8   :  { %v3475_v43 = vpop.xlane.xlu1 %3474 }
 0xdc9   :  { %v3476_v27 = vcvt.f32.s32 %v3475_v43 }
 0xdcb   :  { %v3479_v63 = vadd.s32 %v3478_v61, %v3476_v27  ;;  %v11435_v27 = vld [vmem:[#allocation7 + $0x68] sm:$0xf0] }
 0xdcd   :  { %vm3494_vm2 = vcmp.eq.s32.totalorder %v12222_v10, %v3479_v63  ;;  %v9801_v63 = vor.u32 %v11435_v27, %v9800_v60 }
 0xdd0   :  { %v3489_v52 = vpop.xlane.xlu2 %3488 }
 0xdd1   :  { %v3490_v34 = vcvt.f32.s32 %v3489_v52 }
 0xdd3   :  { %v3493_v0 = vadd.s32 %v3492_v35, %v3490_v34 }
 0xdd5   :  { %vm3495_vm3 = vcmp.eq.s32.totalorder %v12222_v10, %v3493_v0 }
 0xdd6   :  { %vm9508_vm4 = vmpackc.low %vm3495_vm3, %vm3494_vm2 }
 0xdd7   :  { %9509 = vmatmul.msk.bf16.vlgmr.msra.gmra.mxu3 %vm9508_vm4, %v12162_v44  ;;  %9511 = vmatmul.msk.bf16.vlgmr.msrb.gmra.mxu0 %vm9508_vm4, %v12162_v44 }
 0xdd8   :  { %9513 = vmatmul.msk.bf16.vlgmr.msrb.gmra.mxu1 %vm9508_vm4, %v12162_v44 }
 0xdd9   :  { %4549 = vmatpush.bf16.msrb.mxu1 %v9837_v22 }
 0xddd   :  { %4550 = vmatpush.bf16.msrb.mxu1 %v9825_v37 }
 0xde1   :  { %4551 = vmatpush.bf16.msrb.mxu1 %v9813_v51 }
 0xde5   :  { %4552 = vmatpush.bf16.msrb.mxu1 %v9801_v63 }
 0xde7   :  { %3893 = vmatmul.bf16.vlgmr.msrb.gmra.mxu3 %v12875_v2  ;;  %3907 = vmatmul.bf16.vlgmr.msra.gmra.mxu0 %v12875_v2 }
 0xde9   :  { %4553 = vmatpush.bf16.msrb.mxu1 %v9789_v31 }
 0xe54   :  { %v3684_v54 = vpop.f32.mrf.mxu0 }
 0xe5a   :  { %v3670_v4 = vpop.f32.mrf.mxu3 }
 0xe5b   :  { %v3913_v62 = vadd.f32 %v3881_v33, %v3670_v4 }
 0xe5c   :  { %v3686_v16 = vpop.f32.mrf.mxu0 }
 0xe5d   :  { %v9610_v46 = vmul.f32 -1.442695, %v3913_v62 }
 0xe5f   :  { %11859 = vpow2.f32 %v9610_v46 }
 0xe62   :  { %v3672_v2 = vpop.f32.mrf.mxu3 }
 0xe63   :  { %v3914_v56 = vadd.f32 %v3883_v9, %v3672_v2  ;;  %v3698_v9 = vpop.f32.mrf.mxu1 }
 0xe64   :  { %v3908_v57 = vpop.f32.mrf.mxu0 }
 0xe65   :  { %v11860_v13 = vpop.eup %11859  ;;  %v9611_v12 = vmul.f32 -1.442695, %v3914_v56  ;;  %v11429_v56 = vld [vmem:[#allocation7 + $0x38] sm:$0xf0] }
 0xe66   :  { %v12966_v14 = vadd.f32 1.0, %v11860_v13 }
 0xe67   :  { %11861 = vpow2.f32 %v9611_v12 }
 0xe68   :  { %11863 = vrcp.f32 %v12966_v14  ;;  %v3934_v34 = vand.u32 2147483648, %v12966_v14  ;;  %vm3928_vm6 = vweird.f32 %v12966_v14  ;;  %v3932_v38 = vand.u32 2147483647, %v12966_v14 }
 0xe6a   :  { %v3894_v15 = vpop.f32.mrf.mxu3  ;;  %v3935_v47 = vor.u32 1.1754944e-38, %v3934_v34  ;;  %vm3933_vm11 = vcmp.eq.f32.partialorder %v3932_v38, 8.507059e+37 }
 0xe6b   :  { %v3895_v17 = vadd.f32 %v3894_v15, %v3738_v55 }
 0xe6c   :  { %v3910_v6 = vpop.f32.mrf.mxu0 }
 0xe6d   :  { %v11862_v18 = vpop.eup %11861  ;;  %v3953_v20 = vadd.f32 %v3895_v17, %v3684_v54  ;;  %v9776_v54 = vld [vmem:[#allocation7 + $0x30] sm:$0xf]  ;;  %v3909_v17 = vadd.f32 %v3908_v57, %v3739_v3  ;;  %v3911_v21 = vadd.f32 %v3910_v6, %v3739_v3 }
 0xe6e   :  { %v12970_v23 = vpop.eup %11863  ;;  %v12972_v50 = vadd.f32 1.0, %v11862_v18  ;;  %v9777_v41 = vor.u32 %v11429_v56, %v9776_v54 }
 0xe6f   :  { %v3924_v29 = vmul.f32 %v12970_v23, %v12966_v14  ;;  %v9612_v58 = vmul.f32 -1.442695, %v3953_v20  ;;  %vm3929_vm5 = vweird.f32 %v12970_v23  ;;  %v9764_v20 = vld [vmem:[#allocation7 + $0x18] sm:$0xf] }
 0xe70   :  { %11865 = vrcp.f32 %v12972_v50  ;;  %vm12988_vm8 = vmor %vm3928_vm6, %vm3929_vm5  ;;  %v3949_v62 = vand.u32 2147483648, %v12972_v50  ;;  %vm3943_vm9 = vweird.f32 %v12972_v50  ;;  %v3947_v46 = vand.u32 2147483647, %v12972_v50  ;;  %4554 = vmatpush.bf16.msrb.mxu1 %v9777_v41 }
 0xe71   :  { %11867 = vpow2.f32 %v9612_v58  ;;  %v3925_v25 = vsub.f32 1.0, %v3924_v29  ;;  %v9765_v29 = vor.u32 %v11426_v39, %v9764_v20 }
 0xe72   :  { %v3896_v26 = vpop.f32.mrf.mxu3  ;;  %v3950_v15 = vor.u32 1.1754944e-38, %v3949_v62  ;;  %vm3948_vm12 = vcmp.eq.f32.partialorder %v3947_v46, 8.507059e+37 }
 0xe73   :  { %v3897_v40 = vadd.f32 %v3896_v26, %v3738_v55  ;;  %v3926_v24 = vmul.f32 %v12970_v23, %v3925_v25  ;;  %v11423_v25 = vld [vmem:[#allocation7 + $0x8] sm:$0xf0] }
 0xe74   :  { %4555 = vmatpush.bf16.msrb.mxu1 %v9765_v29  ;;  %v11419_v29 = vld [vmem:[#allocation5 + $0xac] sm:$0xf] }
 0xe75   :  { %v3954_v45 = vadd.f32 %v3897_v40, %v3686_v16  ;;  %v3927_v35 = vadd.f32 %v12970_v23, %v3926_v24  ;;  %v3700_v40 = vpop.f32.mrf.mxu1  ;;  %v9753_v24 = vor.u32 %v11423_v25, %v9752_v36  ;;  %v9722_v36 = vld [vmem:[#allocation5 + $0x90] sm:$0xf]  ;;  %v11417_v25 = vld [vmem:[#allocation5 + $0x98] sm:$0xf0] }
 0xe76   :  { %v11866_v49 = vpop.eup %11865 }
 0xe77   :  { %v11868_v53 = vpop.eup %11867  ;;  %v3939_v43 = vmul.f32 %v11866_v49, %v12972_v50  ;;  %v9613_v28 = vmul.f32 -1.442695, %v3954_v45  ;;  %vm3944_vm7 = vweird.f32 %v11866_v49  ;;  %v3931_v5 = vsel %vm12988_vm8, %v12970_v23, %v3927_v35 }
 0xe78   :  { %v12979_v61 = vadd.f32 1.0, %v11868_v53  ;;  %vm12998_vm10 = vmor %vm3943_vm9, %vm3944_vm7  ;;  %v3936_v14 = vsel %vm3933_vm11, %v3935_v47, %v3931_v5  ;;  %4556 = vmatpush.bf16.msrb.mxu1 %v9753_v24  ;;  %v11752_v5 = vld [vmem:[%s13878_s5] ss:$0 sm:$0xff]  ;;  %v11413_v24 = vld [vmem:[#allocation5 + $0x7c] sm:$0xf] }
 0xe79   :  { %v3940_v52 = vsub.f32 1.0, %v3939_v43  ;;  %11869 = vpow2.f32 %v9613_v28  ;;  %v3993_v11 = vmul.f32 %v3936_v14, %v3909_v17 }
 0xe7a   :  { %11871 = vrcp.f32 %v12979_v61  ;;  %v3974_v22 = vand.u32 2147483648, %v12979_v61  ;;  %vm3968_vm14 = vweird.f32 %v12979_v61  ;;  %v3972_v30 = vand.u32 2147483647, %v12979_v61 }
 0xe7b   :  { %v3941_v0 = vmul.f32 %v11866_v49, %v3940_v52  ;;  %v3995_v37 = vadd.f32 %v3993_v11, %v3698_v9 }
 0xe7c   :  { %vm3973_vm0 = vcmp.eq.f32.partialorder %v3972_v30, 8.507059e+37  ;;  %v9736_v30 = vld [vmem:[#allocation5 + $0xb4] sm:$0xf0] }
 0xe7d   :  { %v3942_v4 = vadd.f32 %v11866_v49, %v3941_v0 }
 0xe7f   :  { %v11870_v7 = vpop.eup %11869  ;;  %v3946_v13 = vsel %vm12998_vm10, %v11866_v49, %v3942_v4  ;;  %v3975_v49 = vor.u32 1.1754944e-38, %v3974_v22  ;;  %v11420_v22 = vld [vmem:[#allocation5 + $0xb0] sm:$0xf0] }
 0xe80   :  { %v11872_v19 = vpop.eup %11871  ;;  %v3962_v12 = vadd.f32 1.0, %v11870_v7  ;;  %v3951_v16 = vsel %vm3948_vm12, %v3950_v15, %v3946_v13 }
 0xe81   :  { %v3964_v55 = vmul.f32 %v11872_v19, %v12979_v61  ;;  %vm3969_vm13 = vweird.f32 %v11872_v19  ;;  %v3994_v50 = vmul.f32 %v3951_v16, %v3911_v21 }
 0xe82   :  { %11873 = vrcp.f32 %v3962_v12  ;;  %vm3970_vm15 = vmor %vm3968_vm14, %vm3969_vm13  ;;  %v3989_v57 = vand.u32 2147483648, %v3962_v12  ;;  %v3987_v28 = vand.u32 2147483647, %v3962_v12  ;;  %vm3983_vm2 = vweird.f32 %v3962_v12 }
 0xe83   :  { %v3965_v18 = vsub.f32 1.0, %v3964_v55  ;;  %v3996_v45 = vadd.f32 %v3994_v50, %v3700_v40  ;;  %11875 = vtanh.f32 %v3995_v37  ;;  %v9734_v50 = vld [vmem:[#allocation5 + $0xa8] sm:$0xf]  ;;  %v11416_v37 = vld [vmem:[#allocation5 + $0x94] sm:$0xf] }
 0xe84   :  { %v3990_v61 = vor.u32 1.1754944e-38, %v3989_v57  ;;  %vm3988_vm4 = vcmp.eq.f32.partialorder %v3987_v28, 8.507059e+37  ;;  %v9724_v40 = vld [vmem:[#allocation5 + $0x9c] sm:$0xf0]  ;;  %v11421_v57 = vld [vmem:[#allocation5 + $0xb8] sm:$0xf0] }
 0xe85   :  { %v3966_v23 = vmul.f32 %v11872_v19, %v3965_v18  ;;  %11877 = vtanh.f32 %v3996_v45  ;;  %v9710_v45 = vld [vmem:[#allocation5 + $0x78] sm:$0xf] }
 0xe87   :  { %v3967_v58 = vadd.f32 %v11872_v19, %v3966_v23 }
 0xe88   :  { %v11874_v26 = vpop.eup %11873 }
 0xe89   :  { %v3979_v32 = vmul.f32 %v11874_v26, %v3962_v12  ;;  %v3971_v42 = vsel %vm3970_vm15, %v11872_v19, %v3967_v58  ;;  %vm3984_vm1 = vweird.f32 %v11874_v26  ;;  %v11876_v35 = vpop.eup %11875  ;;  %v9735_v58 = vor.u32 %v11420_v22, %v9734_v50  ;;  %v11401_v50 = vld [vmem:[#allocation5 + $0x1c] sm:$0xf]  ;;  %v9664_v22 = vld [vmem:[#allocation5 + $0x24] sm:$0xf0] }
 0xe8a   :  { %v3976_v53 = vsel %vm3973_vm0, %v3975_v49, %v3971_v42  ;;  %vm3985_vm3 = vmor %vm3983_vm2, %vm3984_vm1  ;;  %v9727_v42 = vor.u32 %v11416_v37, %v9724_v40  ;;  %v11414_v49 = vld [vmem:[#allocation5 + $0x80] sm:$0xf0]  ;;  %v9652_v40 = vld [vmem:[#allocation5 + $0xc] sm:$0xf0] }
 0xe8b   :  { %v3980_v51 = vsub.f32 1.0, %v3979_v32  ;;  %v3999_v27 = vsub.f32 1.0, %v3976_v53  ;;  %v11878_v59 = vpop.eup %11877  ;;  %v4003_v38 = vmul.f32 %v3976_v53, %v12869_v48  ;;  %4339 = vmatpush.bf16.msra.mxu2 %v9735_v58  ;;  %v9723_v32 = vor.u32 %v11417_v25, %v9722_v36  ;;  %v9742_v53 = vld [vmem:[#allocation5 + $0xb0] sm:$0xf]  ;;  %v9650_v25 = vld [vmem:[#allocation5] sm:$0xf] }
 0xe8c   :  { %v9711_v28 = vor.u32 %v11414_v49, %v9710_v45  ;;  %v9667_v36 = vor.u32 %v11401_v50, %v9664_v22  ;;  %v11398_v37 = vld [vmem:[#allocation5 + $0x4] sm:$0xf]  ;;  %v9844_v45 = vld [vmem:[#allocation7 + $0xb0] sm:$0xf]  ;;  %v11445_v49 = vld [vmem:[#allocation7 + $0xb8] sm:$0xf0] }
 0xe8d   :  { %v3981_v43 = vmul.f32 %v11874_v26, %v3980_v51  ;;  %v4001_v0 = vmul.f32 %v11876_v35, %v3999_v27  ;;  %v9712_v51 = vld [vmem:[#allocation5 + $0x84] sm:$0xf0]  ;;  %v11418_v27 = vld [vmem:[#allocation5 + $0xa0] sm:$0xf0]  ;;  %v11411_v35 = vld [vmem:[#allocation5 + $0x68] sm:$0xf0] }
 0xe8e   :  { %v11430_v50 = vld [vmem:[#allocation7 + $0x40] sm:$0xf0] }
 0xe8f   :  { %v3982_v60 = vadd.f32 %v11874_v26, %v3981_v43  ;;  %v13010_v33 = vadd.f32 %v4003_v38, %v4001_v0  ;;  %v9743_v43 = vor.u32 %v11421_v57, %v9742_v53  ;;  %4340 = vmatpush.bf16.msra.mxu2 %v9723_v32  ;;  %v9700_v0 = vld [vmem:[#allocation5 + $0x6c] sm:$0xf0]  ;;  %v11443_v32 = vld [vmem:[#allocation7 + $0xac] sm:$0xf]  ;;  %v9845_v57 = vor.u32 %v11445_v49, %v9844_v45 }
 0xe91   :  { %v3986_v52 = vsel %vm3985_vm3, %v11874_v26, %v3982_v60  ;;  %v9739_v26 = vor.u32 %v11419_v29, %v9736_v30  ;;  %v9730_v60 = vld [vmem:[#allocation5 + $0x98] sm:$0xf]  ;;  %4367 = vmatpush.bf16.msrb.mxu0 %v9743_v43 }
 0xe92   :  { %v3991_v63 = vsel %vm3988_vm4, %v3990_v61, %v3986_v52  ;;  %v9715_v61 = vor.u32 %v11413_v24, %v9712_v51  ;;  %v9698_v52 = vld [vmem:[#allocation5 + $0x60] sm:$0xf] }
 0xe93   :  { %v4000_v34 = vsub.f32 1.0, %v3991_v63  ;;  %v4004_v3 = vmul.f32 %v3991_v63, %v12871_v8  ;;  %4353 = vmatpush.bf16.msra.mxu3 %v9739_v26  ;;  %v11410_v63 = vld [vmem:[#allocation5 + $0x64] sm:$0xf]  ;;  %4341 = vmatpush.bf16.msra.mxu2 %v9711_v28  ;;  %v9699_v38 = vor.u32 %v11411_v35, %v9698_v52  ;;  %v11399_v26 = vld [vmem:[#allocation5 + $0x8] sm:$0xf0] }
 0xe94   :  { %v9651_v24 = vor.u32 %v11399_v26, %v9650_v25  ;;  %v9682_v28 = vld [vmem:[#allocation5 + $0x38] sm:$0xf]  ;;  %v9826_v52 = vld [vmem:[#allocation7 + $0x9c] sm:$0xf0] }
 0xe95   :  { %v4002_v1 = vmul.f32 %v11878_v59, %v4000_v34  ;;  %v9731_v34 = vor.u32 %v11418_v27, %v9730_v60  ;;  %v9718_v59 = vld [vmem:[#allocation5 + $0x80] sm:$0xf]  ;;  %v11406_v60 = vld [vmem:[#allocation5 + $0x40] sm:$0xf0]  ;;  %v11440_v27 = vld [vmem:[#allocation7 + $0x94] sm:$0xf] }
 0xe96   :  { %v9832_v35 = vld [vmem:[#allocation7 + $0x98] sm:$0xf] }
 0xe97   :  { %v13012_v4 = vadd.f32 %v4004_v3, %v4002_v1  ;;  %4354 = vmatpush.bf16.msra.mxu3 %v9727_v42  ;;  %v11415_v1 = vld [vmem:[#allocation5 + $0x88] sm:$0xf0]  ;;  %v9703_v3 = vor.u32 %v11410_v63, %v9700_v0  ;;  %4368 = vmatpush.bf16.msrb.mxu0 %v9731_v34  ;;  %v9838_v42 = vld [vmem:[#allocation7 + $0xb4] sm:$0xf0]  ;;  %v11442_v63 = vld [vmem:[#allocation7 + $0xa0] sm:$0xf0]  ;;  %v9829_v34 = vor.u32 %v11440_v27, %v9826_v52 }
 0xe98   :  { %4342 = vmatpush.bf16.msra.mxu2 %v9699_v38  ;;  %v9833_v0 = vor.u32 %v11442_v63, %v9832_v35  ;;  %v11437_v38 = vld [vmem:[#allocation7 + $0x7c] sm:$0xf]  ;;  %v11452_v63 = vld [vmem:[#allocation10 + $0x30] sm:$0xff] }
 0xe99   :  { %v13016_v62 = vpack.c.bf16 %v13012_v4, %v13010_v33 }
 0xe9b   :  { %4084 = vmatmul.bf16.vlgmr.msra.gmra.mxu1 %v13016_v62  ;;  %4355 = vmatpush.bf16.msra.mxu3 %v9715_v61  ;;  %v9683_v61 = vor.u32 %v11406_v60, %v9682_v28 }
 0xe9f   :  { %4356 = vmatpush.bf16.msra.mxu3 %v9703_v3  ;;  %v9814_v3 = vld [vmem:[#allocation7 + $0x84] sm:$0xf0] }
 0xeab   :  { %4557 = vmatmul.bf16.vlgmr.msrb.gmra.mxu1 %v13016_v62 }
 0xf18   :  { %v4085_v46 = vpop.f32.mrf.mxu1 }
 0xf19   :  { %v4086_v48 = vadd.f32 %v11752_v5, %v4085_v46  ;;  %v11408_v46 = vld [vmem:[#allocation5 + $0x50] sm:$0xf0] }
 0xf1b   :  { %v4092_v31 = vrot.slane %v4086_v48, 1  ;;  %v4093_v8 = vrot.slane %v4086_v48, 2  ;;  %v4094_v7 = vrot.slane %v4086_v48, 3  ;;  %4120 = vst [vmem:[%s13879_s6 + $0x5] sm:$0x1] %v4086_v48  ;;  %4136 = vmax.xlane.f32.xlu0 %v4086_v48  ;;  %v4095_v9 = vrot.slane %v4086_v48, 4 }
 0xf1c   :  { %v4096_v47 = vrot.slane %v4086_v48, 5  ;;  %v4097_v2 = vrot.slane %v4086_v48, 6  ;;  %v4098_v54 = vrot.slane %v4086_v48, 7 }
 0xf1d   :  { %4121 = vst [vmem:[%s13879_s6 + $0x15] sm:$0x1] %v4092_v31  ;;  %v9719_v31 = vor.u32 %v11415_v1, %v9718_v59  ;;  %v9670_v59 = vld [vmem:[#allocation5 + $0x20] sm:$0xf]  ;;  %v11403_v1 = vld [vmem:[#allocation5 + $0x28] sm:$0xf0] }
 0xf1e   :  { %4122 = vst [vmem:[%s13879_s6 + $0x25] sm:$0x1] %v4093_v8  ;;  %v9688_v8 = vld [vmem:[#allocation5 + $0x54] sm:$0xf0] }
 0xf1f   :  { %4123 = vst [vmem:[%s13879_s6 + $0x35] sm:$0x1] %v4094_v7  ;;  %v9706_v7 = vld [vmem:[#allocation5 + $0x68] sm:$0xf]  ;;  %4369 = vmatpush.bf16.msrb.mxu0 %v9719_v31 }
 0xf20   :  { %4124 = vst [vmem:[%s13879_s6 + $0x45] sm:$0x1] %v4095_v9  ;;  %v4087_v56 = vpop.f32.mrf.mxu1  ;;  %v11412_v9 = vld [vmem:[#allocation5 + $0x70] sm:$0xf0] }
 0xf21   :  { %4125 = vst [vmem:[%s13879_s6 + $0x55] sm:$0x1] %v4096_v47  ;;  %v4088_v19 = vadd.f32 %v11752_v5, %v4087_v56  ;;  %v9686_v5 = vld [vmem:[#allocation5 + $0x48] sm:$0xf]  ;;  %v11405_v56 = vld [vmem:[#allocation5 + $0x38] sm:$0xf0] }
 0xf22   :  { %4126 = vst [vmem:[%s13879_s6 + $0x65] sm:$0x1] %v4097_v2  ;;  %v9687_v47 = vor.u32 %v11408_v46, %v9686_v5  ;;  %v9820_v5 = vld [vmem:[#allocation7 + $0x80] sm:$0xf]  ;;  %v11439_v46 = vld [vmem:[#allocation7 + $0x88] sm:$0xf0] }
 0xf23   :  { %4127 = vst [vmem:[%s13879_s6 + $0x75] sm:$0x1] %v4098_v54  ;;  %v4099_v13 = vrot.slane %v4088_v19, 1  ;;  %v4100_v12 = vrot.slane %v4088_v19, 2  ;;  %v4101_v14 = vrot.slane %v4088_v19, 3  ;;  %4138 = vmax.xlane.f32.xlu1 %v4088_v19  ;;  %v4102_v55 = vrot.slane %v4088_v19, 4 }
 0xf24   :  { %4128 = vst [vmem:[%s13879_s6 + $0x85] sm:$0x1] %v4088_v19  ;;  %v4103_v6 = vrot.slane %v4088_v19, 5  ;;  %v4104_v15 = vrot.slane %v4088_v19, 6  ;;  %v4105_v17 = vrot.slane %v4088_v19, 7  ;;  %4343 = vmatpush.bf16.msra.mxu2 %v9687_v47  ;;  %v9821_v31 = vor.u32 %v11439_v46, %v9820_v5 }
 0xf25   :  { %4129 = vst [vmem:[%s13879_s6 + $0x95] sm:$0x1] %v4099_v13  ;;  %v9674_v54 = vld [vmem:[#allocation5 + $0x30] sm:$0xf] }
 0xf26   :  { %4130 = vst [vmem:[%s13879_s6 + $0xa5] sm:$0x1] %v4100_v12  ;;  %v11404_v12 = vld [vmem:[#allocation5 + $0x34] sm:$0xf] }
 0xf27   :  { %4131 = vst [vmem:[%s13879_s6 + $0xb5] sm:$0x1] %v4101_v14  ;;  %v9676_v14 = vld [vmem:[#allocation5 + $0x3c] sm:$0xf0] }
 0xf28   :  { %4132 = vst [vmem:[%s13879_s6 + $0xc5] sm:$0x1] %v4102_v55  ;;  %v9694_v55 = vld [vmem:[#allocation5 + $0x50] sm:$0xf]  ;;  %v4558_v52 = vpop.f32.mrf.mxu1 }
 0xf29   :  { %4133 = vst [vmem:[%s13879_s6 + $0xd5] sm:$0x1] %v4103_v6  ;;  %v11409_v6 = vld [vmem:[#allocation5 + $0x58] sm:$0xf0] }
 0xf2a   :  { %4134 = vst [vmem:[%s13879_s6 + $0xe5] sm:$0x1] %v4104_v15  ;;  %v9675_v15 = vor.u32 %v11405_v56, %v9674_v54  ;;  %v9695_v29 = vor.u32 %v11409_v6, %v9694_v55  ;;  %v9808_v54 = vld [vmem:[#allocation7 + $0x68] sm:$0xf]  ;;  %v11436_v56 = vld [vmem:[#allocation7 + $0x70] sm:$0xf0] }
 0xf2b   :  { %4135 = vst [vmem:[%s13879_s6 + $0xf5] sm:$0x1] %v4105_v17  ;;  %v9679_v17 = vor.u32 %v11404_v12, %v9676_v14  ;;  %v11431_v12 = vld [vmem:[#allocation7 + $0x4c] sm:$0xf]  ;;  %v9790_v14 = vld [vmem:[#allocation7 + $0x54] sm:$0xf0] }
 0xf2c   :  { %4344 = vmatpush.bf16.msra.mxu2 %v9675_v15  ;;  %v9796_v55 = vld [vmem:[#allocation7 + $0x50] sm:$0xf]  ;;  %v11433_v6 = vld [vmem:[#allocation7 + $0x58] sm:$0xf0]  ;;  %v9793_v15 = vor.u32 %v11431_v12, %v9790_v14 }
 0xf8e   :  { %v4137_v41 = vpop.xlane.xlu0 %4136 }
 0xf8f   :  { %vm4140_vm5 = vcmp.eq.f32.partialorder %v4086_v48, %v4137_v41  ;;  %v11407_v48 = vld [vmem:[#allocation5 + $0x4c] sm:$0xf]  ;;  %v9662_v41 = vld [vmem:[#allocation5 + $0x18] sm:$0xf] }
 0xf90   :  { %v13072_v18 = vsel %vm4140_vm5, %v12222_v10, 128  ;;  %v9691_v2 = vor.u32 %v11407_v48, %v9688_v8  ;;  %v9817_v48 = vor.u32 %v11437_v38, %v9814_v3  ;;  %v9658_v8 = vld [vmem:[#allocation5 + $0x8] sm:$0xf] }
 0xf91   :  { %v4145_v16 = vshra.s32 %v13072_v18, 16  ;;  %v4144_v13 = vand.u32 65535, %v13072_v18  ;;  %v11450_v3 = vld [vmem:[#allocation10 + $0x20] sm:$0xff] }
 0xf92   :  { %4357 = vmatpush.bf16.msra.mxu3 %v9691_v2  ;;  %v9802_v2 = vld [vmem:[#allocation7 + $0x6c] sm:$0xf0] }
 0xf93   :  { %v13075_v20 = vcvt.s32.f32 %v4145_v16  ;;  %v11402_v16 = vld [vmem:[#allocation5 + $0x20] sm:$0xf0] }
 0xf94   :  { %v9663_v58 = vor.u32 %v11402_v16, %v9662_v41  ;;  %v11428_v41 = vld [vmem:[#allocation7 + $0x34] sm:$0xf]  ;;  %v9778_v16 = vld [vmem:[#allocation7 + $0x3c] sm:$0xf0] }
 0xf95   :  { %4148 = vmin.xlane.f32.xlu2 %v13075_v20  ;;  %v9781_v22 = vor.u32 %v11428_v41, %v9778_v16  ;;  %v11446_v41 = vld [vmem:[#allocation10] sm:$0xff] }
 0xf96   :  { %v4139_v39 = vpop.xlane.xlu1 %4138  ;;  %4358 = vmatpush.bf16.msra.mxu3 %v9679_v17  ;;  %4345 = vmatpush.bf16.msra.mxu2 %v9663_v58  ;;  %v9797_v17 = vor.u32 %v11433_v6, %v9796_v55  ;;  %v9766_v58 = vld [vmem:[#allocation7 + $0x24] sm:$0xf0] }
 0xf97   :  { %vm4141_vm6 = vcmp.eq.f32.partialorder %v4088_v19, %v4139_v39  ;;  %v9707_v19 = vor.u32 %v11412_v9, %v9706_v7  ;;  %v11400_v7 = vld [vmem:[#allocation5 + $0x10] sm:$0xf0]  ;;  %v11434_v9 = vld [vmem:[#allocation7 + $0x64] sm:$0xf]  ;;  %v10072_v16 = vld [vmem:[#allocation7 + $0xa8] sm:$0xf] }
 0xf98   :  { %v13079_v11 = vsel %vm4141_vm6, %v12222_v10, 128  ;;  %v9659_v47 = vor.u32 %v11400_v7, %v9658_v8 }
 0xf99   :  { %v4159_v21 = vshra.s32 %v13079_v11, 16  ;;  %4370 = vmatpush.bf16.msrb.mxu0 %v9707_v19  ;;  %v4158_v30 = vand.u32 65535, %v13079_v11  ;;  %v9841_v11 = vor.u32 %v11443_v32, %v9838_v42  ;;  %v9805_v19 = vor.u32 %v11434_v9, %v9802_v2  ;;  %v9760_v32 = vld [vmem:[#allocation7 + $0x8] sm:$0xf]  ;;  %v11424_v42 = vld [vmem:[#allocation7 + $0x10] sm:$0xf0] }
 0xf9a   :  { %4359 = vmatpush.bf16.msra.mxu3 %v9667_v36  ;;  %4346 = vmatpush.bf16.msra.mxu2 %v9651_v24  ;;  %v11427_v36 = vld [vmem:[#allocation7 + $0x28] sm:$0xf0]  ;;  %v9761_v49 = vor.u32 %v11424_v42, %v9760_v32  ;;  %v11448_v2 = vld [vmem:[#allocation10 + $0x10] sm:$0xff] }
 0xf9b   :  { %v13082_v23 = vcvt.s32.f32 %v4159_v21  ;;  %v4146_v21 = vcvt.s32.f32 %v4144_v13  ;;  %v4160_v53 = vcvt.s32.f32 %v4158_v30  ;;  %v9809_v13 = vor.u32 %v11436_v56, %v9808_v54  ;;  %v9772_v30 = vld [vmem:[#allocation7 + $0x20] sm:$0xf] }
 0xf9c   :  { %v9773_v26 = vor.u32 %v11427_v36, %v9772_v30  ;;  %v11497_v30 = vld [vmem:[#allocation7 + $0x98] sm:$0xf0] }
 0xf9d   :  { %4162 = vmin.xlane.f32.xlu0 %v13082_v23  ;;  %4371 = vmatpush.bf16.msrb.mxu0 %v9695_v29 }
 0xf9e   :  { %4563 = vmatpush.bf16.msrb.mxu2 %v9841_v11 }
 0xfa1   :  { %4372 = vmatpush.bf16.msrb.mxu0 %v9683_v61 }
 0xfa2   :  { %4564 = vmatpush.bf16.msrb.mxu2 %v9829_v34 }
 0xfa6   :  { %4565 = vmatpush.bf16.msrb.mxu2 %v9817_v48 }
 0xfaa   :  { %4566 = vmatpush.bf16.msrb.mxu2 %v9805_v19  ;;  %v11447_v19 = vld [vmem:[#allocation10 + $0x8] sm:$0xff] }
 0xfae   :  { %4567 = vmatpush.bf16.msrb.mxu2 %v9793_v15 }
 0xfb2   :  { %4568 = vmatpush.bf16.msrb.mxu2 %v9781_v22 }
0x1008   :  { %v13086_v39 = vpop.xlane.xlu2 %4148 }
0x1009   :  { %vm4150_vm7 = vcmp.eq.f32.partialorder %v13075_v20, %v13086_v39  ;;  %v9655_v20 = vor.u32 %v11398_v37, %v9652_v40  ;;  %v11422_v37 = vld [vmem:[#allocation7 + $0x4] sm:$0xf]  ;;  %v9754_v40 = vld [vmem:[#allocation7 + $0xc] sm:$0xf0] }
0x100a   :  { %v4151_v18 = vsel %vm4150_vm7, %v4146_v21, inf  ;;  %v9784_v21 = vld [vmem:[#allocation7 + $0x38] sm:$0xf]  ;;  %v9757_v45 = vor.u32 %v11422_v37, %v9754_v40  ;;  %v11494_v37 = vld [vmem:[#allocation7 + $0x80] sm:$0xf0] }
0x100b   :  { %4152 = vmin.xlane.f32.xlu1 %v4151_v18  ;;  %4360 = vmatpush.bf16.msra.mxu3 %v9655_v20  ;;  %v9785_v29 = vor.u32 %v11430_v50, %v9784_v21  ;;  %v11425_v18 = vld [vmem:[#allocation7 + $0x1c] sm:$0xf]  ;;  %v4155_v20 = vcvt.f32.s32 %v13086_v39  ;;  %v13104_v39 = vld [vmem:[#allocation8] sm:$0x7]  ;;  %v11500_v21 = vld [vmem:[#allocation7 + $0xb0] sm:$0xf0] }
0x100c   :  { %v9769_v25 = vor.u32 %v11425_v18, %v9766_v58  ;;  %v4415_v35 = vperm.slane %v13104_v39, 0  ;;  %v10073_v50 = vor.u32 %v11500_v21, %v10072_v16  ;;  %v10060_v58 = vld [vmem:[#allocation7 + $0x90] sm:$0xf] }
0x100d   :  { %v10061_v36 = vor.u32 %v11497_v30, %v10060_v58  ;;  %v9988_v58 = vld [vmem:[#allocation7] sm:$0xf]  ;;  %v11479_v30 = vld [vmem:[#allocation7 + $0x8] sm:$0xf0] }
0x100e   :  { %4569 = vmatpush.bf16.msrb.mxu2 %v9769_v25  ;;  %v4559_v34 = vadd.f32 %v4558_v52, %v4415_v35  ;;  %v10024_v52 = vld [vmem:[#allocation7 + $0x48] sm:$0xf] }
0x100f   :  { %4577 = vmatpush.bf16.msrb.mxu3 %v9845_v57  ;;  %v4156_v57 = vshll.u32 %v4155_v20, 16 }
0x1010   :  { %v13091_v51 = vpop.xlane.xlu0 %4162 }
0x1011   :  { %vm4164_vm8 = vcmp.eq.f32.partialorder %v13082_v23, %v13091_v51  ;;  %v9671_v23 = vor.u32 %v11403_v1, %v9670_v59  ;;  %v11451_v1 = vld [vmem:[#allocation10 + $0x28] sm:$0xff] }
0x1012   :  { %v4165_v43 = vsel %vm4164_vm8, %v4160_v53, inf  ;;  %4570 = vmatpush.bf16.msrb.mxu2 %v9757_v45  ;;  %v4169_v53 = vcvt.f32.s32 %v13091_v51  ;;  %v11453_v51 = vld [vmem:[#allocation10 + $0x38] sm:$0xff] }
0x1013   :  { %4166 = vmin.xlane.f32.xlu2 %v4165_v43  ;;  %4578 = vmatpush.bf16.msrb.mxu3 %v9833_v0 }
0x1014   :  { %4373 = vmatpush.bf16.msrb.mxu0 %v9671_v23  ;;  %v4170_v28 = vshll.u32 %v4169_v53, 16  ;;  %v4560_v23 = vpop.f32.mrf.mxu1 }
0x1015   :  { %v4561_v5 = vadd.f32 %v4560_v23, %v4415_v35  ;;  %v11488_v35 = vld [vmem:[#allocation7 + $0x50] sm:$0xf0] }
0x1017   :  { %4579 = vmatpush.bf16.msrb.mxu3 %v9821_v31  ;;  %v11449_v31 = vld [vmem:[#allocation10 + $0x18] sm:$0xff] }
0x1018   :  { %4374 = vmatpush.bf16.msrb.mxu0 %v9659_v47  ;;  %v4416_v47 = vperm.slane %v13104_v39, 1 }
0x101b   :  { %4580 = vmatpush.bf16.msrb.mxu3 %v9809_v13 }
0x101c   :  { %4754 = vmatpush.bf16.msra.mxu0 %v11453_v51 }
0x101f   :  { %4581 = vmatpush.bf16.msrb.mxu3 %v9797_v17 }
0x1020   :  { %4755 = vmatpush.bf16.msra.mxu0 %v11452_v63 }
0x1023   :  { %4582 = vmatpush.bf16.msrb.mxu3 %v9785_v29 }
0x1024   :  { %4756 = vmatpush.bf16.msra.mxu0 %v11451_v1 }
0x1027   :  { %4583 = vmatpush.bf16.msrb.mxu3 %v9773_v26  ;;  %v10048_v26 = vld [vmem:[#allocation7 + $0x78] sm:$0xf] }
0x1028   :  { %4757 = vmatpush.bf16.msra.mxu0 %v11450_v3  ;;  %v10049_v20 = vor.u32 %v11494_v37, %v10048_v26 }
0x102b   :  { %4584 = vmatpush.bf16.msrb.mxu3 %v9761_v49 }
0x102c   :  { %4758 = vmatpush.bf16.msra.mxu0 %v11449_v31 }
0x1030   :  { %4759 = vmatpush.bf16.msra.mxu0 %v11448_v2 }
0x1034   :  { %4760 = vmatpush.bf16.msra.mxu0 %v11447_v19 }
0x1038   :  { %4761 = vmatpush.bf16.msra.mxu0 %v11446_v41 }
0x107e   :  { %v4153_v24 = vpop.xlane.xlu1 %4152 }
0x107f   :  { %v4154_v11 = vcvt.f32.s32 %v4153_v24 }
0x1081   :  { %v4157_v60 = vadd.s32 %v4156_v57, %v4154_v11  ;;  %v10036_v11 = vld [vmem:[#allocation7 + $0x60] sm:$0xf]  ;;  %v11491_v57 = vld [vmem:[#allocation7 + $0x68] sm:$0xf0] }
0x1083   :  { %vm4172_vm9 = vcmp.eq.s32.totalorder %v12222_v10, %v4157_v60 }
0x1086   :  { %v4167_v43 = vpop.xlane.xlu2 %4166 }
0x1087   :  { %v4168_v27 = vcvt.f32.s32 %v4167_v43 }
0x1089   :  { %v4171_v61 = vadd.s32 %v4170_v28, %v4168_v27 }
0x108b   :  { %vm4173_vm10 = vcmp.eq.s32.totalorder %v12222_v10, %v4171_v61  ;;  %v10037_v61 = vor.u32 %v11491_v57, %v10036_v11 }
0x108c   :  { %vm9744_vm11 = vmpackc.low %vm4173_vm10, %vm4172_vm9 }
0x108d   :  { %9745 = vmatmul.msk.bf16.vlgmr.msra.gmra.mxu2 %vm9744_vm11, %v12162_v44  ;;  %9747 = vmatmul.msk.bf16.vlgmr.msra.gmra.mxu3 %vm9744_vm11, %v12162_v44 }
0x108e   :  { %9749 = vmatmul.msk.bf16.vlgmr.msrb.gmra.mxu0 %vm9744_vm11, %v12162_v44 }
0x108f   :  { %5227 = vmatpush.bf16.msrb.mxu0 %v10073_v50 }
0x1093   :  { %5228 = vmatpush.bf16.msrb.mxu0 %v10061_v36 }
0x1097   :  { %5229 = vmatpush.bf16.msrb.mxu0 %v10049_v20 }
0x109b   :  { %5230 = vmatpush.bf16.msrb.mxu0 %v10037_v61 }
0x109d   :  { %4571 = vmatmul.bf16.vlgmr.msrb.gmra.mxu2 %v13016_v62  ;;  %4585 = vmatmul.bf16.vlgmr.msrb.gmra.mxu3 %v13016_v62 }
0x110b   :  { %v4376_v3 = vpop.f32.mrf.mxu0 }
0x1110   :  { %v4348_v0 = vpop.f32.mrf.mxu2  ;;  %v4362_v46 = vpop.f32.mrf.mxu3 }
0x1111   :  { %v4591_v59 = vadd.f32 %v4559_v34, %v4348_v0 }
0x1113   :  { %v9846_v38 = vmul.f32 -1.442695, %v4591_v59  ;;  %v4417_v59 = vperm.slane %v13104_v39, 2  ;;  %v4378_v36 = vpop.f32.mrf.mxu0 }
0x1115   :  { %11879 = vpow2.f32 %v9846_v38 }
0x1118   :  { %v4350_v62 = vpop.f32.mrf.mxu2  ;;  %v4364_v12 = vpop.f32.mrf.mxu3 }
0x1119   :  { %v4592_v48 = vadd.f32 %v4561_v5, %v4350_v62 }
0x111b   :  { %v11880_v8 = vpop.eup %11879  ;;  %v9847_v7 = vmul.f32 -1.442695, %v4592_v48 }
0x111c   :  { %v13107_v9 = vadd.f32 1.0, %v11880_v8  ;;  %v10012_v8 = vld [vmem:[#allocation7 + $0x30] sm:$0xf] }
0x111d   :  { %11881 = vpow2.f32 %v9847_v7  ;;  %v11485_v7 = vld [vmem:[#allocation7 + $0x38] sm:$0xf0] }
0x111e   :  { %11883 = vrcp.f32 %v13107_v9  ;;  %v4612_v60 = vand.u32 2147483648, %v13107_v9  ;;  %vm4606_vm13 = vweird.f32 %v13107_v9  ;;  %v4610_v51 = vand.u32 2147483647, %v13107_v9 }
0x1120   :  { %v4572_v54 = vpop.f32.mrf.mxu2  ;;  %v4586_v45 = vpop.f32.mrf.mxu3  ;;  %v4613_v5 = vor.u32 1.1754944e-38, %v4612_v60  ;;  %vm4611_vm2 = vcmp.eq.f32.partialorder %v4610_v51, 8.507059e+37 }
0x1121   :  { %v4573_v56 = vadd.f32 %v4572_v54, %v4416_v47 }
0x1123   :  { %v11882_v13 = vpop.eup %11881  ;;  %v4631_v14 = vadd.f32 %v4573_v56, %v4362_v46  ;;  %v10025_v46 = vor.u32 %v11488_v35, %v10024_v52  ;;  %v4587_v56 = vadd.f32 %v4586_v45, %v4417_v59 }
0x1124   :  { %v13111_v55 = vpop.eup %11883  ;;  %v13113_v6 = vadd.f32 1.0, %v11882_v13 }
0x1125   :  { %v9848_v15 = vmul.f32 -1.442695, %v4631_v14  ;;  %v4602_v17 = vmul.f32 %v13111_v55, %v13107_v9  ;;  %vm4607_vm12 = vweird.f32 %v13111_v55  ;;  %5231 = vmatpush.bf16.msrb.mxu0 %v10025_v46 }
0x1126   :  { %11885 = vrcp.f32 %v13113_v6  ;;  %vm13128_vm15 = vmor %vm4606_vm13, %vm4607_vm12  ;;  %v4627_v0 = vand.u32 2147483648, %v13113_v6  ;;  %vm4621_vm0 = vweird.f32 %v13113_v6  ;;  %v4625_v38 = vand.u32 2147483647, %v13113_v6 }
0x1127   :  { %11887 = vpow2.f32 %v9848_v15  ;;  %v4603_v22 = vsub.f32 1.0, %v4602_v17  ;;  %v11482_v15 = vld [vmem:[#allocation7 + $0x20] sm:$0xf0] }
0x1128   :  { %v4574_v29 = vpop.f32.mrf.mxu2  ;;  %v4588_v2 = vpop.f32.mrf.mxu3  ;;  %v4628_v54 = vor.u32 1.1754944e-38, %v4627_v0  ;;  %vm4626_vm3 = vcmp.eq.f32.partialorder %v4625_v38, 8.507059e+37 }
0x1129   :  { %v4575_v18 = vadd.f32 %v4574_v29, %v4416_v47  ;;  %v4604_v32 = vmul.f32 %v13111_v55, %v4603_v22 }
0x112b   :  { %v4632_v25 = vadd.f32 %v4575_v18, %v4364_v12  ;;  %v4605_v28 = vadd.f32 %v13111_v55, %v4604_v32  ;;  %v10013_v12 = vor.u32 %v11485_v7, %v10012_v8 }
0x112c   :  { %v11886_v40 = vpop.eup %11885 }
0x112d   :  { %v11888_v42 = vpop.eup %11887  ;;  %v9849_v49 = vmul.f32 -1.442695, %v4632_v25  ;;  %v4617_v24 = vmul.f32 %v11886_v40, %v13113_v6  ;;  %vm4622_vm14 = vweird.f32 %v11886_v40  ;;  %v4609_v1 = vsel %vm13128_vm15, %v13111_v55, %v4605_v28  ;;  %v10000_v6 = vld [vmem:[#allocation7 + $0x18] sm:$0xf]  ;;  %5232 = vmatpush.bf16.msrb.mxu0 %v10013_v12 }
0x112e   :  { %v13120_v53 = vadd.f32 1.0, %v11888_v42  ;;  %vm13139_vm1 = vmor %vm4621_vm0, %vm4622_vm14  ;;  %v4614_v47 = vsel %vm4611_vm2, %v4613_v5, %v4609_v1  ;;  %v4589_v55 = vadd.f32 %v4588_v2, %v4417_v59  ;;  %v10001_v22 = vor.u32 %v11482_v15, %v10000_v6  ;;  %v11753_v1 = vld [vmem:[%s13878_s5] ss:$0 sm:$0xff] }
0x112f   :  { %11889 = vpow2.f32 %v9849_v49  ;;  %v4618_v43 = vsub.f32 1.0, %v4617_v24  ;;  %v4671_v14 = vmul.f32 %v4614_v47, %v4587_v56  ;;  %v9989_v42 = vor.u32 %v11479_v30, %v9988_v58  ;;  %v11472_v30 = vld [vmem:[#allocation5 + $0x94] sm:$0xf] }
0x1130   :  { %11891 = vrcp.f32 %v13120_v53  ;;  %v4652_v41 = vand.u32 2147483648, %v13120_v53  ;;  %vm4646_vm5 = vweird.f32 %v13120_v53  ;;  %v4650_v50 = vand.u32 2147483647, %v13120_v53 }
0x1131   :  { %v4619_v27 = vmul.f32 %v11886_v40, %v4618_v43  ;;  %v4673_v18 = vadd.f32 %v4671_v14, %v4376_v3  ;;  %5233 = vmatpush.bf16.msrb.mxu0 %v10001_v22  ;;  %v9972_v22 = vld [vmem:[#allocation5 + $0xb4] sm:$0xf0] }
0x1132   :  { %v4653_v37 = vor.u32 1.1754944e-38, %v4652_v41  ;;  %vm4651_vm7 = vcmp.eq.f32.partialorder %v4650_v50, 8.507059e+37  ;;  %v9970_v41 = vld [vmem:[#allocation5 + $0xa8] sm:$0xf] }
0x1133   :  { %v4620_v34 = vadd.f32 %v11886_v40, %v4619_v27 }
0x1135   :  { %v11890_v23 = vpop.eup %11889  ;;  %v4624_v31 = vsel %vm13139_vm1, %v11886_v40, %v4620_v34  ;;  %5234 = vmatpush.bf16.msrb.mxu0 %v9989_v42  ;;  %v9948_v42 = vld [vmem:[#allocation5 + $0x84] sm:$0xf0] }
0x1136   :  { %v11892_v48 = vpop.eup %11891  ;;  %v4640_v39 = vadd.f32 1.0, %v11890_v23  ;;  %v4629_v13 = vsel %vm4626_vm3, %v4628_v54, %v4624_v31 }
0x1137   :  { %v4642_v9 = vmul.f32 %v11892_v48, %v13120_v53  ;;  %vm4647_vm4 = vweird.f32 %v11892_v48  ;;  %v4672_v16 = vmul.f32 %v4629_v13, %v4589_v55 }
0x1138   :  { %11893 = vrcp.f32 %v4640_v39  ;;  %vm4648_vm6 = vmor %vm4646_vm5, %vm4647_vm4  ;;  %v4667_v49 = vand.u32 2147483648, %v4640_v39  ;;  %v4665_v20 = vand.u32 2147483647, %v4640_v39  ;;  %vm4661_vm9 = vweird.f32 %v4640_v39 }
0x1139   :  { %v4643_v19 = vsub.f32 1.0, %v4642_v9  ;;  %v4674_v40 = vadd.f32 %v4672_v16, %v4378_v36  ;;  %11895 = vtanh.f32 %v4673_v18  ;;  %v11476_v16 = vld [vmem:[#allocation5 + $0xb0] sm:$0xf0]  ;;  %v11473_v18 = vld [vmem:[#allocation5 + $0x98] sm:$0xf0] }
0x113a   :  { %v4668_v57 = vor.u32 1.1754944e-38, %v4667_v49  ;;  %vm4666_vm11 = vcmp.eq.f32.partialorder %v4665_v20, 8.507059e+37  ;;  %v9971_v50 = vor.u32 %v11476_v16, %v9970_v41  ;;  %v9960_v36 = vld [vmem:[#allocation5 + $0x9c] sm:$0xf0]  ;;  %v11477_v49 = vld [vmem:[#allocation5 + $0xb8] sm:$0xf0] }
0x113b   :  { %v4644_v17 = vmul.f32 %v11892_v48, %v4643_v19  ;;  %11897 = vtanh.f32 %v4674_v40  ;;  %v11470_v40 = vld [vmem:[#allocation5 + $0x80] sm:$0xf0]  ;;  %v11457_v41 = vld [vmem:[#allocation5 + $0x1c] sm:$0xf]  ;;  %v9900_v16 = vld [vmem:[#allocation5 + $0x24] sm:$0xf0] }
0x113c   :  { %5017 = vmatpush.bf16.msra.mxu1 %v9971_v50 }
0x113d   :  { %v4645_v21 = vadd.f32 %v11892_v48, %v4644_v17 }
0x113e   :  { %v11894_v29 = vpop.eup %11893 }
0x113f   :  { %v4649_v25 = vsel %vm4648_vm6, %v11892_v48, %v4645_v21  ;;  %v4657_v26 = vmul.f32 %v11894_v29, %v4640_v39  ;;  %vm4662_vm8 = vweird.f32 %v11894_v29  ;;  %v11896_v28 = vpop.eup %11895  ;;  %v11475_v21 = vld [vmem:[#allocation5 + $0xac] sm:$0xf] }
0x1140   :  { %v4654_v45 = vsel %vm4651_vm7, %v4653_v37, %v4649_v25  ;;  %vm4663_vm10 = vmor %vm4661_vm9, %vm4662_vm8  ;;  %v9975_v58 = vor.u32 %v11475_v21, %v9972_v22  ;;  %v9946_v37 = vld [vmem:[#allocation5 + $0x78] sm:$0xf] }
0x1141   :  { %v4658_v32 = vsub.f32 1.0, %v4657_v26  ;;  %v4677_v53 = vsub.f32 1.0, %v4654_v45  ;;  %v11898_v51 = vpop.eup %11897  ;;  %v4681_v35 = vmul.f32 %v4654_v45, %v13010_v33  ;;  %v9963_v26 = vor.u32 %v11472_v30, %v9960_v36  ;;  %v9978_v45 = vld [vmem:[#allocation5 + $0xb0] sm:$0xf]  ;;  %v11454_v30 = vld [vmem:[#allocation5 + $0x4] sm:$0xf] }
0x1142   :  { %5031 = vmatpush.bf16.msra.mxu2 %v9975_v58  ;;  %v9947_v20 = vor.u32 %v11470_v40, %v9946_v37  ;;  %v11455_v58 = vld [vmem:[#allocation5 + $0x8] sm:$0xf0]  ;;  %v9888_v36 = vld [vmem:[#allocation5 + $0xc] sm:$0xf0]  ;;  %v11501_v40 = vld [vmem:[#allocation7 + $0xb8] sm:$0xf0] }
0x1143   :  { %v4659_v24 = vmul.f32 %v11894_v29, %v4658_v32  ;;  %v4679_v27 = vmul.f32 %v11896_v28, %v4677_v53  ;;  %v11469_v32 = vld [vmem:[#allocation5 + $0x7c] sm:$0xf]  ;;  %v9966_v53 = vld [vmem:[#allocation5 + $0x98] sm:$0xf]  ;;  %v11467_v28 = vld [vmem:[#allocation5 + $0x68] sm:$0xf0] }
0x1144   :  { %v10080_v37 = vld [vmem:[#allocation7 + $0xb0] sm:$0xf] }
0x1145   :  { %v4660_v11 = vadd.f32 %v11894_v29, %v4659_v24  ;;  %v13151_v34 = vadd.f32 %v4681_v35, %v4679_v27  ;;  %v9979_v24 = vor.u32 %v11477_v49, %v9978_v45  ;;  %v10081_v49 = vor.u32 %v11501_v40, %v10080_v37 }
0x1146   :  { %5032 = vmatpush.bf16.msra.mxu2 %v9963_v26  ;;  %v10074_v26 = vld [vmem:[#allocation7 + $0xb4] sm:$0xf0] }
0x1147   :  { %v4664_v43 = vsel %vm4663_vm10, %v11894_v29, %v4660_v11  ;;  %v9958_v29 = vld [vmem:[#allocation5 + $0x90] sm:$0xf]  ;;  %v11474_v11 = vld [vmem:[#allocation5 + $0xa0] sm:$0xf0]  ;;  %5045 = vmatpush.bf16.msra.mxu3 %v9979_v24 }
0x1148   :  { %v4669_v60 = vsel %vm4666_vm11, %v4668_v57, %v4664_v43  ;;  %v9959_v25 = vor.u32 %v11473_v18, %v9958_v29  ;;  %v9951_v57 = vor.u32 %v11469_v32, %v9948_v42  ;;  %v9934_v43 = vld [vmem:[#allocation5 + $0x60] sm:$0xf]  ;;  %v9967_v27 = vor.u32 %v11474_v11, %v9966_v53  ;;  %v11462_v53 = vld [vmem:[#allocation5 + $0x40] sm:$0xf0]  ;;  %v11496_v11 = vld [vmem:[#allocation7 + $0x94] sm:$0xf] }
0x1149   :  { %v4678_v61 = vsub.f32 1.0, %v4669_v60  ;;  %v4682_v63 = vmul.f32 %v4669_v60, %v13012_v4  ;;  %v11466_v60 = vld [vmem:[#allocation5 + $0x64] sm:$0xf]  ;;  %v9935_v35 = vor.u32 %v11467_v28, %v9934_v43  ;;  %v9903_v29 = vor.u32 %v11457_v41, %v9900_v16  ;;  %v9886_v18 = vld [vmem:[#allocation5] sm:$0xf] }
0x114a   :  { %5018 = vmatpush.bf16.msra.mxu1 %v9959_v25  ;;  %5033 = vmatpush.bf16.msra.mxu2 %v9951_v57  ;;  %v11499_v25 = vld [vmem:[#allocation7 + $0xac] sm:$0xf]  ;;  %v9887_v32 = vor.u32 %v11455_v58, %v9886_v18  ;;  %v10062_v43 = vld [vmem:[#allocation7 + $0x9c] sm:$0xf0]  ;;  %v10068_v28 = vld [vmem:[#allocation7 + $0x98] sm:$0xf] }
0x114b   :  { %v4680_v52 = vmul.f32 %v11898_v51, %v4678_v61  ;;  %v9936_v61 = vld [vmem:[#allocation5 + $0x6c] sm:$0xf0]  ;;  %v9954_v51 = vld [vmem:[#allocation5 + $0x80] sm:$0xf]  ;;  %5046 = vmatpush.bf16.msra.mxu3 %v9967_v27  ;;  %v10065_v27 = vor.u32 %v11496_v11, %v10062_v43  ;;  %v11486_v41 = vld [vmem:[#allocation7 + $0x40] sm:$0xf0] }
0x114d   :  { %v13153_v0 = vadd.f32 %v4682_v63, %v4680_v52  ;;  %v11471_v52 = vld [vmem:[#allocation5 + $0x88] sm:$0xf0]  ;;  %v9939_v63 = vor.u32 %v11466_v60, %v9936_v61  ;;  %v11498_v60 = vld [vmem:[#allocation7 + $0xa0] sm:$0xf0] }
0x114e   :  { %5019 = vmatpush.bf16.msra.mxu1 %v9947_v20  ;;  %v9918_v20 = vld [vmem:[#allocation5 + $0x38] sm:$0xf]  ;;  %v10069_v61 = vor.u32 %v11498_v60, %v10068_v28 }
0x114f   :  { %v13157_v59 = vpack.c.bf16 %v13153_v0, %v13151_v34  ;;  %5034 = vmatpush.bf16.msra.mxu2 %v9939_v63  ;;  %v9919_v57 = vor.u32 %v11462_v53, %v9918_v20  ;;  %v10050_v63 = vld [vmem:[#allocation7 + $0x84] sm:$0xf0]  ;;  %v11508_v60 = vld [vmem:[#allocation10 + $0x30] sm:$0xff] }
0x1151   :  { %4762 = vmatmul.bf16.vlgmr.msra.gmra.mxu0 %v13157_v59 }
0x1152   :  { %5020 = vmatpush.bf16.msra.mxu1 %v9935_v35  ;;  %v11493_v35 = vld [vmem:[#allocation7 + $0x7c] sm:$0xf] }
0x1161   :  { %5235 = vmatmul.bf16.vlgmr.msrb.gmra.mxu0 %v13157_v59 }
0x11ce   :  { %v4763_v38 = vpop.f32.mrf.mxu0 }
0x11cf   :  { %v4764_v33 = vadd.f32 %v11753_v1, %v4763_v38  ;;  %v11464_v38 = vld [vmem:[#allocation5 + $0x50] sm:$0xf0] }
0x11d1   :  { %v4770_v23 = vrot.slane %v4764_v33, 1  ;;  %v4771_v4 = vrot.slane %v4764_v33, 2  ;;  %v4772_v3 = vrot.slane %v4764_v33, 3  ;;  %4798 = vst [vmem:[%s13879_s6 + $0x6] sm:$0x1] %v4764_v33  ;;  %4814 = vmax.xlane.f32.xlu0 %v4764_v33  ;;  %v4773_v5 = vrot.slane %v4764_v33, 4 }
0x11d2   :  { %v4774_v62 = vrot.slane %v4764_v33, 5  ;;  %v4775_v46 = vrot.slane %v4764_v33, 6  ;;  %v4776_v48 = vrot.slane %v4764_v33, 7 }
0x11d3   :  { %4799 = vst [vmem:[%s13879_s6 + $0x16] sm:$0x1] %v4770_v23  ;;  %v9955_v23 = vor.u32 %v11471_v52, %v9954_v51  ;;  %v9906_v51 = vld [vmem:[#allocation5 + $0x20] sm:$0xf]  ;;  %v11459_v52 = vld [vmem:[#allocation5 + $0x28] sm:$0xf0] }
0x11d4   :  { %4800 = vst [vmem:[%s13879_s6 + $0x26] sm:$0x1] %v4771_v4  ;;  %v9924_v4 = vld [vmem:[#allocation5 + $0x54] sm:$0xf0] }
0x11d5   :  { %4801 = vst [vmem:[%s13879_s6 + $0x36] sm:$0x1] %v4772_v3  ;;  %v9942_v3 = vld [vmem:[#allocation5 + $0x68] sm:$0xf]  ;;  %5047 = vmatpush.bf16.msra.mxu3 %v9955_v23 }
0x11d6   :  { %4802 = vst [vmem:[%s13879_s6 + $0x46] sm:$0x1] %v4773_v5  ;;  %v4765_v39 = vpop.f32.mrf.mxu0  ;;  %v11468_v5 = vld [vmem:[#allocation5 + $0x70] sm:$0xf0] }
0x11d7   :  { %4803 = vst [vmem:[%s13879_s6 + $0x56] sm:$0x1] %v4774_v62  ;;  %v4766_v31 = vadd.f32 %v11753_v1, %v4765_v39  ;;  %v9922_v1 = vld [vmem:[#allocation5 + $0x48] sm:$0xf]  ;;  %v11461_v39 = vld [vmem:[#allocation5 + $0x38] sm:$0xf0] }
0x11d8   :  { %4804 = vst [vmem:[%s13879_s6 + $0x66] sm:$0x1] %v4775_v46  ;;  %v9923_v62 = vor.u32 %v11464_v38, %v9922_v1  ;;  %v10056_v1 = vld [vmem:[#allocation7 + $0x80] sm:$0xf]  ;;  %v11495_v38 = vld [vmem:[#allocation7 + $0x88] sm:$0xf0] }
0x11d9   :  { %4805 = vst [vmem:[%s13879_s6 + $0x76] sm:$0x1] %v4776_v48  ;;  %v4777_v8 = vrot.slane %v4766_v31, 1  ;;  %v4778_v7 = vrot.slane %v4766_v31, 2  ;;  %v4779_v9 = vrot.slane %v4766_v31, 3  ;;  %4816 = vmax.xlane.f32.xlu1 %v4766_v31  ;;  %v4780_v47 = vrot.slane %v4766_v31, 4 }
0x11da   :  { %4806 = vst [vmem:[%s13879_s6 + $0x86] sm:$0x1] %v4766_v31  ;;  %v4781_v2 = vrot.slane %v4766_v31, 5  ;;  %v4782_v54 = vrot.slane %v4766_v31, 6  ;;  %v4783_v56 = vrot.slane %v4766_v31, 7  ;;  %5021 = vmatpush.bf16.msra.mxu1 %v9923_v62  ;;  %v10057_v23 = vor.u32 %v11495_v38, %v10056_v1 }
0x11db   :  { %4807 = vst [vmem:[%s13879_s6 + $0x96] sm:$0x1] %v4777_v8  ;;  %v9910_v48 = vld [vmem:[#allocation5 + $0x30] sm:$0xf] }
0x11dc   :  { %4808 = vst [vmem:[%s13879_s6 + $0xa6] sm:$0x1] %v4778_v7  ;;  %v11460_v7 = vld [vmem:[#allocation5 + $0x34] sm:$0xf] }
0x11dd   :  { %4809 = vst [vmem:[%s13879_s6 + $0xb6] sm:$0x1] %v4779_v9  ;;  %v9912_v9 = vld [vmem:[#allocation5 + $0x3c] sm:$0xf0] }
0x11de   :  { %4810 = vst [vmem:[%s13879_s6 + $0xc6] sm:$0x1] %v4780_v47  ;;  %v9930_v47 = vld [vmem:[#allocation5 + $0x50] sm:$0xf]  ;;  %v5236_v43 = vpop.f32.mrf.mxu0 }
0x11df   :  { %4811 = vst [vmem:[%s13879_s6 + $0xd6] sm:$0x1] %v4781_v2  ;;  %v11465_v2 = vld [vmem:[#allocation5 + $0x58] sm:$0xf0] }
0x11e0   :  { %4812 = vst [vmem:[%s13879_s6 + $0xe6] sm:$0x1] %v4782_v54  ;;  %v9911_v54 = vor.u32 %v11461_v39, %v9910_v48  ;;  %v9931_v21 = vor.u32 %v11465_v2, %v9930_v47  ;;  %v10044_v48 = vld [vmem:[#allocation7 + $0x68] sm:$0xf]  ;;  %v11492_v39 = vld [vmem:[#allocation7 + $0x70] sm:$0xf0] }
0x11e1   :  { %4813 = vst [vmem:[%s13879_s6 + $0xf6] sm:$0x1] %v4783_v56  ;;  %v9915_v56 = vor.u32 %v11460_v7, %v9912_v9  ;;  %v11487_v7 = vld [vmem:[#allocation7 + $0x4c] sm:$0xf]  ;;  %v10026_v9 = vld [vmem:[#allocation7 + $0x54] sm:$0xf0] }
0x11e2   :  { %5022 = vmatpush.bf16.msra.mxu1 %v9911_v54  ;;  %v10032_v47 = vld [vmem:[#allocation7 + $0x50] sm:$0xf]  ;;  %v11489_v2 = vld [vmem:[#allocation7 + $0x58] sm:$0xf0]  ;;  %v10029_v54 = vor.u32 %v11487_v7, %v10026_v9 }
0x1244   :  { %v4815_v19 = vpop.xlane.xlu0 %4814 }
0x1245   :  { %vm4818_vm12 = vcmp.eq.f32.partialorder %v4764_v33, %v4815_v19  ;;  %v11463_v33 = vld [vmem:[#allocation5 + $0x4c] sm:$0xf]  ;;  %v9898_v19 = vld [vmem:[#allocation5 + $0x18] sm:$0xf] }
0x1246   :  { %v13213_v13 = vsel %vm4818_vm12, %v12222_v10, 128  ;;  %v9927_v46 = vor.u32 %v11463_v33, %v9924_v4  ;;  %v10053_v33 = vor.u32 %v11493_v35, %v10050_v63  ;;  %v9894_v4 = vld [vmem:[#allocation5 + $0x8] sm:$0xf] }
0x1247   :  { %v4823_v12 = vshra.s32 %v13213_v13, 16  ;;  %v4822_v8 = vand.u32 65535, %v13213_v13  ;;  %v11506_v63 = vld [vmem:[#allocation10 + $0x20] sm:$0xff] }
0x1248   :  { %5035 = vmatpush.bf16.msra.mxu2 %v9927_v46  ;;  %v10038_v46 = vld [vmem:[#allocation7 + $0x6c] sm:$0xf0] }
0x1249   :  { %v13216_v14 = vcvt.s32.f32 %v4823_v12  ;;  %v11458_v12 = vld [vmem:[#allocation5 + $0x20] sm:$0xf0] }
0x124a   :  { %v9899_v50 = vor.u32 %v11458_v12, %v9898_v19  ;;  %v11484_v19 = vld [vmem:[#allocation7 + $0x34] sm:$0xf]  ;;  %v10014_v12 = vld [vmem:[#allocation7 + $0x3c] sm:$0xf0] }
0x124b   :  { %4826 = vmin.xlane.f32.xlu2 %v13216_v14  ;;  %v10017_v16 = vor.u32 %v11484_v19, %v10014_v12  ;;  %v11502_v19 = vld [vmem:[#allocation10] sm:$0xff] }
0x124c   :  { %v4817_v55 = vpop.xlane.xlu1 %4816  ;;  %5036 = vmatpush.bf16.msra.mxu2 %v9915_v56  ;;  %5023 = vmatpush.bf16.msra.mxu1 %v9899_v50  ;;  %v10033_v56 = vor.u32 %v11489_v2, %v10032_v47  ;;  %v10002_v50 = vld [vmem:[#allocation7 + $0x24] sm:$0xf0] }
0x124d   :  { %vm4819_vm13 = vcmp.eq.f32.partialorder %v4766_v31, %v4817_v55  ;;  %v9943_v31 = vor.u32 %v11468_v5, %v9942_v3  ;;  %v11456_v3 = vld [vmem:[#allocation5 + $0x10] sm:$0xf0]  ;;  %v11490_v5 = vld [vmem:[#allocation7 + $0x64] sm:$0xf]  ;;  %v10308_v12 = vld [vmem:[#allocation7 + $0xa8] sm:$0xf] }
0x124e   :  { %v13220_v6 = vsel %vm4819_vm13, %v12222_v10, 128  ;;  %v9895_v62 = vor.u32 %v11456_v3, %v9894_v4 }
0x124f   :  { %v4837_v15 = vshra.s32 %v13220_v6, 16  ;;  %5048 = vmatpush.bf16.msra.mxu3 %v9943_v31  ;;  %v4836_v22 = vand.u32 65535, %v13220_v6  ;;  %v10077_v6 = vor.u32 %v11499_v25, %v10074_v26  ;;  %v10041_v31 = vor.u32 %v11490_v5, %v10038_v46  ;;  %v9996_v25 = vld [vmem:[#allocation7 + $0x8] sm:$0xf]  ;;  %v11480_v26 = vld [vmem:[#allocation7 + $0x10] sm:$0xf0] }
0x1250   :  { %5037 = vmatpush.bf16.msra.mxu2 %v9903_v29  ;;  %5024 = vmatpush.bf16.msra.mxu1 %v9887_v32  ;;  %v11483_v29 = vld [vmem:[#allocation7 + $0x28] sm:$0xf0]  ;;  %v9997_v40 = vor.u32 %v11480_v26, %v9996_v25  ;;  %v11504_v46 = vld [vmem:[#allocation10 + $0x10] sm:$0xff] }
0x1251   :  { %v13223_v17 = vcvt.s32.f32 %v4837_v15  ;;  %v4824_v15 = vcvt.s32.f32 %v4822_v8  ;;  %v4838_v45 = vcvt.s32.f32 %v4836_v22  ;;  %v10045_v8 = vor.u32 %v11492_v39, %v10044_v48  ;;  %v10008_v22 = vld [vmem:[#allocation7 + $0x20] sm:$0xf] }
0x1252   :  { %v10009_v58 = vor.u32 %v11483_v29, %v10008_v22  ;;  %v11553_v22 = vld [vmem:[#allocation7 + $0x98] sm:$0xf0] }
0x1253   :  { %4840 = vmin.xlane.f32.xlu0 %v13223_v17  ;;  %5049 = vmatpush.bf16.msra.mxu3 %v9931_v21 }
0x1254   :  { %5241 = vmatpush.bf16.msrb.mxu1 %v10077_v6 }
0x1257   :  { %5050 = vmatpush.bf16.msra.mxu3 %v9919_v57 }
0x1258   :  { %5242 = vmatpush.bf16.msrb.mxu1 %v10065_v27 }
0x125c   :  { %5243 = vmatpush.bf16.msrb.mxu1 %v10053_v33 }
0x1260   :  { %5244 = vmatpush.bf16.msrb.mxu1 %v10041_v31  ;;  %v11503_v31 = vld [vmem:[#allocation10 + $0x8] sm:$0xff] }
0x1264   :  { %5245 = vmatpush.bf16.msrb.mxu1 %v10029_v54 }
0x1268   :  { %5246 = vmatpush.bf16.msrb.mxu1 %v10017_v16 }
0x12be   :  { %v13227_v55 = vpop.xlane.xlu2 %4826 }
0x12bf   :  { %vm4828_vm14 = vcmp.eq.f32.partialorder %v13216_v14, %v13227_v55  ;;  %v9891_v14 = vor.u32 %v11454_v30, %v9888_v36  ;;  %v11478_v30 = vld [vmem:[#allocation7 + $0x4] sm:$0xf]  ;;  %v9990_v36 = vld [vmem:[#allocation7 + $0xc] sm:$0xf0] }
0x12c0   :  { %v4829_v13 = vsel %vm4828_vm14, %v4824_v15, inf  ;;  %v10020_v15 = vld [vmem:[#allocation7 + $0x38] sm:$0xf]  ;;  %v9993_v37 = vor.u32 %v11478_v30, %v9990_v36  ;;  %v11550_v30 = vld [vmem:[#allocation7 + $0x80] sm:$0xf0] }
0x12c1   :  { %4830 = vmin.xlane.f32.xlu1 %v4829_v13  ;;  %5038 = vmatpush.bf16.msra.mxu2 %v9891_v14  ;;  %v10021_v21 = vor.u32 %v11486_v41, %v10020_v15  ;;  %v11481_v13 = vld [vmem:[#allocation7 + $0x1c] sm:$0xf]  ;;  %v4833_v14 = vcvt.f32.s32 %v13227_v55  ;;  %v13245_v55 = vld [vmem:[#allocation8] sm:$0x7]  ;;  %v11556_v15 = vld [vmem:[#allocation7 + $0xb0] sm:$0xf0] }
0x12c2   :  { %v10005_v18 = vor.u32 %v11481_v13, %v10002_v50  ;;  %v5093_v28 = vperm.slane %v13245_v55, 0  ;;  %v10309_v41 = vor.u32 %v11556_v15, %v10308_v12  ;;  %v10296_v50 = vld [vmem:[#allocation7 + $0x90] sm:$0xf] }
0x12c3   :  { %v10297_v29 = vor.u32 %v11553_v22, %v10296_v50  ;;  %v10224_v50 = vld [vmem:[#allocation7] sm:$0xf]  ;;  %v11535_v22 = vld [vmem:[#allocation7 + $0x8] sm:$0xf0] }
0x12c4   :  { %5247 = vmatpush.bf16.msrb.mxu1 %v10005_v18  ;;  %v5237_v27 = vadd.f32 %v5236_v43, %v5093_v28  ;;  %v10260_v43 = vld [vmem:[#allocation7 + $0x48] sm:$0xf] }
0x12c5   :  { %5255 = vmatpush.bf16.msrb.mxu2 %v10081_v49  ;;  %v4834_v49 = vshll.u32 %v4833_v14, 16 }
0x12c6   :  { %v13232_v42 = vpop.xlane.xlu0 %4840 }
0x12c7   :  { %vm4842_vm15 = vcmp.eq.f32.partialorder %v13223_v17, %v13232_v42  ;;  %v9907_v17 = vor.u32 %v11459_v52, %v9906_v51  ;;  %v11507_v52 = vld [vmem:[#allocation10 + $0x28] sm:$0xff] }
0x12c8   :  { %v4843_v24 = vsel %vm4842_vm15, %v4838_v45, inf  ;;  %5248 = vmatpush.bf16.msrb.mxu1 %v9993_v37  ;;  %v4847_v45 = vcvt.f32.s32 %v13232_v42  ;;  %v11509_v42 = vld [vmem:[#allocation10 + $0x38] sm:$0xff] }
0x12c9   :  { %4844 = vmin.xlane.f32.xlu2 %v4843_v24  ;;  %5256 = vmatpush.bf16.msrb.mxu2 %v10069_v61 }
0x12ca   :  { %5051 = vmatpush.bf16.msra.mxu3 %v9907_v17  ;;  %v4848_v20 = vshll.u32 %v4847_v45, 16  ;;  %v5238_v17 = vpop.f32.mrf.mxu0 }
0x12cb   :  { %v5239_v1 = vadd.f32 %v5238_v17, %v5093_v28  ;;  %v11544_v28 = vld [vmem:[#allocation7 + $0x50] sm:$0xf0] }
0x12cd   :  { %5257 = vmatpush.bf16.msrb.mxu2 %v10057_v23  ;;  %v11505_v23 = vld [vmem:[#allocation10 + $0x18] sm:$0xff] }
0x12ce   :  { %5052 = vmatpush.bf16.msra.mxu3 %v9895_v62  ;;  %v5094_v62 = vperm.slane %v13245_v55, 1 }
0x12d1   :  { %5258 = vmatpush.bf16.msrb.mxu2 %v10045_v8 }
0x12d2   :  { %5432 = vmatpush.bf16.msrb.mxu3 %v11509_v42 }
0x12d5   :  { %5259 = vmatpush.bf16.msrb.mxu2 %v10033_v56 }
0x12d6   :  { %5433 = vmatpush.bf16.msrb.mxu3 %v11508_v60 }
0x12d9   :  { %5260 = vmatpush.bf16.msrb.mxu2 %v10021_v21 }
0x12da   :  { %5434 = vmatpush.bf16.msrb.mxu3 %v11507_v52 }
0x12dd   :  { %5261 = vmatpush.bf16.msrb.mxu2 %v10009_v58  ;;  %v10284_v58 = vld [vmem:[#allocation7 + $0x78] sm:$0xf] }
0x12de   :  { %5435 = vmatpush.bf16.msrb.mxu3 %v11506_v63  ;;  %v10285_v14 = vor.u32 %v11550_v30, %v10284_v58 }
0x12e1   :  { %5262 = vmatpush.bf16.msrb.mxu2 %v9997_v40 }
0x12e2   :  { %5436 = vmatpush.bf16.msrb.mxu3 %v11505_v23 }
0x12e6   :  { %5437 = vmatpush.bf16.msrb.mxu3 %v11504_v46 }
0x12ea   :  { %5438 = vmatpush.bf16.msrb.mxu3 %v11503_v31 }
0x12ee   :  { %5439 = vmatpush.bf16.msrb.mxu3 %v11502_v19 }
0x1334   :  { %v4831_v32 = vpop.xlane.xlu1 %4830 }
0x1335   :  { %v4832_v6 = vcvt.f32.s32 %v4831_v32 }
0x1337   :  { %v4835_v53 = vadd.s32 %v4834_v49, %v4832_v6  ;;  %v10272_v6 = vld [vmem:[#allocation7 + $0x60] sm:$0xf]  ;;  %v11547_v49 = vld [vmem:[#allocation7 + $0x68] sm:$0xf0] }
0x1339   :  { %vm4850_vm0 = vcmp.eq.s32.totalorder %v12222_v10, %v4835_v53 }
0x133c   :  { %v4845_v24 = vpop.xlane.xlu2 %4844 }
0x133d   :  { %v4846_v11 = vcvt.f32.s32 %v4845_v24 }
0x133f   :  { %v4849_v57 = vadd.s32 %v4848_v20, %v4846_v11 }
0x1341   :  { %vm4851_vm1 = vcmp.eq.s32.totalorder %v12222_v10, %v4849_v57  ;;  %v10273_v57 = vor.u32 %v11547_v49, %v10272_v6 }
0x1342   :  { %vm9980_vm2 = vmpackc.low %vm4851_vm1, %vm4850_vm0 }
0x1343   :  { %9981 = vmatmul.msk.bf16.vlgmr.msra.gmra.mxu1 %vm9980_vm2, %v12162_v44  ;;  %9983 = vmatmul.msk.bf16.vlgmr.msra.gmra.mxu2 %vm9980_vm2, %v12162_v44 }
0x1344   :  { %9985 = vmatmul.msk.bf16.vlgmr.msra.gmra.mxu3 %vm9980_vm2, %v12162_v44 }
0x1345   :  { %5905 = vmatpush.bf16.msra.mxu3 %v10309_v41 }
0x1349   :  { %5906 = vmatpush.bf16.msra.mxu3 %v10297_v29 }
0x134d   :  { %5907 = vmatpush.bf16.msra.mxu3 %v10285_v14 }
0x1351   :  { %5908 = vmatpush.bf16.msra.mxu3 %v10273_v57 }
0x1353   :  { %5249 = vmatmul.bf16.vlgmr.msrb.gmra.mxu1 %v13157_v59  ;;  %5263 = vmatmul.bf16.vlgmr.msrb.gmra.mxu2 %v13157_v59 }
0x13c0   :  { %v5026_v61 = vpop.f32.mrf.mxu1 }
0x13c1   :  { %v5269_v51 = vadd.f32 %v5237_v27, %v5026_v61 }
0x13c3   :  { %v10082_v35 = vmul.f32 -1.442695, %v5269_v51  ;;  %v5095_v51 = vperm.slane %v13245_v55, 2 }
0x13c5   :  { %11899 = vpow2.f32 %v10082_v35 }
0x13c6   :  { %v5040_v38 = vpop.f32.mrf.mxu2 }
0x13c7   :  { %v5054_v63 = vpop.f32.mrf.mxu3 }
0x13c8   :  { %v5028_v59 = vpop.f32.mrf.mxu1 }
0x13c9   :  { %v5270_v33 = vadd.f32 %v5239_v1, %v5028_v59 }
0x13cb   :  { %v11900_v4 = vpop.eup %11899  ;;  %v10083_v3 = vmul.f32 -1.442695, %v5270_v33 }
0x13cc   :  { %v13248_v5 = vadd.f32 1.0, %v11900_v4  ;;  %v10248_v4 = vld [vmem:[#allocation7 + $0x30] sm:$0xf] }
0x13cd   :  { %11901 = vpow2.f32 %v10083_v3  ;;  %v11541_v3 = vld [vmem:[#allocation7 + $0x38] sm:$0xf0] }
0x13ce   :  { %11903 = vrcp.f32 %v13248_v5  ;;  %v5042_v7 = vpop.f32.mrf.mxu2  ;;  %v5290_v53 = vand.u32 2147483648, %v13248_v5  ;;  %vm5284_vm4 = vweird.f32 %v13248_v5  ;;  %v5288_v42 = vand.u32 2147483647, %v13248_v5 }
0x13cf   :  { %v5056_v29 = vpop.f32.mrf.mxu3 }
0x13d0   :  { %v5250_v48 = vpop.f32.mrf.mxu1  ;;  %v5291_v1 = vor.u32 1.1754944e-38, %v5290_v53  ;;  %vm5289_vm9 = vcmp.eq.f32.partialorder %v5288_v42, 8.507059e+37 }
0x13d1   :  { %v5251_v39 = vadd.f32 %v5250_v48, %v5094_v62 }
0x13d3   :  { %v11902_v8 = vpop.eup %11901  ;;  %v5309_v9 = vadd.f32 %v5251_v39, %v5040_v38  ;;  %v10261_v38 = vor.u32 %v11544_v28, %v10260_v43 }
0x13d4   :  { %v13252_v47 = vpop.eup %11903  ;;  %v13254_v2 = vadd.f32 1.0, %v11902_v8 }
0x13d5   :  { %v10084_v54 = vmul.f32 -1.442695, %v5309_v9  ;;  %v5280_v56 = vmul.f32 %v13252_v47, %v13248_v5  ;;  %vm5285_vm3 = vweird.f32 %v13252_v47  ;;  %5909 = vmatpush.bf16.msra.mxu3 %v10261_v38 }
0x13d6   :  { %11905 = vrcp.f32 %v13254_v2  ;;  %v5264_v37 = vpop.f32.mrf.mxu2  ;;  %vm13269_vm6 = vmor %vm5284_vm4, %vm5285_vm3  ;;  %v5305_v61 = vand.u32 2147483648, %v13254_v2  ;;  %vm5299_vm7 = vweird.f32 %v13254_v2  ;;  %v5303_v35 = vand.u32 2147483647, %v13254_v2 }
0x13d7   :  { %11907 = vpow2.f32 %v10084_v54  ;;  %v5281_v16 = vsub.f32 1.0, %v5280_v56  ;;  %v5265_v39 = vadd.f32 %v5264_v37, %v5095_v51  ;;  %v11538_v54 = vld [vmem:[#allocation7 + $0x20] sm:$0xf0] }
0x13d8   :  { %v5252_v21 = vpop.f32.mrf.mxu1  ;;  %v5306_v48 = vor.u32 1.1754944e-38, %v5305_v61  ;;  %vm5304_vm10 = vcmp.eq.f32.partialorder %v5303_v35, 8.507059e+37 }
0x13d9   :  { %v5253_v13 = vadd.f32 %v5252_v21, %v5094_v62  ;;  %v5282_v25 = vmul.f32 %v13252_v47, %v5281_v16 }
0x13db   :  { %v5310_v18 = vadd.f32 %v5253_v13, %v5042_v7  ;;  %v5283_v20 = vadd.f32 %v13252_v47, %v5282_v25  ;;  %v10249_v7 = vor.u32 %v11541_v3, %v10248_v4 }
0x13dc   :  { %v11906_v36 = vpop.eup %11905 }
0x13dd   :  { %v11908_v26 = vpop.eup %11907  ;;  %v10085_v40 = vmul.f32 -1.442695, %v5310_v18  ;;  %v5295_v32 = vmul.f32 %v11906_v36, %v13254_v2  ;;  %vm5300_vm5 = vweird.f32 %v11906_v36  ;;  %v5287_v52 = vsel %vm13269_vm6, %v13252_v47, %v5283_v20  ;;  %v10236_v2 = vld [vmem:[#allocation7 + $0x18] sm:$0xf]  ;;  %5910 = vmatpush.bf16.msra.mxu3 %v10249_v7 }
0x13de   :  { %v13261_v45 = vadd.f32 1.0, %v11908_v26  ;;  %vm13280_vm8 = vmor %vm5299_vm7, %vm5300_vm5  ;;  %v5292_v62 = vsel %vm5289_vm9, %v5291_v1, %v5287_v52  ;;  %v5266_v46 = vpop.f32.mrf.mxu2  ;;  %v10237_v16 = vor.u32 %v11538_v54, %v10236_v2  ;;  %v10225_v26 = vor.u32 %v11535_v22, %v10224_v50  ;;  %v11754_v52 = vld [vmem:[%s13878_s5] ss:$0 sm:$0xff]  ;;  %v11528_v22 = vld [vmem:[#allocation5 + $0x94] sm:$0xf] }
0x13df   :  { %11909 = vpow2.f32 %v10085_v40  ;;  %v5296_v24 = vsub.f32 1.0, %v5295_v32  ;;  %v5349_v9 = vmul.f32 %v5292_v62, %v5265_v39  ;;  %v5267_v47 = vadd.f32 %v5266_v46, %v5095_v51 }
0x13e0   :  { %11911 = vrcp.f32 %v13261_v45  ;;  %v5330_v19 = vand.u32 2147483648, %v13261_v45  ;;  %vm5324_vm12 = vweird.f32 %v13261_v45  ;;  %v5328_v41 = vand.u32 2147483647, %v13261_v45 }
0x13e1   :  { %v5297_v11 = vmul.f32 %v11906_v36, %v5296_v24  ;;  %v5351_v13 = vadd.f32 %v5349_v9, %v5054_v63  ;;  %5911 = vmatpush.bf16.msra.mxu3 %v10237_v16  ;;  %v10208_v16 = vld [vmem:[#allocation5 + $0xb4] sm:$0xf0] }
0x13e2   :  { %v5331_v30 = vor.u32 1.1754944e-38, %v5330_v19  ;;  %vm5329_vm14 = vcmp.eq.f32.partialorder %v5328_v41, 8.507059e+37  ;;  %v10206_v19 = vld [vmem:[#allocation5 + $0xa8] sm:$0xf] }
0x13e3   :  { %v5298_v27 = vadd.f32 %v11906_v36, %v5297_v11 }
0x13e5   :  { %v11910_v17 = vpop.eup %11909  ;;  %v5302_v23 = vsel %vm13280_vm8, %v11906_v36, %v5298_v27  ;;  %5912 = vmatpush.bf16.msra.mxu3 %v10225_v26  ;;  %v10184_v26 = vld [vmem:[#allocation5 + $0x84] sm:$0xf0] }
0x13e6   :  { %v11912_v33 = vpop.eup %11911  ;;  %v5318_v55 = vadd.f32 1.0, %v11910_v17  ;;  %v5307_v8 = vsel %vm5304_vm10, %v5306_v48, %v5302_v23 }
0x13e7   :  { %v5320_v5 = vmul.f32 %v11912_v33, %v13261_v45  ;;  %vm5325_vm11 = vweird.f32 %v11912_v33  ;;  %v5350_v12 = vmul.f32 %v5307_v8, %v5267_v47 }
0x13e8   :  { %11913 = vrcp.f32 %v5318_v55  ;;  %vm5326_vm13 = vmor %vm5324_vm12, %vm5325_vm11  ;;  %v5345_v40 = vand.u32 2147483648, %v5318_v55  ;;  %v5343_v14 = vand.u32 2147483647, %v5318_v55  ;;  %vm5339_vm0 = vweird.f32 %v5318_v55 }
0x13e9   :  { %v5321_v31 = vsub.f32 1.0, %v5320_v5  ;;  %v5352_v36 = vadd.f32 %v5350_v12, %v5056_v29  ;;  %11915 = vtanh.f32 %v5351_v13  ;;  %v11532_v12 = vld [vmem:[#allocation5 + $0xb0] sm:$0xf0]  ;;  %v11529_v13 = vld [vmem:[#allocation5 + $0x98] sm:$0xf0] }
0x13ea   :  { %v5346_v49 = vor.u32 1.1754944e-38, %v5345_v40  ;;  %vm5344_vm2 = vcmp.eq.f32.partialorder %v5343_v14, 8.507059e+37  ;;  %v10207_v41 = vor.u32 %v11532_v12, %v10206_v19  ;;  %v10196_v29 = vld [vmem:[#allocation5 + $0x9c] sm:$0xf0]  ;;  %v11533_v40 = vld [vmem:[#allocation5 + $0xb8] sm:$0xf0] }
0x13eb   :  { %v5322_v56 = vmul.f32 %v11912_v33, %v5321_v31  ;;  %11917 = vtanh.f32 %v5352_v36  ;;  %v11526_v36 = vld [vmem:[#allocation5 + $0x80] sm:$0xf0]  ;;  %v11513_v19 = vld [vmem:[#allocation5 + $0x1c] sm:$0xf]  ;;  %v10136_v12 = vld [vmem:[#allocation5 + $0x24] sm:$0xf0] }
0x13ec   :  { %5695 = vmatpush.bf16.msra.mxu0 %v10207_v41 }
0x13ed   :  { %v5323_v15 = vadd.f32 %v11912_v33, %v5322_v56 }
0x13ee   :  { %v11914_v21 = vpop.eup %11913 }
0x13ef   :  { %v5327_v18 = vsel %vm5326_vm13, %v11912_v33, %v5323_v15  ;;  %v5335_v58 = vmul.f32 %v11914_v21, %v5318_v55  ;;  %vm5340_vm15 = vweird.f32 %v11914_v21  ;;  %v11916_v20 = vpop.eup %11915  ;;  %v11531_v15 = vld [vmem:[#allocation5 + $0xac] sm:$0xf] }
0x13f0   :  { %v5332_v37 = vsel %vm5329_vm14, %v5331_v30, %v5327_v18  ;;  %vm5341_vm1 = vmor %vm5339_vm0, %vm5340_vm15  ;;  %v10211_v50 = vor.u32 %v11531_v15, %v10208_v16  ;;  %v10182_v30 = vld [vmem:[#allocation5 + $0x78] sm:$0xf] }
0x13f1   :  { %v5336_v25 = vsub.f32 1.0, %v5335_v58  ;;  %v5355_v45 = vsub.f32 1.0, %v5332_v37  ;;  %v11918_v42 = vpop.eup %11917  ;;  %v5359_v28 = vmul.f32 %v5332_v37, %v13151_v34  ;;  %v10199_v58 = vor.u32 %v11528_v22, %v10196_v29  ;;  %v10214_v37 = vld [vmem:[#allocation5 + $0xb0] sm:$0xf]  ;;  %v11510_v22 = vld [vmem:[#allocation5 + $0x4] sm:$0xf] }
0x13f2   :  { %5709 = vmatpush.bf16.msra.mxu1 %v10211_v50  ;;  %v10183_v14 = vor.u32 %v11526_v36, %v10182_v30  ;;  %v11511_v50 = vld [vmem:[#allocation5 + $0x8] sm:$0xf0]  ;;  %v10124_v29 = vld [vmem:[#allocation5 + $0xc] sm:$0xf0]  ;;  %v11557_v36 = vld [vmem:[#allocation7 + $0xb8] sm:$0xf0] }
0x13f3   :  { %v5337_v32 = vmul.f32 %v11914_v21, %v5336_v25  ;;  %v5357_v11 = vmul.f32 %v11916_v20, %v5355_v45  ;;  %v11525_v25 = vld [vmem:[#allocation5 + $0x7c] sm:$0xf]  ;;  %v10202_v45 = vld [vmem:[#allocation5 + $0x98] sm:$0xf]  ;;  %v11523_v20 = vld [vmem:[#allocation5 + $0x68] sm:$0xf0] }
0x13f4   :  { %v10316_v30 = vld [vmem:[#allocation7 + $0xb0] sm:$0xf] }
0x13f5   :  { %v5338_v6 = vadd.f32 %v11914_v21, %v5337_v32  ;;  %v13292_v27 = vadd.f32 %v5359_v28, %v5357_v11  ;;  %v10215_v32 = vor.u32 %v11533_v40, %v10214_v37  ;;  %v10317_v40 = vor.u32 %v11557_v36, %v10316_v30 }
0x13f6   :  { %5710 = vmatpush.bf16.msra.mxu1 %v10199_v58  ;;  %v10310_v58 = vld [vmem:[#allocation7 + $0xb4] sm:$0xf0] }
0x13f7   :  { %v5342_v24 = vsel %vm5341_vm1, %v11914_v21, %v5338_v6  ;;  %v10194_v21 = vld [vmem:[#allocation5 + $0x90] sm:$0xf]  ;;  %v11530_v6 = vld [vmem:[#allocation5 + $0xa0] sm:$0xf0]  ;;  %5723 = vmatpush.bf16.msra.mxu2 %v10215_v32 }
0x13f8   :  { %v5347_v53 = vsel %vm5344_vm2, %v5346_v49, %v5342_v24  ;;  %v10195_v18 = vor.u32 %v11529_v13, %v10194_v21  ;;  %v10187_v49 = vor.u32 %v11525_v25, %v10184_v26  ;;  %v10170_v24 = vld [vmem:[#allocation5 + $0x60] sm:$0xf]  ;;  %v10203_v11 = vor.u32 %v11530_v6, %v10202_v45  ;;  %v11518_v45 = vld [vmem:[#allocation5 + $0x40] sm:$0xf0]  ;;  %v11552_v6 = vld [vmem:[#allocation7 + $0x94] sm:$0xf] }
0x13f9   :  { %v5356_v57 = vsub.f32 1.0, %v5347_v53  ;;  %v5360_v60 = vmul.f32 %v5347_v53, %v13153_v0  ;;  %v11522_v53 = vld [vmem:[#allocation5 + $0x64] sm:$0xf]  ;;  %v10171_v28 = vor.u32 %v11523_v20, %v10170_v24  ;;  %v10139_v21 = vor.u32 %v11513_v19, %v10136_v12  ;;  %v10122_v13 = vld [vmem:[#allocation5] sm:$0xf] }
0x13fa   :  { %5696 = vmatpush.bf16.msra.mxu0 %v10195_v18  ;;  %5711 = vmatpush.bf16.msra.mxu1 %v10187_v49  ;;  %v11555_v18 = vld [vmem:[#allocation7 + $0xac] sm:$0xf]  ;;  %v10123_v25 = vor.u32 %v11511_v50, %v10122_v13  ;;  %v10298_v24 = vld [vmem:[#allocation7 + $0x9c] sm:$0xf0]  ;;  %v10304_v20 = vld [vmem:[#allocation7 + $0x98] sm:$0xf] }
0x13fb   :  { %v5358_v43 = vmul.f32 %v11918_v42, %v5356_v57  ;;  %v10172_v57 = vld [vmem:[#allocation5 + $0x6c] sm:$0xf0]  ;;  %v10190_v42 = vld [vmem:[#allocation5 + $0x80] sm:$0xf]  ;;  %5724 = vmatpush.bf16.msra.mxu2 %v10203_v11  ;;  %v10301_v11 = vor.u32 %v11552_v6, %v10298_v24  ;;  %v11542_v19 = vld [vmem:[#allocation7 + $0x40] sm:$0xf0] }
0x13fd   :  { %v13294_v61 = vadd.f32 %v5360_v60, %v5358_v43  ;;  %v11527_v43 = vld [vmem:[#allocation5 + $0x88] sm:$0xf0]  ;;  %v10175_v60 = vor.u32 %v11522_v53, %v10172_v57  ;;  %v11554_v53 = vld [vmem:[#allocation7 + $0xa0] sm:$0xf0] }
0x13fe   :  { %5697 = vmatpush.bf16.msra.mxu0 %v10183_v14  ;;  %v10154_v14 = vld [vmem:[#allocation5 + $0x38] sm:$0xf]  ;;  %v10305_v57 = vor.u32 %v11554_v53, %v10304_v20 }
0x13ff   :  { %v13298_v51 = vpack.c.bf16 %v13294_v61, %v13292_v27  ;;  %5712 = vmatpush.bf16.msra.mxu1 %v10175_v60  ;;  %v10155_v49 = vor.u32 %v11518_v45, %v10154_v14  ;;  %v10286_v60 = vld [vmem:[#allocation7 + $0x84] sm:$0xf0]  ;;  %v11564_v53 = vld [vmem:[#allocation10 + $0x30] sm:$0xff] }
0x1401   :  { %5440 = vmatmul.bf16.vlgmr.msrb.gmra.mxu3 %v13298_v51 }
0x1402   :  { %5698 = vmatpush.bf16.msra.mxu0 %v10171_v28  ;;  %v11549_v28 = vld [vmem:[#allocation7 + $0x7c] sm:$0xf] }
0x1411   :  { %5913 = vmatmul.bf16.vlgmr.msra.gmra.mxu3 %v13298_v51 }
0x1484   :  { %v5441_v35 = vpop.f32.mrf.mxu3 }
0x1485   :  { %v5442_v34 = vadd.f32 %v11754_v52, %v5441_v35  ;;  %v11520_v35 = vld [vmem:[#allocation5 + $0x50] sm:$0xf0] }
0x1487   :  { %v5448_v17 = vrot.slane %v5442_v34, 1  ;;  %v5449_v0 = vrot.slane %v5442_v34, 2  ;;  %v5450_v63 = vrot.slane %v5442_v34, 3  ;;  %5476 = vst [vmem:[%s13879_s6 + $0x7] sm:$0x1] %v5442_v34  ;;  %5492 = vmax.xlane.f32.xlu0 %v5442_v34  ;;  %v5451_v1 = vrot.slane %v5442_v34, 4 }
0x1488   :  { %v5452_v59 = vrot.slane %v5442_v34, 5  ;;  %v5453_v38 = vrot.slane %v5442_v34, 6  ;;  %v5454_v33 = vrot.slane %v5442_v34, 7 }
0x1489   :  { %5477 = vst [vmem:[%s13879_s6 + $0x17] sm:$0x1] %v5448_v17  ;;  %v10191_v17 = vor.u32 %v11527_v43, %v10190_v42  ;;  %v10142_v42 = vld [vmem:[#allocation5 + $0x20] sm:$0xf]  ;;  %v11515_v43 = vld [vmem:[#allocation5 + $0x28] sm:$0xf0] }
0x148a   :  { %5478 = vst [vmem:[%s13879_s6 + $0x27] sm:$0x1] %v5449_v0  ;;  %v10160_v0 = vld [vmem:[#allocation5 + $0x54] sm:$0xf0] }
0x148b   :  { %5479 = vst [vmem:[%s13879_s6 + $0x37] sm:$0x1] %v5450_v63  ;;  %v10178_v63 = vld [vmem:[#allocation5 + $0x68] sm:$0xf]  ;;  %5725 = vmatpush.bf16.msra.mxu2 %v10191_v17 }
0x148c   :  { %5480 = vst [vmem:[%s13879_s6 + $0x47] sm:$0x1] %v5451_v1  ;;  %v5443_v55 = vpop.f32.mrf.mxu3  ;;  %v11524_v1 = vld [vmem:[#allocation5 + $0x70] sm:$0xf0] }
0x148d   :  { %5481 = vst [vmem:[%s13879_s6 + $0x57] sm:$0x1] %v5452_v59  ;;  %v5444_v23 = vadd.f32 %v11754_v52, %v5443_v55  ;;  %v10158_v52 = vld [vmem:[#allocation5 + $0x48] sm:$0xf]  ;;  %v11517_v55 = vld [vmem:[#allocation5 + $0x38] sm:$0xf0] }
0x148e   :  { %5482 = vst [vmem:[%s13879_s6 + $0x67] sm:$0x1] %v5453_v38  ;;  %v10159_v59 = vor.u32 %v11520_v35, %v10158_v52  ;;  %v10292_v52 = vld [vmem:[#allocation7 + $0x80] sm:$0xf]  ;;  %v11551_v35 = vld [vmem:[#allocation7 + $0x88] sm:$0xf0] }
0x148f   :  { %5483 = vst [vmem:[%s13879_s6 + $0x77] sm:$0x1] %v5454_v33  ;;  %v5455_v4 = vrot.slane %v5444_v23, 1  ;;  %v5456_v3 = vrot.slane %v5444_v23, 2  ;;  %v5457_v5 = vrot.slane %v5444_v23, 3  ;;  %5494 = vmax.xlane.f32.xlu1 %v5444_v23  ;;  %v5458_v62 = vrot.slane %v5444_v23, 4 }
0x1490   :  { %5484 = vst [vmem:[%s13879_s6 + $0x87] sm:$0x1] %v5444_v23  ;;  %v5459_v46 = vrot.slane %v5444_v23, 5  ;;  %v5460_v48 = vrot.slane %v5444_v23, 6  ;;  %v5461_v39 = vrot.slane %v5444_v23, 7  ;;  %5699 = vmatpush.bf16.msra.mxu0 %v10159_v59  ;;  %v10293_v17 = vor.u32 %v11551_v35, %v10292_v52 }
0x1491   :  { %5485 = vst [vmem:[%s13879_s6 + $0x97] sm:$0x1] %v5455_v4  ;;  %v10146_v33 = vld [vmem:[#allocation5 + $0x30] sm:$0xf] }
0x1492   :  { %5486 = vst [vmem:[%s13879_s6 + $0xa7] sm:$0x1] %v5456_v3  ;;  %v11516_v3 = vld [vmem:[#allocation5 + $0x34] sm:$0xf] }
0x1493   :  { %5487 = vst [vmem:[%s13879_s6 + $0xb7] sm:$0x1] %v5457_v5  ;;  %v10148_v5 = vld [vmem:[#allocation5 + $0x3c] sm:$0xf0] }
0x1494   :  { %5488 = vst [vmem:[%s13879_s6 + $0xc7] sm:$0x1] %v5458_v62  ;;  %v10166_v62 = vld [vmem:[#allocation5 + $0x50] sm:$0xf]  ;;  %v5914_v24 = vpop.f32.mrf.mxu3 }
0x1495   :  { %5489 = vst [vmem:[%s13879_s6 + $0xd7] sm:$0x1] %v5459_v46  ;;  %v11521_v46 = vld [vmem:[#allocation5 + $0x58] sm:$0xf0] }
0x1496   :  { %5490 = vst [vmem:[%s13879_s6 + $0xe7] sm:$0x1] %v5460_v48  ;;  %v10147_v48 = vor.u32 %v11517_v55, %v10146_v33  ;;  %v10167_v15 = vor.u32 %v11521_v46, %v10166_v62  ;;  %v10280_v33 = vld [vmem:[#allocation7 + $0x68] sm:$0xf]  ;;  %v11548_v55 = vld [vmem:[#allocation7 + $0x70] sm:$0xf0] }
0x1497   :  { %5491 = vst [vmem:[%s13879_s6 + $0xf7] sm:$0x1] %v5461_v39  ;;  %v10151_v39 = vor.u32 %v11516_v3, %v10148_v5  ;;  %v11543_v3 = vld [vmem:[#allocation7 + $0x4c] sm:$0xf]  ;;  %v10262_v5 = vld [vmem:[#allocation7 + $0x54] sm:$0xf0] }
0x1498   :  { %5700 = vmatpush.bf16.msra.mxu0 %v10147_v48  ;;  %v10268_v62 = vld [vmem:[#allocation7 + $0x50] sm:$0xf]  ;;  %v11545_v46 = vld [vmem:[#allocation7 + $0x58] sm:$0xf0]  ;;  %v10265_v48 = vor.u32 %v11543_v3, %v10262_v5 }
0x14fa   :  { %v5493_v31 = vpop.xlane.xlu0 %5492 }
0x14fb   :  { %vm5496_vm3 = vcmp.eq.f32.partialorder %v5442_v34, %v5493_v31  ;;  %v11519_v34 = vld [vmem:[#allocation5 + $0x4c] sm:$0xf]  ;;  %v10134_v31 = vld [vmem:[#allocation5 + $0x18] sm:$0xf] }
0x14fc   :  { %v13354_v8 = vsel %vm5496_vm3, %v12222_v10, 128  ;;  %v10163_v38 = vor.u32 %v11519_v34, %v10160_v0  ;;  %v10289_v34 = vor.u32 %v11549_v28, %v10286_v60  ;;  %v10130_v0 = vld [vmem:[#allocation5 + $0x8] sm:$0xf] }
0x14fd   :  { %v5501_v7 = vshra.s32 %v13354_v8, 16  ;;  %v5500_v4 = vand.u32 65535, %v13354_v8  ;;  %v11562_v60 = vld [vmem:[#allocation10 + $0x20] sm:$0xff] }
0x14fe   :  { %5713 = vmatpush.bf16.msra.mxu1 %v10163_v38  ;;  %v10274_v38 = vld [vmem:[#allocation7 + $0x6c] sm:$0xf0] }
0x14ff   :  { %v13357_v9 = vcvt.s32.f32 %v5501_v7  ;;  %v11514_v7 = vld [vmem:[#allocation5 + $0x20] sm:$0xf0] }
0x1500   :  { %v10135_v41 = vor.u32 %v11514_v7, %v10134_v31  ;;  %v11540_v31 = vld [vmem:[#allocation7 + $0x34] sm:$0xf]  ;;  %v10250_v7 = vld [vmem:[#allocation7 + $0x3c] sm:$0xf0] }
0x1501   :  { %5504 = vmin.xlane.f32.xlu2 %v13357_v9  ;;  %v10253_v12 = vor.u32 %v11540_v31, %v10250_v7  ;;  %v11558_v31 = vld [vmem:[#allocation10] sm:$0xff] }
0x1502   :  { %v5495_v47 = vpop.xlane.xlu1 %5494  ;;  %5714 = vmatpush.bf16.msra.mxu1 %v10151_v39  ;;  %5701 = vmatpush.bf16.msra.mxu0 %v10135_v41  ;;  %v10269_v39 = vor.u32 %v11545_v46, %v10268_v62  ;;  %v10238_v41 = vld [vmem:[#allocation7 + $0x24] sm:$0xf0] }
0x1503   :  { %vm5497_vm4 = vcmp.eq.f32.partialorder %v5444_v23, %v5495_v47  ;;  %v10179_v23 = vor.u32 %v11524_v1, %v10178_v63  ;;  %v11512_v63 = vld [vmem:[#allocation5 + $0x10] sm:$0xf0]  ;;  %v11546_v1 = vld [vmem:[#allocation7 + $0x64] sm:$0xf]  ;;  %v10544_v7 = vld [vmem:[#allocation7 + $0xa8] sm:$0xf] }
0x1504   :  { %v13361_v2 = vsel %vm5497_vm4, %v12222_v10, 128  ;;  %v10131_v59 = vor.u32 %v11512_v63, %v10130_v0 }
0x1505   :  { %v5515_v54 = vshra.s32 %v13361_v2, 16  ;;  %5726 = vmatpush.bf16.msra.mxu2 %v10179_v23  ;;  %v5514_v16 = vand.u32 65535, %v13361_v2  ;;  %v10313_v2 = vor.u32 %v11555_v18, %v10310_v58  ;;  %v10277_v23 = vor.u32 %v11546_v1, %v10274_v38  ;;  %v10232_v18 = vld [vmem:[#allocation7 + $0x8] sm:$0xf]  ;;  %v11536_v58 = vld [vmem:[#allocation7 + $0x10] sm:$0xf0] }
0x1506   :  { %5715 = vmatpush.bf16.msra.mxu1 %v10139_v21  ;;  %5702 = vmatpush.bf16.msra.mxu0 %v10123_v25  ;;  %v11539_v21 = vld [vmem:[#allocation7 + $0x28] sm:$0xf0]  ;;  %v10233_v36 = vor.u32 %v11536_v58, %v10232_v18  ;;  %v11560_v38 = vld [vmem:[#allocation10 + $0x10] sm:$0xff] }
0x1507   :  { %v13364_v56 = vcvt.s32.f32 %v5515_v54  ;;  %v5502_v54 = vcvt.s32.f32 %v5500_v4  ;;  %v5516_v37 = vcvt.s32.f32 %v5514_v16  ;;  %v10281_v4 = vor.u32 %v11548_v55, %v10280_v33  ;;  %v10244_v16 = vld [vmem:[#allocation7 + $0x20] sm:$0xf] }
0x1508   :  { %v10245_v50 = vor.u32 %v11539_v21, %v10244_v16  ;;  %v11609_v16 = vld [vmem:[#allocation7 + $0x98] sm:$0xf0] }
0x1509   :  { %5518 = vmin.xlane.f32.xlu0 %v13364_v56  ;;  %5727 = vmatpush.bf16.msra.mxu2 %v10167_v15 }
0x150a   :  { %5919 = vmatpush.bf16.msrb.mxu0 %v10313_v2 }
0x150d   :  { %5728 = vmatpush.bf16.msra.mxu2 %v10155_v49 }
0x150e   :  { %5920 = vmatpush.bf16.msrb.mxu0 %v10301_v11 }
0x1512   :  { %5921 = vmatpush.bf16.msrb.mxu0 %v10289_v34 }
0x1516   :  { %5922 = vmatpush.bf16.msrb.mxu0 %v10277_v23  ;;  %v11559_v23 = vld [vmem:[#allocation10 + $0x8] sm:$0xff] }
0x151a   :  { %5923 = vmatpush.bf16.msrb.mxu0 %v10265_v48 }
0x151e   :  { %5924 = vmatpush.bf16.msrb.mxu0 %v10253_v12 }
0x1574   :  { %v13368_v47 = vpop.xlane.xlu2 %5504 }
0x1575   :  { %vm5506_vm5 = vcmp.eq.f32.partialorder %v13357_v9, %v13368_v47  ;;  %v10127_v9 = vor.u32 %v11510_v22, %v10124_v29  ;;  %v11534_v22 = vld [vmem:[#allocation7 + $0x4] sm:$0xf]  ;;  %v10226_v29 = vld [vmem:[#allocation7 + $0xc] sm:$0xf0] }
0x1576   :  { %v5507_v8 = vsel %vm5506_vm5, %v5502_v54, inf  ;;  %v10256_v54 = vld [vmem:[#allocation7 + $0x38] sm:$0xf]  ;;  %v10229_v30 = vor.u32 %v11534_v22, %v10226_v29  ;;  %v11606_v22 = vld [vmem:[#allocation7 + $0x80] sm:$0xf0] }
0x1577   :  { %5508 = vmin.xlane.f32.xlu1 %v5507_v8  ;;  %5716 = vmatpush.bf16.msra.mxu1 %v10127_v9  ;;  %v10257_v15 = vor.u32 %v11542_v19, %v10256_v54  ;;  %v11537_v8 = vld [vmem:[#allocation7 + $0x1c] sm:$0xf]  ;;  %v5511_v9 = vcvt.f32.s32 %v13368_v47  ;;  %v13386_v47 = vld [vmem:[#allocation8] sm:$0x7]  ;;  %v11612_v54 = vld [vmem:[#allocation7 + $0xb0] sm:$0xf0] }
0x1578   :  { %v10241_v13 = vor.u32 %v11537_v8, %v10238_v41  ;;  %v5771_v20 = vperm.slane %v13386_v47, 0  ;;  %v10545_v19 = vor.u32 %v11612_v54, %v10544_v7  ;;  %v10532_v41 = vld [vmem:[#allocation7 + $0x90] sm:$0xf] }
0x1579   :  { %v10533_v21 = vor.u32 %v11609_v16, %v10532_v41  ;;  %v10460_v41 = vld [vmem:[#allocation7] sm:$0xf]  ;;  %v11591_v16 = vld [vmem:[#allocation7 + $0x8] sm:$0xf0] }
0x157a   :  { %5925 = vmatpush.bf16.msrb.mxu0 %v10241_v13  ;;  %v5915_v11 = vadd.f32 %v5914_v24, %v5771_v20  ;;  %v10496_v24 = vld [vmem:[#allocation7 + $0x48] sm:$0xf] }
0x157b   :  { %5933 = vmatpush.bf16.msrb.mxu1 %v10317_v40  ;;  %v5512_v40 = vshll.u32 %v5511_v9, 16 }
0x157c   :  { %v13373_v26 = vpop.xlane.xlu0 %5518 }
0x157d   :  { %vm5520_vm6 = vcmp.eq.f32.partialorder %v13364_v56, %v13373_v26  ;;  %v10143_v56 = vor.u32 %v11515_v43, %v10142_v42  ;;  %v11563_v43 = vld [vmem:[#allocation10 + $0x28] sm:$0xff] }
0x157e   :  { %v5521_v32 = vsel %vm5520_vm6, %v5516_v37, inf  ;;  %5926 = vmatpush.bf16.msrb.mxu0 %v10229_v30  ;;  %v5525_v37 = vcvt.f32.s32 %v13373_v26  ;;  %v11565_v26 = vld [vmem:[#allocation10 + $0x38] sm:$0xff] }
0x157f   :  { %5522 = vmin.xlane.f32.xlu2 %v5521_v32  ;;  %5934 = vmatpush.bf16.msrb.mxu1 %v10305_v57 }
0x1580   :  { %5729 = vmatpush.bf16.msra.mxu2 %v10143_v56  ;;  %v5526_v14 = vshll.u32 %v5525_v37, 16  ;;  %v5916_v56 = vpop.f32.mrf.mxu3 }
0x1581   :  { %v5917_v52 = vadd.f32 %v5916_v56, %v5771_v20  ;;  %v11600_v20 = vld [vmem:[#allocation7 + $0x50] sm:$0xf0] }
0x1583   :  { %5935 = vmatpush.bf16.msrb.mxu1 %v10293_v17  ;;  %v11561_v17 = vld [vmem:[#allocation10 + $0x18] sm:$0xff] }
0x1584   :  { %5730 = vmatpush.bf16.msra.mxu2 %v10131_v59  ;;  %v5772_v59 = vperm.slane %v13386_v47, 1 }
0x1587   :  { %5936 = vmatpush.bf16.msrb.mxu1 %v10281_v4 }
0x1588   :  { %6110 = vmatpush.bf16.msrb.mxu2 %v11565_v26 }
0x158b   :  { %5937 = vmatpush.bf16.msrb.mxu1 %v10269_v39 }
0x158c   :  { %6111 = vmatpush.bf16.msrb.mxu2 %v11564_v53 }
0x158f   :  { %5938 = vmatpush.bf16.msrb.mxu1 %v10257_v15 }
0x1590   :  { %6112 = vmatpush.bf16.msrb.mxu2 %v11563_v43 }
0x1593   :  { %5939 = vmatpush.bf16.msrb.mxu1 %v10245_v50  ;;  %v10520_v50 = vld [vmem:[#allocation7 + $0x78] sm:$0xf] }
0x1594   :  { %6113 = vmatpush.bf16.msrb.mxu2 %v11562_v60  ;;  %v10521_v9 = vor.u32 %v11606_v22, %v10520_v50 }
0x1597   :  { %5940 = vmatpush.bf16.msrb.mxu1 %v10233_v36 }
0x1598   :  { %6114 = vmatpush.bf16.msrb.mxu2 %v11561_v17 }
0x159c   :  { %6115 = vmatpush.bf16.msrb.mxu2 %v11560_v38 }
0x15a0   :  { %6116 = vmatpush.bf16.msrb.mxu2 %v11559_v23 }
0x15a4   :  { %6117 = vmatpush.bf16.msrb.mxu2 %v11558_v31 }
0x15ea   :  { %v5509_v25 = vpop.xlane.xlu1 %5508 }
0x15eb   :  { %v5510_v2 = vcvt.f32.s32 %v5509_v25 }
0x15ed   :  { %v5513_v45 = vadd.s32 %v5512_v40, %v5510_v2  ;;  %v10508_v2 = vld [vmem:[#allocation7 + $0x60] sm:$0xf]  ;;  %v11603_v40 = vld [vmem:[#allocation7 + $0x68] sm:$0xf0] }
0x15ef   :  { %vm5528_vm7 = vcmp.eq.s32.totalorder %v12222_v10, %v5513_v45 }
0x15f2   :  { %v5523_v32 = vpop.xlane.xlu2 %5522 }
0x15f3   :  { %v5524_v6 = vcvt.f32.s32 %v5523_v32 }
0x15f5   :  { %v5527_v49 = vadd.s32 %v5526_v14, %v5524_v6 }
0x15f7   :  { %vm5529_vm8 = vcmp.eq.s32.totalorder %v12222_v10, %v5527_v49  ;;  %v10509_v49 = vor.u32 %v11603_v40, %v10508_v2 }
0x15f8   :  { %vm10216_vm9 = vmpackc.low %vm5529_vm8, %vm5528_vm7 }
0x15f9   :  { %10217 = vmatmul.msk.bf16.vlgmr.msra.gmra.mxu0 %vm10216_vm9, %v12162_v44  ;;  %10219 = vmatmul.msk.bf16.vlgmr.msra.gmra.mxu1 %vm10216_vm9, %v12162_v44 }
0x15fa   :  { %10221 = vmatmul.msk.bf16.vlgmr.msra.gmra.mxu2 %vm10216_vm9, %v12162_v44 }
0x15fb   :  { %6583 = vmatpush.bf16.msra.mxu2 %v10545_v19 }
0x15ff   :  { %6584 = vmatpush.bf16.msra.mxu2 %v10533_v21 }
0x1603   :  { %6585 = vmatpush.bf16.msra.mxu2 %v10521_v9 }
0x1607   :  { %6586 = vmatpush.bf16.msra.mxu2 %v10509_v49 }
0x1609   :  { %5927 = vmatmul.bf16.vlgmr.msrb.gmra.mxu0 %v13298_v51  ;;  %5941 = vmatmul.bf16.vlgmr.msrb.gmra.mxu1 %v13298_v51 }
0x1676   :  { %v5704_v57 = vpop.f32.mrf.mxu0  ;;  %v5718_v35 = vpop.f32.mrf.mxu1 }
0x1677   :  { %v5947_v42 = vadd.f32 %v5915_v11, %v5704_v57 }
0x1679   :  { %v10318_v28 = vmul.f32 -1.442695, %v5947_v42  ;;  %v5773_v42 = vperm.slane %v13386_v47, 2 }
0x167b   :  { %11919 = vpow2.f32 %v10318_v28 }
0x167d   :  { %v5732_v60 = vpop.f32.mrf.mxu2 }
0x167e   :  { %v5706_v51 = vpop.f32.mrf.mxu0  ;;  %v5720_v3 = vpop.f32.mrf.mxu1 }
0x167f   :  { %v5948_v34 = vadd.f32 %v5917_v52, %v5706_v51 }
0x1681   :  { %v11920_v0 = vpop.eup %11919  ;;  %v10319_v63 = vmul.f32 -1.442695, %v5948_v34 }
0x1682   :  { %v13389_v1 = vadd.f32 1.0, %v11920_v0  ;;  %v10484_v0 = vld [vmem:[#allocation7 + $0x30] sm:$0xf] }
0x1683   :  { %11921 = vpow2.f32 %v10319_v63  ;;  %v11597_v63 = vld [vmem:[#allocation7 + $0x38] sm:$0xf0] }
0x1684   :  { %11923 = vrcp.f32 %v13389_v1  ;;  %v5968_v45 = vand.u32 2147483648, %v13389_v1  ;;  %vm5962_vm11 = vweird.f32 %v13389_v1  ;;  %v5966_v26 = vand.u32 2147483647, %v13389_v1 }
0x1685   :  { %v5734_v21 = vpop.f32.mrf.mxu2 }
0x1686   :  { %v5928_v33 = vpop.f32.mrf.mxu0  ;;  %v5942_v30 = vpop.f32.mrf.mxu1  ;;  %v5969_v52 = vor.u32 1.1754944e-38, %v5968_v45  ;;  %vm5967_vm0 = vcmp.eq.f32.partialorder %v5966_v26, 8.507059e+37 }
0x1687   :  { %v5929_v55 = vadd.f32 %v5928_v33, %v5772_v59 }
0x1689   :  { %v11922_v4 = vpop.eup %11921  ;;  %v5987_v5 = vadd.f32 %v5929_v55, %v5718_v35  ;;  %v10497_v35 = vor.u32 %v11600_v20, %v10496_v24  ;;  %v5943_v55 = vadd.f32 %v5942_v30, %v5773_v42 }
0x168a   :  { %v13393_v62 = vpop.eup %11923  ;;  %v13395_v46 = vadd.f32 1.0, %v11922_v4 }
0x168b   :  { %v10320_v48 = vmul.f32 -1.442695, %v5987_v5  ;;  %v5958_v39 = vmul.f32 %v13393_v62, %v13389_v1  ;;  %vm5963_vm10 = vweird.f32 %v13393_v62  ;;  %6587 = vmatpush.bf16.msra.mxu2 %v10497_v35 }
0x168c   :  { %11925 = vrcp.f32 %v13395_v46  ;;  %vm13410_vm13 = vmor %vm5962_vm11, %vm5963_vm10  ;;  %v5983_v57 = vand.u32 2147483648, %v13395_v46  ;;  %vm5977_vm14 = vweird.f32 %v13395_v46  ;;  %v5981_v28 = vand.u32 2147483647, %v13395_v46 }
0x168d   :  { %11927 = vpow2.f32 %v10320_v48  ;;  %v5959_v12 = vsub.f32 1.0, %v5958_v39  ;;  %v11594_v48 = vld [vmem:[#allocation7 + $0x20] sm:$0xf0] }
0x168e   :  { %v5930_v15 = vpop.f32.mrf.mxu0  ;;  %v5944_v38 = vpop.f32.mrf.mxu1  ;;  %v5984_v33 = vor.u32 1.1754944e-38, %v5983_v57  ;;  %vm5982_vm1 = vcmp.eq.f32.partialorder %v5981_v28, 8.507059e+37 }
0x168f   :  { %v5931_v8 = vadd.f32 %v5930_v15, %v5772_v59  ;;  %v5960_v18 = vmul.f32 %v13393_v62, %v5959_v12 }
0x1691   :  { %v5988_v13 = vadd.f32 %v5931_v8, %v5720_v3  ;;  %v5961_v14 = vadd.f32 %v13393_v62, %v5960_v18  ;;  %v10485_v3 = vor.u32 %v11597_v63, %v10484_v0 }
0x1692   :  { %v11926_v29 = vpop.eup %11925 }
0x1693   :  { %v11928_v58 = vpop.eup %11927  ;;  %v10321_v36 = vmul.f32 -1.442695, %v5988_v13  ;;  %v5973_v25 = vmul.f32 %v11926_v29, %v13395_v46  ;;  %vm5978_vm12 = vweird.f32 %v11926_v29  ;;  %v5965_v43 = vsel %vm13410_vm13, %v13393_v62, %v5961_v14  ;;  %v10472_v46 = vld [vmem:[#allocation7 + $0x18] sm:$0xf]  ;;  %6588 = vmatpush.bf16.msra.mxu2 %v10485_v3 }
0x1694   :  { %v13402_v37 = vadd.f32 1.0, %v11928_v58  ;;  %vm13421_vm15 = vmor %vm5977_vm14, %vm5978_vm12  ;;  %v5970_v59 = vsel %vm5967_vm0, %v5969_v52, %v5965_v43  ;;  %v5945_v62 = vadd.f32 %v5944_v38, %v5773_v42  ;;  %v10473_v12 = vor.u32 %v11594_v48, %v10472_v46  ;;  %v11755_v43 = vld [vmem:[%s13878_s5] ss:$0 sm:$0xff] }
0x1695   :  { %11929 = vpow2.f32 %v10321_v36  ;;  %v5974_v32 = vsub.f32 1.0, %v5973_v25  ;;  %v6027_v5 = vmul.f32 %v5970_v59, %v5943_v55  ;;  %v10461_v58 = vor.u32 %v11591_v16, %v10460_v41  ;;  %v11584_v16 = vld [vmem:[#allocation5 + $0x94] sm:$0xf] }
0x1696   :  { %11931 = vrcp.f32 %v13402_v37  ;;  %v6008_v31 = vand.u32 2147483648, %v13402_v37  ;;  %vm6002_vm3 = vweird.f32 %v13402_v37  ;;  %v6006_v19 = vand.u32 2147483647, %v13402_v37 }
0x1697   :  { %v5975_v6 = vmul.f32 %v11926_v29, %v5974_v32  ;;  %v6029_v8 = vadd.f32 %v6027_v5, %v5732_v60  ;;  %6589 = vmatpush.bf16.msra.mxu2 %v10473_v12  ;;  %v10444_v12 = vld [vmem:[#allocation5 + $0xb4] sm:$0xf0] }
0x1698   :  { %v6009_v22 = vor.u32 1.1754944e-38, %v6008_v31  ;;  %vm6007_vm5 = vcmp.eq.f32.partialorder %v6006_v19, 8.507059e+37  ;;  %v10442_v31 = vld [vmem:[#allocation5 + $0xa8] sm:$0xf] }
0x1699   :  { %v5976_v11 = vadd.f32 %v11926_v29, %v5975_v6 }
0x169b   :  { %v11930_v56 = vpop.eup %11929  ;;  %v5980_v17 = vsel %vm13421_vm15, %v11926_v29, %v5976_v11  ;;  %6590 = vmatpush.bf16.msra.mxu2 %v10461_v58  ;;  %v10420_v58 = vld [vmem:[#allocation5 + $0x84] sm:$0xf0] }
0x169c   :  { %v11932_v34 = vpop.eup %11931  ;;  %v5996_v47 = vadd.f32 1.0, %v11930_v56  ;;  %v5985_v4 = vsel %vm5982_vm1, %v5984_v33, %v5980_v17 }
0x169d   :  { %v5998_v1 = vmul.f32 %v11932_v34, %v13402_v37  ;;  %vm6003_vm2 = vweird.f32 %v11932_v34  ;;  %v6028_v7 = vmul.f32 %v5985_v4, %v5945_v62 }
0x169e   :  { %11933 = vrcp.f32 %v5996_v47  ;;  %vm6004_vm4 = vmor %vm6002_vm3, %vm6003_vm2  ;;  %v6023_v36 = vand.u32 2147483648, %v5996_v47  ;;  %v6021_v9 = vand.u32 2147483647, %v5996_v47  ;;  %vm6017_vm7 = vweird.f32 %v5996_v47 }
0x169f   :  { %v5999_v23 = vsub.f32 1.0, %v5998_v1  ;;  %v6030_v29 = vadd.f32 %v6028_v7, %v5734_v21  ;;  %11935 = vtanh.f32 %v6029_v8  ;;  %v11588_v7 = vld [vmem:[#allocation5 + $0xb0] sm:$0xf0]  ;;  %v11585_v8 = vld [vmem:[#allocation5 + $0x98] sm:$0xf0] }
0x16a0   :  { %v6024_v40 = vor.u32 1.1754944e-38, %v6023_v36  ;;  %vm6022_vm9 = vcmp.eq.f32.partialorder %v6021_v9, 8.507059e+37  ;;  %v10443_v19 = vor.u32 %v11588_v7, %v10442_v31  ;;  %v10432_v21 = vld [vmem:[#allocation5 + $0x9c] sm:$0xf0]  ;;  %v11589_v36 = vld [vmem:[#allocation5 + $0xb8] sm:$0xf0] }
0x16a1   :  { %v6000_v39 = vmul.f32 %v11932_v34, %v5999_v23  ;;  %11937 = vtanh.f32 %v6030_v29  ;;  %v11582_v29 = vld [vmem:[#allocation5 + $0x80] sm:$0xf0]  ;;  %v11569_v31 = vld [vmem:[#allocation5 + $0x1c] sm:$0xf]  ;;  %v10372_v7 = vld [vmem:[#allocation5 + $0x24] sm:$0xf0] }
0x16a2   :  { %6373 = vmatpush.bf16.msrb.mxu3 %v10443_v19 }
0x16a3   :  { %v6001_v54 = vadd.f32 %v11932_v34, %v6000_v39 }
0x16a4   :  { %v11934_v15 = vpop.eup %11933 }
0x16a5   :  { %v6005_v13 = vsel %vm6004_vm4, %v11932_v34, %v6001_v54  ;;  %v6013_v50 = vmul.f32 %v11934_v15, %v5996_v47  ;;  %vm6018_vm6 = vweird.f32 %v11934_v15  ;;  %v11936_v14 = vpop.eup %11935  ;;  %v11587_v54 = vld [vmem:[#allocation5 + $0xac] sm:$0xf] }
0x16a6   :  { %v6010_v30 = vsel %vm6007_vm5, %v6009_v22, %v6005_v13  ;;  %vm6019_vm8 = vmor %vm6017_vm7, %vm6018_vm6  ;;  %v10447_v41 = vor.u32 %v11587_v54, %v10444_v12  ;;  %v10418_v22 = vld [vmem:[#allocation5 + $0x78] sm:$0xf] }
0x16a7   :  { %v6014_v18 = vsub.f32 1.0, %v6013_v50  ;;  %v6033_v37 = vsub.f32 1.0, %v6010_v30  ;;  %v11938_v26 = vpop.eup %11937  ;;  %v6037_v20 = vmul.f32 %v6010_v30, %v13292_v27  ;;  %v10435_v50 = vor.u32 %v11584_v16, %v10432_v21  ;;  %v10450_v30 = vld [vmem:[#allocation5 + $0xb0] sm:$0xf]  ;;  %v11566_v16 = vld [vmem:[#allocation5 + $0x4] sm:$0xf] }
0x16a8   :  { %6387 = vmatpush.bf16.msra.mxu0 %v10447_v41  ;;  %v10419_v9 = vor.u32 %v11582_v29, %v10418_v22  ;;  %v11567_v41 = vld [vmem:[#allocation5 + $0x8] sm:$0xf0]  ;;  %v10360_v21 = vld [vmem:[#allocation5 + $0xc] sm:$0xf0]  ;;  %v11613_v29 = vld [vmem:[#allocation7 + $0xb8] sm:$0xf0] }
0x16a9   :  { %v6015_v25 = vmul.f32 %v11934_v15, %v6014_v18  ;;  %v6035_v6 = vmul.f32 %v11936_v14, %v6033_v37  ;;  %v11581_v18 = vld [vmem:[#allocation5 + $0x7c] sm:$0xf]  ;;  %v10438_v37 = vld [vmem:[#allocation5 + $0x98] sm:$0xf]  ;;  %v11579_v14 = vld [vmem:[#allocation5 + $0x68] sm:$0xf0] }
0x16aa   :  { %v10552_v22 = vld [vmem:[#allocation7 + $0xb0] sm:$0xf] }
0x16ab   :  { %v6016_v2 = vadd.f32 %v11934_v15, %v6015_v25  ;;  %v13433_v11 = vadd.f32 %v6037_v20, %v6035_v6  ;;  %v10451_v25 = vor.u32 %v11589_v36, %v10450_v30  ;;  %v10553_v36 = vor.u32 %v11613_v29, %v10552_v22 }
0x16ac   :  { %6388 = vmatpush.bf16.msra.mxu0 %v10435_v50  ;;  %v10546_v50 = vld [vmem:[#allocation7 + $0xb4] sm:$0xf0] }
0x16ad   :  { %v6020_v32 = vsel %vm6019_vm8, %v11934_v15, %v6016_v2  ;;  %v10430_v15 = vld [vmem:[#allocation5 + $0x90] sm:$0xf]  ;;  %v11586_v2 = vld [vmem:[#allocation5 + $0xa0] sm:$0xf0]  ;;  %6401 = vmatpush.bf16.msra.mxu1 %v10451_v25 }
0x16ae   :  { %v6025_v45 = vsel %vm6022_vm9, %v6024_v40, %v6020_v32  ;;  %v10431_v13 = vor.u32 %v11585_v8, %v10430_v15  ;;  %v10423_v40 = vor.u32 %v11581_v18, %v10420_v58  ;;  %v10406_v32 = vld [vmem:[#allocation5 + $0x60] sm:$0xf]  ;;  %v10439_v6 = vor.u32 %v11586_v2, %v10438_v37  ;;  %v11574_v37 = vld [vmem:[#allocation5 + $0x40] sm:$0xf0]  ;;  %v11608_v2 = vld [vmem:[#allocation7 + $0x94] sm:$0xf] }
0x16af   :  { %v6034_v49 = vsub.f32 1.0, %v6025_v45  ;;  %v6038_v53 = vmul.f32 %v6025_v45, %v13294_v61  ;;  %v11578_v45 = vld [vmem:[#allocation5 + $0x64] sm:$0xf]  ;;  %v10407_v20 = vor.u32 %v11579_v14, %v10406_v32  ;;  %v10375_v15 = vor.u32 %v11569_v31, %v10372_v7  ;;  %v10358_v8 = vld [vmem:[#allocation5] sm:$0xf] }
0x16b0   :  { %6374 = vmatpush.bf16.msrb.mxu3 %v10431_v13  ;;  %6389 = vmatpush.bf16.msra.mxu0 %v10423_v40  ;;  %v11611_v13 = vld [vmem:[#allocation7 + $0xac] sm:$0xf]  ;;  %v10359_v18 = vor.u32 %v11567_v41, %v10358_v8  ;;  %v10534_v32 = vld [vmem:[#allocation7 + $0x9c] sm:$0xf0]  ;;  %v10540_v14 = vld [vmem:[#allocation7 + $0x98] sm:$0xf] }
0x16b1   :  { %v6036_v24 = vmul.f32 %v11938_v26, %v6034_v49  ;;  %v10408_v49 = vld [vmem:[#allocation5 + $0x6c] sm:$0xf0]  ;;  %v10426_v26 = vld [vmem:[#allocation5 + $0x80] sm:$0xf]  ;;  %6402 = vmatpush.bf16.msra.mxu1 %v10439_v6  ;;  %v10537_v6 = vor.u32 %v11608_v2, %v10534_v32  ;;  %v11598_v31 = vld [vmem:[#allocation7 + $0x40] sm:$0xf0] }
0x16b3   :  { %v13435_v57 = vadd.f32 %v6038_v53, %v6036_v24  ;;  %v11583_v24 = vld [vmem:[#allocation5 + $0x88] sm:$0xf0]  ;;  %v10411_v53 = vor.u32 %v11578_v45, %v10408_v49  ;;  %v11610_v45 = vld [vmem:[#allocation7 + $0xa0] sm:$0xf0] }
0x16b4   :  { %6375 = vmatpush.bf16.msrb.mxu3 %v10419_v9  ;;  %v10390_v9 = vld [vmem:[#allocation5 + $0x38] sm:$0xf]  ;;  %v10541_v49 = vor.u32 %v11610_v45, %v10540_v14 }
0x16b5   :  { %v13439_v42 = vpack.c.bf16 %v13435_v57, %v13433_v11  ;;  %6390 = vmatpush.bf16.msra.mxu0 %v10411_v53  ;;  %v10391_v40 = vor.u32 %v11574_v37, %v10390_v9  ;;  %v10522_v53 = vld [vmem:[#allocation7 + $0x84] sm:$0xf0]  ;;  %v11620_v45 = vld [vmem:[#allocation10 + $0x30] sm:$0xff] }
0x16b7   :  { %6118 = vmatmul.bf16.vlgmr.msrb.gmra.mxu2 %v13439_v42 }
0x16b8   :  { %6376 = vmatpush.bf16.msrb.mxu3 %v10407_v20  ;;  %v11605_v20 = vld [vmem:[#allocation7 + $0x7c] sm:$0xf] }
0x16c7   :  { %6591 = vmatmul.bf16.vlgmr.msra.gmra.mxu2 %v13439_v42 }
0x173a   :  { %v6119_v28 = vpop.f32.mrf.mxu2 }
0x173b   :  { %v6120_v27 = vadd.f32 %v11755_v43, %v6119_v28  ;;  %v11576_v28 = vld [vmem:[#allocation5 + $0x50] sm:$0xf0] }
0x173d   :  { %v6126_v56 = vrot.slane %v6120_v27, 1  ;;  %v6127_v61 = vrot.slane %v6120_v27, 2  ;;  %v6128_v60 = vrot.slane %v6120_v27, 3  ;;  %6154 = vst [vmem:[%s13879_s6 + $0x8] sm:$0x1] %v6120_v27  ;;  %6170 = vmax.xlane.f32.xlu0 %v6120_v27  ;;  %v6129_v52 = vrot.slane %v6120_v27, 4 }
0x173e   :  { %v6130_v51 = vrot.slane %v6120_v27, 5  ;;  %v6131_v35 = vrot.slane %v6120_v27, 6  ;;  %v6132_v34 = vrot.slane %v6120_v27, 7 }
0x173f   :  { %6155 = vst [vmem:[%s13879_s6 + $0x18] sm:$0x1] %v6126_v56  ;;  %v10427_v56 = vor.u32 %v11583_v24, %v10426_v26  ;;  %v10378_v26 = vld [vmem:[#allocation5 + $0x20] sm:$0xf]  ;;  %v11571_v24 = vld [vmem:[#allocation5 + $0x28] sm:$0xf0] }
0x1740   :  { %6156 = vst [vmem:[%s13879_s6 + $0x28] sm:$0x1] %v6127_v61  ;;  %v10396_v61 = vld [vmem:[#allocation5 + $0x54] sm:$0xf0] }
0x1741   :  { %6157 = vst [vmem:[%s13879_s6 + $0x38] sm:$0x1] %v6128_v60  ;;  %v10414_v60 = vld [vmem:[#allocation5 + $0x68] sm:$0xf]  ;;  %6403 = vmatpush.bf16.msra.mxu1 %v10427_v56 }
0x1742   :  { %6158 = vst [vmem:[%s13879_s6 + $0x48] sm:$0x1] %v6129_v52  ;;  %v6121_v47 = vpop.f32.mrf.mxu2  ;;  %v11580_v52 = vld [vmem:[#allocation5 + $0x70] sm:$0xf0] }
0x1743   :  { %6159 = vst [vmem:[%s13879_s6 + $0x58] sm:$0x1] %v6130_v51  ;;  %v6122_v17 = vadd.f32 %v11755_v43, %v6121_v47  ;;  %v10394_v43 = vld [vmem:[#allocation5 + $0x48] sm:$0xf]  ;;  %v11573_v47 = vld [vmem:[#allocation5 + $0x38] sm:$0xf0] }
0x1744   :  { %6160 = vst [vmem:[%s13879_s6 + $0x68] sm:$0x1] %v6131_v35  ;;  %v10395_v51 = vor.u32 %v11576_v28, %v10394_v43  ;;  %v10528_v43 = vld [vmem:[#allocation7 + $0x80] sm:$0xf]  ;;  %v11607_v28 = vld [vmem:[#allocation7 + $0x88] sm:$0xf0] }
0x1745   :  { %6161 = vst [vmem:[%s13879_s6 + $0x78] sm:$0x1] %v6132_v34  ;;  %v6133_v0 = vrot.slane %v6122_v17, 1  ;;  %v6134_v63 = vrot.slane %v6122_v17, 2  ;;  %v6135_v1 = vrot.slane %v6122_v17, 3  ;;  %6172 = vmax.xlane.f32.xlu1 %v6122_v17  ;;  %v6136_v59 = vrot.slane %v6122_v17, 4 }
0x1746   :  { %6162 = vst [vmem:[%s13879_s6 + $0x88] sm:$0x1] %v6122_v17  ;;  %v6137_v38 = vrot.slane %v6122_v17, 5  ;;  %v6138_v33 = vrot.slane %v6122_v17, 6  ;;  %v6139_v55 = vrot.slane %v6122_v17, 7  ;;  %6377 = vmatpush.bf16.msrb.mxu3 %v10395_v51  ;;  %v10529_v56 = vor.u32 %v11607_v28, %v10528_v43 }
0x1747   :  { %6163 = vst [vmem:[%s13879_s6 + $0x98] sm:$0x1] %v6133_v0  ;;  %v10382_v34 = vld [vmem:[#allocation5 + $0x30] sm:$0xf] }
0x1748   :  { %6164 = vst [vmem:[%s13879_s6 + $0xa8] sm:$0x1] %v6134_v63  ;;  %v11572_v63 = vld [vmem:[#allocation5 + $0x34] sm:$0xf] }
0x1749   :  { %6165 = vst [vmem:[%s13879_s6 + $0xb8] sm:$0x1] %v6135_v1  ;;  %v10384_v1 = vld [vmem:[#allocation5 + $0x3c] sm:$0xf0] }
0x174a   :  { %6166 = vst [vmem:[%s13879_s6 + $0xc8] sm:$0x1] %v6136_v59  ;;  %v10402_v59 = vld [vmem:[#allocation5 + $0x50] sm:$0xf]  ;;  %v6592_v32 = vpop.f32.mrf.mxu2 }
0x174b   :  { %6167 = vst [vmem:[%s13879_s6 + $0xd8] sm:$0x1] %v6137_v38  ;;  %v11577_v38 = vld [vmem:[#allocation5 + $0x58] sm:$0xf0] }
0x174c   :  { %6168 = vst [vmem:[%s13879_s6 + $0xe8] sm:$0x1] %v6138_v33  ;;  %v10383_v33 = vor.u32 %v11573_v47, %v10382_v34  ;;  %v10403_v54 = vor.u32 %v11577_v38, %v10402_v59  ;;  %v10516_v34 = vld [vmem:[#allocation7 + $0x68] sm:$0xf]  ;;  %v11604_v47 = vld [vmem:[#allocation7 + $0x70] sm:$0xf0] }
0x174d   :  { %6169 = vst [vmem:[%s13879_s6 + $0xf8] sm:$0x1] %v6139_v55  ;;  %v10387_v55 = vor.u32 %v11572_v63, %v10384_v1  ;;  %v11599_v63 = vld [vmem:[#allocation7 + $0x4c] sm:$0xf]  ;;  %v10498_v1 = vld [vmem:[#allocation7 + $0x54] sm:$0xf0] }
0x174e   :  { %6378 = vmatpush.bf16.msrb.mxu3 %v10383_v33  ;;  %v10504_v59 = vld [vmem:[#allocation7 + $0x50] sm:$0xf]  ;;  %v11601_v38 = vld [vmem:[#allocation7 + $0x58] sm:$0xf0]  ;;  %v10501_v33 = vor.u32 %v11599_v63, %v10498_v1 }
0x17b0   :  { %v6171_v23 = vpop.xlane.xlu0 %6170 }
0x17b1   :  { %vm6174_vm10 = vcmp.eq.f32.partialorder %v6120_v27, %v6171_v23  ;;  %v11575_v27 = vld [vmem:[#allocation5 + $0x4c] sm:$0xf]  ;;  %v10370_v23 = vld [vmem:[#allocation5 + $0x18] sm:$0xf] }
0x17b2   :  { %v13495_v4 = vsel %vm6174_vm10, %v12222_v10, 128  ;;  %v10399_v35 = vor.u32 %v11575_v27, %v10396_v61  ;;  %v10525_v27 = vor.u32 %v11605_v20, %v10522_v53  ;;  %v10366_v61 = vld [vmem:[#allocation5 + $0x8] sm:$0xf] }
0x17b3   :  { %v6179_v3 = vshra.s32 %v13495_v4, 16  ;;  %v6178_v0 = vand.u32 65535, %v13495_v4  ;;  %v11618_v53 = vld [vmem:[#allocation10 + $0x20] sm:$0xff] }
0x17b4   :  { %6391 = vmatpush.bf16.msra.mxu0 %v10399_v35  ;;  %v10510_v35 = vld [vmem:[#allocation7 + $0x6c] sm:$0xf0] }
0x17b5   :  { %v13498_v5 = vcvt.s32.f32 %v6179_v3  ;;  %v11570_v3 = vld [vmem:[#allocation5 + $0x20] sm:$0xf0] }
0x17b6   :  { %v10371_v19 = vor.u32 %v11570_v3, %v10370_v23  ;;  %v11596_v23 = vld [vmem:[#allocation7 + $0x34] sm:$0xf]  ;;  %v10486_v3 = vld [vmem:[#allocation7 + $0x3c] sm:$0xf0] }
0x17b7   :  { %6182 = vmin.xlane.f32.xlu2 %v13498_v5  ;;  %v10489_v7 = vor.u32 %v11596_v23, %v10486_v3  ;;  %v11614_v23 = vld [vmem:[#allocation10] sm:$0xff] }
0x17b8   :  { %v6173_v62 = vpop.xlane.xlu1 %6172  ;;  %6392 = vmatpush.bf16.msra.mxu0 %v10387_v55  ;;  %6379 = vmatpush.bf16.msrb.mxu3 %v10371_v19  ;;  %v10505_v55 = vor.u32 %v11601_v38, %v10504_v59  ;;  %v10474_v19 = vld [vmem:[#allocation7 + $0x24] sm:$0xf0] }
0x17b9   :  { %vm6175_vm11 = vcmp.eq.f32.partialorder %v6122_v17, %v6173_v62  ;;  %v10415_v17 = vor.u32 %v11580_v52, %v10414_v60  ;;  %v11568_v60 = vld [vmem:[#allocation5 + $0x10] sm:$0xf0]  ;;  %v11602_v52 = vld [vmem:[#allocation7 + $0x64] sm:$0xf]  ;;  %v10780_v3 = vld [vmem:[#allocation7 + $0xa8] sm:$0xf] }
0x17ba   :  { %v13502_v46 = vsel %vm6175_vm11, %v12222_v10, 128  ;;  %v10367_v51 = vor.u32 %v11568_v60, %v10366_v61 }
0x17bb   :  { %v6193_v48 = vshra.s32 %v13502_v46, 16  ;;  %6404 = vmatpush.bf16.msra.mxu1 %v10415_v17  ;;  %v6192_v12 = vand.u32 65535, %v13502_v46  ;;  %v10549_v46 = vor.u32 %v11611_v13, %v10546_v50  ;;  %v10513_v17 = vor.u32 %v11602_v52, %v10510_v35  ;;  %v10468_v13 = vld [vmem:[#allocation7 + $0x8] sm:$0xf]  ;;  %v11592_v50 = vld [vmem:[#allocation7 + $0x10] sm:$0xf0] }
0x17bc   :  { %6393 = vmatpush.bf16.msra.mxu0 %v10375_v15  ;;  %6380 = vmatpush.bf16.msrb.mxu3 %v10359_v18  ;;  %v11595_v15 = vld [vmem:[#allocation7 + $0x28] sm:$0xf0]  ;;  %v10469_v29 = vor.u32 %v11592_v50, %v10468_v13  ;;  %v11616_v35 = vld [vmem:[#allocation10 + $0x10] sm:$0xff] }
0x17bd   :  { %v13505_v39 = vcvt.s32.f32 %v6193_v48  ;;  %v6180_v48 = vcvt.s32.f32 %v6178_v0  ;;  %v6194_v30 = vcvt.s32.f32 %v6192_v12  ;;  %v10517_v0 = vor.u32 %v11604_v47, %v10516_v34  ;;  %v10480_v12 = vld [vmem:[#allocation7 + $0x20] sm:$0xf] }
0x17be   :  { %v10481_v41 = vor.u32 %v11595_v15, %v10480_v12 }
0x17bf   :  { %6196 = vmin.xlane.f32.xlu0 %v13505_v39  ;;  %6405 = vmatpush.bf16.msra.mxu1 %v10403_v54 }
0x17c0   :  { %6597 = vmatpush.bf16.msra.mxu3 %v10549_v46 }
0x17c3   :  { %6406 = vmatpush.bf16.msra.mxu1 %v10391_v40 }
0x17c4   :  { %6598 = vmatpush.bf16.msra.mxu3 %v10537_v6 }
0x17c8   :  { %6599 = vmatpush.bf16.msra.mxu3 %v10525_v27 }
0x17cc   :  { %6600 = vmatpush.bf16.msra.mxu3 %v10513_v17  ;;  %v11615_v17 = vld [vmem:[#allocation10 + $0x8] sm:$0xff] }
0x17d0   :  { %6601 = vmatpush.bf16.msra.mxu3 %v10501_v33 }
0x17d4   :  { %6602 = vmatpush.bf16.msra.mxu3 %v10489_v7  ;;  %v10768_v7 = vld [vmem:[#allocation7 + $0x90] sm:$0xf] }
0x182a   :  { %v13509_v62 = vpop.xlane.xlu2 %6182 }
0x182b   :  { %vm6184_vm12 = vcmp.eq.f32.partialorder %v13498_v5, %v13509_v62  ;;  %v10363_v5 = vor.u32 %v11566_v16, %v10360_v21  ;;  %v11590_v16 = vld [vmem:[#allocation7 + $0x4] sm:$0xf]  ;;  %v10462_v21 = vld [vmem:[#allocation7 + $0xc] sm:$0xf0] }
0x182c   :  { %v6185_v4 = vsel %vm6184_vm12, %v6180_v48, inf  ;;  %v10492_v48 = vld [vmem:[#allocation7 + $0x38] sm:$0xf]  ;;  %v10465_v22 = vor.u32 %v11590_v16, %v10462_v21 }
0x182d   :  { %6186 = vmin.xlane.f32.xlu1 %v6185_v4  ;;  %6394 = vmatpush.bf16.msra.mxu0 %v10363_v5  ;;  %v10493_v54 = vor.u32 %v11598_v31, %v10492_v48  ;;  %v11593_v4 = vld [vmem:[#allocation7 + $0x1c] sm:$0xf]  ;;  %v6189_v5 = vcvt.f32.s32 %v13509_v62  ;;  %v13527_v62 = vld [vmem:[#allocation8] sm:$0x7]  ;;  %v11668_v48 = vld [vmem:[#allocation7 + $0xb0] sm:$0xf0] }
0x182e   :  { %v10477_v8 = vor.u32 %v11593_v4, %v10474_v19  ;;  %v6449_v14 = vperm.slane %v13527_v62, 0  ;;  %v10781_v31 = vor.u32 %v11668_v48, %v10780_v3 }
0x1830   :  { %6603 = vmatpush.bf16.msra.mxu3 %v10477_v8  ;;  %v6593_v6 = vadd.f32 %v6592_v32, %v6449_v14  ;;  %v10756_v8 = vld [vmem:[#allocation7 + $0x78] sm:$0xf]  ;;  %v10732_v32 = vld [vmem:[#allocation7 + $0x48] sm:$0xf] }
0x1831   :  { %6611 = vmatpush.bf16.msrb.mxu0 %v10553_v36  ;;  %v6190_v36 = vshll.u32 %v6189_v5, 16 }
0x1832   :  { %v13514_v58 = vpop.xlane.xlu0 %6196 }
0x1833   :  { %vm6198_vm13 = vcmp.eq.f32.partialorder %v13505_v39, %v13514_v58  ;;  %v10379_v39 = vor.u32 %v11571_v24, %v10378_v26  ;;  %v11619_v24 = vld [vmem:[#allocation10 + $0x28] sm:$0xff] }
0x1834   :  { %v6199_v25 = vsel %vm6198_vm13, %v6194_v30, inf  ;;  %6604 = vmatpush.bf16.msra.mxu3 %v10465_v22  ;;  %v6203_v30 = vcvt.f32.s32 %v13514_v58  ;;  %v11621_v58 = vld [vmem:[#allocation10 + $0x38] sm:$0xff] }
0x1835   :  { %6200 = vmin.xlane.f32.xlu2 %v6199_v25  ;;  %6612 = vmatpush.bf16.msrb.mxu0 %v10541_v49 }
0x1836   :  { %6407 = vmatpush.bf16.msra.mxu1 %v10379_v39  ;;  %v6204_v9 = vshll.u32 %v6203_v30, 16  ;;  %v6594_v39 = vpop.f32.mrf.mxu2 }
0x1837   :  { %v6595_v43 = vadd.f32 %v6594_v39, %v6449_v14  ;;  %v11656_v14 = vld [vmem:[#allocation7 + $0x50] sm:$0xf0] }
0x1839   :  { %6613 = vmatpush.bf16.msrb.mxu0 %v10529_v56  ;;  %v11617_v56 = vld [vmem:[#allocation10 + $0x18] sm:$0xff] }
0x183a   :  { %6408 = vmatpush.bf16.msra.mxu1 %v10367_v51  ;;  %v6450_v51 = vperm.slane %v13527_v62, 1 }
0x183d   :  { %6614 = vmatpush.bf16.msrb.mxu0 %v10517_v0 }
0x183e   :  { %6788 = vmatpush.bf16.msrb.mxu1 %v11621_v58 }
0x1841   :  { %6615 = vmatpush.bf16.msrb.mxu0 %v10505_v55 }
0x1842   :  { %6789 = vmatpush.bf16.msrb.mxu1 %v11620_v45 }
0x1845   :  { %6616 = vmatpush.bf16.msrb.mxu0 %v10493_v54  ;;  %v11665_v54 = vld [vmem:[#allocation7 + $0x98] sm:$0xf0] }
0x1846   :  { %6790 = vmatpush.bf16.msrb.mxu1 %v11619_v24  ;;  %v10769_v15 = vor.u32 %v11665_v54, %v10768_v7 }
0x1849   :  { %6617 = vmatpush.bf16.msrb.mxu0 %v10481_v41  ;;  %v11662_v41 = vld [vmem:[#allocation7 + $0x80] sm:$0xf0] }
0x184a   :  { %6791 = vmatpush.bf16.msrb.mxu1 %v11618_v53  ;;  %v10757_v5 = vor.u32 %v11662_v41, %v10756_v8 }
0x184d   :  { %6618 = vmatpush.bf16.msrb.mxu0 %v10469_v29 }
0x184e   :  { %6792 = vmatpush.bf16.msrb.mxu1 %v11617_v56 }
0x1852   :  { %6793 = vmatpush.bf16.msrb.mxu1 %v11616_v35 }
0x1856   :  { %6794 = vmatpush.bf16.msrb.mxu1 %v11615_v17 }
0x185a   :  { %6795 = vmatpush.bf16.msrb.mxu1 %v11614_v23 }
0x18a0   :  { %v6187_v18 = vpop.xlane.xlu1 %6186 }
0x18a1   :  { %v6188_v46 = vcvt.f32.s32 %v6187_v18 }
0x18a3   :  { %v6191_v37 = vadd.s32 %v6190_v36, %v6188_v46  ;;  %v10744_v46 = vld [vmem:[#allocation7 + $0x60] sm:$0xf]  ;;  %v11659_v36 = vld [vmem:[#allocation7 + $0x68] sm:$0xf0] }
0x18a5   :  { %vm6206_vm14 = vcmp.eq.s32.totalorder %v12222_v10, %v6191_v37 }
0x18a8   :  { %v6201_v25 = vpop.xlane.xlu2 %6200 }
0x18a9   :  { %v6202_v2 = vcvt.f32.s32 %v6201_v25 }
0x18ab   :  { %v6205_v40 = vadd.s32 %v6204_v9, %v6202_v2 }
0x18ad   :  { %vm6207_vm15 = vcmp.eq.s32.totalorder %v12222_v10, %v6205_v40  ;;  %v10745_v40 = vor.u32 %v11659_v36, %v10744_v46 }
0x18ae   :  { %vm10452_vm0 = vmpackc.low %vm6207_vm15, %vm6206_vm14 }
0x18af   :  { %10453 = vmatmul.msk.bf16.vlgmr.msrb.gmra.mxu3 %vm10452_vm0, %v12162_v44  ;;  %10455 = vmatmul.msk.bf16.vlgmr.msra.gmra.mxu0 %vm10452_vm0, %v12162_v44 }
0x18b0   :  { %10457 = vmatmul.msk.bf16.vlgmr.msra.gmra.mxu1 %vm10452_vm0, %v12162_v44 }
0x18b1   :  { %7261 = vmatpush.bf16.msra.mxu1 %v10781_v31 }
0x18b5   :  { %7262 = vmatpush.bf16.msra.mxu1 %v10769_v15 }
0x18b9   :  { %7263 = vmatpush.bf16.msra.mxu1 %v10757_v5 }
0x18bd   :  { %7264 = vmatpush.bf16.msra.mxu1 %v10745_v40 }
0x18bf   :  { %6605 = vmatmul.bf16.vlgmr.msra.gmra.mxu3 %v13439_v42  ;;  %6619 = vmatmul.bf16.vlgmr.msrb.gmra.mxu0 %v13439_v42 }
0x192c   :  { %v6396_v28 = vpop.f32.mrf.mxu0 }
0x192d   :  { %v6410_v53 = vpop.f32.mrf.mxu1 }
0x1932   :  { %v6382_v49 = vpop.f32.mrf.mxu3 }
0x1933   :  { %v6625_v26 = vadd.f32 %v6593_v6, %v6382_v49 }
0x1934   :  { %v6398_v63 = vpop.f32.mrf.mxu0 }
0x1935   :  { %v10554_v20 = vmul.f32 -1.442695, %v6625_v26  ;;  %v6451_v26 = vperm.slane %v13527_v62, 2  ;;  %v6412_v15 = vpop.f32.mrf.mxu1 }
0x1937   :  { %11939 = vpow2.f32 %v10554_v20 }
0x193a   :  { %v6384_v42 = vpop.f32.mrf.mxu3 }
0x193b   :  { %v6626_v27 = vadd.f32 %v6595_v43, %v6384_v42 }
0x193c   :  { %v6620_v22 = vpop.f32.mrf.mxu0 }
0x193d   :  { %v11940_v61 = vpop.eup %11939  ;;  %v10555_v60 = vmul.f32 -1.442695, %v6626_v27 }
0x193e   :  { %v13530_v52 = vadd.f32 1.0, %v11940_v61  ;;  %v10720_v61 = vld [vmem:[#allocation7 + $0x30] sm:$0xf] }
0x193f   :  { %11941 = vpow2.f32 %v10555_v60  ;;  %v11653_v60 = vld [vmem:[#allocation7 + $0x38] sm:$0xf0] }
0x1940   :  { %11943 = vrcp.f32 %v13530_v52  ;;  %v6646_v37 = vand.u32 2147483648, %v13530_v52  ;;  %vm6640_vm2 = vweird.f32 %v13530_v52  ;;  %v6644_v58 = vand.u32 2147483647, %v13530_v52 }
0x1942   :  { %v6606_v34 = vpop.f32.mrf.mxu3  ;;  %v6647_v43 = vor.u32 1.1754944e-38, %v6646_v37  ;;  %vm6645_vm7 = vcmp.eq.f32.partialorder %v6644_v58, 8.507059e+37 }
0x1943   :  { %v6607_v47 = vadd.f32 %v6606_v34, %v6450_v51 }
0x1944   :  { %v6622_v35 = vpop.f32.mrf.mxu0 }
0x1945   :  { %v11942_v0 = vpop.eup %11941  ;;  %v6665_v1 = vadd.f32 %v6607_v47, %v6396_v28  ;;  %v10733_v28 = vor.u32 %v11656_v14, %v10732_v32  ;;  %v6621_v47 = vadd.f32 %v6620_v22, %v6451_v26 }
0x1946   :  { %v13534_v59 = vpop.eup %11943  ;;  %v13536_v38 = vadd.f32 1.0, %v11942_v0 }
0x1947   :  { %v6636_v33 = vmul.f32 %v13534_v59, %v13530_v52  ;;  %v10556_v55 = vmul.f32 -1.442695, %v6665_v1  ;;  %vm6641_vm1 = vweird.f32 %v13534_v59  ;;  %7265 = vmatpush.bf16.msra.mxu1 %v10733_v28 }
0x1948   :  { %11945 = vrcp.f32 %v13536_v38  ;;  %vm13551_vm4 = vmor %vm6640_vm2, %vm6641_vm1  ;;  %v6661_v49 = vand.u32 2147483648, %v13536_v38  ;;  %vm6655_vm5 = vweird.f32 %v13536_v38  ;;  %v6659_v20 = vand.u32 2147483647, %v13536_v38 }
0x1949   :  { %11947 = vpow2.f32 %v10556_v55  ;;  %v6637_v4 = vsub.f32 1.0, %v6636_v33  ;;  %v11650_v33 = vld [vmem:[#allocation7 + $0x20] sm:$0xf0] }
0x194a   :  { %v6608_v19 = vpop.f32.mrf.mxu3  ;;  %v6662_v34 = vor.u32 1.1754944e-38, %v6661_v49  ;;  %vm6660_vm8 = vcmp.eq.f32.partialorder %v6659_v20, 8.507059e+37 }
0x194b   :  { %v6609_v12 = vadd.f32 %v6608_v19, %v6450_v51  ;;  %v6638_v13 = vmul.f32 %v13534_v59, %v6637_v4  ;;  %v10696_v19 = vld [vmem:[#allocation7] sm:$0xf] }
0x194d   :  { %v6666_v16 = vadd.f32 %v6609_v12, %v6398_v63  ;;  %v6639_v9 = vadd.f32 %v13534_v59, %v6638_v13  ;;  %v10721_v63 = vor.u32 %v11653_v60, %v10720_v61  ;;  %v11647_v12 = vld [vmem:[#allocation7 + $0x8] sm:$0xf0] }
0x194e   :  { %v11946_v21 = vpop.eup %11945 }
0x194f   :  { %v11948_v50 = vpop.eup %11947  ;;  %v6651_v29 = vmul.f32 %v11946_v21, %v13536_v38  ;;  %v10557_v18 = vmul.f32 -1.442695, %v6666_v16  ;;  %vm6656_vm3 = vweird.f32 %v11946_v21  ;;  %v6643_v24 = vsel %vm13551_vm4, %v13534_v59, %v6639_v9  ;;  %v10708_v38 = vld [vmem:[#allocation7 + $0x18] sm:$0xf]  ;;  %7266 = vmatpush.bf16.msra.mxu1 %v10721_v63 }
0x1950   :  { %v13543_v30 = vadd.f32 1.0, %v11948_v50  ;;  %vm13562_vm6 = vmor %vm6655_vm5, %vm6656_vm3  ;;  %v6648_v52 = vsel %vm6645_vm7, %v6647_v43, %v6643_v24  ;;  %v6623_v59 = vadd.f32 %v6622_v35, %v6451_v26  ;;  %v10709_v7 = vor.u32 %v11650_v33, %v10708_v38  ;;  %v11756_v24 = vld [vmem:[%s13878_s5] ss:$0 sm:$0xff] }
0x1951   :  { %v6652_v25 = vsub.f32 1.0, %v6651_v29  ;;  %11949 = vpow2.f32 %v10557_v18  ;;  %v6705_v1 = vmul.f32 %v6648_v52, %v6621_v47  ;;  %v10697_v50 = vor.u32 %v11647_v12, %v10696_v19  ;;  %v11640_v12 = vld [vmem:[#allocation5 + $0x94] sm:$0xf] }
0x1952   :  { %11951 = vrcp.f32 %v13543_v30  ;;  %v6686_v23 = vand.u32 2147483648, %v13543_v30  ;;  %vm6680_vm10 = vweird.f32 %v13543_v30  ;;  %v6684_v31 = vand.u32 2147483647, %v13543_v30 }
0x1953   :  { %v6653_v2 = vmul.f32 %v11946_v21, %v6652_v25  ;;  %v6707_v4 = vadd.f32 %v6705_v1, %v6410_v53  ;;  %7267 = vmatpush.bf16.msra.mxu1 %v10709_v7  ;;  %v10680_v7 = vld [vmem:[#allocation5 + $0xb4] sm:$0xf0] }
0x1954   :  { %v6687_v16 = vor.u32 1.1754944e-38, %v6686_v23  ;;  %vm6685_vm12 = vcmp.eq.f32.partialorder %v6684_v31, 8.507059e+37  ;;  %v10678_v23 = vld [vmem:[#allocation5 + $0xa8] sm:$0xf] }
0x1955   :  { %v6654_v6 = vadd.f32 %v11946_v21, %v6653_v2 }
0x1957   :  { %v11950_v39 = vpop.eup %11949  ;;  %v6658_v62 = vsel %vm13562_vm6, %v11946_v21, %v6654_v6  ;;  %7268 = vmatpush.bf16.msra.mxu1 %v10697_v50  ;;  %v10656_v50 = vld [vmem:[#allocation5 + $0x84] sm:$0xf0] }
0x1958   :  { %v11952_v27 = vpop.eup %11951  ;;  %v6674_v56 = vadd.f32 1.0, %v11950_v39  ;;  %v6663_v0 = vsel %vm6660_vm8, %v6662_v34, %v6658_v62 }
0x1959   :  { %v6676_v51 = vmul.f32 %v11952_v27, %v13543_v30  ;;  %vm6681_vm9 = vweird.f32 %v11952_v27  ;;  %v6706_v3 = vmul.f32 %v6663_v0, %v6623_v59 }
0x195a   :  { %11953 = vrcp.f32 %v6674_v56  ;;  %vm6682_vm11 = vmor %vm6680_vm10, %vm6681_vm9  ;;  %v6701_v22 = vand.u32 2147483648, %v6674_v56  ;;  %v6699_v5 = vand.u32 2147483647, %v6674_v56  ;;  %vm6695_vm14 = vweird.f32 %v6674_v56 }
0x195b   :  { %v6677_v17 = vsub.f32 1.0, %v6676_v51  ;;  %v6708_v21 = vadd.f32 %v6706_v3, %v6412_v15  ;;  %11955 = vtanh.f32 %v6707_v4  ;;  %v11644_v3 = vld [vmem:[#allocation5 + $0xb0] sm:$0xf0]  ;;  %v11641_v4 = vld [vmem:[#allocation5 + $0x98] sm:$0xf0] }
0x195c   :  { %v6702_v36 = vor.u32 1.1754944e-38, %v6701_v22  ;;  %vm6700_vm0 = vcmp.eq.f32.partialorder %v6699_v5, 8.507059e+37  ;;  %v10679_v31 = vor.u32 %v11644_v3, %v10678_v23  ;;  %v10668_v15 = vld [vmem:[#allocation5 + $0x9c] sm:$0xf0]  ;;  %v10686_v22 = vld [vmem:[#allocation5 + $0xb0] sm:$0xf] }
0x195d   :  { %v6678_v55 = vmul.f32 %v11952_v27, %v6677_v17  ;;  %11957 = vtanh.f32 %v6708_v21  ;;  %v11638_v21 = vld [vmem:[#allocation5 + $0x80] sm:$0xf0]  ;;  %v11625_v23 = vld [vmem:[#allocation5 + $0x1c] sm:$0xf]  ;;  %v10608_v3 = vld [vmem:[#allocation5 + $0x24] sm:$0xf0] }
0x195e   :  { %7051 = vmatpush.bf16.msrb.mxu2 %v10679_v31 }
0x195f   :  { %v6679_v48 = vadd.f32 %v11952_v27, %v6678_v55 }
0x1960   :  { %v11954_v54 = vpop.eup %11953 }
0x1961   :  { %v6691_v8 = vmul.f32 %v11954_v54, %v6674_v56  ;;  %v6683_v41 = vsel %vm6682_vm11, %v11952_v27, %v6679_v48  ;;  %vm6696_vm13 = vweird.f32 %v11954_v54  ;;  %v11956_v9 = vpop.eup %11955  ;;  %v11643_v48 = vld [vmem:[#allocation5 + $0xac] sm:$0xf] }
0x1962   :  { %v6688_v29 = vsel %vm6685_vm12, %v6687_v16, %v6683_v41  ;;  %vm6697_vm15 = vmor %vm6695_vm14, %vm6696_vm13  ;;  %v10683_v19 = vor.u32 %v11643_v48, %v10680_v7  ;;  %v10671_v41 = vor.u32 %v11640_v12, %v10668_v15  ;;  %v10654_v16 = vld [vmem:[#allocation5 + $0x78] sm:$0xf]  ;;  %v11622_v12 = vld [vmem:[#allocation5 + $0x4] sm:$0xf] }
0x1963   :  { %v6692_v13 = vsub.f32 1.0, %v6691_v8  ;;  %v6711_v46 = vsub.f32 1.0, %v6688_v29  ;;  %v11958_v58 = vpop.eup %11957  ;;  %v6715_v14 = vmul.f32 %v6688_v29, %v13433_v11  ;;  %v11645_v29 = vld [vmem:[#allocation5 + $0xb8] sm:$0xf0]  ;;  %v10655_v5 = vor.u32 %v11638_v21, %v10654_v16  ;;  %v10596_v15 = vld [vmem:[#allocation5 + $0xc] sm:$0xf0] }
0x1964   :  { %7065 = vmatpush.bf16.msrb.mxu3 %v10683_v19  ;;  %v11623_v19 = vld [vmem:[#allocation5 + $0x8] sm:$0xf0]  ;;  %v10788_v16 = vld [vmem:[#allocation7 + $0xb0] sm:$0xf]  ;;  %v11669_v21 = vld [vmem:[#allocation7 + $0xb8] sm:$0xf0] }
0x1965   :  { %v6693_v18 = vmul.f32 %v11954_v54, %v6692_v13  ;;  %v6713_v40 = vmul.f32 %v11956_v9, %v6711_v46  ;;  %v11637_v13 = vld [vmem:[#allocation5 + $0x7c] sm:$0xf]  ;;  %v11642_v46 = vld [vmem:[#allocation5 + $0xa0] sm:$0xf0]  ;;  %v11635_v9 = vld [vmem:[#allocation5 + $0x68] sm:$0xf0] }
0x1967   :  { %v6694_v30 = vadd.f32 %v11954_v54, %v6693_v18  ;;  %v13574_v6 = vadd.f32 %v6715_v14, %v6713_v40  ;;  %v10687_v18 = vor.u32 %v11645_v29, %v10686_v22  ;;  %v10644_v40 = vld [vmem:[#allocation5 + $0x6c] sm:$0xf0]  ;;  %v10789_v29 = vor.u32 %v11669_v21, %v10788_v16 }
0x1968   :  { %7066 = vmatpush.bf16.msrb.mxu3 %v10671_v41  ;;  %v10782_v41 = vld [vmem:[#allocation7 + $0xb4] sm:$0xf0] }
0x1969   :  { %v6698_v25 = vsel %vm6697_vm15, %v11954_v54, %v6694_v30  ;;  %v10666_v54 = vld [vmem:[#allocation5 + $0x90] sm:$0xf]  ;;  %v10674_v30 = vld [vmem:[#allocation5 + $0x98] sm:$0xf]  ;;  %7079 = vmatpush.bf16.msra.mxu0 %v10687_v18 }
0x196a   :  { %v6703_v37 = vsel %vm6700_vm0, %v6702_v36, %v6698_v25  ;;  %v10667_v8 = vor.u32 %v11641_v4, %v10666_v54  ;;  %v10659_v36 = vor.u32 %v11637_v13, %v10656_v50  ;;  %v10642_v25 = vld [vmem:[#allocation5 + $0x60] sm:$0xf]  ;;  %v10611_v54 = vor.u32 %v11625_v23, %v10608_v3  ;;  %v11654_v23 = vld [vmem:[#allocation7 + $0x40] sm:$0xf0] }
0x196b   :  { %v6712_v2 = vsub.f32 1.0, %v6703_v37  ;;  %v6716_v45 = vmul.f32 %v6703_v37, %v13435_v57  ;;  %v11634_v37 = vld [vmem:[#allocation5 + $0x64] sm:$0xf]  ;;  %v10643_v14 = vor.u32 %v11635_v9, %v10642_v25  ;;  %v10594_v4 = vld [vmem:[#allocation5] sm:$0xf] }
0x196c   :  { %7052 = vmatpush.bf16.msrb.mxu2 %v10667_v8  ;;  %7067 = vmatpush.bf16.msrb.mxu3 %v10659_v36  ;;  %v11667_v8 = vld [vmem:[#allocation7 + $0xac] sm:$0xf]  ;;  %v10595_v13 = vor.u32 %v11623_v19, %v10594_v4  ;;  %v10770_v25 = vld [vmem:[#allocation7 + $0x9c] sm:$0xf0]  ;;  %v10776_v9 = vld [vmem:[#allocation7 + $0x98] sm:$0xf] }
0x196d   :  { %v6714_v32 = vmul.f32 %v11958_v58, %v6712_v2  ;;  %v10675_v2 = vor.u32 %v11642_v46, %v10674_v30  ;;  %v10662_v58 = vld [vmem:[#allocation5 + $0x80] sm:$0xf]  ;;  %v11630_v30 = vld [vmem:[#allocation5 + $0x40] sm:$0xf0]  ;;  %v11664_v46 = vld [vmem:[#allocation7 + $0x94] sm:$0xf] }
0x196f   :  { %v13576_v49 = vadd.f32 %v6716_v45, %v6714_v32  ;;  %v11639_v32 = vld [vmem:[#allocation5 + $0x88] sm:$0xf0]  ;;  %v10647_v45 = vor.u32 %v11634_v37, %v10644_v40  ;;  %7080 = vmatpush.bf16.msra.mxu0 %v10675_v2  ;;  %v11666_v37 = vld [vmem:[#allocation7 + $0xa0] sm:$0xf0]  ;;  %v10773_v2 = vor.u32 %v11664_v46, %v10770_v25 }
0x1970   :  { %7053 = vmatpush.bf16.msrb.mxu2 %v10655_v5  ;;  %v10626_v5 = vld [vmem:[#allocation5 + $0x38] sm:$0xf]  ;;  %v10777_v40 = vor.u32 %v11666_v37, %v10776_v9 }
0x1971   :  { %v13580_v26 = vpack.c.bf16 %v13576_v49, %v13574_v6  ;;  %7068 = vmatpush.bf16.msrb.mxu3 %v10647_v45  ;;  %v10627_v36 = vor.u32 %v11630_v30, %v10626_v5  ;;  %v10758_v45 = vld [vmem:[#allocation7 + $0x84] sm:$0xf0]  ;;  %v11676_v37 = vld [vmem:[#allocation10 + $0x30] sm:$0xff] }
0x1973   :  { %6796 = vmatmul.bf16.vlgmr.msrb.gmra.mxu1 %v13580_v26 }
0x1974   :  { %7054 = vmatpush.bf16.msrb.mxu2 %v10643_v14  ;;  %v11661_v14 = vld [vmem:[#allocation7 + $0x7c] sm:$0xf] }
0x1983   :  { %7269 = vmatmul.bf16.vlgmr.msra.gmra.mxu1 %v13580_v26 }
0x19f0   :  { %v6797_v20 = vpop.f32.mrf.mxu1 }
0x19f1   :  { %v6798_v11 = vadd.f32 %v11756_v24, %v6797_v20  ;;  %v11632_v20 = vld [vmem:[#allocation5 + $0x50] sm:$0xf0] }
0x19f3   :  { %v6804_v39 = vrot.slane %v6798_v11, 1  ;;  %v6805_v57 = vrot.slane %v6798_v11, 2  ;;  %v6806_v53 = vrot.slane %v6798_v11, 3  ;;  %6832 = vst [vmem:[%s13879_s6 + $0x9] sm:$0x1] %v6798_v11  ;;  %6848 = vmax.xlane.f32.xlu0 %v6798_v11  ;;  %v6807_v43 = vrot.slane %v6798_v11, 4 }
0x19f4   :  { %v6808_v42 = vrot.slane %v6798_v11, 5  ;;  %v6809_v28 = vrot.slane %v6798_v11, 6  ;;  %v6810_v27 = vrot.slane %v6798_v11, 7 }
0x19f5   :  { %6833 = vst [vmem:[%s13879_s6 + $0x19] sm:$0x1] %v6804_v39  ;;  %v10663_v39 = vor.u32 %v11639_v32, %v10662_v58  ;;  %v10614_v58 = vld [vmem:[#allocation5 + $0x20] sm:$0xf]  ;;  %v11627_v32 = vld [vmem:[#allocation5 + $0x28] sm:$0xf0] }
0x19f6   :  { %6834 = vst [vmem:[%s13879_s6 + $0x29] sm:$0x1] %v6805_v57  ;;  %v10632_v57 = vld [vmem:[#allocation5 + $0x54] sm:$0xf0] }
0x19f7   :  { %6835 = vst [vmem:[%s13879_s6 + $0x39] sm:$0x1] %v6806_v53  ;;  %v10650_v53 = vld [vmem:[#allocation5 + $0x68] sm:$0xf]  ;;  %7081 = vmatpush.bf16.msra.mxu0 %v10663_v39 }
0x19f8   :  { %6836 = vst [vmem:[%s13879_s6 + $0x49] sm:$0x1] %v6807_v43  ;;  %v6799_v62 = vpop.f32.mrf.mxu1  ;;  %v11636_v43 = vld [vmem:[#allocation5 + $0x70] sm:$0xf0] }
0x19f9   :  { %6837 = vst [vmem:[%s13879_s6 + $0x59] sm:$0x1] %v6808_v42  ;;  %v6800_v56 = vadd.f32 %v11756_v24, %v6799_v62  ;;  %v10630_v24 = vld [vmem:[#allocation5 + $0x48] sm:$0xf]  ;;  %v11629_v62 = vld [vmem:[#allocation5 + $0x38] sm:$0xf0] }
0x19fa   :  { %6838 = vst [vmem:[%s13879_s6 + $0x69] sm:$0x1] %v6809_v28  ;;  %v10631_v42 = vor.u32 %v11632_v20, %v10630_v24  ;;  %v10764_v24 = vld [vmem:[#allocation7 + $0x80] sm:$0xf]  ;;  %v11663_v20 = vld [vmem:[#allocation7 + $0x88] sm:$0xf0] }
0x19fb   :  { %6839 = vst [vmem:[%s13879_s6 + $0x79] sm:$0x1] %v6810_v27  ;;  %v6811_v61 = vrot.slane %v6800_v56, 1  ;;  %v6812_v60 = vrot.slane %v6800_v56, 2  ;;  %v6813_v52 = vrot.slane %v6800_v56, 3  ;;  %6850 = vmax.xlane.f32.xlu1 %v6800_v56  ;;  %v6814_v51 = vrot.slane %v6800_v56, 4 }
0x19fc   :  { %6840 = vst [vmem:[%s13879_s6 + $0x89] sm:$0x1] %v6800_v56  ;;  %v6815_v35 = vrot.slane %v6800_v56, 5  ;;  %v6816_v34 = vrot.slane %v6800_v56, 6  ;;  %v6817_v47 = vrot.slane %v6800_v56, 7  ;;  %7055 = vmatpush.bf16.msrb.mxu2 %v10631_v42  ;;  %v10765_v39 = vor.u32 %v11663_v20, %v10764_v24 }
0x19fd   :  { %6841 = vst [vmem:[%s13879_s6 + $0x99] sm:$0x1] %v6811_v61  ;;  %v10618_v27 = vld [vmem:[#allocation5 + $0x30] sm:$0xf] }
0x19fe   :  { %6842 = vst [vmem:[%s13879_s6 + $0xa9] sm:$0x1] %v6812_v60  ;;  %v11628_v60 = vld [vmem:[#allocation5 + $0x34] sm:$0xf] }
0x19ff   :  { %6843 = vst [vmem:[%s13879_s6 + $0xb9] sm:$0x1] %v6813_v52  ;;  %v10620_v52 = vld [vmem:[#allocation5 + $0x3c] sm:$0xf0] }
0x1a00   :  { %6844 = vst [vmem:[%s13879_s6 + $0xc9] sm:$0x1] %v6814_v51  ;;  %v10638_v51 = vld [vmem:[#allocation5 + $0x50] sm:$0xf]  ;;  %v7270_v25 = vpop.f32.mrf.mxu1 }
0x1a01   :  { %6845 = vst [vmem:[%s13879_s6 + $0xd9] sm:$0x1] %v6815_v35  ;;  %v11633_v35 = vld [vmem:[#allocation5 + $0x58] sm:$0xf0] }
0x1a02   :  { %6846 = vst [vmem:[%s13879_s6 + $0xe9] sm:$0x1] %v6816_v34  ;;  %v10619_v34 = vor.u32 %v11629_v62, %v10618_v27  ;;  %v10639_v48 = vor.u32 %v11633_v35, %v10638_v51  ;;  %v10752_v27 = vld [vmem:[#allocation7 + $0x68] sm:$0xf]  ;;  %v11660_v62 = vld [vmem:[#allocation7 + $0x70] sm:$0xf0] }
0x1a03   :  { %6847 = vst [vmem:[%s13879_s6 + $0xf9] sm:$0x1] %v6817_v47  ;;  %v10623_v47 = vor.u32 %v11628_v60, %v10620_v52  ;;  %v11655_v60 = vld [vmem:[#allocation7 + $0x4c] sm:$0xf]  ;;  %v10734_v52 = vld [vmem:[#allocation7 + $0x54] sm:$0xf0] }
0x1a04   :  { %7056 = vmatpush.bf16.msrb.mxu2 %v10619_v34  ;;  %v10740_v51 = vld [vmem:[#allocation7 + $0x50] sm:$0xf]  ;;  %v11657_v35 = vld [vmem:[#allocation7 + $0x58] sm:$0xf0]  ;;  %v10737_v34 = vor.u32 %v11655_v60, %v10734_v52 }
0x1a66   :  { %v6849_v17 = vpop.xlane.xlu0 %6848 }
0x1a67   :  { %vm6852_vm1 = vcmp.eq.f32.partialorder %v6798_v11, %v6849_v17  ;;  %v11631_v11 = vld [vmem:[#allocation5 + $0x4c] sm:$0xf]  ;;  %v10606_v17 = vld [vmem:[#allocation5 + $0x18] sm:$0xf] }
0x1a68   :  { %v13636_v0 = vsel %vm6852_vm1, %v12222_v10, 128  ;;  %v10635_v28 = vor.u32 %v11631_v11, %v10632_v57  ;;  %v10761_v11 = vor.u32 %v11661_v14, %v10758_v45  ;;  %v10602_v57 = vld [vmem:[#allocation5 + $0x8] sm:$0xf] }
0x1a69   :  { %v6857_v63 = vshra.s32 %v13636_v0, 16  ;;  %v6856_v61 = vand.u32 65535, %v13636_v0  ;;  %v11674_v45 = vld [vmem:[#allocation10 + $0x20] sm:$0xff] }
0x1a6a   :  { %7069 = vmatpush.bf16.msrb.mxu3 %v10635_v28  ;;  %v10746_v28 = vld [vmem:[#allocation7 + $0x6c] sm:$0xf0] }
0x1a6b   :  { %v13639_v1 = vcvt.s32.f32 %v6857_v63  ;;  %v11626_v63 = vld [vmem:[#allocation5 + $0x20] sm:$0xf0] }
0x1a6c   :  { %v10607_v31 = vor.u32 %v11626_v63, %v10606_v17  ;;  %v11652_v17 = vld [vmem:[#allocation7 + $0x34] sm:$0xf]  ;;  %v10722_v63 = vld [vmem:[#allocation7 + $0x3c] sm:$0xf0] }
0x1a6d   :  { %6860 = vmin.xlane.f32.xlu2 %v13639_v1  ;;  %v10725_v3 = vor.u32 %v11652_v17, %v10722_v63  ;;  %v11670_v17 = vld [vmem:[#allocation10] sm:$0xff] }
0x1a6e   :  { %v6851_v59 = vpop.xlane.xlu1 %6850  ;;  %7070 = vmatpush.bf16.msrb.mxu3 %v10623_v47  ;;  %7057 = vmatpush.bf16.msrb.mxu2 %v10607_v31  ;;  %v10741_v47 = vor.u32 %v11657_v35, %v10740_v51  ;;  %v10710_v31 = vld [vmem:[#allocation7 + $0x24] sm:$0xf0] }
0x1a6f   :  { %vm6853_vm2 = vcmp.eq.f32.partialorder %v6800_v56, %v6851_v59  ;;  %v10651_v56 = vor.u32 %v11636_v43, %v10650_v53  ;;  %v11624_v53 = vld [vmem:[#allocation5 + $0x10] sm:$0xf0]  ;;  %v11658_v43 = vld [vmem:[#allocation7 + $0x64] sm:$0xf]  ;;  %v11016_v63 = vld [vmem:[#allocation7 + $0xa8] sm:$0xf] }
0x1a70   :  { %v13643_v38 = vsel %vm6853_vm2, %v12222_v10, 128  ;;  %v10603_v42 = vor.u32 %v11624_v53, %v10602_v57 }
0x1a71   :  { %v6871_v33 = vshra.s32 %v13643_v38, 16  ;;  %7082 = vmatpush.bf16.msra.mxu0 %v10651_v56  ;;  %v6870_v7 = vand.u32 65535, %v13643_v38  ;;  %v10785_v38 = vor.u32 %v11667_v8, %v10782_v41  ;;  %v10749_v56 = vor.u32 %v11658_v43, %v10746_v28  ;;  %v10704_v8 = vld [vmem:[#allocation7 + $0x8] sm:$0xf]  ;;  %v11648_v41 = vld [vmem:[#allocation7 + $0x10] sm:$0xf0] }
0x1a72   :  { %7071 = vmatpush.bf16.msrb.mxu3 %v10611_v54  ;;  %7058 = vmatpush.bf16.msrb.mxu2 %v10595_v13  ;;  %v11651_v54 = vld [vmem:[#allocation7 + $0x28] sm:$0xf0]  ;;  %v10705_v21 = vor.u32 %v11648_v41, %v10704_v8  ;;  %v11672_v28 = vld [vmem:[#allocation10 + $0x10] sm:$0xff] }
0x1a73   :  { %v13646_v55 = vcvt.s32.f32 %v6871_v33  ;;  %v6858_v33 = vcvt.s32.f32 %v6856_v61  ;;  %v6872_v22 = vcvt.s32.f32 %v6870_v7  ;;  %v10753_v61 = vor.u32 %v11660_v62, %v10752_v27  ;;  %v10716_v7 = vld [vmem:[#allocation7 + $0x20] sm:$0xf] }
0x1a74   :  { %v10717_v19 = vor.u32 %v11651_v54, %v10716_v7  ;;  %v11721_v7 = vld [vmem:[#allocation7 + $0x98] sm:$0xf0] }
0x1a75   :  { %6874 = vmin.xlane.f32.xlu0 %v13646_v55  ;;  %7083 = vmatpush.bf16.msra.mxu0 %v10639_v48 }
0x1a76   :  { %7275 = vmatpush.bf16.msra.mxu2 %v10785_v38 }
0x1a79   :  { %7084 = vmatpush.bf16.msra.mxu0 %v10627_v36 }
0x1a7a   :  { %7276 = vmatpush.bf16.msra.mxu2 %v10773_v2 }
0x1a7e   :  { %7277 = vmatpush.bf16.msra.mxu2 %v10761_v11 }
0x1a82   :  { %7278 = vmatpush.bf16.msra.mxu2 %v10749_v56  ;;  %v11671_v56 = vld [vmem:[#allocation10 + $0x8] sm:$0xff] }
0x1a86   :  { %7279 = vmatpush.bf16.msra.mxu2 %v10737_v34 }
0x1a8a   :  { %7280 = vmatpush.bf16.msra.mxu2 %v10725_v3 }
0x1ae0   :  { %v13650_v59 = vpop.xlane.xlu2 %6860 }
0x1ae1   :  { %vm6862_vm3 = vcmp.eq.f32.partialorder %v13639_v1, %v13650_v59  ;;  %v10599_v1 = vor.u32 %v11622_v12, %v10596_v15  ;;  %v11646_v12 = vld [vmem:[#allocation7 + $0x4] sm:$0xf]  ;;  %v10698_v15 = vld [vmem:[#allocation7 + $0xc] sm:$0xf0] }
0x1ae2   :  { %v6863_v0 = vsel %vm6862_vm3, %v6858_v33, inf  ;;  %v10728_v33 = vld [vmem:[#allocation7 + $0x38] sm:$0xf]  ;;  %v10701_v16 = vor.u32 %v11646_v12, %v10698_v15  ;;  %v11718_v12 = vld [vmem:[#allocation7 + $0x80] sm:$0xf0] }
0x1ae3   :  { %6864 = vmin.xlane.f32.xlu1 %v6863_v0  ;;  %7072 = vmatpush.bf16.msrb.mxu3 %v10599_v1  ;;  %v10729_v48 = vor.u32 %v11654_v23, %v10728_v33  ;;  %v11649_v0 = vld [vmem:[#allocation7 + $0x1c] sm:$0xf]  ;;  %v6867_v1 = vcvt.f32.s32 %v13650_v59  ;;  %v13668_v59 = vld [vmem:[#allocation8] sm:$0x7]  ;;  %v11724_v33 = vld [vmem:[#allocation7 + $0xb0] sm:$0xf0] }
0x1ae4   :  { %v10713_v4 = vor.u32 %v11649_v0, %v10710_v31  ;;  %v7127_v9 = vperm.slane %v13668_v59, 0  ;;  %v11017_v23 = vor.u32 %v11724_v33, %v11016_v63  ;;  %v11004_v31 = vld [vmem:[#allocation7 + $0x90] sm:$0xf] }
0x1ae5   :  { %v11005_v54 = vor.u32 %v11721_v7, %v11004_v31  ;;  %v10932_v31 = vld [vmem:[#allocation7] sm:$0xf]  ;;  %v11703_v7 = vld [vmem:[#allocation7 + $0x8] sm:$0xf0] }
0x1ae6   :  { %7281 = vmatpush.bf16.msra.mxu2 %v10713_v4  ;;  %v7271_v2 = vadd.f32 %v7270_v25, %v7127_v9  ;;  %v10968_v25 = vld [vmem:[#allocation7 + $0x48] sm:$0xf] }
0x1ae7   :  { %7289 = vmatpush.bf16.msra.mxu3 %v10789_v29  ;;  %v6868_v29 = vshll.u32 %v6867_v1, 16 }
0x1ae8   :  { %v13655_v50 = vpop.xlane.xlu0 %6874 }
0x1ae9   :  { %vm6876_vm4 = vcmp.eq.f32.partialorder %v13646_v55, %v13655_v50  ;;  %v10615_v55 = vor.u32 %v11627_v32, %v10614_v58  ;;  %v11675_v32 = vld [vmem:[#allocation10 + $0x28] sm:$0xff] }
0x1aea   :  { %v6877_v18 = vsel %vm6876_vm4, %v6872_v22, inf  ;;  %7282 = vmatpush.bf16.msra.mxu2 %v10701_v16  ;;  %v6881_v22 = vcvt.f32.s32 %v13655_v50  ;;  %v11677_v50 = vld [vmem:[#allocation10 + $0x38] sm:$0xff] }
0x1aeb   :  { %6878 = vmin.xlane.f32.xlu2 %v6877_v18  ;;  %7290 = vmatpush.bf16.msra.mxu3 %v10777_v40 }
0x1aec   :  { %7085 = vmatpush.bf16.msra.mxu0 %v10615_v55  ;;  %v6882_v5 = vshll.u32 %v6881_v22, 16  ;;  %v7272_v55 = vpop.f32.mrf.mxu1 }
0x1aed   :  { %v7273_v24 = vadd.f32 %v7272_v55, %v7127_v9  ;;  %v11712_v9 = vld [vmem:[#allocation7 + $0x50] sm:$0xf0] }
0x1aef   :  { %7291 = vmatpush.bf16.msra.mxu3 %v10765_v39  ;;  %v11673_v39 = vld [vmem:[#allocation10 + $0x18] sm:$0xff] }
0x1af0   :  { %7086 = vmatpush.bf16.msra.mxu0 %v10603_v42  ;;  %v7128_v42 = vperm.slane %v13668_v59, 1 }
0x1af3   :  { %7292 = vmatpush.bf16.msra.mxu3 %v10753_v61 }
0x1af4   :  { %7466 = vmatpush.bf16.msrb.mxu0 %v11677_v50 }
0x1af7   :  { %7293 = vmatpush.bf16.msra.mxu3 %v10741_v47 }
0x1af8   :  { %7467 = vmatpush.bf16.msrb.mxu0 %v11676_v37 }
0x1afb   :  { %7294 = vmatpush.bf16.msra.mxu3 %v10729_v48 }
0x1afc   :  { %7468 = vmatpush.bf16.msrb.mxu0 %v11675_v32 }
0x1aff   :  { %7295 = vmatpush.bf16.msra.mxu3 %v10717_v19  ;;  %v10992_v19 = vld [vmem:[#allocation7 + $0x78] sm:$0xf] }
0x1b00   :  { %7469 = vmatpush.bf16.msrb.mxu0 %v11674_v45  ;;  %v10993_v1 = vor.u32 %v11718_v12, %v10992_v19 }
0x1b03   :  { %7296 = vmatpush.bf16.msra.mxu3 %v10705_v21 }
0x1b04   :  { %7470 = vmatpush.bf16.msrb.mxu0 %v11673_v39 }
0x1b08   :  { %7471 = vmatpush.bf16.msrb.mxu0 %v11672_v28 }
0x1b0c   :  { %7472 = vmatpush.bf16.msrb.mxu0 %v11671_v56 }
0x1b10   :  { %7473 = vmatpush.bf16.msrb.mxu0 %v11670_v17 }
0x1b56   :  { %v6865_v13 = vpop.xlane.xlu1 %6864 }
0x1b57   :  { %v6866_v38 = vcvt.f32.s32 %v6865_v13 }
0x1b59   :  { %v6869_v30 = vadd.s32 %v6868_v29, %v6866_v38  ;;  %v10980_v38 = vld [vmem:[#allocation7 + $0x60] sm:$0xf]  ;;  %v11715_v29 = vld [vmem:[#allocation7 + $0x68] sm:$0xf0] }
0x1b5b   :  { %vm6884_vm5 = vcmp.eq.s32.totalorder %v12222_v10, %v6869_v30 }
0x1b5e   :  { %v6879_v18 = vpop.xlane.xlu2 %6878 }
0x1b5f   :  { %v6880_v46 = vcvt.f32.s32 %v6879_v18 }
0x1b61   :  { %v6883_v36 = vadd.s32 %v6882_v5, %v6880_v46 }
0x1b63   :  { %vm6885_vm6 = vcmp.eq.s32.totalorder %v12222_v10, %v6883_v36  ;;  %v10981_v36 = vor.u32 %v11715_v29, %v10980_v38 }
0x1b64   :  { %vm10688_vm7 = vmpackc.low %vm6885_vm6, %vm6884_vm5 }
0x1b65   :  { %10689 = vmatmul.msk.bf16.vlgmr.msrb.gmra.mxu2 %vm10688_vm7, %v12162_v44  ;;  %10691 = vmatmul.msk.bf16.vlgmr.msrb.gmra.mxu3 %vm10688_vm7, %v12162_v44 }
0x1b66   :  { %10693 = vmatmul.msk.bf16.vlgmr.msra.gmra.mxu0 %vm10688_vm7, %v12162_v44 }
0x1b67   :  { %7939 = vmatpush.bf16.msra.mxu0 %v11017_v23 }
0x1b6b   :  { %7940 = vmatpush.bf16.msra.mxu0 %v11005_v54 }
0x1b6f   :  { %7941 = vmatpush.bf16.msra.mxu0 %v10993_v1 }
0x1b73   :  { %7942 = vmatpush.bf16.msra.mxu0 %v10981_v36 }
0x1b75   :  { %7283 = vmatmul.bf16.vlgmr.msra.gmra.mxu2 %v13580_v26  ;;  %7297 = vmatmul.bf16.vlgmr.msra.gmra.mxu3 %v13580_v26 }
0x1be3   :  { %v7088_v45 = vpop.f32.mrf.mxu0 }
0x1be8   :  { %v7060_v40 = vpop.f32.mrf.mxu2  ;;  %v7074_v20 = vpop.f32.mrf.mxu3 }
0x1be9   :  { %v7303_v58 = vadd.f32 %v7271_v2, %v7060_v40 }
0x1beb   :  { %v10790_v14 = vmul.f32 -1.442695, %v7303_v58  ;;  %v7129_v58 = vperm.slane %v13668_v59, 2  ;;  %v7090_v54 = vpop.f32.mrf.mxu0 }
0x1bed   :  { %11959 = vpow2.f32 %v10790_v14 }
0x1bf0   :  { %v7062_v26 = vpop.f32.mrf.mxu2  ;;  %v7076_v60 = vpop.f32.mrf.mxu3 }
0x1bf1   :  { %v7304_v11 = vadd.f32 %v7273_v24, %v7062_v26 }
0x1bf3   :  { %v11960_v57 = vpop.eup %11959  ;;  %v10791_v53 = vmul.f32 -1.442695, %v7304_v11 }
0x1bf4   :  { %v13671_v43 = vadd.f32 1.0, %v11960_v57  ;;  %v10956_v57 = vld [vmem:[#allocation7 + $0x30] sm:$0xf] }
0x1bf5   :  { %11961 = vpow2.f32 %v10791_v53  ;;  %v11709_v53 = vld [vmem:[#allocation7 + $0x38] sm:$0xf0] }
0x1bf6   :  { %11963 = vrcp.f32 %v13671_v43  ;;  %v7324_v30 = vand.u32 2147483648, %v13671_v43  ;;  %vm7318_vm9 = vweird.f32 %v13671_v43  ;;  %v7322_v50 = vand.u32 2147483647, %v13671_v43 }
0x1bf8   :  { %v7284_v27 = vpop.f32.mrf.mxu2  ;;  %v7298_v16 = vpop.f32.mrf.mxu3  ;;  %v7325_v24 = vor.u32 1.1754944e-38, %v7324_v30  ;;  %vm7323_vm14 = vcmp.eq.f32.partialorder %v7322_v50, 8.507059e+37 }
0x1bf9   :  { %v7285_v62 = vadd.f32 %v7284_v27, %v7128_v42 }
0x1bfb   :  { %v11962_v61 = vpop.eup %11961  ;;  %v7343_v52 = vadd.f32 %v7285_v62, %v7074_v20  ;;  %v10969_v20 = vor.u32 %v11712_v9, %v10968_v25  ;;  %v7299_v62 = vadd.f32 %v7298_v16, %v7129_v58 }
0x1bfc   :  { %v13675_v51 = vpop.eup %11963  ;;  %v13677_v35 = vadd.f32 1.0, %v11962_v61 }
0x1bfd   :  { %v10792_v34 = vmul.f32 -1.442695, %v7343_v52  ;;  %v7314_v47 = vmul.f32 %v13675_v51, %v13671_v43  ;;  %vm7319_vm8 = vweird.f32 %v13675_v51  ;;  %7943 = vmatpush.bf16.msra.mxu0 %v10969_v20 }
0x1bfe   :  { %11965 = vrcp.f32 %v13677_v35  ;;  %vm13692_vm11 = vmor %vm7318_vm9, %vm7319_vm8  ;;  %v7339_v40 = vand.u32 2147483648, %v13677_v35  ;;  %vm7333_vm12 = vweird.f32 %v13677_v35  ;;  %v7337_v14 = vand.u32 2147483647, %v13677_v35 }
0x1bff   :  { %11967 = vpow2.f32 %v10792_v34  ;;  %v7315_v3 = vsub.f32 1.0, %v7314_v47  ;;  %v11706_v34 = vld [vmem:[#allocation7 + $0x20] sm:$0xf0] }
0x1c00   :  { %v7286_v48 = vpop.f32.mrf.mxu2  ;;  %v7300_v28 = vpop.f32.mrf.mxu3  ;;  %v7340_v27 = vor.u32 1.1754944e-38, %v7339_v40  ;;  %vm7338_vm15 = vcmp.eq.f32.partialorder %v7337_v14, 8.507059e+37 }
0x1c01   :  { %v7287_v0 = vadd.f32 %v7286_v48, %v7128_v42  ;;  %v7316_v8 = vmul.f32 %v13675_v51, %v7315_v3 }
0x1c03   :  { %v7344_v4 = vadd.f32 %v7287_v0, %v7076_v60  ;;  %v7317_v5 = vadd.f32 %v13675_v51, %v7316_v8  ;;  %v10957_v60 = vor.u32 %v11709_v53, %v10956_v57 }
0x1c04   :  { %v11966_v15 = vpop.eup %11965 }
0x1c05   :  { %v11968_v41 = vpop.eup %11967  ;;  %v10793_v21 = vmul.f32 -1.442695, %v7344_v4  ;;  %v7329_v13 = vmul.f32 %v11966_v15, %v13677_v35  ;;  %vm7334_vm10 = vweird.f32 %v11966_v15  ;;  %v7321_v32 = vsel %vm13692_vm11, %v13675_v51, %v7317_v5  ;;  %v10944_v35 = vld [vmem:[#allocation7 + $0x18] sm:$0xf]  ;;  %7944 = vmatpush.bf16.msra.mxu0 %v10957_v60 }
0x1c06   :  { %v13684_v22 = vadd.f32 1.0, %v11968_v41  ;;  %vm13703_vm13 = vmor %vm7333_vm12, %vm7334_vm10  ;;  %v7326_v42 = vsel %vm7323_vm14, %v7325_v24, %v7321_v32  ;;  %v7301_v51 = vadd.f32 %v7300_v28, %v7129_v58  ;;  %v10945_v3 = vor.u32 %v11706_v34, %v10944_v35  ;;  %v11757_v32 = vld [vmem:[%s13878_s5] ss:$0 sm:$0xff] }
0x1c07   :  { %11969 = vpow2.f32 %v10793_v21  ;;  %v7330_v18 = vsub.f32 1.0, %v7329_v13  ;;  %v7383_v52 = vmul.f32 %v7326_v42, %v7299_v62  ;;  %v10933_v41 = vor.u32 %v11703_v7, %v10932_v31  ;;  %v11696_v7 = vld [vmem:[#allocation5 + $0x94] sm:$0xf] }
0x1c08   :  { %11971 = vrcp.f32 %v13684_v22  ;;  %v7364_v17 = vand.u32 2147483648, %v13684_v22  ;;  %vm7358_vm1 = vweird.f32 %v13684_v22  ;;  %v7362_v23 = vand.u32 2147483647, %v13684_v22 }
0x1c09   :  { %v7331_v46 = vmul.f32 %v11966_v15, %v7330_v18  ;;  %v7385_v0 = vadd.f32 %v7383_v52, %v7088_v45  ;;  %7945 = vmatpush.bf16.msra.mxu0 %v10945_v3  ;;  %v10916_v3 = vld [vmem:[#allocation5 + $0xb4] sm:$0xf0] }
0x1c0a   :  { %v7365_v12 = vor.u32 1.1754944e-38, %v7364_v17  ;;  %vm7363_vm3 = vcmp.eq.f32.partialorder %v7362_v23, 8.507059e+37  ;;  %v10914_v17 = vld [vmem:[#allocation5 + $0xa8] sm:$0xf] }
0x1c0b   :  { %v7332_v2 = vadd.f32 %v11966_v15, %v7331_v46 }
0x1c0d   :  { %v11970_v55 = vpop.eup %11969  ;;  %v7336_v39 = vsel %vm13703_vm13, %v11966_v15, %v7332_v2  ;;  %7946 = vmatpush.bf16.msra.mxu0 %v10933_v41  ;;  %v10892_v41 = vld [vmem:[#allocation5 + $0x84] sm:$0xf0] }
0x1c0e   :  { %v11972_v11 = vpop.eup %11971  ;;  %v7352_v59 = vadd.f32 1.0, %v11970_v55  ;;  %v7341_v61 = vsel %vm7338_vm15, %v7340_v27, %v7336_v39 }
0x1c0f   :  { %v7354_v43 = vmul.f32 %v11972_v11, %v13684_v22  ;;  %vm7359_vm0 = vweird.f32 %v11972_v11  ;;  %v7384_v63 = vmul.f32 %v7341_v61, %v7301_v51 }
0x1c10   :  { %11973 = vrcp.f32 %v7352_v59  ;;  %vm7360_vm2 = vmor %vm7358_vm1, %vm7359_vm0  ;;  %v7379_v21 = vand.u32 2147483648, %v7352_v59  ;;  %v7377_v1 = vand.u32 2147483647, %v7352_v59  ;;  %vm7373_vm5 = vweird.f32 %v7352_v59 }
0x1c11   :  { %v7355_v56 = vsub.f32 1.0, %v7354_v43  ;;  %v7386_v15 = vadd.f32 %v7384_v63, %v7090_v54  ;;  %11975 = vtanh.f32 %v7385_v0  ;;  %v11700_v63 = vld [vmem:[#allocation5 + $0xb0] sm:$0xf0]  ;;  %v11697_v0 = vld [vmem:[#allocation5 + $0x98] sm:$0xf0] }
0x1c12   :  { %v7380_v29 = vor.u32 1.1754944e-38, %v7379_v21  ;;  %vm7378_vm7 = vcmp.eq.f32.partialorder %v7377_v1, 8.507059e+37  ;;  %v10915_v23 = vor.u32 %v11700_v63, %v10914_v17  ;;  %v10904_v54 = vld [vmem:[#allocation5 + $0x9c] sm:$0xf0]  ;;  %v11701_v21 = vld [vmem:[#allocation5 + $0xb8] sm:$0xf0] }
0x1c13   :  { %v7356_v47 = vmul.f32 %v11972_v11, %v7355_v56  ;;  %11977 = vtanh.f32 %v7386_v15  ;;  %v11694_v15 = vld [vmem:[#allocation5 + $0x80] sm:$0xf0]  ;;  %v11681_v17 = vld [vmem:[#allocation5 + $0x1c] sm:$0xf]  ;;  %v10844_v63 = vld [vmem:[#allocation5 + $0x24] sm:$0xf0] }
0x1c14   :  { %7729 = vmatpush.bf16.msrb.mxu1 %v10915_v23 }
0x1c15   :  { %v7357_v33 = vadd.f32 %v11972_v11, %v7356_v47 }
0x1c16   :  { %v11974_v48 = vpop.eup %11973 }
0x1c17   :  { %v7361_v4 = vsel %vm7360_vm2, %v11972_v11, %v7357_v33  ;;  %v7369_v19 = vmul.f32 %v11974_v48, %v7352_v59  ;;  %vm7374_vm4 = vweird.f32 %v11974_v48  ;;  %v11976_v5 = vpop.eup %11975  ;;  %v11699_v33 = vld [vmem:[#allocation5 + $0xac] sm:$0xf] }
0x1c18   :  { %v7366_v16 = vsel %vm7363_vm3, %v7365_v12, %v7361_v4  ;;  %vm7375_vm6 = vmor %vm7373_vm5, %vm7374_vm4  ;;  %v10919_v31 = vor.u32 %v11699_v33, %v10916_v3  ;;  %v10890_v12 = vld [vmem:[#allocation5 + $0x78] sm:$0xf] }
0x1c19   :  { %v7370_v8 = vsub.f32 1.0, %v7369_v19  ;;  %v7389_v22 = vsub.f32 1.0, %v7366_v16  ;;  %v11978_v50 = vpop.eup %11977  ;;  %v7393_v9 = vmul.f32 %v7366_v16, %v13574_v6  ;;  %v10907_v19 = vor.u32 %v11696_v7, %v10904_v54  ;;  %v10922_v16 = vld [vmem:[#allocation5 + $0xb0] sm:$0xf]  ;;  %v11678_v7 = vld [vmem:[#allocation5 + $0x4] sm:$0xf] }
0x1c1a   :  { %7743 = vmatpush.bf16.msrb.mxu2 %v10919_v31  ;;  %v10891_v1 = vor.u32 %v11694_v15, %v10890_v12  ;;  %v11679_v31 = vld [vmem:[#allocation5 + $0x8] sm:$0xf0]  ;;  %v10832_v54 = vld [vmem:[#allocation5 + $0xc] sm:$0xf0]  ;;  %v11725_v15 = vld [vmem:[#allocation7 + $0xb8] sm:$0xf0] }
0x1c1b   :  { %v7371_v13 = vmul.f32 %v11974_v48, %v7370_v8  ;;  %v7391_v46 = vmul.f32 %v11976_v5, %v7389_v22  ;;  %v11693_v8 = vld [vmem:[#allocation5 + $0x7c] sm:$0xf]  ;;  %v10910_v22 = vld [vmem:[#allocation5 + $0x98] sm:$0xf]  ;;  %v11691_v5 = vld [vmem:[#allocation5 + $0x68] sm:$0xf0] }
0x1c1c   :  { %v11024_v12 = vld [vmem:[#allocation7 + $0xb0] sm:$0xf] }
0x1c1d   :  { %v7372_v38 = vadd.f32 %v11974_v48, %v7371_v13  ;;  %v13715_v2 = vadd.f32 %v7393_v9, %v7391_v46  ;;  %v10923_v13 = vor.u32 %v11701_v21, %v10922_v16  ;;  %v11025_v21 = vor.u32 %v11725_v15, %v11024_v12 }
0x1c1e   :  { %7744 = vmatpush.bf16.msrb.mxu2 %v10907_v19  ;;  %v11018_v19 = vld [vmem:[#allocation7 + $0xb4] sm:$0xf0] }
0x1c1f   :  { %v7376_v18 = vsel %vm7375_vm6, %v11974_v48, %v7372_v38  ;;  %v10902_v48 = vld [vmem:[#allocation5 + $0x90] sm:$0xf]  ;;  %v11698_v38 = vld [vmem:[#allocation5 + $0xa0] sm:$0xf0]  ;;  %7757 = vmatpush.bf16.msrb.mxu3 %v10923_v13 }
0x1c20   :  { %v7381_v30 = vsel %vm7378_vm7, %v7380_v29, %v7376_v18  ;;  %v10903_v4 = vor.u32 %v11697_v0, %v10902_v48  ;;  %v10895_v29 = vor.u32 %v11693_v8, %v10892_v41  ;;  %v10878_v18 = vld [vmem:[#allocation5 + $0x60] sm:$0xf]  ;;  %v10911_v46 = vor.u32 %v11698_v38, %v10910_v22  ;;  %v11686_v22 = vld [vmem:[#allocation5 + $0x40] sm:$0xf0]  ;;  %v11720_v38 = vld [vmem:[#allocation7 + $0x94] sm:$0xf] }
0x1c21   :  { %v7390_v36 = vsub.f32 1.0, %v7381_v30  ;;  %v7394_v37 = vmul.f32 %v7381_v30, %v13576_v49  ;;  %v11690_v30 = vld [vmem:[#allocation5 + $0x64] sm:$0xf]  ;;  %v10879_v9 = vor.u32 %v11691_v5, %v10878_v18  ;;  %v10847_v48 = vor.u32 %v11681_v17, %v10844_v63  ;;  %v10830_v0 = vld [vmem:[#allocation5] sm:$0xf] }
0x1c22   :  { %7730 = vmatpush.bf16.msrb.mxu1 %v10903_v4  ;;  %7745 = vmatpush.bf16.msrb.mxu2 %v10895_v29  ;;  %v11723_v4 = vld [vmem:[#allocation7 + $0xac] sm:$0xf]  ;;  %v10831_v8 = vor.u32 %v11679_v31, %v10830_v0  ;;  %v11006_v18 = vld [vmem:[#allocation7 + $0x9c] sm:$0xf0]  ;;  %v11012_v5 = vld [vmem:[#allocation7 + $0x98] sm:$0xf] }
0x1c23   :  { %v7392_v25 = vmul.f32 %v11978_v50, %v7390_v36  ;;  %v10880_v36 = vld [vmem:[#allocation5 + $0x6c] sm:$0xf0]  ;;  %v10898_v50 = vld [vmem:[#allocation5 + $0x80] sm:$0xf]  ;;  %7758 = vmatpush.bf16.msrb.mxu3 %v10911_v46  ;;  %v11009_v46 = vor.u32 %v11720_v38, %v11006_v18  ;;  %v11710_v17 = vld [vmem:[#allocation7 + $0x40] sm:$0xf0] }
0x1c25   :  { %v13717_v40 = vadd.f32 %v7394_v37, %v7392_v25  ;;  %v11695_v25 = vld [vmem:[#allocation5 + $0x88] sm:$0xf0]  ;;  %v10883_v37 = vor.u32 %v11690_v30, %v10880_v36  ;;  %v11722_v30 = vld [vmem:[#allocation7 + $0xa0] sm:$0xf0] }
0x1c26   :  { %7731 = vmatpush.bf16.msrb.mxu1 %v10891_v1  ;;  %v10862_v1 = vld [vmem:[#allocation5 + $0x38] sm:$0xf]  ;;  %v11013_v36 = vor.u32 %v11722_v30, %v11012_v5 }
0x1c27   :  { %v13721_v58 = vpack.c.bf16 %v13717_v40, %v13715_v2  ;;  %7746 = vmatpush.bf16.msrb.mxu2 %v10883_v37  ;;  %v10863_v29 = vor.u32 %v11686_v22, %v10862_v1  ;;  %v10994_v37 = vld [vmem:[#allocation7 + $0x84] sm:$0xf0] }
0x1c29   :  { %7474 = vmatmul.bf16.vlgmr.msrb.gmra.mxu0 %v13721_v58 }
0x1c2a   :  { %7732 = vmatpush.bf16.msrb.mxu1 %v10879_v9  ;;  %v11717_v9 = vld [vmem:[#allocation7 + $0x7c] sm:$0xf] }
0x1c39   :  { %7947 = vmatmul.bf16.vlgmr.msra.gmra.mxu0 %v13721_v58 }
0x1ca6   :  { %v7475_v14 = vpop.f32.mrf.mxu0 }
0x1ca7   :  { %v7476_v6 = vadd.f32 %v11757_v32, %v7475_v14  ;;  %v11688_v14 = vld [vmem:[#allocation5 + $0x50] sm:$0xf0] }
0x1ca9   :  { %v7482_v55 = vrot.slane %v7476_v6, 1  ;;  %v7483_v49 = vrot.slane %v7476_v6, 2  ;;  %v7484_v45 = vrot.slane %v7476_v6, 3  ;;  %7510 = vst [vmem:[%s13879_s6 + $0xa] sm:$0x1] %v7476_v6  ;;  %7526 = vmax.xlane.f32.xlu0 %v7476_v6  ;;  %v7485_v24 = vrot.slane %v7476_v6, 4 }
0x1caa   :  { %v7486_v26 = vrot.slane %v7476_v6, 5  ;;  %v7487_v20 = vrot.slane %v7476_v6, 6  ;;  %v7488_v11 = vrot.slane %v7476_v6, 7 }
0x1cab   :  { %7511 = vst [vmem:[%s13879_s6 + $0x1a] sm:$0x1] %v7482_v55  ;;  %v10899_v55 = vor.u32 %v11695_v25, %v10898_v50  ;;  %v10850_v50 = vld [vmem:[#allocation5 + $0x20] sm:$0xf]  ;;  %v11683_v25 = vld [vmem:[#allocation5 + $0x28] sm:$0xf0] }
0x1cac   :  { %7512 = vst [vmem:[%s13879_s6 + $0x2a] sm:$0x1] %v7483_v49  ;;  %v10868_v49 = vld [vmem:[#allocation5 + $0x54] sm:$0xf0] }
0x1cad   :  { %7513 = vst [vmem:[%s13879_s6 + $0x3a] sm:$0x1] %v7484_v45  ;;  %v10886_v45 = vld [vmem:[#allocation5 + $0x68] sm:$0xf]  ;;  %7759 = vmatpush.bf16.msrb.mxu3 %v10899_v55 }
0x1cae   :  { %7514 = vst [vmem:[%s13879_s6 + $0x4a] sm:$0x1] %v7485_v24  ;;  %v7477_v59 = vpop.f32.mrf.mxu0  ;;  %v11692_v24 = vld [vmem:[#allocation5 + $0x70] sm:$0xf0] }
0x1caf   :  { %7515 = vst [vmem:[%s13879_s6 + $0x5a] sm:$0x1] %v7486_v26  ;;  %v7478_v39 = vadd.f32 %v11757_v32, %v7477_v59  ;;  %v10866_v32 = vld [vmem:[#allocation5 + $0x48] sm:$0xf]  ;;  %v11685_v59 = vld [vmem:[#allocation5 + $0x38] sm:$0xf0] }
0x1cb0   :  { %7516 = vst [vmem:[%s13879_s6 + $0x6a] sm:$0x1] %v7487_v20  ;;  %v10867_v26 = vor.u32 %v11688_v14, %v10866_v32  ;;  %v11000_v32 = vld [vmem:[#allocation7 + $0x80] sm:$0xf]  ;;  %v11719_v14 = vld [vmem:[#allocation7 + $0x88] sm:$0xf0] }
0x1cb1   :  { %7517 = vst [vmem:[%s13879_s6 + $0x7a] sm:$0x1] %v7488_v11  ;;  %v7489_v57 = vrot.slane %v7478_v39, 1  ;;  %v7490_v53 = vrot.slane %v7478_v39, 2  ;;  %v7491_v43 = vrot.slane %v7478_v39, 3  ;;  %7528 = vmax.xlane.f32.xlu1 %v7478_v39  ;;  %v7492_v42 = vrot.slane %v7478_v39, 4 }
0x1cb2   :  { %7518 = vst [vmem:[%s13879_s6 + $0x8a] sm:$0x1] %v7478_v39  ;;  %v7493_v28 = vrot.slane %v7478_v39, 5  ;;  %v7494_v27 = vrot.slane %v7478_v39, 6  ;;  %v7495_v62 = vrot.slane %v7478_v39, 7  ;;  %7733 = vmatpush.bf16.msrb.mxu1 %v10867_v26  ;;  %v11001_v55 = vor.u32 %v11719_v14, %v11000_v32 }
0x1cb3   :  { %7519 = vst [vmem:[%s13879_s6 + $0x9a] sm:$0x1] %v7489_v57  ;;  %v10854_v11 = vld [vmem:[#allocation5 + $0x30] sm:$0xf] }
0x1cb4   :  { %7520 = vst [vmem:[%s13879_s6 + $0xaa] sm:$0x1] %v7490_v53  ;;  %v11684_v53 = vld [vmem:[#allocation5 + $0x34] sm:$0xf] }
0x1cb5   :  { %7521 = vst [vmem:[%s13879_s6 + $0xba] sm:$0x1] %v7491_v43  ;;  %v10856_v43 = vld [vmem:[#allocation5 + $0x3c] sm:$0xf0] }
0x1cb6   :  { %7522 = vst [vmem:[%s13879_s6 + $0xca] sm:$0x1] %v7492_v42  ;;  %v10874_v42 = vld [vmem:[#allocation5 + $0x50] sm:$0xf] }
0x1cb7   :  { %7523 = vst [vmem:[%s13879_s6 + $0xda] sm:$0x1] %v7493_v28  ;;  %v11689_v28 = vld [vmem:[#allocation5 + $0x58] sm:$0xf0] }
0x1cb8   :  { %7524 = vst [vmem:[%s13879_s6 + $0xea] sm:$0x1] %v7494_v27  ;;  %v10855_v27 = vor.u32 %v11685_v59, %v10854_v11  ;;  %v10875_v33 = vor.u32 %v11689_v28, %v10874_v42  ;;  %v10988_v11 = vld [vmem:[#allocation7 + $0x68] sm:$0xf]  ;;  %v11716_v59 = vld [vmem:[#allocation7 + $0x70] sm:$0xf0] }
0x1cb9   :  { %7525 = vst [vmem:[%s13879_s6 + $0xfa] sm:$0x1] %v7495_v62  ;;  %v10859_v62 = vor.u32 %v11684_v53, %v10856_v43  ;;  %v11711_v53 = vld [vmem:[#allocation7 + $0x4c] sm:$0xf]  ;;  %v10970_v43 = vld [vmem:[#allocation7 + $0x54] sm:$0xf0] }
0x1cba   :  { %7734 = vmatpush.bf16.msrb.mxu1 %v10855_v27  ;;  %v10976_v42 = vld [vmem:[#allocation7 + $0x50] sm:$0xf]  ;;  %v11713_v28 = vld [vmem:[#allocation7 + $0x58] sm:$0xf0]  ;;  %v10973_v27 = vor.u32 %v11711_v53, %v10970_v43 }
0x1cbb   :  { %v11729_v43 = vld [vmem:[#allocation10 + $0x18] sm:$0xff] }
0x1d1c   :  { %v7527_v56 = vpop.xlane.xlu0 %7526 }
0x1d1d   :  { %vm7530_vm8 = vcmp.eq.f32.partialorder %v7476_v6, %v7527_v56  ;;  %v11687_v6 = vld [vmem:[#allocation5 + $0x4c] sm:$0xf]  ;;  %v10842_v56 = vld [vmem:[#allocation5 + $0x18] sm:$0xf] }
0x1d1e   :  { %v13777_v61 = vsel %vm7530_vm8, %v12222_v10, 128  ;;  %v10871_v20 = vor.u32 %v11687_v6, %v10868_v49  ;;  %v10997_v6 = vor.u32 %v11717_v9, %v10994_v37  ;;  %v10838_v49 = vld [vmem:[#allocation5 + $0x8] sm:$0xf]  ;;  %v11732_v37 = vld [vmem:[#allocation10 + $0x30] sm:$0xff] }
0x1d1f   :  { %v7535_v60 = vshra.s32 %v13777_v61, 16  ;;  %v7534_v57 = vand.u32 65535, %v13777_v61 }
0x1d20   :  { %7747 = vmatpush.bf16.msrb.mxu2 %v10871_v20  ;;  %v10982_v20 = vld [vmem:[#allocation7 + $0x6c] sm:$0xf0] }
0x1d21   :  { %v13780_v52 = vcvt.s32.f32 %v7535_v60  ;;  %v11682_v60 = vld [vmem:[#allocation5 + $0x20] sm:$0xf0] }
0x1d22   :  { %v10843_v23 = vor.u32 %v11682_v60, %v10842_v56  ;;  %v11708_v56 = vld [vmem:[#allocation7 + $0x34] sm:$0xf]  ;;  %v10958_v60 = vld [vmem:[#allocation7 + $0x3c] sm:$0xf0] }
0x1d23   :  { %7538 = vmin.xlane.f32.xlu2 %v13780_v52  ;;  %v10961_v63 = vor.u32 %v11708_v56, %v10958_v60  ;;  %v11728_v56 = vld [vmem:[#allocation10 + $0x10] sm:$0xff] }
0x1d24   :  { %v7529_v51 = vpop.xlane.xlu1 %7528  ;;  %7748 = vmatpush.bf16.msrb.mxu2 %v10859_v62  ;;  %7735 = vmatpush.bf16.msrb.mxu1 %v10843_v23  ;;  %v10977_v62 = vor.u32 %v11713_v28, %v10976_v42  ;;  %v10946_v23 = vld [vmem:[#allocation7 + $0x24] sm:$0xf0] }
0x1d25   :  { %vm7531_vm9 = vcmp.eq.f32.partialorder %v7478_v39, %v7529_v51  ;;  %v10887_v39 = vor.u32 %v11692_v24, %v10886_v45  ;;  %v11680_v45 = vld [vmem:[#allocation5 + $0x10] sm:$0xf0]  ;;  %v11714_v24 = vld [vmem:[#allocation7 + $0x64] sm:$0xf] }
0x1d26   :  { %v13784_v35 = vsel %vm7531_vm9, %v12222_v10, 128  ;;  %v10839_v26 = vor.u32 %v11680_v45, %v10838_v49 }
0x1d27   :  { %v7549_v34 = vshra.s32 %v13784_v35, 16  ;;  %7760 = vmatpush.bf16.msrb.mxu3 %v10887_v39  ;;  %v7548_v3 = vand.u32 65535, %v13784_v35  ;;  %v11021_v35 = vor.u32 %v11723_v4, %v11018_v19  ;;  %v10985_v39 = vor.u32 %v11714_v24, %v10982_v20  ;;  %v10940_v4 = vld [vmem:[#allocation7 + $0x8] sm:$0xf]  ;;  %v11704_v19 = vld [vmem:[#allocation7 + $0x10] sm:$0xf0] }
0x1d28   :  { %7749 = vmatpush.bf16.msrb.mxu2 %v10847_v48  ;;  %7736 = vmatpush.bf16.msrb.mxu1 %v10831_v8  ;;  %v11707_v48 = vld [vmem:[#allocation7 + $0x28] sm:$0xf0]  ;;  %v10941_v15 = vor.u32 %v11704_v19, %v10940_v4  ;;  %v11730_v24 = vld [vmem:[#allocation10 + $0x20] sm:$0xff] }
0x1d29   :  { %v13787_v47 = vcvt.s32.f32 %v7549_v34  ;;  %v7536_v34 = vcvt.s32.f32 %v7534_v57  ;;  %v7550_v16 = vcvt.s32.f32 %v7548_v3  ;;  %v10989_v57 = vor.u32 %v11716_v59, %v10988_v11  ;;  %v10952_v3 = vld [vmem:[#allocation7 + $0x20] sm:$0xf] }
0x1d2a   :  { %v10953_v31 = vor.u32 %v11707_v48, %v10952_v3 }
0x1d2b   :  { %7552 = vmin.xlane.f32.xlu0 %v13787_v47  ;;  %7761 = vmatpush.bf16.msrb.mxu3 %v10875_v33 }
0x1d2c   :  { %7953 = vmatpush.bf16.msra.mxu1 %v11021_v35 }
0x1d2f   :  { %7762 = vmatpush.bf16.msrb.mxu3 %v10863_v29 }
0x1d30   :  { %7954 = vmatpush.bf16.msra.mxu1 %v11009_v46 }
0x1d34   :  { %7955 = vmatpush.bf16.msra.mxu1 %v10997_v6 }
0x1d38   :  { %7956 = vmatpush.bf16.msra.mxu1 %v10985_v39 }
0x1d3c   :  { %7957 = vmatpush.bf16.msra.mxu1 %v10973_v27 }
0x1d40   :  { %7958 = vmatpush.bf16.msra.mxu1 %v10961_v63 }
0x1d96   :  { %v13791_v51 = vpop.xlane.xlu2 %7538 }
0x1d97   :  { %vm7540_vm10 = vcmp.eq.f32.partialorder %v13780_v52, %v13791_v51  ;;  %v10835_v52 = vor.u32 %v11678_v7, %v10832_v54  ;;  %v11702_v7 = vld [vmem:[#allocation7 + $0x4] sm:$0xf]  ;;  %v10934_v54 = vld [vmem:[#allocation7 + $0xc] sm:$0xf0] }
0x1d98   :  { %v7541_v61 = vsel %vm7540_vm10, %v7536_v34, inf  ;;  %v10964_v34 = vld [vmem:[#allocation7 + $0x38] sm:$0xf]  ;;  %v10937_v12 = vor.u32 %v11702_v7, %v10934_v54 }
0x1d99   :  { %7542 = vmin.xlane.f32.xlu1 %v7541_v61  ;;  %7750 = vmatpush.bf16.msrb.mxu2 %v10835_v52  ;;  %v10965_v33 = vor.u32 %v11710_v17, %v10964_v34  ;;  %v11705_v61 = vld [vmem:[#allocation7 + $0x1c] sm:$0xf]  ;;  %v7545_v52 = vcvt.f32.s32 %v13791_v51  ;;  %v13809_v51 = vld [vmem:[#allocation8] sm:$0x7] }
0x1d9a   :  { %v10949_v0 = vor.u32 %v11705_v61, %v10946_v23  ;;  %v7805_v18 = vperm.slane %v13809_v51, 0  ;;  %v7806_v6 = vperm.slane %v13809_v51, 1  ;;  %v11727_v61 = vld [vmem:[#allocation10 + $0x8] sm:$0xff]  ;;  %v7807_v7 = vperm.slane %v13809_v51, 2 }
0x1d9c   :  { %7959 = vmatpush.bf16.msra.mxu1 %v10949_v0 }
0x1d9d   :  { %7967 = vmatpush.bf16.msra.mxu2 %v11025_v21  ;;  %v7546_v21 = vshll.u32 %v7545_v52, 16 }
0x1d9e   :  { %v13796_v41 = vpop.xlane.xlu0 %7552 }
0x1d9f   :  { %vm7554_vm11 = vcmp.eq.f32.partialorder %v13787_v47, %v13796_v41  ;;  %v10851_v47 = vor.u32 %v11683_v25, %v10850_v50  ;;  %v11733_v50 = vld [vmem:[#allocation10 + $0x38] sm:$0xff] }
0x1da0   :  { %v7555_v13 = vsel %vm7554_vm11, %v7550_v16, inf  ;;  %7960 = vmatpush.bf16.msra.mxu1 %v10937_v12  ;;  %v7559_v16 = vcvt.f32.s32 %v13796_v41  ;;  %v7948_v41 = vpop.f32.mrf.mxu0  ;;  %v11726_v12 = vld [vmem:[#allocation10] sm:$0xff] }
0x1da1   :  { %7556 = vmin.xlane.f32.xlu2 %v7555_v13  ;;  %7968 = vmatpush.bf16.msra.mxu2 %v11013_v36  ;;  %v7949_v5 = vadd.f32 %v7948_v41, %v7805_v18 }
0x1da2   :  { %7763 = vmatpush.bf16.msrb.mxu3 %v10851_v47  ;;  %v7560_v1 = vshll.u32 %v7559_v16, 16 }
0x1da5   :  { %7969 = vmatpush.bf16.msra.mxu2 %v11001_v55  ;;  %v11731_v55 = vld [vmem:[#allocation10 + $0x28] sm:$0xff] }
0x1da6   :  { %7764 = vmatpush.bf16.msrb.mxu3 %v10839_v26 }
0x1da8   :  { %v7950_v36 = vpop.f32.mrf.mxu0 }
0x1da9   :  { %7970 = vmatpush.bf16.msra.mxu2 %v10989_v57  ;;  %v7951_v25 = vadd.f32 %v7950_v36, %v7805_v18 }
0x1daa   :  { %8144 = vmatpush.bf16.msra.mxu3 %v11733_v50 }
0x1dad   :  { %7971 = vmatpush.bf16.msra.mxu2 %v10977_v62 }
0x1dae   :  { %8145 = vmatpush.bf16.msra.mxu3 %v11732_v37 }
0x1db1   :  { %7972 = vmatpush.bf16.msra.mxu2 %v10965_v33 }
0x1db2   :  { %8146 = vmatpush.bf16.msra.mxu3 %v11731_v55 }
0x1db5   :  { %7973 = vmatpush.bf16.msra.mxu2 %v10953_v31 }
0x1db6   :  { %8147 = vmatpush.bf16.msra.mxu3 %v11730_v24 }
0x1db9   :  { %7974 = vmatpush.bf16.msra.mxu2 %v10941_v15 }
0x1dba   :  { %8148 = vmatpush.bf16.msra.mxu3 %v11729_v43 }
0x1dbe   :  { %8149 = vmatpush.bf16.msra.mxu3 %v11728_v56 }
0x1dc2   :  { %8150 = vmatpush.bf16.msra.mxu3 %v11727_v61 }
0x1dc6   :  { %8151 = vmatpush.bf16.msra.mxu3 %v11726_v12 }
0x1e0c   :  { %v7543_v8 = vpop.xlane.xlu1 %7542 }
0x1e0d   :  { %v7544_v35 = vcvt.f32.s32 %v7543_v8 }
0x1e0f   :  { %v7547_v22 = vadd.s32 %v7546_v21, %v7544_v35 }
0x1e11   :  { %vm7562_vm12 = vcmp.eq.s32.totalorder %v12222_v10, %v7547_v22 }
0x1e14   :  { %v7557_v13 = vpop.xlane.xlu2 %7556 }
0x1e15   :  { %v7558_v38 = vcvt.f32.s32 %v7557_v13 }
0x1e17   :  { %v7561_v29 = vadd.s32 %v7560_v1, %v7558_v38 }
0x1e19   :  { %vm7563_vm13 = vcmp.eq.s32.totalorder %v12222_v10, %v7561_v29 }
0x1e1a   :  { %vm10924_vm14 = vmpackc.low %vm7563_vm13, %vm7562_vm12 }
0x1e1b   :  { %10925 = vmatmul.msk.bf16.vlgmr.msrb.gmra.mxu1 %vm10924_vm14, %v12162_v44  ;;  %10927 = vmatmul.msk.bf16.vlgmr.msrb.gmra.mxu2 %vm10924_vm14, %v12162_v44 }
0x1e1c   :  { %10929 = vmatmul.msk.bf16.vlgmr.msrb.gmra.mxu3 %vm10924_vm14, %v12162_v44 }
0x1e2b   :  { %7961 = vmatmul.bf16.vlgmr.msra.gmra.mxu1 %v13721_v58  ;;  %7975 = vmatmul.bf16.vlgmr.msra.gmra.mxu2 %v13721_v58 }
0x1e98   :  { %v7738_v30 = vpop.f32.mrf.mxu1 }
0x1e99   :  { %v7981_v46 = vadd.f32 %v7949_v5, %v7738_v30 }
0x1e9b   :  { %v11026_v10 = vmul.f32 -1.442695, %v7981_v46 }
0x1e9d   :  { %11979 = vpow2.f32 %v11026_v10 }
0x1e9e   :  { %v7752_v44 = vpop.f32.mrf.mxu2 }
0x1e9f   :  { %v7766_v22 = vpop.f32.mrf.mxu3 }
0x1ea0   :  { %v7740_v9 = vpop.f32.mrf.mxu1 }
0x1ea1   :  { %v7982_v47 = vadd.f32 %v7951_v25, %v7740_v9 }
0x1ea3   :  { %v11980_v32 = vpop.eup %11979  ;;  %v11027_v58 = vmul.f32 -1.442695, %v7982_v47 }
0x1ea4   :  { %v7989_v14 = vadd.f32 1.0, %v11980_v32 }
0x1ea5   :  { %11981 = vpow2.f32 %v11027_v58 }
0x1ea6   :  { %11983 = vrcp.f32 %v7989_v14  ;;  %v7754_v20 = vpop.f32.mrf.mxu2  ;;  %v8002_v34 = vand.u32 2147483648, %v7989_v14  ;;  %vm7996_vm0 = vweird.f32 %v7989_v14  ;;  %v8000_v33 = vand.u32 2147483647, %v7989_v14 }
0x1ea7   :  { %v7768_v58 = vpop.f32.mrf.mxu3 }
0x1ea8   :  { %v7962_v49 = vpop.f32.mrf.mxu1  ;;  %v8003_v4 = vor.u32 1.1754944e-38, %v8002_v34  ;;  %vm8001_vm2 = vcmp.eq.f32.partialorder %v8000_v33, 8.507059e+37 }
0x1ea9   :  { %v7963_v45 = vadd.f32 %v7962_v49, %v7806_v6 }
0x1eab   :  { %v11982_v26 = vpop.eup %11981  ;;  %v8021_v11 = vadd.f32 %v7963_v45, %v7752_v44 }
0x1eac   :  { %v11984_v59 = vpop.eup %11983  ;;  %v7990_v39 = vadd.f32 1.0, %v11982_v26 }
0x1ead   :  { %v11028_v57 = vmul.f32 -1.442695, %v8021_v11  ;;  %v7992_v53 = vmul.f32 %v11984_v59, %v7989_v14  ;;  %vm7997_vm15 = vweird.f32 %v11984_v59 }
0x1eae   :  { %11985 = vrcp.f32 %v7990_v39  ;;  %v7976_v3 = vpop.f32.mrf.mxu2  ;;  %vm7998_vm1 = vmor %vm7996_vm0, %vm7997_vm15  ;;  %v8017_v35 = vand.u32 2147483648, %v7990_v39  ;;  %vm8011_vm4 = vweird.f32 %v7990_v39  ;;  %v8015_v13 = vand.u32 2147483647, %v7990_v39 }
0x1eaf   :  { %11987 = vpow2.f32 %v11028_v57  ;;  %v7993_v42 = vsub.f32 1.0, %v7992_v53  ;;  %v7977_v52 = vadd.f32 %v7976_v3, %v7807_v7 }
0x1eb0   :  { %v7964_v28 = vpop.f32.mrf.mxu1  ;;  %v8018_v5 = vor.u32 1.1754944e-38, %v8017_v35  ;;  %vm8016_vm6 = vcmp.eq.f32.partialorder %v8015_v13, 8.507059e+37 }
0x1eb1   :  { %v7994_v27 = vmul.f32 %v11984_v59, %v7993_v42  ;;  %v7965_v62 = vadd.f32 %v7964_v28, %v7806_v6 }
0x1eb3   :  { %v7995_v60 = vadd.f32 %v11984_v59, %v7994_v27  ;;  %v8022_v17 = vadd.f32 %v7965_v62, %v7754_v20 }
0x1eb4   :  { %v11986_v63 = vpop.eup %11985 }
0x1eb5   :  { %v11988_v23 = vpop.eup %11987  ;;  %v11029_v48 = vmul.f32 -1.442695, %v8022_v17  ;;  %v8007_v0 = vmul.f32 %v11986_v63, %v7990_v39  ;;  %v7999_v54 = vsel %vm7998_vm1, %v11984_v59, %v7995_v60  ;;  %vm8012_vm3 = vweird.f32 %v11986_v63 }
0x1eb6   :  { %v8029_v31 = vadd.f32 1.0, %v11988_v23  ;;  %v8004_v15 = vsel %vm8001_vm2, %v8003_v4, %v7999_v54  ;;  %vm8013_vm5 = vmor %vm8011_vm4, %vm8012_vm3  ;;  %v7978_v18 = vpop.f32.mrf.mxu2 }
0x1eb7   :  { %11989 = vpow2.f32 %v11029_v48  ;;  %v8008_v19 = vsub.f32 1.0, %v8007_v0  ;;  %v8061_v21 = vmul.f32 %v8004_v15, %v7977_v52  ;;  %v7979_v50 = vadd.f32 %v7978_v18, %v7807_v7 }
0x1eb8   :  { %11991 = vrcp.f32 %v8029_v31  ;;  %v8042_v36 = vand.u32 2147483648, %v8029_v31  ;;  %v8040_v9 = vand.u32 2147483647, %v8029_v31  ;;  %vm8036_vm8 = vweird.f32 %v8029_v31 }
0x1eb9   :  { %v8009_v8 = vmul.f32 %v11986_v63, %v8008_v19  ;;  %v8063_v30 = vadd.f32 %v8061_v21, %v7766_v22 }
0x1eba   :  { %v8043_v32 = vor.u32 1.1754944e-38, %v8042_v36  ;;  %vm8041_vm10 = vcmp.eq.f32.partialorder %v8040_v9, 8.507059e+37 }
0x1ebb   :  { %v8010_v16 = vadd.f32 %v11986_v63, %v8009_v8 }
0x1ebd   :  { %v11990_v1 = vpop.eup %11989  ;;  %v8014_v51 = vsel %vm8013_vm5, %v11986_v63, %v8010_v16 }
0x1ebe   :  { %v11992_v38 = vpop.eup %11991  ;;  %v8030_v29 = vadd.f32 1.0, %v11990_v1  ;;  %v8019_v10 = vsel %vm8016_vm6, %v8018_v5, %v8014_v51 }
0x1ebf   :  { %v8032_v41 = vmul.f32 %v11992_v38, %v8029_v31  ;;  %vm8037_vm7 = vweird.f32 %v11992_v38  ;;  %v8062_v44 = vmul.f32 %v8019_v10, %v7979_v50 }
0x1ec0   :  { %11993 = vrcp.f32 %v8030_v29  ;;  %vm8038_vm9 = vmor %vm8036_vm8, %vm8037_vm7  ;;  %v8057_v20 = vand.u32 2147483648, %v8030_v29  ;;  %v8055_v11 = vand.u32 2147483647, %v8030_v29  ;;  %vm8051_vm12 = vweird.f32 %v8030_v29 }
0x1ec1   :  { %v8033_v46 = vsub.f32 1.0, %v8032_v41  ;;  %11995 = vtanh.f32 %v8063_v30  ;;  %v8064_v49 = vadd.f32 %v8062_v44, %v7768_v58 }
0x1ec2   :  { %v8058_v42 = vor.u32 1.1754944e-38, %v8057_v20  ;;  %vm8056_vm14 = vcmp.eq.f32.partialorder %v8055_v11, 8.507059e+37 }
0x1ec3   :  { %v8034_v25 = vmul.f32 %v11992_v38, %v8033_v46  ;;  %11997 = vtanh.f32 %v8064_v49 }
0x1ec5   :  { %v8035_v47 = vadd.f32 %v11992_v38, %v8034_v25 }
0x1ec6   :  { %v11994_v37 = vpop.eup %11993 }
0x1ec7   :  { %v8039_v14 = vsel %vm8038_vm9, %v11992_v38, %v8035_v47  ;;  %v8047_v6 = vmul.f32 %v11994_v37, %v8030_v29  ;;  %v11996_v26 = vpop.eup %11995  ;;  %vm8052_vm11 = vweird.f32 %v11994_v37 }
0x1ec8   :  { %v8044_v55 = vsel %vm8041_vm10, %v8043_v32, %v8039_v14  ;;  %vm8053_vm13 = vmor %vm8051_vm12, %vm8052_vm11 }
0x1ec9   :  { %v8067_v45 = vsub.f32 1.0, %v8044_v55  ;;  %v8048_v24 = vsub.f32 1.0, %v8047_v6  ;;  %v8071_v57 = vmul.f32 %v8044_v55, %v13715_v2  ;;  %v11998_v56 = vpop.eup %11997  ;;  %v11758_v2 = vld [vmem:[%s13878_s5] ss:$0 sm:$0xff] }
0x1ecb   :  { %v8069_v59 = vmul.f32 %v11996_v26, %v8067_v45  ;;  %v8049_v39 = vmul.f32 %v11994_v37, %v8048_v24 }
0x1ecd   :  { %v8050_v53 = vadd.f32 %v11994_v37, %v8049_v39  ;;  %v8073_v43 = vadd.f32 %v8071_v57, %v8069_v59 }
0x1ecf   :  { %v8054_v28 = vsel %vm8053_vm13, %v11994_v37, %v8050_v53  ;;  %8204 = vst [vmem:[#allocation11] sm:$0xff] %v8073_v43 }
0x1ed0   :  { %v8059_v27 = vsel %vm8056_vm14, %v8058_v42, %v8054_v28 }
0x1ed1   :  { %v8068_v62 = vsub.f32 1.0, %v8059_v27  ;;  %v8072_v34 = vmul.f32 %v8059_v27, %v13717_v40 }
0x1ed3   :  { %v8070_v60 = vmul.f32 %v11998_v56, %v8068_v62 }
0x1ed5   :  { %v8074_v17 = vadd.f32 %v8072_v34, %v8070_v60 }
0x1ed7   :  { %v8075_v63 = vpack.c.bf16 %v8074_v17, %v8073_v43  ;;  %8205 = vst [vmem:[#allocation11 + $0x8] sm:$0xff] %v8074_v17 }
0x1ed8   :  { %8220 = dma.vmem_to_hbm [thread:$0]  %s8213_s15, 256, %s8215_s17, [#allocation4], %s12156_s19, %s12156_s19, %s12157_s20  }
0x1ed9   :  { %8152 = vmatmul.bf16.vlgmr.msra.gmra.mxu3 %v8075_v63 }
0x1f5c   :  { %v8153_v40 = vpop.f32.mrf.mxu3 }
0x1f5d   :  { %v8154_v33 = vadd.f32 %v11758_v2, %v8153_v40 }
0x1f5f   :  { %v8160_v61 = vrot.slane %v8154_v33, 1  ;;  %v8161_v23 = vrot.slane %v8154_v33, 2  ;;  %v8162_v3 = vrot.slane %v8154_v33, 3  ;;  %8188 = vst [vmem:[%s13879_s6 + $0xb] sm:$0x1] %v8154_v33  ;;  %v8163_v48 = vrot.slane %v8154_v33, 4 }
0x1f60   :  { %v8164_v0 = vrot.slane %v8154_v33, 5  ;;  %v8165_v31 = vrot.slane %v8154_v33, 6  ;;  %v8166_v7 = vrot.slane %v8154_v33, 7 }
0x1f61   :  { %8189 = vst [vmem:[%s13879_s6 + $0x1b] sm:$0x1] %v8160_v61 }
0x1f62   :  { %8190 = vst [vmem:[%s13879_s6 + $0x2b] sm:$0x1] %v8161_v23 }
0x1f63   :  { %8191 = vst [vmem:[%s13879_s6 + $0x3b] sm:$0x1] %v8162_v3 }
0x1f64   :  { %8192 = vst [vmem:[%s13879_s6 + $0x4b] sm:$0x1] %v8163_v48  ;;  %v8155_v54 = vpop.f32.mrf.mxu3 }
0x1f65   :  { %8193 = vst [vmem:[%s13879_s6 + $0x5b] sm:$0x1] %v8164_v0  ;;  %v8156_v4 = vadd.f32 %v11758_v2, %v8155_v54 }
0x1f66   :  { %8194 = vst [vmem:[%s13879_s6 + $0x6b] sm:$0x1] %v8165_v31 }
0x1f67   :  { %8195 = vst [vmem:[%s13879_s6 + $0x7b] sm:$0x1] %v8166_v7  ;;  %v8167_v19 = vrot.slane %v8156_v4, 1  ;;  %v8168_v12 = vrot.slane %v8156_v4, 2  ;;  %v8169_v15 = vrot.slane %v8156_v4, 3  ;;  %v8170_v8 = vrot.slane %v8156_v4, 4 }
0x1f68   :  { %8196 = vst [vmem:[%s13879_s6 + $0x8b] sm:$0x1] %v8156_v4  ;;  %v8171_v52 = vrot.slane %v8156_v4, 5  ;;  %v8172_v16 = vrot.slane %v8156_v4, 6  ;;  %v8173_v35 = vrot.slane %v8156_v4, 7 }
0x1f69   :  { %8197 = vst [vmem:[%s13879_s6 + $0x9b] sm:$0x1] %v8167_v19 }
0x1f6a   :  { %8198 = vst [vmem:[%s13879_s6 + $0xab] sm:$0x1] %v8168_v12 }
0x1f6b   :  { %8199 = vst [vmem:[%s13879_s6 + $0xbb] sm:$0x1] %v8169_v15 }
0x1f6c   :  { %8200 = vst [vmem:[%s13879_s6 + $0xcb] sm:$0x1] %v8170_v8 }
0x1f6d   :  { %8201 = vst [vmem:[%s13879_s6 + $0xdb] sm:$0x1] %v8171_v52 }
0x1f6e   :  { %8202 = vst [vmem:[%s13879_s6 + $0xeb] sm:$0x1] %v8172_v16 }
0x1f6f   :  { %8203 = vst [vmem:[%s13879_s6 + $0xfb] sm:$0x1] %v8173_v35 }
0x1f70   :  { %12149 = dma.done.wait [#allocation4], 256  }
0x1f71   :  { %12150 = vsyncadd [#allocation4], 4294967040 }
0x1f72   :  { %8227 = vsyncpa [#allocation3], 1 }
0x1f73   :  { %8228 = vsyncpa [#allocation6], 1 }
0x1f74   :  { %8229 = vsyncpa [#allocation9], 1 }
0x1f75   :  { %8230 = vsyncpa [#allocation4], 1 }

</bundles_post_ra>
